<compile_context>
chip_gen: v7x
topology: tpu7x:2x2x1
jax: 0.10.0
libtpu: 0.0.40
codegen_flags: <defaults>
</compile_context>

<pallas_src>
import functools

import jax
import jax.numpy as jnp
from jax import lax
from jax.experimental import pallas as pl
from jax.experimental.pallas import tpu as pltpu


# ---------------------------------------------------------------------------
# Projection kernel: out = x @ W  (bf16 MXU inputs, f32 accumulate), row-tiled.
# ---------------------------------------------------------------------------
def _proj_kernel(x_ref, w_ref, out_ref):
    out_ref[...] = jnp.dot(
        x_ref[...].astype(jnp.bfloat16),
        w_ref[...].astype(jnp.bfloat16),
        preferred_element_type=jnp.float32,
    ).astype(out_ref.dtype)


def _project(x, w, *, tile):
    n, f = x.shape
    k = w.shape[1]
    return pl.pallas_call(
        _proj_kernel,
        out_shape=jax.ShapeDtypeStruct((n, k), jnp.bfloat16),
        grid_spec=pltpu.PrefetchScalarGridSpec(
            num_scalar_prefetch=0,
            grid=(n // tile,),
            in_specs=[
                pl.BlockSpec((tile, f), lambda i: (i, 0)),   # row tile of x
                pl.BlockSpec((f, k), lambda i: (0, 0)),      # full projection matrix
            ],
            out_specs=pl.BlockSpec((tile, k), lambda i: (i, 0)),
        ),
        compiler_params=pltpu.CompilerParams(dimension_semantics=("parallel",)),
    )(x, w)


# ---------------------------------------------------------------------------
# Fused multi-head attention kernel, tiled over (query rows) x (key columns).
# ---------------------------------------------------------------------------
def _attn_kernel(hq_ref, hkv_ref, adj_ref, a1_ref, a2_ref, out_ref,
                 acc_ref, rs_ref, *, nheads, dhead, alpha, mode):
    ki = pl.program_id(1)

    @pl.when(ki == 0)
    def _init():
        acc_ref[...] = jnp.zeros_like(acc_ref)
        rs_ref[...] = jnp.zeros_like(rs_ref)

    h_q = hq_ref[...]                                    # (TQ, H*D) bf16
    h_kv = hkv_ref[...]                                  # (TK, H*D) bf16
    # adj is only a predicate; int8 -> f32 -> compare (shared by all heads).
    mask = adj_ref[...].astype(jnp.float32) > 0.0        # (TQ, TK)

    # All heads' attention logits in two MXU matmuls (block-diagonal a1/a2):
    #   f1[:, h] = a1_h . h_i (query side), f2t[h, :] = a2_h . h_j (key side).
    f1 = jnp.dot(h_q, a1_ref[...], preferred_element_type=jnp.float32)      # (TQ, H)
    f2t = lax.dot_general(a2_ref[...], h_kv, (((0,), (1,)), ((), ())),
                          preferred_element_type=jnp.float32)               # (H, TK)

    acc_parts, rs_parts = [], []
    for h in range(nheads):                              # static unroll over heads
        s = f1[:, h:h + 1] + f2t[h:h + 1, :]             # (TQ, TK) f32
        s = jnp.where(s > 0, s, alpha * s)               # LeakyReLU(alpha)
        e = jnp.where(mask, jnp.exp(-s), 0.0)            # edge_e (f32 exp, v5e-safe)
        rs_parts.append(jnp.sum(e, axis=1, keepdims=True))
        acc_parts.append(jnp.dot(e.astype(jnp.bfloat16),
                                 h_kv[:, h * dhead:(h + 1) * dhead],
                                 preferred_element_type=jnp.float32))
    acc_ref[...] += jnp.concatenate(acc_parts, axis=1)   # lane-dense scratch update
    rs_ref[...] += jnp.concatenate(rs_parts, axis=1)

    @pl.when(ki == pl.num_programs(1) - 1)
    def _finalize():
        # Guard: rows with no edges (or padding rows) have rowsum 0 -> emit 0.
        inv = pl.reciprocal(jnp.maximum(rs_ref[...], 1e-30), approx=True)   # (TQ, H)
        if mode == "heads":                              # concat=True heads: ELU
            outs = []
            for h in range(nheads):
                hp = acc_ref[:, h * dhead:(h + 1) * dhead] * inv[:, h:h + 1]
                outs.append(jnp.where(hp > 0, hp, jnp.exp(hp) - 1.0))
            out_ref[...] = jnp.concatenate(outs, axis=1).astype(out_ref.dtype)
        else:                                            # out layer: F.elu + log_softmax
            hp = acc_ref[...] * inv[:, 0:1]
            y = jnp.where(hp > 0, hp, jnp.exp(hp) - 1.0)
            m = jnp.max(y, axis=1, keepdims=True)
            z = y - m
            lse = jnp.log(jnp.sum(jnp.exp(z), axis=1, keepdims=True))
            out_ref[...] = (z - lse).astype(out_ref.dtype)


def _attention(h, adj_i8, a1, a2, *, nheads, dhead, alpha, mode, out_dtype, tile):
    n_pad, feat = h.shape
    out_dim = nheads * dhead
    kernel = functools.partial(_attn_kernel, nheads=nheads, dhead=dhead,
                               alpha=alpha, mode=mode)
    return pl.pallas_call(
        kernel,
        out_shape=jax.ShapeDtypeStruct((n_pad, out_dim), out_dtype),
        grid_spec=pltpu.PrefetchScalarGridSpec(
            num_scalar_prefetch=0,
            grid=(n_pad // tile, n_pad // tile),          # (q tiles, kv tiles)
            in_specs=[
                pl.BlockSpec((tile, feat), lambda qi, ki: (qi, 0)),    # h (query rows)
                pl.BlockSpec((tile, feat), lambda qi, ki: (ki, 0)),    # h (key rows)
                pl.BlockSpec((tile, tile), lambda qi, ki: (qi, ki)),   # adj tile (int8)
                pl.BlockSpec(a1.shape, lambda qi, ki: (0, 0)),         # a1 blocks
                pl.BlockSpec(a2.shape, lambda qi, ki: (0, 0)),         # a2 blocks
            ],
            out_specs=pl.BlockSpec((tile, out_dim), lambda qi, ki: (qi, 0)),
            scratch_shapes=[
                pltpu.VMEM((tile, out_dim), jnp.float32),  # e @ h accumulator
                pltpu.VMEM((tile, nheads), jnp.float32),   # running rowsum per head
            ],
        ),
        compiler_params=pltpu.CompilerParams(
            dimension_semantics=("parallel", "arbitrary")),
    )(h, h, adj_i8, a1, a2)


# ---------------------------------------------------------------------------
# Wrapper (parameter plumbing only; all heavy lifting is in the kernels).
# ---------------------------------------------------------------------------
def _split_attn_params(a):
    """a: (H, 2, D) -> block-diagonal A1, A2 of shape (H*D, H), bf16."""
    nh, _, d = a.shape
    eye = jnp.eye(nh, dtype=a.dtype)
    a1 = (a[:, 0, :, None] * eye[:, None, :]).reshape(nh * d, nh)
    a2 = (a[:, 1, :, None] * eye[:, None, :]).reshape(nh * d, nh)
    return a1.astype(jnp.bfloat16), a2.astype(jnp.bfloat16)


def spgat_forward(x, adj, W_heads, a_heads, W_out, a_out, *, alpha, tile=128):
    # F.dropout / nn.Dropout are identity in eval mode.
    n = x.shape[0]
    nh, nfeat, nhid = W_heads.shape
    nclass = W_out.shape[1]

    # Pad node count to a tile multiple (padded rows/cols are masked out).
    n_pad = ((n + tile - 1) // tile) * tile
    pad = n_pad - n
    xp = jnp.pad(x, ((0, pad), (0, 0)))
    adj_i8 = jnp.pad((adj != 0).astype(jnp.int8), ((0, pad), (0, pad)))

    # Fused per-head projection weights: one (nfeat, H*nhid) matmul.
    w_cat = jnp.transpose(W_heads, (1, 0, 2)).reshape(nfeat, nh * nhid)
    a1_h, a2_h = _split_attn_params(a_heads)
    a1_o, a2_o = _split_attn_params(a_out[None])

    h1 = _project(xp, w_cat, tile=tile)                       # (Np, H*nhid) bf16
    z1 = _attention(h1, adj_i8, a1_h, a2_h, nheads=nh, dhead=nhid, alpha=alpha,
                    mode="heads", out_dtype=jnp.bfloat16, tile=tile)
    h2 = _project(z1, W_out, tile=tile)                       # (Np, nclass) bf16
    out = _attention(h2, adj_i8, a1_o, a2_o, nheads=1, dhead=nclass, alpha=alpha,
                     mode="out", out_dtype=jnp.float32, tile=tile)
    return out[:n]                                            # (N, nclass) log-probs


def _xavier_normal(key, shape, gain=1.414):
    fan_in, fan_out = shape[-2], shape[-1]
    std = gain * (2.0 / (fan_in + fan_out)) ** 0.5
    return std * jax.random.normal(key, shape, jnp.float32)


if __name__ == "__main__":
    # Small synthetic config consistent with SpGAT(nfeat, nhid, nclass, dropout, alpha, nheads)
    N, nfeat, nhid, nclass, nheads = 256, 64, 32, 16, 4
    alpha = 0.2  # dropout is identity at inference

    key = jax.random.PRNGKey(0)
    k_x, k_adj, k_w, k_a, k_wo, k_ao = jax.random.split(key, 6)

    x = jax.random.normal(k_x, (N, nfeat), jnp.float32)
    # Random sparse adjacency (~10% density) with self-loops so every row sum > 0.
    adj = (jax.random.uniform(k_adj, (N, N)) < 0.1).astype(jnp.float32)
    adj = jnp.maximum(adj, jnp.eye(N, dtype=jnp.float32))

    W_heads = _xavier_normal(k_w, (nheads, nfeat, nhid))   # per-head W: (nfeat, nhid)
    a_heads = _xavier_normal(k_a, (nheads, 2, nhid))       # per-head a split (src, dst)
    W_out = _xavier_normal(k_wo, (nheads * nhid, nclass))  # out_att W
    a_out = _xavier_normal(k_ao, (2, nclass))              # out_att a

    fwd = jax.jit(functools.partial(spgat_forward, alpha=alpha))
    logp = fwd(x, adj, W_heads, a_heads, W_out, a_out)
    jax.block_until_ready(logp)

    assert logp.shape == (N, nclass)
    assert bool(jnp.all(jnp.isfinite(logp)))
    # rows of exp(log_softmax) must sum to 1
    assert bool(jnp.allclose(jnp.sum(jnp.exp(logp), axis=1), 1.0, atol=1e-4))
    print("KERNEL_OK")
</pallas_src>

<mosaic_0001>
module attributes {stable_mosaic.version = 11 : i64} {
  func.func @_proj_kernel(%arg0: i32, %arg1: memref<128x64xf32, #tpu.memory_space<vmem>>, %arg2: memref<64x128xf32, #tpu.memory_space<vmem>>, %arg3: memref<128x128xbf16, #tpu.memory_space<vmem>>) attributes {dimension_semantics = [#tpu.dimension_semantics<parallel>], iteration_bounds = array<i64: 2>, scalar_prefetch = 0 : i64, scratch_operands = 0 : i64, tpu.core_type = #tpu.core_type<tc>, window_params = [{transform_indices = @transform_0, window_bounds = array<i64: 128, 64>}, {pipeline_mode = #tpu.pipeline_mode<synchronous>, transform_indices = @transform_1, window_bounds = array<i64: 64, 128>}, {transform_indices = @transform_2, window_bounds = array<i64: 128, 128>}]} {
    %c0 = arith.constant 0 : index
    %c0_0 = arith.constant 0 : index
    %0 = vector.load %arg1[%c0, %c0_0] : memref<128x64xf32, #tpu.memory_space<vmem>>, vector<128x64xf32>
    %1 = arith.truncf %0 : vector<128x64xf32> to vector<128x64xbf16>
    %c0_1 = arith.constant 0 : index
    %c0_2 = arith.constant 0 : index
    %2 = vector.load %arg2[%c0_1, %c0_2] : memref<64x128xf32, #tpu.memory_space<vmem>>, vector<64x128xf32>
    %3 = arith.truncf %2 : vector<64x128xf32> to vector<64x128xbf16>
    %cst = arith.constant dense<0.000000e+00> : vector<128x128xf32>
    %4 = tpu.matmul %1, %3, %cst {dimension_numbers = #tpu.dot_dimension_numbers<[1], [0], [0], [1], [0, 0, 1, 1], [], []>} : vector<128x64xbf16>, vector<64x128xbf16>, vector<128x128xf32> -> vector<128x128xf32>
    %5 = arith.truncf %4 : vector<128x128xf32> to vector<128x128xbf16>
    %c0_3 = arith.constant 0 : index
    %c0_4 = arith.constant 0 : index
    %6 = vector.load %arg3[%c0_3, %c0_4] : memref<128x128xbf16, #tpu.memory_space<vmem>>, vector<128x128xbf16>
    tpu.vector_store %arg3[%c0_3, %c0_4], %5 {strides = array<i32>} : memref<128x128xbf16, #tpu.memory_space<vmem>>, vector<128x128xbf16>,
    return
  }
  func.func @transform_0(%arg0: i32) -> (i32, i32) {
    %c0_i32 = arith.constant 0 : i32
    %c0_i32_0 = arith.constant 0 : i32
    return %arg0, %c0_i32 : i32, i32
  }
  func.func @transform_1(%arg0: i32) -> (i32, i32) {
    %c0_i32 = arith.constant 0 : i32
    %c0_i32_0 = arith.constant 0 : i32
    %c0_i32_1 = arith.constant 0 : i32
    return %c0_i32, %c0_i32_0 : i32, i32
  }
  func.func @transform_2(%arg0: i32) -> (i32, i32) {
    %c0_i32 = arith.constant 0 : i32
    %c0_i32_0 = arith.constant 0 : i32
    return %arg0, %c0_i32 : i32, i32
  }
}

module attributes {stable_mosaic.version = 11 : i64} {
  func.func @_attn_kernel(%arg0: i32, %arg1: i32, %arg2: memref<128x128xbf16, #tpu.memory_space<vmem>>, %arg3: memref<128x128xbf16, #tpu.memory_space<vmem>>, %arg4: memref<128x128xi8, #tpu.memory_space<vmem>>, %arg5: memref<128x4xbf16, #tpu.memory_space<vmem>>, %arg6: memref<128x4xbf16, #tpu.memory_space<vmem>>, %arg7: memref<128x128xbf16, #tpu.memory_space<vmem>>, %arg8: memref<128x128xf32, #tpu.memory_space<vmem>>, %arg9: memref<128x4xf32, #tpu.memory_space<vmem>>) attributes {dimension_semantics = [#tpu.dimension_semantics<parallel>, #tpu.dimension_semantics<arbitrary>], iteration_bounds = array<i64: 2, 2>, scalar_prefetch = 0 : i64, scratch_operands = 2 : i64, tpu.core_type = #tpu.core_type<tc>, window_params = [{transform_indices = @transform_0, window_bounds = array<i64: 128, 128>}, {transform_indices = @transform_1, window_bounds = array<i64: 128, 128>}, {transform_indices = @transform_2, window_bounds = array<i64: 128, 128>}, {pipeline_mode = #tpu.pipeline_mode<synchronous>, transform_indices = @transform_3, window_bounds = array<i64: 128, 4>}, {pipeline_mode = #tpu.pipeline_mode<synchronous>, transform_indices = @transform_4, window_bounds = array<i64: 128, 4>}, {transform_indices = @transform_5, window_bounds = array<i64: 128, 128>}]} {
    %c0_i32 = arith.constant 0 : i32
    %0 = arith.cmpi eq, %arg1, %c0_i32 : i32
    %1 = arith.extui %0 : i1 to i32
    %c0_i32_0 = arith.constant 0 : i32
    %2 = arith.cmpi ne, %1, %c0_i32_0 : i32
    scf.if %2 {
      %cst_45 = arith.constant 0.000000e+00 : f32
      %104 = vector.broadcast %cst_45 : f32 to vector<128x128xf32>
      %c0_46 = arith.constant 0 : index
      %c0_47 = arith.constant 0 : index
      %105 = vector.load %arg8[%c0_46, %c0_47] : memref<128x128xf32, #tpu.memory_space<vmem>>, vector<128x128xf32>
      tpu.vector_store %arg8[%c0_46, %c0_47], %104 {strides = array<i32>} : memref<128x128xf32, #tpu.memory_space<vmem>>, vector<128x128xf32>,
      %cst_48 = arith.constant 0.000000e+00 : f32
      %106 = vector.broadcast %cst_48 : f32 to vector<128x4xf32>
      %c0_49 = arith.constant 0 : index
      %c0_50 = arith.constant 0 : index
      %107 = vector.load %arg9[%c0_49, %c0_50] : memref<128x4xf32, #tpu.memory_space<vmem>>, vector<128x4xf32>
      tpu.vector_store %arg9[%c0_49, %c0_50], %106 {strides = array<i32>} : memref<128x4xf32, #tpu.memory_space<vmem>>, vector<128x4xf32>,
    } else {
    }
    %c0 = arith.constant 0 : index
    %c0_1 = arith.constant 0 : index
    %3 = vector.load %arg2[%c0, %c0_1] : memref<128x128xbf16, #tpu.memory_space<vmem>>, vector<128x128xbf16>
    %c0_2 = arith.constant 0 : index
    %c0_3 = arith.constant 0 : index
    %4 = vector.load %arg3[%c0_2, %c0_3] : memref<128x128xbf16, #tpu.memory_space<vmem>>, vector<128x128xbf16>
    %c0_4 = arith.constant 0 : index
    %c0_5 = arith.constant 0 : index
    %5 = vector.load %arg4[%c0_4, %c0_5] : memref<128x128xi8, #tpu.memory_space<vmem>>, vector<128x128xi8>
    %6 = arith.sitofp %5 : vector<128x128xi8> to vector<128x128xf32>
    %cst = arith.constant 0.000000e+00 : f32
    %7 = vector.broadcast %cst : f32 to vector<128x128xf32>
    %8 = arith.cmpf ogt, %6, %7 : vector<128x128xf32>
    %c0_6 = arith.constant 0 : index
    %c0_7 = arith.constant 0 : index
    %9 = vector.load %arg5[%c0_6, %c0_7] : memref<128x4xbf16, #tpu.memory_space<vmem>>, vector<128x4xbf16>
    %cst_8 = arith.constant dense<0.000000e+00> : vector<128x4xf32>
    %10 = tpu.matmul %3, %9, %cst_8 {dimension_numbers = #tpu.dot_dimension_numbers<[1], [0], [0], [1], [0, 0, 1, 1], [], []>} : vector<128x128xbf16>, vector<128x4xbf16>, vector<128x4xf32> -> vector<128x4xf32>
    %c0_9 = arith.constant 0 : index
    %c0_10 = arith.constant 0 : index
    %11 = vector.load %arg6[%c0_9, %c0_10] : memref<128x4xbf16, #tpu.memory_space<vmem>>, vector<128x4xbf16>
    %cst_11 = arith.constant dense<0.000000e+00> : vector<4x128xf32>
    %12 = tpu.matmul %11, %4, %cst_11 {dimension_numbers = #tpu.dot_dimension_numbers<[0], [1], [1], [0], [0, 1, 1, 0], [], []>} : vector<128x4xbf16>, vector<128x128xbf16>, vector<4x128xf32> -> vector<4x128xf32>
    %13 = vector.extract_strided_slice %10 {offsets = [0, 0], sizes = [128, 1], strides = [1, 1]} : vector<128x4xf32> to vector<128x1xf32>
    %14 = vector.extract_strided_slice %12 {offsets = [0, 0], sizes = [1, 128], strides = [1, 1]} : vector<4x128xf32> to vector<1x128xf32>
    %15 = vector.broadcast %13 : vector<128x1xf32> to vector<128x128xf32>
    %16 = vector.broadcast %14 : vector<1x128xf32> to vector<128x128xf32>
    %17 = arith.addf %15, %16 : vector<128x128xf32>
    %cst_12 = arith.constant 0.000000e+00 : f32
    %18 = vector.broadcast %cst_12 : f32 to vector<128x128xf32>
    %19 = arith.cmpf ogt, %17, %18 : vector<128x128xf32>
    %cst_13 = arith.constant 2.000000e-01 : f32
    %20 = vector.broadcast %cst_13 : f32 to vector<128x128xf32>
    %21 = arith.mulf %20, %17 : vector<128x128xf32>
    %22 = arith.select %19, %17, %21 : vector<128x128xi1>, vector<128x128xf32>
    %cst_14 = arith.constant 0.000000e+00 : f32
    %23 = vector.broadcast %cst_14 : f32 to vector<128x128xf32>
    %24 = arith.subf %23, %22 : vector<128x128xf32>
    %25 = math.exp %24 : vector<128x128xf32>
    %cst_15 = arith.constant 0.000000e+00 : f32
    %26 = vector.broadcast %cst_15 : f32 to vector<128x128xf32>
    %27 = arith.select %8, %25, %26 : vector<128x128xi1>, vector<128x128xf32>
    %cst_16 = arith.constant dense<0.000000e+00> : vector<128xf32>
    %28 = vector.multi_reduction <add>, %27, %cst_16 [1] : vector<128x128xf32> to vector<128xf32>
    %29 = vector.shape_cast %28 : vector<128xf32> to vector<128x1xf32>
    %30 = arith.truncf %27 : vector<128x128xf32> to vector<128x128xbf16>
    %31 = vector.extract_strided_slice %4 {offsets = [0, 0], sizes = [128, 32], strides = [1, 1]} : vector<128x128xbf16> to vector<128x32xbf16>
    %cst_17 = arith.constant dense<0.000000e+00> : vector<128x32xf32>
    %32 = tpu.matmul %30, %31, %cst_17 {dimension_numbers = #tpu.dot_dimension_numbers<[1], [0], [0], [1], [0, 0, 1, 1], [], []>} : vector<128x128xbf16>, vector<128x32xbf16>, vector<128x32xf32> -> vector<128x32xf32>
    %33 = vector.extract_strided_slice %10 {offsets = [0, 1], sizes = [128, 1], strides = [1, 1]} : vector<128x4xf32> to vector<128x1xf32>
    %34 = vector.extract_strided_slice %12 {offsets = [1, 0], sizes = [1, 128], strides = [1, 1]} : vector<4x128xf32> to vector<1x128xf32>
    %35 = vector.broadcast %33 : vector<128x1xf32> to vector<128x128xf32>
    %36 = vector.broadcast %34 : vector<1x128xf32> to vector<128x128xf32>
    %37 = arith.addf %35, %36 : vector<128x128xf32>
    %cst_18 = arith.constant 0.000000e+00 : f32
    %38 = vector.broadcast %cst_18 : f32 to vector<128x128xf32>
    %39 = arith.cmpf ogt, %37, %38 : vector<128x128xf32>
    %cst_19 = arith.constant 2.000000e-01 : f32
    %40 = vector.broadcast %cst_19 : f32 to vector<128x128xf32>
    %41 = arith.mulf %40, %37 : vector<128x128xf32>
    %42 = arith.select %39, %37, %41 : vector<128x128xi1>, vector<128x128xf32>
    %cst_20 = arith.constant 0.000000e+00 : f32
    %43 = vector.broadcast %cst_20 : f32 to vector<128x128xf32>
    %44 = arith.subf %43, %42 : vector<128x128xf32>
    %45 = math.exp %44 : vector<128x128xf32>
    %cst_21 = arith.constant 0.000000e+00 : f32
    %46 = vector.broadcast %cst_21 : f32 to vector<128x128xf32>
    %47 = arith.select %8, %45, %46 : vector<128x128xi1>, vector<128x128xf32>
    %cst_22 = arith.constant dense<0.000000e+00> : vector<128xf32>
    %48 = vector.multi_reduction <add>, %47, %cst_22 [1] : vector<128x128xf32> to vector<128xf32>
    %49 = vector.shape_cast %48 : vector<128xf32> to vector<128x1xf32>
    %50 = arith.truncf %47 : vector<128x128xf32> to vector<128x128xbf16>
    %51 = vector.extract_strided_slice %4 {offsets = [0, 32], sizes = [128, 32], strides = [1, 1]} : vector<128x128xbf16> to vector<128x32xbf16>
    %cst_23 = arith.constant dense<0.000000e+00> : vector<128x32xf32>
    %52 = tpu.matmul %50, %51, %cst_23 {dimension_numbers = #tpu.dot_dimension_numbers<[1], [0], [0], [1], [0, 0, 1, 1], [], []>} : vector<128x128xbf16>, vector<128x32xbf16>, vector<128x32xf32> -> vector<128x32xf32>
    %53 = vector.extract_strided_slice %10 {offsets = [0, 2], sizes = [128, 1], strides = [1, 1]} : vector<128x4xf32> to vector<128x1xf32>
    %54 = vector.extract_strided_slice %12 {offsets = [2, 0], sizes = [1, 128], strides = [1, 1]} : vector<4x128xf32> to vector<1x128xf32>
    %55 = vector.broadcast %53 : vector<128x1xf32> to vector<128x128xf32>
    %56 = vector.broadcast %54 : vector<1x128xf32> to vector<128x128xf32>
    %57 = arith.addf %55, %56 : vector<128x128xf32>
    %cst_24 = arith.constant 0.000000e+00 : f32
    %58 = vector.broadcast %cst_24 : f32 to vector<128x128xf32>
    %59 = arith.cmpf ogt, %57, %58 : vector<128x128xf32>
    %cst_25 = arith.constant 2.000000e-01 : f32
    %60 = vector.broadcast %cst_25 : f32 to vector<128x128xf32>
    %61 = arith.mulf %60, %57 : vector<128x128xf32>
    %62 = arith.select %59, %57, %61 : vector<128x128xi1>, vector<128x128xf32>
    %cst_26 = arith.constant 0.000000e+00 : f32
    %63 = vector.broadcast %cst_26 : f32 to vector<128x128xf32>
    %64 = arith.subf %63, %62 : vector<128x128xf32>
    %65 = math.exp %64 : vector<128x128xf32>
    %cst_27 = arith.constant 0.000000e+00 : f32
    %66 = vector.broadcast %cst_27 : f32 to vector<128x128xf32>
    %67 = arith.select %8, %65, %66 : vector<128x128xi1>, vector<128x128xf32>
    %cst_28 = arith.constant dense<0.000000e+00> : vector<128xf32>
    %68 = vector.multi_reduction <add>, %67, %cst_28 [1] : vector<128x128xf32> to vector<128xf32>
    %69 = vector.shape_cast %68 : vector<128xf32> to vector<128x1xf32>
    %70 = arith.truncf %67 : vector<128x128xf32> to vector<128x128xbf16>
    %71 = vector.extract_strided_slice %4 {offsets = [0, 64], sizes = [128, 32], strides = [1, 1]} : vector<128x128xbf16> to vector<128x32xbf16>
    %cst_29 = arith.constant dense<0.000000e+00> : vector<128x32xf32>
    %72 = tpu.matmul %70, %71, %cst_29 {dimension_numbers = #tpu.dot_dimension_numbers<[1], [0], [0], [1], [0, 0, 1, 1], [], []>} : vector<128x128xbf16>, vector<128x32xbf16>, vector<128x32xf32> -> vector<128x32xf32>
    %73 = vector.extract_strided_slice %10 {offsets = [0, 3], sizes = [128, 1], strides = [1, 1]} : vector<128x4xf32> to vector<128x1xf32>
    %74 = vector.extract_strided_slice %12 {offsets = [3, 0], sizes = [1, 128], strides = [1, 1]} : vector<4x128xf32> to vector<1x128xf32>
    %75 = vector.broadcast %73 : vector<128x1xf32> to vector<128x128xf32>
    %76 = vector.broadcast %74 : vector<1x128xf32> to vector<128x128xf32>
    %77 = arith.addf %75, %76 : vector<128x128xf32>
    %cst_30 = arith.constant 0.000000e+00 : f32
    %78 = vector.broadcast %cst_30 : f32 to vector<128x128xf32>
    %79 = arith.cmpf ogt, %77, %78 : vector<128x128xf32>
    %cst_31 = arith.constant 2.000000e-01 : f32
    %80 = vector.broadcast %cst_31 : f32 to vector<128x128xf32>
    %81 = arith.mulf %80, %77 : vector<128x128xf32>
    %82 = arith.select %79, %77, %81 : vector<128x128xi1>, vector<128x128xf32>
    %cst_32 = arith.constant 0.000000e+00 : f32
    %83 = vector.broadcast %cst_32 : f32 to vector<128x128xf32>
    %84 = arith.subf %83, %82 : vector<128x128xf32>
    %85 = math.exp %84 : vector<128x128xf32>
    %cst_33 = arith.constant 0.000000e+00 : f32
    %86 = vector.broadcast %cst_33 : f32 to vector<128x128xf32>
    %87 = arith.select %8, %85, %86 : vector<128x128xi1>, vector<128x128xf32>
    %cst_34 = arith.constant dense<0.000000e+00> : vector<128xf32>
    %88 = vector.multi_reduction <add>, %87, %cst_34 [1] : vector<128x128xf32> to vector<128xf32>
    %89 = vector.shape_cast %88 : vector<128xf32> to vector<128x1xf32>
    %90 = arith.truncf %87 : vector<128x128xf32> to vector<128x128xbf16>
    %91 = vector.extract_strided_slice %4 {offsets = [0, 96], sizes = [128, 32], strides = [1, 1]} : vector<128x128xbf16> to vector<128x32xbf16>
    %cst_35 = arith.constant dense<0.000000e+00> : vector<128x32xf32>
    %92 = tpu.matmul %90, %91, %cst_35 {dimension_numbers = #tpu.dot_dimension_numbers<[1], [0], [0], [1], [0, 0, 1, 1], [], []>} : vector<128x128xbf16>, vector<128x32xbf16>, vector<128x32xf32> -> vector<128x32xf32>
    %c0_36 = arith.constant 0 : index
    %c0_37 = arith.constant 0 : index
    %93 = vector.load %arg8[%c0_36, %c0_37] : memref<128x128xf32, #tpu.memory_space<vmem>>, vector<128x128xf32>
    %94 = tpu.concatenate %32, %52, %72, %92 in 1 : vector<128x32xf32>, vector<128x32xf32>, vector<128x32xf32>, vector<128x32xf32> -> vector<128x128xf32>
    %95 = arith.addf %93, %94 : vector<128x128xf32>
    %c0_38 = arith.constant 0 : index
    %c0_39 = arith.constant 0 : index
    %96 = vector.load %arg8[%c0_38, %c0_39] : memref<128x128xf32, #tpu.memory_space<vmem>>, vector<128x128xf32>
    tpu.vector_store %arg8[%c0_38, %c0_39], %95 {strides = array<i32>} : memref<128x128xf32, #tpu.memory_space<vmem>>, vector<128x128xf32>,
    %c0_40 = arith.constant 0 : index
    %c0_41 = arith.constant 0 : index
    %97 = vector.load %arg9[%c0_40, %c0_41] : memref<128x4xf32, #tpu.memory_space<vmem>>, vector<128x4xf32>
    %98 = tpu.concatenate %29, %49, %69, %89 in 1 : vector<128x1xf32>, vector<128x1xf32>, vector<128x1xf32>, vector<128x1xf32> -> vector<128x4xf32>
    %99 = arith.addf %97, %98 : vector<128x4xf32>
    %c0_42 = arith.constant 0 : index
    %c0_43 = arith.constant 0 : index
    %100 = vector.load %arg9[%c0_42, %c0_43] : memref<128x4xf32, #tpu.memory_space<vmem>>, vector<128x4xf32>
    tpu.vector_store %arg9[%c0_42, %c0_43], %99 {strides = array<i32>} : memref<128x4xf32, #tpu.memory_space<vmem>>, vector<128x4xf32>,
    %c1_i32 = arith.constant 1 : i32
    %101 = arith.cmpi eq, %arg1, %c1_i32 : i32
    %102 = arith.extui %101 : i1 to i32
    %c0_i32_44 = arith.constant 0 : i32
    %103 = arith.cmpi ne, %102, %c0_i32_44 : i32
    scf.if %103 {
      %c0_45 = arith.constant 0 : index
      %c0_46 = arith.constant 0 : index
      %104 = vector.load %arg9[%c0_45, %c0_46] : memref<128x4xf32, #tpu.memory_space<vmem>>, vector<128x4xf32>
      %cst_47 = arith.constant 1.000000e-30 : f32
      %105 = vector.broadcast %cst_47 : f32 to vector<128x4xf32>
      %106 = arith.maximumf %104, %105 : vector<128x4xf32>
      %107 = tpu.reciprocal %106 {approx = true} : vector<128x4xf32> -> vector<128x4xf32>
      %c0_48 = arith.constant 0 : index
      %c0_49 = arith.constant 0 : index
      %108 = vector.load %arg8[%c0_48, %c0_49] : memref<128x128xf32, #tpu.memory_space<vmem>>, vector<128x32xf32>
      %109 = vector.extract_strided_slice %107 {offsets = [0, 0], sizes = [128, 1], strides = [1, 1]} : vector<128x4xf32> to vector<128x1xf32>
      %110 = vector.broadcast %109 : vector<128x1xf32> to vector<128x32xf32>
      %111 = arith.mulf %108, %110 : vector<128x32xf32>
      %cst_50 = arith.constant 0.000000e+00 : f32
      %112 = vector.broadcast %cst_50 : f32 to vector<128x32xf32>
      %113 = arith.cmpf ogt, %111, %112 : vector<128x32xf32>
      %114 = math.exp %111 : vector<128x32xf32>
      %cst_51 = arith.constant 1.000000e+00 : f32
      %115 = vector.broadcast %cst_51 : f32 to vector<128x32xf32>
      %116 = arith.subf %114, %115 : vector<128x32xf32>
      %117 = arith.select %113, %111, %116 : vector<128x32xi1>, vector<128x32xf32>
      %c0_52 = arith.constant 0 : index
      %c32 = arith.constant 32 : index
      %118 = vector.load %arg8[%c0_52, %c32] : memref<128x128xf32, #tpu.memory_space<vmem>>, vector<128x32xf32>
      %119 = vector.extract_strided_slice %107 {offsets = [0, 1], sizes = [128, 1], strides = [1, 1]} : vector<128x4xf32> to vector<128x1xf32>
      %120 = vector.broadcast %119 : vector<128x1xf32> to vector<128x32xf32>
      %121 = arith.mulf %118, %120 : vector<128x32xf32>
      %cst_53 = arith.constant 0.000000e+00 : f32
      %122 = vector.broadcast %cst_53 : f32 to vector<128x32xf32>
      %123 = arith.cmpf ogt, %121, %122 : vector<128x32xf32>
      %124 = math.exp %121 : vector<128x32xf32>
      %cst_54 = arith.constant 1.000000e+00 : f32
      %125 = vector.broadcast %cst_54 : f32 to vector<128x32xf32>
      %126 = arith.subf %124, %125 : vector<128x32xf32>
      %127 = arith.select %123, %121, %126 : vector<128x32xi1>, vector<128x32xf32>
      %c0_55 = arith.constant 0 : index
      %c64 = arith.constant 64 : index
      %128 = vector.load %arg8[%c0_55, %c64] : memref<128x128xf32, #tpu.memory_space<vmem>>, vector<128x32xf32>
      %129 = vector.extract_strided_slice %107 {offsets = [0, 2], sizes = [128, 1], strides = [1, 1]} : vector<128x4xf32> to vector<128x1xf32>
      %130 = vector.broadcast %129 : vector<128x1xf32> to vector<128x32xf32>
      %131 = arith.mulf %128, %130 : vector<128x32xf32>
      %cst_56 = arith.constant 0.000000e+00 : f32
      %132 = vector.broadcast %cst_56 : f32 to vector<128x32xf32>
      %133 = arith.cmpf ogt, %131, %132 : vector<128x32xf32>
      %134 = math.exp %131 : vector<128x32xf32>
      %cst_57 = arith.constant 1.000000e+00 : f32
      %135 = vector.broadcast %cst_57 : f32 to vector<128x32xf32>
      %136 = arith.subf %134, %135 : vector<128x32xf32>
      %137 = arith.select %133, %131, %136 : vector<128x32xi1>, vector<128x32xf32>
      %c0_58 = arith.constant 0 : index
      %c96 = arith.constant 96 : index
      %138 = vector.load %arg8[%c0_58, %c96] : memref<128x128xf32, #tpu.memory_space<vmem>>, vector<128x32xf32>
      %139 = vector.extract_strided_slice %107 {offsets = [0, 3], sizes = [128, 1], strides = [1, 1]} : vector<128x4xf32> to vector<128x1xf32>
      %140 = vector.broadcast %139 : vector<128x1xf32> to vector<128x32xf32>
      %141 = arith.mulf %138, %140 : vector<128x32xf32>
      %cst_59 = arith.constant 0.000000e+00 : f32
      %142 = vector.broadcast %cst_59 : f32 to vector<128x32xf32>
      %143 = arith.cmpf ogt, %141, %142 : vector<128x32xf32>
      %144 = math.exp %141 : vector<128x32xf32>
      %cst_60 = arith.constant 1.000000e+00 : f32
      %145 = vector.broadcast %cst_60 : f32 to vector<128x32xf32>
      %146 = arith.subf %144, %145 : vector<128x32xf32>
      %147 = arith.select %143, %141, %146 : vector<128x32xi1>, vector<128x32xf32>
      %148 = tpu.concatenate %117, %127, %137, %147 in 1 : vector<128x32xf32>, vector<128x32xf32>, vector<128x32xf32>, vector<128x32xf32> -> vector<128x128xf32>
      %149 = arith.truncf %148 : vector<128x128xf32> to vector<128x128xbf16>
      %c0_61 = arith.constant 0 : index
      %c0_62 = arith.constant 0 : index
      %150 = vector.load %arg7[%c0_61, %c0_62] : memref<128x128xbf16, #tpu.memory_space<vmem>>, vector<128x128xbf16>
      tpu.vector_store %arg7[%c0_61, %c0_62], %149 {strides = array<i32>} : memref<128x128xbf16, #tpu.memory_space<vmem>>, vector<128x128xbf16>,
    } else {
    }
    return
  }
  func.func @transform_0(%arg0: i32, %arg1: i32) -> (i32, i32) {
    %c0_i32 = arith.constant 0 : i32
    %c0_i32_0 = arith.constant 0 : i32
    return %arg0, %c0_i32 : i32, i32
  }
  func.func @transform_1(%arg0: i32, %arg1: i32) -> (i32, i32) {
    %c0_i32 = arith.constant 0 : i32
    %c0_i32_0 = arith.constant 0 : i32
    return %arg1, %c0_i32 : i32, i32
  }
  func.func @transform_2(%arg0: i32, %arg1: i32) -> (i32, i32) {
    %c0_i32 = arith.constant 0 : i32
    return %arg0, %arg1 : i32, i32
  }
  func.func @transform_3(%arg0: i32, %arg1: i32) -> (i32, i32) {
    %c0_i32 = arith.constant 0 : i32
    %c0_i32_0 = arith.constant 0 : i32
    %c0_i32_1 = arith.constant 0 : i32
    return %c0_i32, %c0_i32_0 : i32, i32
  }
  func.func @transform_4(%arg0: i32, %arg1: i32) -> (i32, i32) {
    %c0_i32 = arith.constant 0 : i32
    %c0_i32_0 = arith.constant 0 : i32
    %c0_i32_1 = arith.constant 0 : i32
    return %c0_i32, %c0_i32_0 : i32, i32
  }
  func.func @transform_5(%arg0: i32, %arg1: i32) -> (i32, i32) {
    %c0_i32 = arith.constant 0 : i32
    %c0_i32_0 = arith.constant 0 : i32
    return %arg0, %c0_i32 : i32, i32
  }
}

module attributes {stable_mosaic.version = 11 : i64} {
  func.func @_proj_kernel(%arg0: i32, %arg1: memref<128x128xbf16, #tpu.memory_space<vmem>>, %arg2: memref<128x16xf32, #tpu.memory_space<vmem>>, %arg3: memref<128x16xbf16, #tpu.memory_space<vmem>>) attributes {dimension_semantics = [#tpu.dimension_semantics<parallel>], iteration_bounds = array<i64: 2>, scalar_prefetch = 0 : i64, scratch_operands = 0 : i64, tpu.core_type = #tpu.core_type<tc>, window_params = [{transform_indices = @transform_0, window_bounds = array<i64: 128, 128>}, {pipeline_mode = #tpu.pipeline_mode<synchronous>, transform_indices = @transform_1, window_bounds = array<i64: 128, 16>}, {transform_indices = @transform_2, window_bounds = array<i64: 128, 16>}]} {
    %c0 = arith.constant 0 : index
    %c0_0 = arith.constant 0 : index
    %0 = vector.load %arg1[%c0, %c0_0] : memref<128x128xbf16, #tpu.memory_space<vmem>>, vector<128x128xbf16>
    %c0_1 = arith.constant 0 : index
    %c0_2 = arith.constant 0 : index
    %1 = vector.load %arg2[%c0_1, %c0_2] : memref<128x16xf32, #tpu.memory_space<vmem>>, vector<128x16xf32>
    %2 = arith.truncf %1 : vector<128x16xf32> to vector<128x16xbf16>
    %cst = arith.constant dense<0.000000e+00> : vector<128x16xf32>
    %3 = tpu.matmul %0, %2, %cst {dimension_numbers = #tpu.dot_dimension_numbers<[1], [0], [0], [1], [0, 0, 1, 1], [], []>} : vector<128x128xbf16>, vector<128x16xbf16>, vector<128x16xf32> -> vector<128x16xf32>
    %4 = arith.truncf %3 : vector<128x16xf32> to vector<128x16xbf16>
    %c0_3 = arith.constant 0 : index
    %c0_4 = arith.constant 0 : index
    %5 = vector.load %arg3[%c0_3, %c0_4] : memref<128x16xbf16, #tpu.memory_space<vmem>>, vector<128x16xbf16>
    tpu.vector_store %arg3[%c0_3, %c0_4], %4 {strides = array<i32>} : memref<128x16xbf16, #tpu.memory_space<vmem>>, vector<128x16xbf16>,
    return
  }
  func.func @transform_0(%arg0: i32) -> (i32, i32) {
    %c0_i32 = arith.constant 0 : i32
    %c0_i32_0 = arith.constant 0 : i32
    return %arg0, %c0_i32 : i32, i32
  }
  func.func @transform_1(%arg0: i32) -> (i32, i32) {
    %c0_i32 = arith.constant 0 : i32
    %c0_i32_0 = arith.constant 0 : i32
    %c0_i32_1 = arith.constant 0 : i32
    return %c0_i32, %c0_i32_0 : i32, i32
  }
  func.func @transform_2(%arg0: i32) -> (i32, i32) {
    %c0_i32 = arith.constant 0 : i32
    %c0_i32_0 = arith.constant 0 : i32
    return %arg0, %c0_i32 : i32, i32
  }
}

module attributes {stable_mosaic.version = 11 : i64} {
  func.func @_attn_kernel(%arg0: i32, %arg1: i32, %arg2: memref<128x16xbf16, #tpu.memory_space<vmem>>, %arg3: memref<128x16xbf16, #tpu.memory_space<vmem>>, %arg4: memref<128x128xi8, #tpu.memory_space<vmem>>, %arg5: memref<16x1xbf16, #tpu.memory_space<vmem>>, %arg6: memref<16x1xbf16, #tpu.memory_space<vmem>>, %arg7: memref<128x16xf32, #tpu.memory_space<vmem>>, %arg8: memref<128x16xf32, #tpu.memory_space<vmem>>, %arg9: memref<128x1xf32, #tpu.memory_space<vmem>>) attributes {dimension_semantics = [#tpu.dimension_semantics<parallel>, #tpu.dimension_semantics<arbitrary>], iteration_bounds = array<i64: 2, 2>, scalar_prefetch = 0 : i64, scratch_operands = 2 : i64, tpu.core_type = #tpu.core_type<tc>, window_params = [{transform_indices = @transform_0, window_bounds = array<i64: 128, 16>}, {transform_indices = @transform_1, window_bounds = array<i64: 128, 16>}, {transform_indices = @transform_2, window_bounds = array<i64: 128, 128>}, {pipeline_mode = #tpu.pipeline_mode<synchronous>, transform_indices = @transform_3, window_bounds = array<i64: 16, 1>}, {pipeline_mode = #tpu.pipeline_mode<synchronous>, transform_indices = @transform_4, window_bounds = array<i64: 16, 1>}, {transform_indices = @transform_5, window_bounds = array<i64: 128, 16>}]} {
    %c0_i32 = arith.constant 0 : i32
    %0 = arith.cmpi eq, %arg1, %c0_i32 : i32
    %1 = arith.extui %0 : i1 to i32
    %c0_i32_0 = arith.constant 0 : i32
    %2 = arith.cmpi ne, %1, %c0_i32_0 : i32
    scf.if %2 {
      %cst_27 = arith.constant 0.000000e+00 : f32
      %39 = vector.broadcast %cst_27 : f32 to vector<128x16xf32>
      %c0_28 = arith.constant 0 : index
      %c0_29 = arith.constant 0 : index
      %40 = vector.load %arg8[%c0_28, %c0_29] : memref<128x16xf32, #tpu.memory_space<vmem>>, vector<128x16xf32>
      tpu.vector_store %arg8[%c0_28, %c0_29], %39 {strides = array<i32>} : memref<128x16xf32, #tpu.memory_space<vmem>>, vector<128x16xf32>,
      %cst_30 = arith.constant 0.000000e+00 : f32
      %41 = vector.broadcast %cst_30 : f32 to vector<128x1xf32>
      %c0_31 = arith.constant 0 : index
      %c0_32 = arith.constant 0 : index
      %42 = vector.load %arg9[%c0_31, %c0_32] : memref<128x1xf32, #tpu.memory_space<vmem>>, vector<128x1xf32>
      tpu.vector_store %arg9[%c0_31, %c0_32], %41 {strides = array<i32>} : memref<128x1xf32, #tpu.memory_space<vmem>>, vector<128x1xf32>,
    } else {
    }
    %c0 = arith.constant 0 : index
    %c0_1 = arith.constant 0 : index
    %3 = vector.load %arg2[%c0, %c0_1] : memref<128x16xbf16, #tpu.memory_space<vmem>>, vector<128x16xbf16>
    %c0_2 = arith.constant 0 : index
    %c0_3 = arith.constant 0 : index
    %4 = vector.load %arg3[%c0_2, %c0_3] : memref<128x16xbf16, #tpu.memory_space<vmem>>, vector<128x16xbf16>
    %c0_4 = arith.constant 0 : index
    %c0_5 = arith.constant 0 : index
    %5 = vector.load %arg4[%c0_4, %c0_5] : memref<128x128xi8, #tpu.memory_space<vmem>>, vector<128x128xi8>
    %6 = arith.sitofp %5 : vector<128x128xi8> to vector<128x128xf32>
    %cst = arith.constant 0.000000e+00 : f32
    %7 = vector.broadcast %cst : f32 to vector<128x128xf32>
    %8 = arith.cmpf ogt, %6, %7 : vector<128x128xf32>
    %c0_6 = arith.constant 0 : index
    %c0_7 = arith.constant 0 : index
    %9 = vector.load %arg5[%c0_6, %c0_7] : memref<16x1xbf16, #tpu.memory_space<vmem>>, vector<16x1xbf16>
    %cst_8 = arith.constant dense<0.000000e+00> : vector<128x1xf32>
    %10 = tpu.matmul %3, %9, %cst_8 {dimension_numbers = #tpu.dot_dimension_numbers<[1], [0], [0], [1], [0, 0, 1, 1], [], []>} : vector<128x16xbf16>, vector<16x1xbf16>, vector<128x1xf32> -> vector<128x1xf32>
    %c0_9 = arith.constant 0 : index
    %c0_10 = arith.constant 0 : index
    %11 = vector.load %arg6[%c0_9, %c0_10] : memref<16x1xbf16, #tpu.memory_space<vmem>>, vector<16x1xbf16>
    %cst_11 = arith.constant dense<0.000000e+00> : vector<1x128xf32>
    %12 = tpu.matmul %11, %4, %cst_11 {dimension_numbers = #tpu.dot_dimension_numbers<[0], [1], [1], [0], [0, 1, 1, 0], [], []>} : vector<16x1xbf16>, vector<128x16xbf16>, vector<1x128xf32> -> vector<1x128xf32>
    %13 = vector.broadcast %10 : vector<128x1xf32> to vector<128x128xf32>
    %14 = vector.broadcast %12 : vector<1x128xf32> to vector<128x128xf32>
    %15 = arith.addf %13, %14 : vector<128x128xf32>
    %cst_12 = arith.constant 0.000000e+00 : f32
    %16 = vector.broadcast %cst_12 : f32 to vector<128x128xf32>
    %17 = arith.cmpf ogt, %15, %16 : vector<128x128xf32>
    %cst_13 = arith.constant 2.000000e-01 : f32
    %18 = vector.broadcast %cst_13 : f32 to vector<128x128xf32>
    %19 = arith.mulf %18, %15 : vector<128x128xf32>
    %20 = arith.select %17, %15, %19 : vector<128x128xi1>, vector<128x128xf32>
    %cst_14 = arith.constant 0.000000e+00 : f32
    %21 = vector.broadcast %cst_14 : f32 to vector<128x128xf32>
    %22 = arith.subf %21, %20 : vector<128x128xf32>
    %23 = math.exp %22 : vector<128x128xf32>
    %cst_15 = arith.constant 0.000000e+00 : f32
    %24 = vector.broadcast %cst_15 : f32 to vector<128x128xf32>
    %25 = arith.select %8, %23, %24 : vector<128x128xi1>, vector<128x128xf32>
    %cst_16 = arith.constant dense<0.000000e+00> : vector<128xf32>
    %26 = vector.multi_reduction <add>, %25, %cst_16 [1] : vector<128x128xf32> to vector<128xf32>
    %27 = vector.shape_cast %26 : vector<128xf32> to vector<128x1xf32>
    %28 = arith.truncf %25 : vector<128x128xf32> to vector<128x128xbf16>
    %cst_17 = arith.constant dense<0.000000e+00> : vector<128x16xf32>
    %29 = tpu.matmul %28, %4, %cst_17 {dimension_numbers = #tpu.dot_dimension_numbers<[1], [0], [0], [1], [0, 0, 1, 1], [], []>} : vector<128x128xbf16>, vector<128x16xbf16>, vector<128x16xf32> -> vector<128x16xf32>
    %c0_18 = arith.constant 0 : index
    %c0_19 = arith.constant 0 : index
    %30 = vector.load %arg8[%c0_18, %c0_19] : memref<128x16xf32, #tpu.memory_space<vmem>>, vector<128x16xf32>
    %31 = arith.addf %30, %29 : vector<128x16xf32>
    %c0_20 = arith.constant 0 : index
    %c0_21 = arith.constant 0 : index
    %32 = vector.load %arg8[%c0_20, %c0_21] : memref<128x16xf32, #tpu.memory_space<vmem>>, vector<128x16xf32>
    tpu.vector_store %arg8[%c0_20, %c0_21], %31 {strides = array<i32>} : memref<128x16xf32, #tpu.memory_space<vmem>>, vector<128x16xf32>,
    %c0_22 = arith.constant 0 : index
    %c0_23 = arith.constant 0 : index
    %33 = vector.load %arg9[%c0_22, %c0_23] : memref<128x1xf32, #tpu.memory_space<vmem>>, vector<128x1xf32>
    %34 = arith.addf %33, %27 : vector<128x1xf32>
    %c0_24 = arith.constant 0 : index
    %c0_25 = arith.constant 0 : index
    %35 = vector.load %arg9[%c0_24, %c0_25] : memref<128x1xf32, #tpu.memory_space<vmem>>, vector<128x1xf32>
    tpu.vector_store %arg9[%c0_24, %c0_25], %34 {strides = array<i32>} : memref<128x1xf32, #tpu.memory_space<vmem>>, vector<128x1xf32>,
    %c1_i32 = arith.constant 1 : i32
    %36 = arith.cmpi eq, %arg1, %c1_i32 : i32
    %37 = arith.extui %36 : i1 to i32
    %c0_i32_26 = arith.constant 0 : i32
    %38 = arith.cmpi ne, %37, %c0_i32_26 : i32
    scf.if %38 {
      %c0_27 = arith.constant 0 : index
      %c0_28 = arith.constant 0 : index
      %39 = vector.load %arg9[%c0_27, %c0_28] : memref<128x1xf32, #tpu.memory_space<vmem>>, vector<128x1xf32>
      %cst_29 = arith.constant 1.000000e-30 : f32
      %40 = vector.broadcast %cst_29 : f32 to vector<128x1xf32>
      %41 = arith.maximumf %39, %40 : vector<128x1xf32>
      %42 = tpu.reciprocal %41 {approx = true} : vector<128x1xf32> -> vector<128x1xf32>
      %c0_30 = arith.constant 0 : index
      %c0_31 = arith.constant 0 : index
      %43 = vector.load %arg8[%c0_30, %c0_31] : memref<128x16xf32, #tpu.memory_space<vmem>>, vector<128x16xf32>
      %44 = vector.broadcast %42 : vector<128x1xf32> to vector<128x16xf32>
      %45 = arith.mulf %43, %44 : vector<128x16xf32>
      %cst_32 = arith.constant 0.000000e+00 : f32
      %46 = vector.broadcast %cst_32 : f32 to vector<128x16xf32>
      %47 = arith.cmpf ogt, %45, %46 : vector<128x16xf32>
      %48 = math.exp %45 : vector<128x16xf32>
      %cst_33 = arith.constant 1.000000e+00 : f32
      %49 = vector.broadcast %cst_33 : f32 to vector<128x16xf32>
      %50 = arith.subf %48, %49 : vector<128x16xf32>
      %51 = arith.select %47, %45, %50 : vector<128x16xi1>, vector<128x16xf32>
      %cst_34 = arith.constant dense<0xFF800000> : vector<128xf32>
      %52 = vector.multi_reduction <maximumf>, %51, %cst_34 [1] : vector<128x16xf32> to vector<128xf32>
      %53 = vector.shape_cast %52 : vector<128xf32> to vector<128x1xf32>
      %54 = vector.broadcast %53 : vector<128x1xf32> to vector<128x16xf32>
      %55 = arith.subf %51, %54 : vector<128x16xf32>
      %56 = math.exp %55 : vector<128x16xf32>
      %cst_35 = arith.constant dense<0.000000e+00> : vector<128xf32>
      %57 = vector.multi_reduction <add>, %56, %cst_35 [1] : vector<128x16xf32> to vector<128xf32>
      %58 = vector.shape_cast %57 : vector<128xf32> to vector<128x1xf32>
      %59 = math.log %58 : vector<128x1xf32>
      %60 = vector.broadcast %59 : vector<128x1xf32> to vector<128x16xf32>
      %61 = arith.subf %55, %60 : vector<128x16xf32>
      %c0_36 = arith.constant 0 : index
      %c0_37 = arith.constant 0 : index
      %62 = vector.load %arg7[%c0_36, %c0_37] : memref<128x16xf32, #tpu.memory_space<vmem>>, vector<128x16xf32>
      tpu.vector_store %arg7[%c0_36, %c0_37], %61 {strides = array<i32>} : memref<128x16xf32, #tpu.memory_space<vmem>>, vector<128x16xf32>,
    } else {
    }
    return
  }
  func.func @transform_0(%arg0: i32, %arg1: i32) -> (i32, i32) {
    %c0_i32 = arith.constant 0 : i32
    %c0_i32_0 = arith.constant 0 : i32
    return %arg0, %c0_i32 : i32, i32
  }
  func.func @transform_1(%arg0: i32, %arg1: i32) -> (i32, i32) {
    %c0_i32 = arith.constant 0 : i32
    %c0_i32_0 = arith.constant 0 : i32
    return %arg1, %c0_i32 : i32, i32
  }
  func.func @transform_2(%arg0: i32, %arg1: i32) -> (i32, i32) {
    %c0_i32 = arith.constant 0 : i32
    return %arg0, %arg1 : i32, i32
  }
  func.func @transform_3(%arg0: i32, %arg1: i32) -> (i32, i32) {
    %c0_i32 = arith.constant 0 : i32
    %c0_i32_0 = arith.constant 0 : i32
    %c0_i32_1 = arith.constant 0 : i32
    return %c0_i32, %c0_i32_0 : i32, i32
  }
  func.func @transform_4(%arg0: i32, %arg1: i32) -> (i32, i32) {
    %c0_i32 = arith.constant 0 : i32
    %c0_i32_0 = arith.constant 0 : i32
    %c0_i32_1 = arith.constant 0 : i32
    return %c0_i32, %c0_i32_0 : i32, i32
  }
  func.func @transform_5(%arg0: i32, %arg1: i32) -> (i32, i32) {
    %c0_i32 = arith.constant 0 : i32
    %c0_i32_0 = arith.constant 0 : i32
    return %arg0, %c0_i32 : i32, i32
  }
}

</mosaic_0001>

<bundles_post_ra>
// kernel: spgat_forward.4
= control target key start
LH: loop header
LB: loop body
LE: loop exit
PB: predicated region body
PF: predicated region fallthrough
CT: control target
= control target key end

     0   :  { %s615_s9 = smov 0   ;;  %s686_s0 = inlined_call_operand.vmem [shape: f32[256,64], index: 0, kind: input, shape index: {}]   ;;  %s687_s1 = inlined_call_operand.vmem [shape: f32[64,128], index: 1, kind: input, shape index: {}]   ;;  %s688_s2 = inlined_call_operand.vmem [shape: bf16[256,128], index: 2, kind: output, shape index: {}]  }
   0x1 LB: > { %s442_s10 = sadd.s32 4294967295, %s598_s9   ;;  %p446_p0 = scmp.ge.s32.totalorder %s598_s9, 1  ;;  %s598_s9 = sphi %s615_s9, %s12_s9  }
   0x2   : > { %p113_p1 = scmp.lt.s32.totalorder %s598_s9, 3 }
   0x4   : > { %p114_p2 = pnand %p446_p0, %p113_p1 }
   0x5   : > { %v172_v0 = vld [vmem:[%s687_s1] sm:$0xff] (!%p114_p2)  ;;  %v173_v1 = vld [vmem:[%s687_s1 + $0x8] sm:$0xff] (!%p114_p2)  ;;  %v174_v2 = vld [vmem:[%s687_s1 + $0x10] sm:$0xff] (!%p114_p2)  ;;  %s447_s17 = sshll.u32 (!%p114_p2), %s442_s10, 4  ;;  %vm184_vm0 = vcmask (!%p114_p2), 523264  }
   0x6   : > { %117 = sbr.rel (%p114_p2) target bundleno = 250 (0xfa), region = 28  ;;  %v180_v3 = vpack.c.bf16 (!%p114_p2), %v173_v1, %v172_v0  ;;  %v175_v4 = vld [vmem:[%s687_s1 + $0x18] sm:$0xff] (!%p114_p2)  ;;  %p136_p3 = scmp.lt.s32.totalorder (!%p114_p2), %s447_s17, 31  ;;  %v176_v6 = vld [vmem:[%s687_s1 + $0x20] sm:$0xff] (!%p114_p2)  ;;  %v177_v7 = vld [vmem:[%s687_s1 + $0x28] sm:$0xff] (!%p114_p2) }
   0x7   : > { %v181_v5 = vpack.c.bf16 (!%p114_p2), %v175_v4, %v174_v2  ;;  %v182_v8 = vpack.c.bf16 (!%p114_p2), %v177_v7, %v176_v6  ;;  %v178_v9 = vld [vmem:[%s687_s1 + $0x30] sm:$0xff] (!%p114_p2)  ;;  %v179_v10 = vld [vmem:[%s687_s1 + $0x38] sm:$0xff] (!%p114_p2) }
   0x8   : > { %552 = vmatprep.subr.bf16.mxu0 (!%p114_p2), %v180_v3  ;;  %576 = vmatprep.subr.bf16.mxu1 (!%p114_p2), %v180_v3  ;;  %v183_v16 = vpack.c.bf16 (!%p114_p2), %v179_v10, %v178_v9 }
   0x9   : > { %553 = vmatpush3.bf16.msra.mxu0 (!%p114_p2), %v180_v3  ;;  %580 = vmatpush3.bf16.msra.mxu1 (!%p114_p2), %v180_v3 }
   0xa   : > { %554 = vmatprep.subr.bf16.mxu0 (!%p114_p2), %v181_v5  ;;  %577 = vmatprep.subr.bf16.mxu1 (!%p114_p2), %v181_v5 }
   0xd   : > { %s690_s17 = smov (!%p136_p3, %s447_s17), 31  ;;  %555 = vmatpush3.bf16.msra.mxu0 %v181_v5  ;;  %581 = vmatpush3.bf16.msra.mxu1 %v181_v5 }
   0xe   : > { %s448_s24 = sshll.u32 %s690_s17, 3  ;;  %556 = vmatprep.subr.bf16.mxu0 %v182_v8  ;;  %578 = vmatprep.subr.bf16.mxu1 %v182_v8  ;;  %s450_s4 = sshll.u32 %s690_s17, 2 }
   0xf   : > { %s653_s3 = scalar_lea.vmem %s686_s0, %s448_s24  ;;  %s145_s7 = scalar_lea.vmem %s688_s2, %s450_s4 }
  0x10   : > { %v148_v11 = vld [vmem:[%s653_s3] sm:$0xff]  ;;  %v149_v12 = vld [vmem:[%s653_s3 + $0x8] sm:$0xff]  ;;  %v150_v18 = vld [vmem:[%s653_s3 + $0x10] sm:$0xff] }
  0x11   : > { %v156_v13 = vld [vmem:[%s653_s3 + $0x40] sm:$0xff]  ;;  %v164_v14 = vpack.c.bf16 %v149_v12, %v148_v11  ;;  %v157_v15 = vld [vmem:[%s653_s3 + $0x48] sm:$0xff]  ;;  %v151_v19 = vld [vmem:[%s653_s3 + $0x18] sm:$0xff]  ;;  %557 = vmatpush3.bf16.msra.mxu0 %v182_v8  ;;  %582 = vmatpush3.bf16.msra.mxu1 %v182_v8 }
  0x12   : > { %v168_v17 = vpack.c.bf16 %v157_v15, %v156_v13  ;;  %v158_v20 = vld [vmem:[%s653_s3 + $0x50] sm:$0xff]  ;;  %v159_v21 = vld [vmem:[%s653_s3 + $0x58] sm:$0xff]  ;;  %v152_v22 = vld [vmem:[%s653_s3 + $0x20] sm:$0xff]  ;;  %558 = vmatprep.subr.bf16.mxu0 %v183_v16  ;;  %579 = vmatprep.subr.bf16.mxu1 %v183_v16  ;;  %v165_v26 = vpack.c.bf16 %v151_v19, %v150_v18 }
  0x13   : > { %560 = vmatprep.mubr.msk.bf16.mxu0 %vm184_vm0, %v164_v14  ;;  %v153_v23 = vld [vmem:[%s653_s3 + $0x28] sm:$0xff]  ;;  %v160_v24 = vld [vmem:[%s653_s3 + $0x60] sm:$0xff]  ;;  %v169_v27 = vpack.c.bf16 %v159_v21, %v158_v20  ;;  %v154_v30 = vld [vmem:[%s653_s3 + $0x30] sm:$0xff] }
  0x14   : > { %568 = vmatprep.mubr.msk.bf16.mxu1 %vm184_vm0, %v168_v17  ;;  %v161_v25 = vld [vmem:[%s653_s3 + $0x68] sm:$0xff]  ;;  %v166_v28 = vpack.c.bf16 %v153_v23, %v152_v22  ;;  %v155_v31 = vld [vmem:[%s653_s3 + $0x38] sm:$0xff]  ;;  %v162_v32 = vld [vmem:[%s653_s3 + $0x70] sm:$0xff] }
  0x15   : > { %559 = vmatpush3.bf16.msra.mxu0 %v183_v16  ;;  %583 = vmatpush3.bf16.msra.mxu1 %v183_v16  ;;  %v170_v29 = vpack.c.bf16 %v161_v25, %v160_v24  ;;  %v163_v33 = vld [vmem:[%s653_s3 + $0x78] sm:$0xff]  ;;  %v167_v34 = vpack.c.bf16 %v155_v31, %v154_v30 }
  0x16   : > { %v171_v35 = vpack.c.bf16 %v163_v33, %v162_v32 }
  0x18   : > { %561 = vmatmul.mubr.msk.bf16.vlgmr.msra.gmra.mrb[0].mxu0 %vm184_vm0, %v165_v26  ;;  %569 = vmatmul.mubr.msk.bf16.vlgmr.msra.gmra.mrb[0].mxu1 %vm184_vm0, %v169_v27 }
  0x19   : > { %564 = vmatprep.mubr.msk.bf16.mxu0 %vm184_vm0, %v166_v28  ;;  %572 = vmatprep.mubr.msk.bf16.mxu1 %vm184_vm0, %v170_v29 }
  0x20   : > { %565 = vmatmul.mubr.msk.bf16.gmra.mrb[4].mxu0 %vm184_vm0, %v167_v34  ;;  %573 = vmatmul.mubr.msk.bf16.gmra.mrb[4].mxu1 %vm184_vm0, %v171_v35 }
  0xeb   : > { %v562_v36 = vpop.f32.mrb[0].mxu0  ;;  %v570_v37 = vpop.f32.mrb[0].mxu1 }
  0xec   : > { %v243_v38 = vpop.f32.mrb[1].mxu0  ;;  %v275_v39 = vpop.f32.mrb[1].mxu1 }
  0xed   : > { %v563_v40 = vpop.f32.mrb[2].mxu0  ;;  %v571_v41 = vpop.f32.mrb[2].mxu1 }
  0xee   : > { %v501_v42 = vpack.c.bf16 %v563_v40, %v562_v36  ;;  %v521_v43 = vpack.c.bf16 %v571_v41, %v570_v37  ;;  %v246_v44 = vpop.f32.mrb[3].mxu0  ;;  %v278_v45 = vpop.f32.mrb[3].mxu1 }
  0xef   : > { %v496_v46 = vpack.c.bf16 %v246_v44, %v243_v38  ;;  %v516_v47 = vpack.c.bf16 %v278_v45, %v275_v39 }
  0xf0   : > { %533 = vst [vmem:[%s145_s7 + $0x8] sm:$0xff] %v501_v42   ;;  %537 = vst [vmem:[%s145_s7 + $0x28] sm:$0xff] %v521_v43  }
  0xf1   : > { %497 = vst [vmem:[%s145_s7] sm:$0xff] %v496_v46   ;;  %536 = vst [vmem:[%s145_s7 + $0x20] sm:$0xff] %v516_v47  }
  0xf3   : > { %v566_v48 = vpop.f32.mrb[4].mxu0  ;;  %v574_v49 = vpop.f32.mrb[4].mxu1 }
  0xf4   : > { %v259_v50 = vpop.f32.mrb[5].mxu0  ;;  %v291_v51 = vpop.f32.mrb[5].mxu1 }
  0xf5   : > { %v567_v52 = vpop.f32.mrb[6].mxu0  ;;  %v575_v53 = vpop.f32.mrb[6].mxu1 }
  0xf6   : > { %v511_v54 = vpack.c.bf16 %v567_v52, %v566_v48  ;;  %v531_v55 = vpack.c.bf16 %v575_v53, %v574_v49  ;;  %v262_v56 = vpop.f32.mrb[7].mxu0  ;;  %v294_v57 = vpop.f32.mrb[7].mxu1 }
  0xf7   : > { %v506_v58 = vpack.c.bf16 %v262_v56, %v259_v50  ;;  %v526_v59 = vpack.c.bf16 %v294_v57, %v291_v51 }
  0xf8   : > { %535 = vst [vmem:[%s145_s7 + $0x18] sm:$0xff] %v511_v54   ;;  %539 = vst [vmem:[%s145_s7 + $0x38] sm:$0xff] %v531_v55  }
  0xf9   : > { %534 = vst [vmem:[%s145_s7 + $0x10] sm:$0xff] %v506_v58   ;;  %538 = vst [vmem:[%s145_s7 + $0x30] sm:$0xff] %v526_v59  }
  0xfa PF: > { %s12_s9 = sadd.s32 1, %s598_s9  }
  0xfb   : > { %p9_p4 = scmp.ge.s32.totalorder %s12_s9, 4  }
  0xfd   :  { %11 = sbr.rel (!%p9_p4) target bundleno = 1 (0x1), region = 58 }

// kernel: spgat_forward.6
= control target key start
LH: loop header
LB: loop body
LE: loop exit
PB: predicated region body
PF: predicated region fallthrough
CT: control target
= control target key end

     0   :  { %s624_s9 = smov 0   ;;  %s740_s0 = inlined_call_operand.vmem [shape: bf16[256,128], index: 0, kind: input, shape index: {}]   ;;  %s741_s1 = inlined_call_operand.vmem [shape: f32[128,16], index: 1, kind: input, shape index: {}]   ;;  %s742_s2 = inlined_call_operand.vmem [shape: bf16[256,16], index: 2, kind: output, shape index: {}]  }
   0x1 LB: > { %s470_s10 = sadd.s32 4294967295, %s607_s9   ;;  %p474_p0 = scmp.ge.s32.totalorder %s607_s9, 1  ;;  %s607_s9 = sphi %s624_s9, %s12_s9  }
   0x2   : > { %p113_p1 = scmp.lt.s32.totalorder %s607_s9, 3 }
   0x4   : > { %p114_p2 = pnand %p474_p0, %p113_p1 }
   0x5   : > { %v164_v0 = vld [vmem:[%s741_s1] sm:$0xff] (!%p114_p2)  ;;  %v165_v1 = vld [vmem:[%s741_s1 + $0x8] sm:$0xff] (!%p114_p2)  ;;  %v166_v2 = vld [vmem:[%s741_s1 + $0x10] sm:$0xff] (!%p114_p2)  ;;  %s475_s17 = sshll.u32 (!%p114_p2), %s470_s10, 4  ;;  %vm397_vm0 = vcmask (!%p114_p2), 125952  }
   0x6   : > { %117 = sbr.rel (%p114_p2) target bundleno = 267 (0x10b), region = 28  ;;  %v180_v3 = vpack.c.bf16 (!%p114_p2), %v165_v1, %v164_v0  ;;  %v167_v4 = vld [vmem:[%s741_s1 + $0x18] sm:$0xff] (!%p114_p2)  ;;  %p136_p3 = scmp.lt.s32.totalorder (!%p114_p2), %s475_s17, 31  ;;  %v168_v6 = vld [vmem:[%s741_s1 + $0x20] sm:$0xff] (!%p114_p2)  ;;  %v169_v7 = vld [vmem:[%s741_s1 + $0x28] sm:$0xff] (!%p114_p2) }
   0x7   : > { %v181_v5 = vpack.c.bf16 (!%p114_p2), %v167_v4, %v166_v2  ;;  %v182_v8 = vpack.c.bf16 (!%p114_p2), %v169_v7, %v168_v6  ;;  %v170_v9 = vld [vmem:[%s741_s1 + $0x30] sm:$0xff] (!%p114_p2)  ;;  %v171_v10 = vld [vmem:[%s741_s1 + $0x38] sm:$0xff] (!%p114_p2)  ;;  %v172_v14 = vld [vmem:[%s741_s1 + $0x40] sm:$0xff] (!%p114_p2) }
   0x8   : > { %537 = vmatprep.subr.bf16.mxu0 (!%p114_p2), %v180_v3  ;;  %569 = vmatprep.subr.bf16.mxu1 (!%p114_p2), %v180_v3  ;;  %v183_v13 = vpack.c.bf16 (!%p114_p2), %v171_v10, %v170_v9  ;;  %v173_v15 = vld [vmem:[%s741_s1 + $0x48] sm:$0xff] (!%p114_p2)  ;;  %v174_v17 = vld [vmem:[%s741_s1 + $0x50] sm:$0xff] (!%p114_p2)  ;;  %v175_v18 = vld [vmem:[%s741_s1 + $0x58] sm:$0xff] (!%p114_p2) }
   0x9   : > { %538 = vmatpush3.bf16.msra.mxu0 (!%p114_p2), %v180_v3  ;;  %577 = vmatpush3.bf16.msra.mxu1 (!%p114_p2), %v180_v3  ;;  %v184_v16 = vpack.c.bf16 (!%p114_p2), %v173_v15, %v172_v14  ;;  %v185_v19 = vpack.c.bf16 (!%p114_p2), %v175_v18, %v174_v17  ;;  %v176_v20 = vld [vmem:[%s741_s1 + $0x60] sm:$0xff] (!%p114_p2)  ;;  %v177_v21 = vld [vmem:[%s741_s1 + $0x68] sm:$0xff] (!%p114_p2)  ;;  %v178_v23 = vld [vmem:[%s741_s1 + $0x70] sm:$0xff] (!%p114_p2) }
   0xa   : > { %539 = vmatprep.subr.bf16.mxu0 (!%p114_p2), %v181_v5  ;;  %570 = vmatprep.subr.bf16.mxu1 (!%p114_p2), %v181_v5  ;;  %v186_v22 = vpack.c.bf16 (!%p114_p2), %v177_v21, %v176_v20  ;;  %v179_v24 = vld [vmem:[%s741_s1 + $0x78] sm:$0xff] (!%p114_p2) }
   0xb   : > { %v187_v25 = vpack.c.bf16 (!%p114_p2), %v179_v24, %v178_v23 }
   0xd   : > { %s744_s17 = smov (!%p136_p3, %s475_s17), 31  ;;  %540 = vmatpush3.bf16.msra.mxu0 %v181_v5  ;;  %578 = vmatpush3.bf16.msra.mxu1 %v181_v5 }
   0xe   : > { %s476_s24 = sshll.u32 %s744_s17, 2  ;;  %541 = vmatprep.subr.bf16.mxu0 %v182_v8  ;;  %571 = vmatprep.subr.bf16.mxu1 %v182_v8 }
   0xf   : > { %s664_s3 = scalar_lea.vmem %s740_s0, %s476_s24  ;;  %s703_s25 = scalar_lea.vmem %s742_s2, %s476_s24 }
  0x10   : > { %v593_v11 = vld [vmem:[%s664_s3] sm:$0xff]   ;;  %v595_v26 = vld [vmem:[%s664_s3 + $0x8] sm:$0xff]   ;;  %v597_v28 = vld [vmem:[%s664_s3 + $0x10] sm:$0xff]  }
  0x11   : > { %v594_v12 = vld [vmem:[%s664_s3 + $0x20] sm:$0xff]   ;;  %553 = vmatprep.mubr.bf16.mxu0 %v593_v11  ;;  %542 = vmatpush3.bf16.msra.mxu0 %v182_v8  ;;  %v596_v27 = vld [vmem:[%s664_s3 + $0x28] sm:$0xff]   ;;  %v598_v29 = vld [vmem:[%s664_s3 + $0x30] sm:$0xff]  }
  0x12   : > { %561 = vmatprep.mubr.bf16.mxu1 %v594_v12  ;;  %579 = vmatpush3.bf16.msra.mxu1 %v182_v8  ;;  %v599_v30 = vld [vmem:[%s664_s3 + $0x18] sm:$0xff]  }
  0x13   : > { %543 = vmatprep.subr.bf16.mxu0 %v183_v13  ;;  %572 = vmatprep.subr.bf16.mxu1 %v183_v13  ;;  %v600_v31 = vld [vmem:[%s664_s3 + $0x38] sm:$0xff]  }
  0x15   : > { %544 = vmatpush3.bf16.msra.mxu0 %v183_v13 }
  0x16   : > { %580 = vmatpush3.bf16.msra.mxu1 %v183_v13  ;;  %545 = vmatprep.subr.bf16.mxu0 %v184_v16 }
  0x17   : > { %573 = vmatprep.subr.bf16.mxu1 %v184_v16 }
  0x19   : > { %546 = vmatpush3.bf16.msra.mxu0 %v184_v16 }
  0x1a   : > { %581 = vmatpush3.bf16.msra.mxu1 %v184_v16  ;;  %547 = vmatprep.subr.bf16.mxu0 %v185_v19 }
  0x1b   : > { %574 = vmatprep.subr.bf16.mxu1 %v185_v19 }
  0x1d   : > { %548 = vmatpush3.bf16.msra.mxu0 %v185_v19 }
  0x1e   : > { %582 = vmatpush3.bf16.msra.mxu1 %v185_v19  ;;  %549 = vmatprep.subr.bf16.mxu0 %v186_v22 }
  0x1f   : > { %575 = vmatprep.subr.bf16.mxu1 %v186_v22 }
  0x21   : > { %550 = vmatpush3.bf16.msra.mxu0 %v186_v22 }
  0x22   : > { %583 = vmatpush3.bf16.msra.mxu1 %v186_v22  ;;  %551 = vmatprep.subr.bf16.mxu0 %v187_v25 }
  0x23   : > { %576 = vmatprep.subr.bf16.mxu1 %v187_v25 }
  0x25   : > { %552 = vmatpush3.bf16.msra.mxu0 %v187_v25 }
  0x26   : > { %584 = vmatpush3.bf16.msra.mxu1 %v187_v25 }
  0x28   : > { %554 = vmatmul.mubr.bf16.vlgmr.msra.gmra.mrb[0].mxu0 %v595_v26 }
  0x29   : > { %562 = vmatmul.mubr.bf16.vlgmr.msra.gmra.mrb[0].mxu1 %v596_v27  ;;  %557 = vmatprep.mubr.bf16.mxu0 %v597_v28 }
  0x2a   : > { %565 = vmatprep.mubr.bf16.mxu1 %v598_v29 }
  0x30   : > { %558 = vmatmul.mubr.bf16.gmra.mrb[4].mxu0 %v599_v30 }
  0x31   : > { %566 = vmatmul.mubr.bf16.gmra.mrb[4].mxu1 %v600_v31 }
  0xfb   : > { %v555_v32 = vpop.f32.mrb[0].mxu0 }
  0xfc   : > { %v563_v33 = vpop.f32.mrb[0].mxu1  ;;  %v507_v34 = vpack.c.bf16 %v555_v32, %v555_v32  ;;  %v270_v36 = vpop.f32.mrb[1].mxu0 }
  0xfd   : > { %v515_v35 = vpack.c.bf16 %v563_v33, %v563_v33  ;;  %v302_v37 = vpop.f32.mrb[1].mxu1  ;;  %v505_v38 = vpack.c.bf16 %v270_v36, %v270_v36  ;;  %v556_v40 = vpop.f32.mrb[2].mxu0 }
  0xfe   : > { %v513_v39 = vpack.c.bf16 %v302_v37, %v302_v37  ;;  %v564_v41 = vpop.f32.mrb[2].mxu1  ;;  %400 = vst.msk [vmem:[%s703_s25 + $0x8] sm:$0xf] %vm397_vm0, %v507_v34  ;;  %v508_v42 = vpack.c.bf16 %v556_v40, %v556_v40  ;;  %v273_v44 = vpop.f32.mrb[3].mxu0 }
  0xff   : > { %408 = vst.msk [vmem:[%s703_s25 + $0x28] sm:$0xf] %vm397_vm0, %v515_v35  ;;  %v516_v43 = vpack.c.bf16 %v564_v41, %v564_v41  ;;  %v305_v45 = vpop.f32.mrb[3].mxu1  ;;  %398 = vst.msk [vmem:[%s703_s25] sm:$0xf] %vm397_vm0, %v505_v38  ;;  %v506_v46 = vpack.c.bf16 %v273_v44, %v273_v44 }
 0x100   : > { %406 = vst.msk [vmem:[%s703_s25 + $0x20] sm:$0xf] %vm397_vm0, %v513_v39  ;;  %v514_v47 = vpack.c.bf16 %v305_v45, %v305_v45  ;;  %401 = vst.msk [vmem:[%s703_s25 + $0xc] sm:$0xf] %vm397_vm0, %v508_v42 }
 0x101   : > { %409 = vst.msk [vmem:[%s703_s25 + $0x2c] sm:$0xf] %vm397_vm0, %v516_v43  ;;  %399 = vst.msk [vmem:[%s703_s25 + $0x4] sm:$0xf] %vm397_vm0, %v506_v46 }
 0x102   : > { %407 = vst.msk [vmem:[%s703_s25 + $0x24] sm:$0xf] %vm397_vm0, %v514_v47 }
 0x103   : > { %v559_v48 = vpop.f32.mrb[4].mxu0 }
 0x104   : > { %v567_v49 = vpop.f32.mrb[4].mxu1  ;;  %v511_v50 = vpack.c.bf16 %v559_v48, %v559_v48  ;;  %v286_v52 = vpop.f32.mrb[5].mxu0 }
 0x105   : > { %v519_v51 = vpack.c.bf16 %v567_v49, %v567_v49  ;;  %v318_v53 = vpop.f32.mrb[5].mxu1  ;;  %v509_v54 = vpack.c.bf16 %v286_v52, %v286_v52  ;;  %v560_v56 = vpop.f32.mrb[6].mxu0 }
 0x106   : > { %v517_v55 = vpack.c.bf16 %v318_v53, %v318_v53  ;;  %v568_v57 = vpop.f32.mrb[6].mxu1  ;;  %404 = vst.msk [vmem:[%s703_s25 + $0x18] sm:$0xf] %vm397_vm0, %v511_v50  ;;  %v512_v58 = vpack.c.bf16 %v560_v56, %v560_v56  ;;  %v289_v60 = vpop.f32.mrb[7].mxu0 }
 0x107   : > { %412 = vst.msk [vmem:[%s703_s25 + $0x38] sm:$0xf] %vm397_vm0, %v519_v51  ;;  %v520_v59 = vpack.c.bf16 %v568_v57, %v568_v57  ;;  %v321_v61 = vpop.f32.mrb[7].mxu1  ;;  %402 = vst.msk [vmem:[%s703_s25 + $0x10] sm:$0xf] %vm397_vm0, %v509_v54  ;;  %v510_v62 = vpack.c.bf16 %v289_v60, %v289_v60 }
 0x108   : > { %410 = vst.msk [vmem:[%s703_s25 + $0x30] sm:$0xf] %vm397_vm0, %v517_v55  ;;  %v518_v63 = vpack.c.bf16 %v321_v61, %v321_v61  ;;  %405 = vst.msk [vmem:[%s703_s25 + $0x1c] sm:$0xf] %vm397_vm0, %v512_v58 }
 0x109   : > { %413 = vst.msk [vmem:[%s703_s25 + $0x3c] sm:$0xf] %vm397_vm0, %v520_v59  ;;  %403 = vst.msk [vmem:[%s703_s25 + $0x14] sm:$0xf] %vm397_vm0, %v510_v62 }
 0x10a   : > { %411 = vst.msk [vmem:[%s703_s25 + $0x34] sm:$0xf] %vm397_vm0, %v518_v63 }
 0x10b PF: > { %s12_s9 = sadd.s32 1, %s607_s9  }
 0x10c   : > { %p9_p4 = scmp.ge.s32.totalorder %s12_s9, 4  }
 0x10e   :  { %11 = sbr.rel (!%p9_p4) target bundleno = 1 (0x1), region = 58 }

// kernel: spgat_forward.7
= control target key start
LH: loop header
LB: loop body
LE: loop exit
PB: predicated region body
PF: predicated region fallthrough
CT: control target
= control target key end

     0   :  { %s2290_s18 = smov 0   ;;  %s2292_s19 = smov 0   ;;  %s2885_s0 = inlined_call_operand.vmem [shape: bf16[256,16], index: 0, kind: input, shape index: {}, may-alias: {0,1}]   ;;  %s2886_s1 = inlined_call_operand.vmem [shape: bf16[256,16], index: 1, kind: input, shape index: {}, may-alias: {0,1}]   ;;  %s2887_s2 = inlined_call_operand.vmem [shape: s8[256,256], index: 2, kind: input, shape index: {}]   ;;  %s2888_s3 = inlined_call_operand.vmem [shape: bf16[16,1], index: 3, kind: input, shape index: {}]   ;;  %s2889_s4 = inlined_call_operand.vmem [shape: bf16[16,1], index: 4, kind: input, shape index: {}]   ;;  %s2890_s5 = inlined_call_operand.vmem [shape: f32[256,16], index: 5, kind: output, shape index: {}]  }
   0x1   :  { %s2294_s20 = smov 0   ;;  %s2296_s21 = smov 0  }
   0x2   :  { %s2298_s22 = smov 0   ;;  %s2300_s23 = smov 0  }
   0x3   :  { %s2302_s24 = smov 0  }
   0x4 LB: > { %s24_s25 = sadd.s32 1, %s2245_s22  ;;  %s27_s26 = sadd.s32 1, %s2249_s23  ;;  %s2253_s24 = sphi %s2302_s24, %s15_s24   ;;  %s2249_s23 = sphi %s2300_s23, %s2900_s23   ;;  %s2245_s22 = sphi %s2298_s22, %s2899_s22   ;;  %s2241_s21 = sphi %s2296_s21, %s2898_s21   ;;  %s2237_s20 = sphi %s2294_s20, %s2897_s20   ;;  %s2233_s19 = sphi %s2292_s19, %s2896_s19   ;;  %s2229_s18 = sphi %s2290_s18, %s2895_s18  }
   0x5   : > { %p25_p0 = scmp.ge.s32.totalorder %s24_s25, 2  ;;  %p95_p1 = scmp.ne.s32.totalorder %s2233_s19, %s2229_s18 }
   0x6   : > { %p96_p2 = scmp.eq.s32.totalorder %s2253_s24, 0  ;;  %s88_s30 = sadd.s32 1, %s2233_s19 }
   0x7   : > { %s2902_s25 = smov (%p25_p0, %s24_s25), 0  ;;  %s2904_s26 = smov (!%p25_p0, %s27_s26), %s2249_s23 }
   0x8   : > { %p97_p3 = por %p96_p2, %p95_p1  ;;  %p29_p4 = scmp.ge.s32.totalorder %s2904_s26, 2 }
   0x9   : > { %s84_s27 = ssub.s32 %s2245_s22, %s2902_s25  ;;  %p1767_p6 = scmp.ge.s32.totalorder %s2253_s24, 4 }
   0xa   : > { %s2906_s26 = smov (%p29_p4, %s2904_s26), 0 }
   0xb   : > { %s83_s28 = ssub.s32 %s2249_s23, %s2906_s26  ;;  %195 = sbr.rel (%p1767_p6) target bundleno = 26 (0x1a), region = 24 }
   0xc   : > { %s85_s29 = sor.u32 %s84_s27, %s83_s28 }
   0xd   : > { %p86_p5 = scmp.eq.s32.totalorder %s85_s29, 0 }
   0xf   : > { %s2341_s6 = scalar_select %p86_p5, %s2233_s19, %s88_s30  }
  0x12   : > { %216 = sbr.rel (!%p97_p3) target bundleno = 26 (0x1a), region = 36  ;;  %s218_s7 = sand.u32 (%p97_p3), 1, %s2233_s19  }
  0x13   : > { %s1851_s8 = sshll.u32 (%p97_p3), %s2249_s23, 3  ;;  %s1768_s9 = sshll.u32 (%p97_p3), %s218_s7, 5 }
  0x14   : > { %s223_s10 = sadd.s32 (%p97_p3), %s2245_s22, %s1851_s8  ;;  %s220_s15 = scalar_lea.vmem (%p97_p3), [#allocation4], %s1768_s9 }
  0x15   : > { %s1771_s11 = sshll.u32 (%p97_p3), %s223_s10, 3 }
  0x16   : > { %s225_s14 = scalar_lea.vmem (%p97_p3), %s2887_s2, %s1771_s11 }
  0x17   : > { %v259_v0 = vld [vmem:[%s225_s14] sm:$0xff] (%p97_p3)  ;;  %v261_v1 = vld [vmem:[%s225_s14 + $0x10] sm:$0xff] (%p97_p3) }
  0x18   : > { %v263_v2 = vld [vmem:[%s225_s14 + $0x20] sm:$0xff] (%p97_p3)  ;;  %260 = vst [vmem:[%s220_s15] sm:$0xff] (%p97_p3), %v259_v0  ;;  %262 = vst [vmem:[%s220_s15 + $0x8] sm:$0xff] (%p97_p3), %v261_v1  ;;  %v265_v3 = vld [vmem:[%s225_s14 + $0x30] sm:$0xff] (%p97_p3) }
  0x19   : > { %264 = vst [vmem:[%s220_s15 + $0x10] sm:$0xff] %v263_v2  ;;  %266 = vst [vmem:[%s220_s15 + $0x18] sm:$0xff] %v265_v3 }
  0x1a PF: > { %p1772_p7 = scmp.ge.s32.totalorder %s2253_s24, 1  ;;  %p271_p8 = scmp.lt.s32.totalorder %s2253_s24, 5 }
  0x1c   : > { %p272_p9 = pnand %p1772_p7, %p271_p8 }
  0x1d   : > { %s278_s16 = sand.u32 (!%p272_p9), 1, %s2229_s18   ;;  %s1774_s17 = sshll.u32 (!%p272_p9), %s2241_s21, 4 }
  0x1e   : > { %275 = sbr.rel (%p272_p9) target bundleno = 1143 (0x477), region = 74  ;;  %s1773_s27 = sshll.u32 (!%p272_p9), %s278_s16, 5 }
  0x1f   : > { %p316_p10 = scmp.lt.s32.totalorder (!%p272_p9), %s1774_s17, 31  ;;  %s1776_s28 = sshll.u32 (!%p272_p9), %s2237_s20, 4 }
  0x20   : > { %p322_p11 = scmp.lt.s32.totalorder (!%p272_p9), %s1776_s28, 31  ;;  %s2370_s15 = scalar_lea.vmem (!%p272_p9), [#allocation4], %s1773_s27 }
  0x21   : > { %p1780_p12 = scmp.ne.s32.totalorder (!%p272_p9), %s2237_s20, 0 }
  0x25   : > { %s2908_s17 = smov (!%p316_p10, %s1774_s17), 31  ;;  %s2910_s28 = smov (!%p322_p11, %s1776_s28), 31 }
  0x26   : > { %s1775_s29 = sshll.u32 %s2908_s17, 2  ;;  %s1779_s30 = sshll.u32 %s2908_s17, 3  ;;  %vm339_vm0 = vcmask (!%p1780_p12), 130048   ;;  %vm356_vm1 = vcmask (!%p1780_p12), 7168   ;;  %v2255_v4 = vmov (!%p1780_p12), 0.0  }
  0x27   : > { %s2358_s9 = scalar_lea.vmem %s2885_s0, %s1775_s29  ;;  %s2363_s12 = scalar_lea.vmem %s2890_s5, %s1779_s30  ;;  %340 = vst.msk [vmem:[#allocation2] sm:$0xff] (!%p1780_p12), %vm339_vm0, %v2255_v4  ;;  %341 = vst.msk [vmem:[#allocation2 + $0x8] sm:$0xff] (!%p1780_p12), %vm339_vm0, %v2255_v4 }
  0x28   : > { %s1777_s18 = sshll.u32 %s2910_s28, 2  ;;  %338 = sbr.rel (%p1780_p12) target bundleno = 55 (0x37), region = 82  ;;  %342 = vst.msk [vmem:[#allocation2 + $0x10] sm:$0xff] (!%p1780_p12), %vm339_vm0, %v2255_v4  ;;  %343 = vst.msk [vmem:[#allocation2 + $0x18] sm:$0xff] (!%p1780_p12), %vm339_vm0, %v2255_v4 }
  0x29   : > { %s2368_s14 = scalar_lea.vmem %s2886_s1, %s1777_s18  ;;  %344 = vst.msk [vmem:[#allocation2 + $0x20] sm:$0xff] (!%p1780_p12), %vm339_vm0, %v2255_v4  ;;  %345 = vst.msk [vmem:[#allocation2 + $0x28] sm:$0xff] (!%p1780_p12), %vm339_vm0, %v2255_v4 }
  0x2a   : > { %346 = vst.msk [vmem:[#allocation2 + $0x30] sm:$0xff] (!%p1780_p12), %vm339_vm0, %v2255_v4  ;;  %347 = vst.msk [vmem:[#allocation2 + $0x38] sm:$0xff] (!%p1780_p12), %vm339_vm0, %v2255_v4 }
  0x2b   : > { %348 = vst.msk [vmem:[#allocation2 + $0x40] sm:$0xff] (!%p1780_p12), %vm339_vm0, %v2255_v4  ;;  %349 = vst.msk [vmem:[#allocation2 + $0x48] sm:$0xff] (!%p1780_p12), %vm339_vm0, %v2255_v4 }
  0x2c   : > { %350 = vst.msk [vmem:[#allocation2 + $0x50] sm:$0xff] (!%p1780_p12), %vm339_vm0, %v2255_v4  ;;  %351 = vst.msk [vmem:[#allocation2 + $0x58] sm:$0xff] (!%p1780_p12), %vm339_vm0, %v2255_v4 }
  0x2d   : > { %352 = vst.msk [vmem:[#allocation2 + $0x60] sm:$0xff] (!%p1780_p12), %vm339_vm0, %v2255_v4  ;;  %353 = vst.msk [vmem:[#allocation2 + $0x68] sm:$0xff] (!%p1780_p12), %vm339_vm0, %v2255_v4 }
  0x2e   : > { %354 = vst.msk [vmem:[#allocation2 + $0x70] sm:$0xff] (!%p1780_p12), %vm339_vm0, %v2255_v4  ;;  %355 = vst.msk [vmem:[#allocation2 + $0x78] sm:$0xff] (!%p1780_p12), %vm339_vm0, %v2255_v4 }
  0x2f   : > { %357 = vst.msk [vmem:[#allocation3] sm:$0xff] %vm356_vm1, %v2255_v4  ;;  %358 = vst.msk [vmem:[#allocation3 + $0x8] sm:$0xff] %vm356_vm1, %v2255_v4 }
  0x30   : > { %359 = vst.msk [vmem:[#allocation3 + $0x10] sm:$0xff] %vm356_vm1, %v2255_v4  ;;  %360 = vst.msk [vmem:[#allocation3 + $0x18] sm:$0xff] %vm356_vm1, %v2255_v4 }
  0x31   : > { %361 = vst.msk [vmem:[#allocation3 + $0x20] sm:$0xff] %vm356_vm1, %v2255_v4  ;;  %362 = vst.msk [vmem:[#allocation3 + $0x28] sm:$0xff] %vm356_vm1, %v2255_v4 }
  0x32   : > { %363 = vst.msk [vmem:[#allocation3 + $0x30] sm:$0xff] %vm356_vm1, %v2255_v4  ;;  %364 = vst.msk [vmem:[#allocation3 + $0x38] sm:$0xff] %vm356_vm1, %v2255_v4 }
  0x33   : > { %365 = vst.msk [vmem:[#allocation3 + $0x40] sm:$0xff] %vm356_vm1, %v2255_v4  ;;  %366 = vst.msk [vmem:[#allocation3 + $0x48] sm:$0xff] %vm356_vm1, %v2255_v4 }
  0x34   : > { %367 = vst.msk [vmem:[#allocation3 + $0x50] sm:$0xff] %vm356_vm1, %v2255_v4  ;;  %368 = vst.msk [vmem:[#allocation3 + $0x58] sm:$0xff] %vm356_vm1, %v2255_v4 }
  0x35   : > { %369 = vst.msk [vmem:[#allocation3 + $0x60] sm:$0xff] %vm356_vm1, %v2255_v4  ;;  %370 = vst.msk [vmem:[#allocation3 + $0x68] sm:$0xff] %vm356_vm1, %v2255_v4 }
  0x36   : > { %371 = vst.msk [vmem:[#allocation3 + $0x70] sm:$0xff] %vm356_vm1, %v2255_v4  ;;  %372 = vst.msk [vmem:[#allocation3 + $0x78] sm:$0xff] %vm356_vm1, %v2255_v4 }
  0x37 PF: > { %v2019_v5 = vld [vmem:[%s2888_s3] sm:$0xff]   ;;  %vm505_vm2 = vcmask 130048   ;;  %v2021_v7 = vld [vmem:[%s2358_s9 + $0x8] sm:$0xff]   ;;  %v2256_v8 = vmov 0.0   ;;  %v2022_v9 = vld [vmem:[%s2358_s9 + $0x10] sm:$0xff]   ;;  %vm2257_vm3 = vmmov 0   ;;  %v838_v54 = vlaneseq }
  0x38   : > { %v2020_v6 = vld [vmem:[%s2358_s9] sm:$0xff]   ;;  %1886 = vmatprep.subr.bf16.mxu0 %v2019_v5  ;;  %1904 = vmatprep.subr.bf16.mxu1 %v2256_v8  ;;  %v2258_v10 = vmov 0   ;;  %v2023_v12 = vld [vmem:[%s2358_s9 + $0x18] sm:$0xff]   ;;  %v2030_v16 = vld [vmem:[%s2368_s14 + $0x8] sm:$0xff]   ;;  %p1832_p13 = scmp.ne.s32.totalorder %s2237_s20, 1 }
  0x39   : > { %1887 = vmatpush3.bf16.msra.mxu0 %v2019_v5  ;;  %1888 = vmatprep.mubr.msk.bf16.mxu0 %vm505_vm2, %v2020_v6  ;;  %v2026_v11 = vld [vmem:[%s2889_s4] sm:$0xff]   ;;  %v2031_v17 = vld [vmem:[%s2368_s14 + $0x10] sm:$0xff]   ;;  %v2025_v18 = vld [vmem:[%s2358_s9 + $0x28] sm:$0xff]   ;;  %v698_v19 = vsel %vm505_vm2, %v2030_v16, 0  ;;  %v839_v55 = vshrl.u32 %v838_v54, 7 }
  0x3a   : > { %1920 = vmatprep.mubr.msk.bf16.mxu1 %vm2257_vm3, %v2256_v8  ;;  %2018 = vset.pattern.permute.xlu1 %v2258_v10  ;;  %v2029_v13 = vld [vmem:[%s2368_s14] sm:$0xff]   ;;  %v2027_v20 = vld [vmem:[%s2358_s9 + $0x30] sm:$0xff]   ;;  %v2032_v21 = vld [vmem:[%s2368_s14 + $0x18] sm:$0xff]   ;;  %v701_v24 = vsel %vm505_vm2, %v2031_v17, 0 }
  0x3b   : > { %635 = vxpose.xlu0.c.b16.start.end [1/1] (short) (narrow) %v2026_v11, 16  ;;  %v2024_v14 = vld [vmem:[%s2358_s9 + $0x20] sm:$0xff]   ;;  %v695_v15 = vsel %vm505_vm2, %v2029_v13, 0  ;;  %1924 = vmatprep.subr.bf16.mxu0 %v2029_v13  ;;  %v2028_v23 = vld [vmem:[%s2358_s9 + $0x38] sm:$0xff]   ;;  %v2034_v25 = vld [vmem:[%s2368_s14 + $0x28] sm:$0xff]   ;;  %v704_v27 = vsel %vm505_vm2, %v2032_v21, 0 }
  0x3c   : > { %1889 = vmatmul.mubr.msk.bf16.vlgmr.msra.gmra.mrb[0].mxu0 %vm505_vm2, %v2021_v7  ;;  %1905 = vmatpush3.bf16.xpose.msra.mxu1 %v695_v15  ;;  %v2033_v22 = vld [vmem:[%s2368_s14 + $0x20] sm:$0xff]   ;;  %v2035_v26 = vld [vmem:[%s2368_s14 + $0x30] sm:$0xff]   ;;  %v2036_v28 = vld [vmem:[%s2368_s14 + $0x38] sm:$0xff]   ;;  %v710_v30 = vsel %vm505_vm2, %v2034_v25, 0  ;;  %v840_v56 = vsub.s32 0, %v839_v55 }
  0x3d   : > { %1892 = vmatprep.mubr.msk.bf16.mxu0 %vm505_vm2, %v2022_v9  ;;  %1925 = vmatpush3.bf16.msra.mxu0 %v2029_v13  ;;  %v707_v29 = vsel %vm505_vm2, %v2033_v22, 0  ;;  %v713_v31 = vsel %vm505_vm2, %v2035_v26, 0  ;;  %v716_v32 = vsel %vm505_vm2, %v2036_v28, 0  ;;  %v405_v59 = vld [vmem:[%s2370_s15] sm:$0xff]  ;;  %v406_v6 = vld [vmem:[%s2370_s15 + $0x8] sm:$0xff] }
  0x3e   : > { %1906 = vmatprep.subr.bf16.mxu1 %v2256_v8  ;;  %1926 = vmatprep.subr.bf16.mxu0 %v2030_v16  ;;  %v411_v0 = vunpack.c.2.s8 %v405_v59  ;;  %v409_v3 = vunpack.c.0.s8 %v405_v59  ;;  %v410_v9 = vunpack.c.1.s8 %v405_v59 }
  0x40   : > { %v2462_v15 = vcvt.s32.f32 %v409_v3 }
  0x41   : > { %1927 = vmatpush3.bf16.msra.mxu0 %v2030_v16  ;;  %v412_v16 = vunpack.c.3.s8 %v405_v59 }
  0x42   : > { %1928 = vmatprep.subr.bf16.mxu0 %v2031_v17  ;;  %vm441_vm9 = vcmp.gt.f32.partialorder %v2462_v15, 0.0 }
  0x44   : > { %1893 = vmatmul.mubr.msk.bf16.gmra.mrb[4].mxu0 %vm505_vm2, %v2023_v12  ;;  %2017 = vset.pattern.permute.xlu0 %v2258_v10  ;;  %v2460_v12 = vcvt.s32.f32 %v411_v0 }
  0x45   : > { %1896 = vmatprep.mubr.msk.bf16.mxu0 %vm505_vm2, %v2024_v14  ;;  %1907 = vmatpush3.bf16.xpose.msra.mxu1 %v698_v19 }
  0x46   : > { %1929 = vmatpush3.bf16.msra.mxu0 %v2031_v17  ;;  %1908 = vmatprep.subr.bf16.mxu1 %v2256_v8  ;;  %v414_v17 = vunpack.c.1.s8 %v406_v6  ;;  %vm443_vm8 = vcmp.gt.f32.partialorder %v2460_v12, 0.0 }
  0x47   : > { %1930 = vmatprep.subr.bf16.mxu0 %v2032_v21 }
  0x4a   : > { %1931 = vmatpush3.bf16.msra.mxu0 %v2032_v21  ;;  %v413_v21 = vunpack.c.0.s8 %v406_v6 }
  0x4b   : > { %1932 = vmatprep.subr.bf16.mxu0 %v2033_v22 }
  0x4c   : > { %1897 = vmatmul.mubr.msk.bf16.gmra.mrb[8].mxu0 %vm505_vm2, %v2025_v18 }
  0x4d   : > { %1900 = vmatprep.mubr.msk.bf16.mxu0 %vm505_vm2, %v2027_v20  ;;  %1909 = vmatpush3.bf16.xpose.msra.mxu1 %v701_v24 }
  0x4e   : > { %1933 = vmatpush3.bf16.msra.mxu0 %v2033_v22  ;;  %1910 = vmatprep.subr.bf16.mxu1 %v2256_v8 }
  0x4f   : > { %1934 = vmatprep.subr.bf16.mxu0 %v2034_v25 }
  0x52   : > { %1935 = vmatpush3.bf16.msra.mxu0 %v2034_v25 }
  0x53   : > { %1936 = vmatprep.subr.bf16.mxu0 %v2035_v26 }
  0x54   : > { %1901 = vmatmul.mubr.msk.bf16.gmra.mrb[12].mxu0 %vm505_vm2, %v2028_v23  ;;  %v2465_v23 = vcvt.s32.f32 %v410_v9 }
  0x55   : > { %1911 = vmatpush3.bf16.xpose.msra.mxu1 %v704_v27 }
  0x56   : > { %1937 = vmatpush3.bf16.msra.mxu0 %v2035_v26  ;;  %1912 = vmatprep.subr.bf16.mxu1 %v2256_v8  ;;  %v416_v26 = vunpack.c.3.s8 %v406_v6  ;;  %vm442_vm12 = vcmp.gt.f32.partialorder %v2465_v23, 0.0 }
  0x57   : > { %1938 = vmatprep.subr.bf16.mxu0 %v2036_v28 }
  0x5a   : > { %1939 = vmatpush3.bf16.msra.mxu0 %v2036_v28 }
  0x5d   : > { %1913 = vmatpush3.bf16.xpose.msra.mxu1 %v707_v29 }
  0x5e   : > { %1914 = vmatprep.subr.bf16.mxu1 %v2256_v8 }
  0x65   : > { %1915 = vmatpush3.bf16.xpose.msra.mxu1 %v710_v30  ;;  %v2469_v30 = vcvt.s32.f32 %v412_v16 }
  0x66   : > { %1916 = vmatprep.subr.bf16.mxu1 %v2256_v8 }
  0x67   : > { %vm444_vm13 = vcmp.gt.f32.partialorder %v2469_v30, 0.0 }
  0x6d   : > { %1917 = vmatpush3.bf16.xpose.msra.mxu1 %v713_v31  ;;  %v2471_v31 = vcvt.s32.f32 %v414_v17 }
  0x6e   : > { %1918 = vmatprep.subr.bf16.mxu1 %v2256_v8 }
  0x75   : > { %1919 = vmatpush3.bf16.xpose.msra.mxu1 %v716_v32  ;;  %v2474_v32 = vld [vmem:[%s2370_s15 + $0x10] sm:$0xff] }
  0xa1   : > { %v643_v33 = vpop.trf.xlu0 }
  0xa2   : > { %1921 = vmatmul.mubr.msk.bf16.vlgmr.msra.gmra.mrb[0].mxu1 %vm505_vm2, %v643_v33 }
 0x10f   : > { %v1890_v34 = vpop.f32.mrb[0].mxu0 }
 0x110   : > { %770 = vperm.xlu1 %2018, %v1890_v34   ;;  %v564_v35 = vpop.f32.mrb[1].mxu0 }
 0x111   : > { %760 = vperm.xlu0 %2017, %v564_v35   ;;  %v1891_v36 = vpop.f32.mrb[2].mxu0  ;;  %v2478_v35 = vcvt.s32.f32 %v413_v21 }
 0x112   : > { %v567_v37 = vpop.f32.mrb[3].mxu0 }
 0x113   : > { %vm445_vm3 = vcmp.gt.f32.partialorder %v2478_v35, 0.0 }
 0x114   : > { %765 = vperm.xlu1 %2018, %v567_v37  }
 0x117   : > { %v1894_v38 = vpop.f32.mrb[4].mxu0 }
 0x118   : > { %775 = vperm.xlu1 %2018, %v1891_v36   ;;  %v580_v39 = vpop.f32.mrb[5].mxu0  ;;  %v415_v36 = vunpack.c.2.s8 %v406_v6 }
 0x119   : > { %v1895_v40 = vpop.f32.mrb[6].mxu0 }
 0x11a   : > { %v583_v41 = vpop.f32.mrb[7].mxu0 }
 0x11b   : > { %785 = vperm.xlu0 %2017, %v583_v41   ;;  %v2481_v41 = vcvt.s32.f32 %v416_v26 }
 0x11c   : > { %780 = vperm.xlu1 %2018, %v580_v39  }
 0x11f   : > { %795 = vperm.xlu0 %2017, %v1895_v40   ;;  %v1898_v42 = vpop.f32.mrb[8].mxu0 }
 0x120   : > { %790 = vperm.xlu1 %2018, %v1894_v38   ;;  %v596_v43 = vpop.f32.mrb[9].mxu0 }
 0x121   : > { %v1899_v44 = vpop.f32.mrb[10].mxu0 }
 0x122   : > { %v599_v45 = vpop.f32.mrb[11].mxu0 }
 0x123   : > { %805 = vperm.xlu0 %2017, %v599_v45  }
 0x124   : > { %800 = vperm.xlu1 %2018, %v596_v43  }
 0x127   : > { %815 = vperm.xlu0 %2017, %v1899_v44   ;;  %v1902_v46 = vpop.f32.mrb[12].mxu0 }
 0x128   : > { %810 = vperm.xlu1 %2018, %v1898_v42   ;;  %v612_v47 = vpop.f32.mrb[13].mxu0  ;;  %v418_v42 = vunpack.c.1.s8 %v2474_v32 }
 0x129   : > { %v1903_v48 = vpop.f32.mrb[14].mxu0 }
 0x12a   : > { %v615_v49 = vpop.f32.mrb[15].mxu0 }
 0x12b   : > { %825 = vperm.xlu0 %2017, %v615_v49  }
 0x12c   : > { %820 = vperm.xlu1 %2018, %v612_v47   ;;  %v417_v47 = vunpack.c.0.s8 %v2474_v32 }
 0x12e   : > { %v2495_v0 = vcvt.s32.f32 %v417_v47 }
 0x12f   : > { %835 = vperm.xlu0 %2017, %v1903_v48  }
 0x130   : > { %830 = vperm.xlu1 %2018, %v1902_v46  }
 0x175   : > { %v752_v50 = vpop.f32.mrb[0].mxu1 }
 0x176   : > { %v1922_v51 = vpop.f32.mrb[1].mxu1  ;;  %v2453_v57 = vrot.slane %v752_v50, %v840_v56 }
 0x177   : > { %v755_v52 = vpop.f32.mrb[2].mxu1  ;;  %v2488_v51 = vcvt.s32.f32 %v415_v36 }
 0x178   : > { %v1923_v53 = vpop.f32.mrb[3].mxu1 }
 0x18f   : > { %v771_v58 = vpop.permute.xlu1 %770 }
 0x190   : > { %v844_v60 = vadd.f32 %v2453_v57, %v771_v58  ;;  %v761_v61 = vpop.permute.xlu0 %760  ;;  %v2490_v58 = vcvt.s32.f32 %v418_v42 }
 0x191   : > { %v842_v62 = vadd.f32 %v2453_v57, %v761_v61 }
 0x192   : > { %vm860_vm4 = vcmp.gt.f32.partialorder %v844_v60, 0.0  ;;  %v876_v63 = vmul.f32 0.2, %v844_v60 }
 0x193   : > { %vm858_vm5 = vcmp.gt.f32.partialorder %v842_v62, 0.0  ;;  %v874_v1 = vmul.f32 0.2, %v842_v62  ;;  %v766_v2 = vpop.permute.xlu1 %765 }
 0x194   : > { %v892_v4 = vsel %vm860_vm4, %v844_v60, %v876_v63  ;;  %v843_v5 = vadd.f32 %v2453_v57, %v766_v2  ;;  %vm446_vm4 = vcmp.gt.f32.partialorder %v2471_v31, 0.0 }
 0x195   : > { %v908_v7 = vsub.f32 0.0, %v892_v4  ;;  %v890_v8 = vsel %vm858_vm5, %v842_v62, %v874_v1 }
 0x196   : > { %v906_v10 = vsub.f32 0.0, %v890_v8  ;;  %vm859_vm6 = vcmp.gt.f32.partialorder %v843_v5, 0.0  ;;  %v875_v11 = vmul.f32 0.2, %v843_v5 }
 0x197   : > { %v926_v13 = vmul.f32 1.442695, %v908_v7  ;;  %v776_v14 = vpop.permute.xlu1 %775 }
 0x198   : > { %v922_v18 = vmul.f32 1.442695, %v906_v10  ;;  %v891_v19 = vsel %vm859_vm6, %v843_v5, %v875_v11  ;;  %v845_v20 = vadd.f32 %v2453_v57, %v776_v14  ;;  %vm2513_vm6 = vmpackc.low %vm442_vm12, %vm441_vm9 }
 0x199   : > { %2037 = vpow2.f32 %v926_v13  ;;  %v907_v22 = vsub.f32 0.0, %v891_v19 }
 0x19a   : > { %2039 = vpow2.f32 %v922_v18  ;;  %vm861_vm7 = vcmp.gt.f32.partialorder %v845_v20, 0.0  ;;  %v877_v24 = vmul.f32 0.2, %v845_v20  ;;  %v786_v25 = vpop.permute.xlu0 %785 }
 0x19b   : > { %v924_v27 = vmul.f32 1.442695, %v907_v22  ;;  %v847_v28 = vadd.f32 %v2453_v57, %v786_v25  ;;  %v781_v29 = vpop.permute.xlu1 %780 }
 0x19c   : > { %v893_v33 = vsel %vm861_vm7, %v845_v20, %v877_v24  ;;  %v846_v34 = vadd.f32 %v2453_v57, %v781_v29  ;;  %vm447_vm7 = vcmp.gt.f32.partialorder %v2488_v51, 0.0 }
 0x19d   : > { %2041 = vpow2.f32 %v924_v27  ;;  %v909_v37 = vsub.f32 0.0, %v893_v33  ;;  %vm863_vm10 = vcmp.gt.f32.partialorder %v847_v28, 0.0  ;;  %v879_v38 = vmul.f32 0.2, %v847_v28 }
 0x19e   : > { %vm862_vm11 = vcmp.gt.f32.partialorder %v846_v34, 0.0  ;;  %v878_v39 = vmul.f32 0.2, %v846_v34  ;;  %v796_v40 = vpop.permute.xlu0 %795 }
 0x19f   : > { %v928_v43 = vmul.f32 1.442695, %v909_v37  ;;  %v895_v44 = vsel %vm863_vm10, %v847_v28, %v879_v38  ;;  %v849_v45 = vadd.f32 %v2453_v57, %v796_v40  ;;  %v791_v46 = vpop.permute.xlu1 %790  ;;  %vm448_vm10 = vcmp.gt.f32.partialorder %v2481_v41, 0.0 }
 0x1a0   : > { %v911_v48 = vsub.f32 0.0, %v895_v44  ;;  %v894_v49 = vsel %vm862_vm11, %v846_v34, %v878_v39  ;;  %v848_v50 = vadd.f32 %v2453_v57, %v791_v46  ;;  %v420_v39 = vunpack.c.3.s8 %v2474_v32 }
 0x1a1   : > { %2043 = vpow2.f32 %v928_v43  ;;  %v910_v52 = vsub.f32 0.0, %v894_v49  ;;  %vm865_vm14 = vcmp.gt.f32.partialorder %v849_v45, 0.0  ;;  %v881_v53 = vmul.f32 0.2, %v849_v45 }
 0x1a2   : > { %v932_v54 = vmul.f32 1.442695, %v911_v48  ;;  %vm864_vm15 = vcmp.gt.f32.partialorder %v848_v50, 0.0  ;;  %v880_v55 = vmul.f32 0.2, %v848_v50  ;;  %v806_v56 = vpop.permute.xlu0 %805 }
 0x1a3   : > { %v2492_v59 = vpop.eup %2037  ;;  %v930_v60 = vmul.f32 1.442695, %v910_v52  ;;  %v897_v61 = vsel %vm865_vm14, %v849_v45, %v881_v53  ;;  %v851_v62 = vadd.f32 %v2453_v57, %v806_v56  ;;  %v801_v63 = vpop.permute.xlu1 %800  ;;  %vm449_vm14 = vcmp.gt.f32.partialorder %v2495_v0, 0.0 }
 0x1a4   : > { %v2040_v1 = vpop.eup %2039  ;;  %2045 = vpow2.f32 %v932_v54  ;;  %v913_v2 = vsub.f32 0.0, %v897_v61  ;;  %v896_v3 = vsel %vm864_vm15, %v848_v50, %v880_v55  ;;  %v850_v4 = vadd.f32 %v2453_v57, %v801_v63 }
 0x1a5   : > { %2047 = vpow2.f32 %v930_v60  ;;  %v912_v5 = vsub.f32 0.0, %v896_v3  ;;  %vm867_vm0 = vcmp.gt.f32.partialorder %v851_v62, 0.0  ;;  %v883_v6 = vmul.f32 0.2, %v851_v62 }
 0x1a6   : > { %v936_v7 = vmul.f32 1.442695, %v913_v2  ;;  %vm866_vm1 = vcmp.gt.f32.partialorder %v850_v4, 0.0  ;;  %v882_v8 = vmul.f32 0.2, %v850_v4  ;;  %v956_v9 = vsel %vm443_vm8, %v2492_v59, 0.0  ;;  %v816_v10 = vpop.permute.xlu0 %815 }
 0x1a7   : > { %v2502_v11 = vpop.eup %2041  ;;  %v934_v13 = vmul.f32 1.442695, %v912_v5  ;;  %v899_v14 = vsel %vm867_vm0, %v851_v62, %v883_v6  ;;  %974 = vadd.xlane.f32.xlu0 %v956_v9  ;;  %v853_v16 = vadd.f32 %v2453_v57, %v816_v10  ;;  %v954_v17 = vsel %vm441_vm9, %v2040_v1, 0.0  ;;  %v811_v18 = vpop.permute.xlu1 %810  ;;  %vm2525_vm9 = vmpackc.low %vm444_vm13, %vm443_vm8 }
 0x1a8   : > { %2049 = vpow2.f32 %v936_v7  ;;  %v915_v19 = vsub.f32 0.0, %v899_v14  ;;  %v898_v20 = vsel %vm866_vm1, %v850_v4, %v882_v8  ;;  %970 = vadd.xlane.f32.xlu1 %v954_v17  ;;  %v852_v21 = vadd.f32 %v2453_v57, %v811_v18  ;;  %vm1814_vm0 = vmpackc.low %vm446_vm4, %vm445_vm3 }
 0x1a9   : > { %2051 = vpow2.f32 %v934_v13  ;;  %v914_v22 = vsub.f32 0.0, %v898_v20  ;;  %vm869_vm5 = vcmp.gt.f32.partialorder %v853_v16, 0.0  ;;  %v885_v24 = vmul.f32 0.2, %v853_v16 }
 0x1aa   : > { %v940_v26 = vmul.f32 1.442695, %v915_v19  ;;  %vm868_vm11 = vcmp.gt.f32.partialorder %v852_v21, 0.0  ;;  %v884_v27 = vmul.f32 0.2, %v852_v21  ;;  %v1809_v28 = vpack.c.bf16 %v2502_v11, %v2040_v1  ;;  %v826_v29 = vpop.permute.xlu0 %825 }
 0x1ab   : > { %v2044_v33 = vpop.eup %2043  ;;  %v938_v34 = vmul.f32 1.442695, %v914_v22  ;;  %v901_v36 = vsel %vm869_vm5, %v853_v16, %v885_v24  ;;  %v855_v15 = vadd.f32 %v2453_v57, %v826_v29  ;;  %v821_v37 = vpop.permute.xlu1 %820  ;;  %v419_v50 = vunpack.c.2.s8 %v2474_v32 }
 0x1ac   : > { %v1812_v40 = vpack.c.bf16 %v2044_v33, %v2492_v59  ;;  %2053 = vpow2.f32 %v940_v26  ;;  %v917_v42 = vsub.f32 0.0, %v901_v36  ;;  %v900_v43 = vsel %vm868_vm11, %v852_v21, %v884_v27  ;;  %1940 = vmatprep.mubr.msk.bf16.mxu0 %vm2513_vm6, %v1809_v28 }
 0x1ad   : > { %2055 = vpow2.f32 %v938_v34  ;;  %v916_v12 = vsub.f32 0.0, %v900_v43  ;;  %vm871_vm15 = vcmp.gt.f32.partialorder %v855_v15, 0.0  ;;  %v887_v44 = vmul.f32 0.2, %v855_v15 }
 0x1ae   : > { %v2534_v45 = vpop.eup %2045  ;;  %v944_v46 = vmul.f32 1.442695, %v917_v42  ;;  %v854_v47 = vadd.f32 %v2453_v57, %v821_v37  ;;  %v957_v48 = vsel %vm444_vm13, %v2044_v33, 0.0  ;;  %1941 = vmatmul.mubr.msk.bf16.vlgmr.msra.gmra.mrb[16].mxu0 %vm2525_vm9, %v1812_v40  ;;  %v836_v49 = vpop.permute.xlu0 %835  ;;  %v436_v59 = vcvt.s32.f32 %v420_v39 }
 0x1af   : > { %v2048_v52 = vpop.eup %2047  ;;  %v942_v53 = vmul.f32 1.442695, %v916_v12  ;;  %v903_v54 = vsel %vm871_vm15, %v855_v15, %v887_v44  ;;  %976 = vadd.xlane.f32.xlu0 %v957_v48  ;;  %v857_v55 = vadd.f32 %v2453_v57, %v836_v49  ;;  %v831_v56 = vpop.permute.xlu1 %830  ;;  %v955_v2 = vsel %vm442_vm12, %v2502_v11, 0.0  ;;  %vm1817_vm12 = vmpackc.low %vm448_vm10, %vm447_vm7  ;;  %v1163_v48 = vld [vmem:[#allocation3] sm:$0xff] }
 0x1b0   : > { %2057 = vpow2.f32 %v944_v46  ;;  %v919_v60 = vsub.f32 0.0, %v903_v54  ;;  %vm870_vm8 = vcmp.gt.f32.partialorder %v854_v47, 0.0  ;;  %v886_v61 = vmul.f32 0.2, %v854_v47  ;;  %v1166_v54 = vld [vmem:[#allocation3 + $0x18] sm:$0xff] }
 0x1b1   : > { %2059 = vpow2.f32 %v942_v53  ;;  %vm873_vm13 = vcmp.gt.f32.partialorder %v857_v55, 0.0  ;;  %v889_v30 = vmul.f32 0.2, %v857_v55  ;;  %v856_v62 = vadd.f32 %v2453_v57, %v831_v56  ;;  %v408_v57 = vld [vmem:[%s2370_s15 + $0x18] sm:$0xff] }
 0x1b2   : > { %v2050_v32 = vpop.eup %2049  ;;  %v948_v63 = vmul.f32 1.442695, %v919_v60  ;;  %v902_v1 = vsel %vm870_vm8, %v854_v47, %v886_v61  ;;  %v1815_v3 = vpack.c.bf16 %v2534_v45, %v2048_v52  ;;  %v435_v23 = vcvt.s32.f32 %v419_v50  ;;  %v1169_v61 = vld [vmem:[#allocation3 + $0x30] sm:$0xff] }
 0x1b3   : > { %v2052_v4 = vpop.eup %2051  ;;  %v918_v5 = vsub.f32 0.0, %v902_v1  ;;  %v905_v6 = vsel %vm873_vm13, %v857_v55, %v889_v30  ;;  %vm872_vm1 = vcmp.gt.f32.partialorder %v856_v62, 0.0  ;;  %v888_v7 = vmul.f32 0.2, %v856_v62  ;;  %972 = vadd.xlane.f32.xlu0 %v955_v2  ;;  %v1167_v2 = vld [vmem:[#allocation3 + $0x20] sm:$0xff] }
 0x1b4   : > { %v921_v8 = vsub.f32 0.0, %v905_v6  ;;  %1944 = vmatprep.mubr.msk.bf16.mxu0 %vm1814_vm0, %v1815_v3  ;;  %v960_v9 = vsel %vm447_vm7, %v2052_v4, 0.0  ;;  %v961_v10 = vsel %vm448_vm10, %v2050_v32, 0.0  ;;  %2061 = vpow2.f32 %v948_v63 }
 0x1b5   : > { %v946_v11 = vmul.f32 1.442695, %v918_v5  ;;  %v904_v13 = vsel %vm872_vm1, %v856_v62, %v888_v7  ;;  %982 = vadd.xlane.f32.xlu1 %v960_v9  ;;  %v1818_v14 = vpack.c.bf16 %v2050_v32, %v2052_v4  ;;  %vm450_vm5 = vcmp.gt.f32.partialorder %v2490_v58, 0.0  ;;  %v1165_v58 = vld [vmem:[#allocation3 + $0x10] sm:$0xff]  ;;  %v1170_v32 = vld [vmem:[#allocation3 + $0x38] sm:$0xff]  ;;  %v1168_v5 = vld [vmem:[#allocation3 + $0x28] sm:$0xff] }
 0x1b6   : > { %v2054_v16 = vpop.eup %2053  ;;  %v952_v17 = vmul.f32 1.442695, %v921_v8  ;;  %v920_v18 = vsub.f32 0.0, %v904_v13  ;;  %v421_v19 = vunpack.c.0.s8 %v408_v57  ;;  %vm1820_vm6 = vmpackc.low %vm450_vm5, %vm449_vm14  ;;  %v422_v41 = vunpack.c.1.s8 %v408_v57  ;;  %v1171_v13 = vld [vmem:[#allocation3 + $0x40] sm:$0xff] }
 0x1b7   : > { %v2056_v20 = vpop.eup %2055  ;;  %2063 = vpow2.f32 %v946_v11  ;;  %984 = vadd.xlane.f32.xlu0 %v961_v10  ;;  %1945 = vmatmul.mubr.msk.bf16.gmra.mrb[20].mxu0 %vm1817_vm12, %v1818_v14  ;;  %v958_v21 = vsel %vm445_vm3, %v2048_v52, 0.0  ;;  %vm451_vm7 = vcmp.gt.f32.partialorder %v435_v23, 0.0  ;;  %vm452_vm10 = vcmp.gt.f32.partialorder %v436_v59, 0.0  ;;  %v1164_v59 = vld [vmem:[#allocation3 + $0x8] sm:$0xff]  ;;  %v1174_v10 = vld [vmem:[#allocation3 + $0x58] sm:$0xff] }
 0x1b8   : > { %2065 = vpow2.f32 %v952_v17  ;;  %v950_v51 = vmul.f32 1.442695, %v920_v18  ;;  %v1821_v22 = vpack.c.bf16 %v2054_v16, %v2056_v20  ;;  %v423_v24 = vunpack.c.2.s8 %v408_v57  ;;  %vm1823_vm11 = vmpackc.low %vm452_vm10, %vm451_vm7  ;;  %v1172_v17 = vld [vmem:[#allocation3 + $0x48] sm:$0xff] }
 0x1b9   : > { %978 = vadd.xlane.f32.xlu1 %v958_v21  ;;  %v959_v26 = vsel %vm446_vm4, %v2534_v45, 0.0  ;;  %v437_v27 = vcvt.s32.f32 %v421_v19  ;;  %v424_v29 = vunpack.c.3.s8 %v408_v57  ;;  %v438_v36 = vcvt.s32.f32 %v422_v41  ;;  %v1173_v57 = vld [vmem:[#allocation3 + $0x50] sm:$0xff]  ;;  %v1176_v21 = vld [vmem:[#allocation3 + $0x68] sm:$0xff] }
 0x1ba   : > { %v2058_v25 = vpop.eup %2057  ;;  %2067 = vpow2.f32 %v950_v51  ;;  %1948 = vmatprep.mubr.msk.bf16.mxu0 %vm1820_vm6, %v1821_v22  ;;  %v439_v15 = vcvt.s32.f32 %v423_v24  ;;  %v962_v31 = vsel %vm449_vm14, %v2056_v20, 0.0  ;;  %v963_v42 = vsel %vm450_vm5, %v2054_v16, 0.0  ;;  %v1175_v20 = vld [vmem:[#allocation3 + $0x60] sm:$0xff] }
 0x1bb   : > { %v2060_v28 = vpop.eup %2059  ;;  %980 = vadd.xlane.f32.xlu0 %v959_v26  ;;  %v965_v34 = vsel %vm452_vm10, %v2058_v25, 0.0  ;;  %vm453_vm3 = vcmp.gt.f32.partialorder %v437_v27, 0.0  ;;  %v440_v38 = vcvt.s32.f32 %v424_v29  ;;  %vm454_vm4 = vcmp.gt.f32.partialorder %v438_v36, 0.0  ;;  %v1115_v36 = vld [vmem:[#allocation2] sm:$0xff] }
 0x1bc   : > { %v964_v33 = vsel %vm451_vm7, %v2060_v28, 0.0  ;;  %v1824_v35 = vpack.c.bf16 %v2058_v25, %v2060_v28  ;;  %vm1826_vm9 = vmpackc.low %vm454_vm4, %vm453_vm3  ;;  %vm455_vm15 = vcmp.gt.f32.partialorder %v439_v15, 0.0  ;;  %vm1195_vm14 = vcmask 7168   ;;  %v1177_v25 = vld [vmem:[#allocation3 + $0x70] sm:$0xff]  ;;  %v1178_v28 = vld [vmem:[#allocation3 + $0x78] sm:$0xff] }
 0x1bd   : > { %990 = vadd.xlane.f32.xlu1 %v964_v33  ;;  %vm456_vm8 = vcmp.gt.f32.partialorder %v440_v38, 0.0 }
 0x1be   : > { %v2062_v37 = vpop.eup %2061  ;;  %vm1829_vm13 = vmpackc.low %vm456_vm8, %vm455_vm15 }
 0x1bf   : > { %992 = vadd.xlane.f32.xlu0 %v965_v34  ;;  %1949 = vmatmul.mubr.msk.bf16.gmra.mrb[24].mxu0 %vm1823_vm11, %v1824_v35  ;;  %v967_v45 = vsel %vm454_vm4, %v2062_v37, 0.0  ;;  %v1117_v35 = vld [vmem:[#allocation2 + $0x10] sm:$0xff] }
 0x1c1   : > { %v2064_v39 = vpop.eup %2063  ;;  %986 = vadd.xlane.f32.xlu1 %v962_v31 }
 0x1c2   : > { %v2066_v40 = vpop.eup %2065  ;;  %v1827_v43 = vpack.c.bf16 %v2062_v37, %v2064_v39  ;;  %v966_v44 = vsel %vm453_vm3, %v2064_v39, 0.0  ;;  %v1118_v37 = vld [vmem:[#allocation2 + $0x18] sm:$0xff]  ;;  %v1116_v39 = vld [vmem:[#allocation2 + $0x8] sm:$0xff] }
 0x1c3   : > { %988 = vadd.xlane.f32.xlu0 %v963_v42  ;;  %v969_v47 = vsel %vm456_vm8, %v2066_v40, 0.0 }
 0x1c4   : > { %v2068_v12 = vpop.eup %2067  ;;  %1952 = vmatprep.mubr.msk.bf16.mxu0 %vm1826_vm9, %v1827_v43 }
 0x1c5   : > { %994 = vadd.xlane.f32.xlu1 %v966_v44  ;;  %v1830_v0 = vpack.c.bf16 %v2066_v40, %v2068_v12  ;;  %v968_v46 = vsel %vm455_vm15, %v2068_v12, 0.0 }
 0x1c7   : > { %996 = vadd.xlane.f32.xlu0 %v967_v45  ;;  %1953 = vmatmul.mubr.msk.bf16.gmra.mrb[28].mxu0 %vm1829_vm13, %v1830_v0  ;;  %v1121_v0 = vld [vmem:[#allocation2 + $0x30] sm:$0xff]  ;;  %v1119_v45 = vld [vmem:[#allocation2 + $0x20] sm:$0xff] }
 0x1c9   : > { %998 = vadd.xlane.f32.xlu1 %v968_v46 }
 0x1cb   : > { %1000 = vadd.xlane.f32.xlu0 %v969_v47  ;;  %v1122_v47 = vld [vmem:[#allocation2 + $0x38] sm:$0xff] }
 0x234   : > { %v975_v49 = vpop.xlane.xlu0 %974 }
 0x235   : > { %v1181_v50 = vadd.f32 %v1165_v58, %v975_v49  ;;  %v971_v52 = vpop.xlane.xlu1 %970  ;;  %v1120_v49 = vld [vmem:[#allocation2 + $0x28] sm:$0xff] }
 0x236   : > { %v1179_v53 = vadd.f32 %v1163_v48, %v971_v52 }
 0x237   : > { %1198 = vst.msk [vmem:[#allocation3 + $0x10] sm:$0xff] %vm1195_vm14, %v1181_v50 }
 0x238   : > { %1196 = vst.msk [vmem:[#allocation3] sm:$0xff] %vm1195_vm14, %v1179_v53 }
 0x23c   : > { %v977_v55 = vpop.xlane.xlu0 %976 }
 0x23d   : > { %v1182_v56 = vadd.f32 %v1166_v54, %v977_v55 }
 0x23f   : > { %1199 = vst.msk [vmem:[#allocation3 + $0x18] sm:$0xff] %vm1195_vm14, %v1182_v56  ;;  %v1125_v56 = vld [vmem:[#allocation2 + $0x50] sm:$0xff] }
 0x240   : > { %v973_v60 = vpop.xlane.xlu0 %972 }
 0x241   : > { %v1180_v30 = vadd.f32 %v1164_v59, %v973_v60  ;;  %v1123_v59 = vld [vmem:[#allocation2 + $0x40] sm:$0xff] }
 0x242   : > { %v983_v62 = vpop.xlane.xlu1 %982 }
 0x243   : > { %1197 = vst.msk [vmem:[#allocation3 + $0x8] sm:$0xff] %vm1195_vm14, %v1180_v30  ;;  %v1185_v63 = vadd.f32 %v1169_v61, %v983_v62  ;;  %v1126_v61 = vld [vmem:[#allocation2 + $0x58] sm:$0xff] }
 0x244   : > { %v985_v1 = vpop.xlane.xlu0 %984 }
 0x245   : > { %1202 = vst.msk [vmem:[#allocation3 + $0x30] sm:$0xff] %vm1195_vm14, %v1185_v63  ;;  %v1186_v3 = vadd.f32 %v1170_v32, %v985_v1  ;;  %v1124_v32 = vld [vmem:[#allocation2 + $0x48] sm:$0xff] }
 0x246   : > { %v979_v4 = vpop.xlane.xlu1 %978 }
 0x247   : > { %1203 = vst.msk [vmem:[#allocation3 + $0x38] sm:$0xff] %vm1195_vm14, %v1186_v3  ;;  %v1183_v6 = vadd.f32 %v1167_v2, %v979_v4 }
 0x248   : > { %v981_v7 = vpop.xlane.xlu0 %980 }
 0x249   : > { %1200 = vst.msk [vmem:[#allocation3 + $0x20] sm:$0xff] %vm1195_vm14, %v1183_v6  ;;  %v1184_v8 = vadd.f32 %v1168_v5, %v981_v7  ;;  %v1129_v5 = vld [vmem:[#allocation2 + $0x70] sm:$0xff]  ;;  %v1127_v6 = vld [vmem:[#allocation2 + $0x60] sm:$0xff] }
 0x24a   : > { %v991_v9 = vpop.xlane.xlu1 %990 }
 0x24b   : > { %1201 = vst.msk [vmem:[#allocation3 + $0x28] sm:$0xff] %vm1195_vm14, %v1184_v8  ;;  %v1189_v23 = vadd.f32 %v1173_v57, %v991_v9  ;;  %v1130_v57 = vld [vmem:[#allocation2 + $0x78] sm:$0xff] }
 0x24c   : > { %v993_v11 = vpop.xlane.xlu0 %992 }
 0x24d   : > { %1206 = vst.msk [vmem:[#allocation3 + $0x50] sm:$0xff] %vm1195_vm14, %v1189_v23  ;;  %v1190_v14 = vadd.f32 %v1174_v10, %v993_v11  ;;  %v1128_v10 = vld [vmem:[#allocation2 + $0x68] sm:$0xff] }
 0x24e   : > { %v987_v16 = vpop.xlane.xlu1 %986 }
 0x24f   : > { %1207 = vst.msk [vmem:[#allocation3 + $0x58] sm:$0xff] %vm1195_vm14, %v1190_v14  ;;  %v1187_v18 = vadd.f32 %v1171_v13, %v987_v16 }
 0x250   : > { %v989_v19 = vpop.xlane.xlu0 %988 }
 0x251   : > { %1204 = vst.msk [vmem:[#allocation3 + $0x40] sm:$0xff] %vm1195_vm14, %v1187_v18  ;;  %v1188_v41 = vadd.f32 %v1172_v17, %v989_v19  ;;  %v1218_v17 = vld [vmem:[#allocation3 + $0x10] sm:$0xff] (!%p1832_p13)  ;;  %v1216_v18 = vld [vmem:[#allocation3] sm:$0xff] (!%p1832_p13)  ;;  %v1219_v19 = vld [vmem:[#allocation3 + $0x18] sm:$0xff] (!%p1832_p13) }
 0x252   : > { %v995_v51 = vpop.xlane.xlu1 %994 }
 0x253   : > { %1205 = vst.msk [vmem:[#allocation3 + $0x48] sm:$0xff] %vm1195_vm14, %v1188_v41  ;;  %v1191_v22 = vadd.f32 %v1175_v20, %v995_v51  ;;  %v2259_v20 = vmov (!%p1832_p13), 0   ;;  %v1234_v41 = vmax.f32 (!%p1832_p13), %v1218_v17, 1e-30  ;;  %v1232_v51 = vmax.f32 (!%p1832_p13), %v1216_v18, 1e-30 }
 0x254   : > { %v997_v24 = vpop.xlane.xlu0 %996  ;;  %2070 = vset.pattern.permute.xlu1 (!%p1832_p13), %v2259_v20  ;;  %2069 = vset.pattern.permute.xlu0 (!%p1832_p13), %v2259_v20 }
 0x255   : > { %1208 = vst.msk [vmem:[#allocation3 + $0x60] sm:$0xff] %vm1195_vm14, %v1191_v22  ;;  %v1192_v26 = vadd.f32 %v1176_v21, %v997_v24  ;;  %v1235_v21 = vmax.f32 (!%p1832_p13), %v1219_v19, 1e-30  ;;  %v1217_v22 = vld [vmem:[#allocation3 + $0x8] sm:$0xff] (!%p1832_p13)  ;;  %2071 = vrcp.f32 (!%p1832_p13), %v1234_v41 }
 0x256   : > { %v999_v27 = vpop.xlane.xlu1 %998  ;;  %v1221_v24 = vld [vmem:[#allocation3 + $0x28] sm:$0xff] (!%p1832_p13)  ;;  %2073 = vrcp.f32 (!%p1832_p13), %v1232_v51 }
 0x257   : > { %1209 = vst.msk [vmem:[#allocation3 + $0x68] sm:$0xff] %vm1195_vm14, %v1192_v26  ;;  %v1193_v29 = vadd.f32 %v1177_v25, %v999_v27  ;;  %v1233_v25 = vmax.f32 (!%p1832_p13), %v1217_v22, 1e-30  ;;  %v1220_v26 = vld [vmem:[#allocation3 + $0x20] sm:$0xff] (!%p1832_p13)  ;;  %2075 = vrcp.f32 (!%p1832_p13), %v1235_v21  ;;  %v1237_v27 = vmax.f32 (!%p1832_p13), %v1221_v24, 1e-30 }
 0x258   : > { %v1001_v33 = vpop.xlane.xlu0 %1000 }
 0x259   : > { %1210 = vst.msk [vmem:[#allocation3 + $0x70] sm:$0xff] %vm1195_vm14, %v1193_v29  ;;  %v1194_v34 = vadd.f32 %v1178_v28, %v1001_v33  ;;  %2077 = vrcp.f32 (!%p1832_p13), %v1233_v25  ;;  %v1236_v28 = vmax.f32 (!%p1832_p13), %v1220_v26, 1e-30  ;;  %v1223_v29 = vld [vmem:[#allocation3 + $0x38] sm:$0xff] (!%p1832_p13)  ;;  %v1222_v33 = vld [vmem:[#allocation3 + $0x30] sm:$0xff] (!%p1832_p13) }
 0x25a   : > { %2079 = vrcp.f32 (!%p1832_p13), %v1237_v27 }
 0x25b   : > { %1211 = vst.msk [vmem:[#allocation3 + $0x78] sm:$0xff] %vm1195_vm14, %v1194_v34  ;;  %v1239_v34 = vmax.f32 (!%p1832_p13), %v1223_v29, 1e-30  ;;  %2081 = vrcp.f32 (!%p1832_p13), %v1236_v28 }
 0x25d   : > { %2083 = vrcp.f32 (!%p1832_p13), %v1239_v34 }
 0x281   : > { %v1942_v15 = vpop.f32.mrb[16].mxu0 }
 0x282   : > { %v1133_v38 = vadd.f32 %v1942_v15, %v1117_v35  ;;  %v1052_v31 = vpop.f32.mrb[17].mxu0  ;;  %v1238_v35 = vmax.f32 (!%p1832_p13), %v1222_v33, 1e-30  ;;  %v1224_v15 = vld [vmem:[#allocation3 + $0x40] sm:$0xff] (!%p1832_p13) }
 0x283   : > { %v1131_v40 = vadd.f32 %v1115_v36, %v1052_v31  ;;  %v1943_v42 = vpop.f32.mrb[18].mxu0  ;;  %v1225_v36 = vld [vmem:[#allocation3 + $0x48] sm:$0xff] (!%p1832_p13) }
 0x284   : > { %1149 = vst.msk [vmem:[#allocation2 + $0x10] sm:$0xff] %vm505_vm2, %v1133_v38  ;;  %v1134_v43 = vadd.f32 %v1943_v42, %v1118_v37  ;;  %v1055_v12 = vpop.f32.mrb[19].mxu0  ;;  %v2072_v37 = vpop.eup (!%p1832_p13), %2071  ;;  %v1241_v38 = vmax.f32 (!%p1832_p13), %v1225_v36, 1e-30  ;;  %2085 = vrcp.f32 (!%p1832_p13), %v1238_v35 }
 0x285   : > { %1147 = vst.msk [vmem:[#allocation2] sm:$0xff] %vm505_vm2, %v1131_v40  ;;  %v1132_v44 = vadd.f32 %v1116_v39, %v1055_v12  ;;  %v2074_v31 = vpop.eup (!%p1832_p13), %2073  ;;  %1292 = vperm.xlu1 (!%p1832_p13), %2070, %v2072_v37   ;;  %v1240_v39 = vmax.f32 (!%p1832_p13), %v1224_v15, 1e-30  ;;  %v1227_v40 = vld [vmem:[#allocation3 + $0x58] sm:$0xff] (!%p1832_p13) }
 0x286   : > { %1150 = vst.msk [vmem:[#allocation2 + $0x18] sm:$0xff] %vm505_vm2, %v1134_v43  ;;  %v2076_v42 = vpop.eup (!%p1832_p13), %2075  ;;  %1282 = vperm.xlu0 (!%p1832_p13), %2069, %v2074_v31   ;;  %v1226_v43 = vld [vmem:[#allocation3 + $0x50] sm:$0xff] (!%p1832_p13)  ;;  %2087 = vrcp.f32 (!%p1832_p13), %v1241_v38 }
 0x287   : > { %1148 = vst.msk [vmem:[#allocation2 + $0x8] sm:$0xff] %vm505_vm2, %v1132_v44  ;;  %v2078_v12 = vpop.eup (!%p1832_p13), %2077  ;;  %v1243_v44 = vmax.f32 (!%p1832_p13), %v1227_v40, 1e-30  ;;  %2089 = vrcp.f32 (!%p1832_p13), %v1240_v39 }
 0x289   : > { %1297 = vperm.xlu1 (!%p1832_p13), %2070, %v2076_v42   ;;  %2091 = vrcp.f32 (!%p1832_p13), %v1243_v44 }
 0x28a   : > { %v1946_v46 = vpop.f32.mrb[20].mxu0  ;;  %1287 = vperm.xlu0 (!%p1832_p13), %2069, %v2078_v12  }
 0x28b   : > { %v1137_v58 = vadd.f32 %v1946_v46, %v1121_v0  ;;  %v1068_v48 = vpop.f32.mrb[21].mxu0  ;;  %v1242_v0 = vmax.f32 (!%p1832_p13), %v1226_v43, 1e-30  ;;  %v2080_v46 = vpop.eup (!%p1832_p13), %2079 }
 0x28c   : > { %v1135_v50 = vadd.f32 %v1119_v45, %v1068_v48  ;;  %v1947_v52 = vpop.f32.mrb[22].mxu0  ;;  %v1229_v45 = vld [vmem:[#allocation3 + $0x68] sm:$0xff] (!%p1832_p13) }
 0x28d   : > { %1153 = vst.msk [vmem:[#allocation2 + $0x30] sm:$0xff] %vm505_vm2, %v1137_v58  ;;  %v1138_v53 = vadd.f32 %v1947_v52, %v1122_v47  ;;  %v1071_v54 = vpop.f32.mrb[23].mxu0  ;;  %v1228_v47 = vld [vmem:[#allocation3 + $0x60] sm:$0xff] (!%p1832_p13)  ;;  %v2082_v58 = vpop.eup (!%p1832_p13), %2081  ;;  %v1245_v48 = vmax.f32 (!%p1832_p13), %v1229_v45, 1e-30  ;;  %1307 = vperm.xlu1 (!%p1832_p13), %2070, %v2080_v46   ;;  %2093 = vrcp.f32 (!%p1832_p13), %v1242_v0 }
 0x28e   : > { %1151 = vst.msk [vmem:[#allocation2 + $0x20] sm:$0xff] %vm505_vm2, %v1135_v50  ;;  %v1136_v55 = vadd.f32 %v1120_v49, %v1071_v54  ;;  %v1244_v49 = vmax.f32 (!%p1832_p13), %v1228_v47, 1e-30  ;;  %v1231_v50 = vld [vmem:[#allocation3 + $0x78] sm:$0xff] (!%p1832_p13)  ;;  %v2084_v52 = vpop.eup (!%p1832_p13), %2083  ;;  %1302 = vperm.xlu0 (!%p1832_p13), %2069, %v2082_v58  }
 0x28f   : > { %1154 = vst.msk [vmem:[#allocation2 + $0x38] sm:$0xff] %vm505_vm2, %v1138_v53  ;;  %v1230_v53 = vld [vmem:[#allocation3 + $0x70] sm:$0xff] (!%p1832_p13)  ;;  %v2086_v54 = vpop.eup (!%p1832_p13), %2085  ;;  %2095 = vrcp.f32 (!%p1832_p13), %v1245_v48 }
 0x290   : > { %1152 = vst.msk [vmem:[#allocation2 + $0x28] sm:$0xff] %vm505_vm2, %v1136_v55  ;;  %v1247_v55 = vmax.f32 (!%p1832_p13), %v1231_v50, 1e-30  ;;  %2097 = vrcp.f32 (!%p1832_p13), %v1244_v49 }
 0x291   : > { %1317 = vperm.xlu1 (!%p1832_p13), %2070, %v2084_v52  }
 0x292   : > { %v1950_v60 = vpop.f32.mrb[24].mxu0  ;;  %1312 = vperm.xlu0 (!%p1832_p13), %2069, %v2086_v54   ;;  %2099 = vrcp.f32 (!%p1832_p13), %v1247_v55 }
 0x293   : > { %v1141_v30 = vadd.f32 %v1950_v60, %v1125_v56  ;;  %v1084_v62 = vpop.f32.mrb[25].mxu0  ;;  %v1246_v56 = vmax.f32 (!%p1832_p13), %v1230_v53, 1e-30 }
 0x294   : > { %v1139_v63 = vadd.f32 %v1123_v59, %v1084_v62  ;;  %v1951_v1 = vpop.f32.mrb[26].mxu0  ;;  %v2088_v59 = vpop.eup (!%p1832_p13), %2087  ;;  %v1270_v25 = vld [vmem:[#allocation2 + $0x30] sm:$0xff] (!%p1832_p13) }
 0x295   : > { %1157 = vst.msk [vmem:[#allocation2 + $0x50] sm:$0xff] %vm505_vm2, %v1141_v30  ;;  %v1142_v2 = vadd.f32 %v1951_v1, %v1126_v61  ;;  %v1087_v3 = vpop.f32.mrb[27].mxu0  ;;  %v2090_v60 = vpop.eup (!%p1832_p13), %2089  ;;  %1327 = vperm.xlu1 (!%p1832_p13), %2070, %v2088_v59   ;;  %2101 = vrcp.f32 (!%p1832_p13), %v1246_v56  ;;  %v1268_v18 = vld [vmem:[#allocation2 + $0x20] sm:$0xff] (!%p1832_p13) }
 0x296   : > { %1155 = vst.msk [vmem:[#allocation2 + $0x40] sm:$0xff] %vm505_vm2, %v1139_v63  ;;  %v1140_v4 = vadd.f32 %v1124_v32, %v1087_v3  ;;  %v2092_v61 = vpop.eup (!%p1832_p13), %2091  ;;  %1322 = vperm.xlu0 (!%p1832_p13), %2069, %v2090_v60   ;;  %v1264_v3 = vld [vmem:[#allocation2] sm:$0xff] (!%p1832_p13)  ;;  %v1271_v22 = vld [vmem:[#allocation2 + $0x38] sm:$0xff] (!%p1832_p13) }
 0x297   : > { %1158 = vst.msk [vmem:[#allocation2 + $0x58] sm:$0xff] %vm505_vm2, %v1142_v2  ;;  %v2094_v30 = vpop.eup (!%p1832_p13), %2093  ;;  %v1266_v2 = vld [vmem:[#allocation2 + $0x10] sm:$0xff] (!%p1832_p13) }
 0x298   : > { %1156 = vst.msk [vmem:[#allocation2 + $0x48] sm:$0xff] %vm505_vm2, %v1140_v4 }
 0x299   : > { %1337 = vperm.xlu1 (!%p1832_p13), %2070, %v2092_v61   ;;  %v2096_v62 = vpop.eup (!%p1832_p13), %2095 }
 0x29a   : > { %v1954_v7 = vpop.f32.mrb[28].mxu0  ;;  %1215 = sbr.rel (%p1832_p13) target bundleno = 1143 (0x477), region = 86  ;;  %1332 = vperm.xlu0 (!%p1832_p13), %2069, %v2094_v30   ;;  %v2098_v32 = vpop.eup (!%p1832_p13), %2097 }
 0x29b   : > { %v1145_v8 = vadd.f32 %v1954_v7, %v1129_v5  ;;  %v1100_v9 = vpop.f32.mrb[29].mxu0 }
 0x29c   : > { %v1143_v23 = vadd.f32 %v1127_v6, %v1100_v9  ;;  %v1955_v11 = vpop.f32.mrb[30].mxu0  ;;  %v2100_v63 = vpop.eup (!%p1832_p13), %2099  ;;  %v1265_v9 = vld [vmem:[#allocation2 + $0x8] sm:$0xff] (!%p1832_p13)  ;;  %v1274_v47 = vld [vmem:[#allocation2 + $0x50] sm:$0xff] (!%p1832_p13) }
 0x29d   : > { %1161 = vst.msk [vmem:[#allocation2 + $0x70] sm:$0xff] %vm505_vm2, %v1145_v8  ;;  %v1146_v13 = vadd.f32 %v1955_v11, %v1130_v57  ;;  %v1103_v14 = vpop.f32.mrb[31].mxu0  ;;  %1347 = vperm.xlu1 (!%p1832_p13), %2070, %v2096_v62   ;;  %v1267_v57 = vld [vmem:[#allocation2 + $0x18] sm:$0xff] (!%p1832_p13)  ;;  %v1272_v15 = vld [vmem:[#allocation2 + $0x40] sm:$0xff] (!%p1832_p13) }
 0x29e   : > { %1159 = vst.msk [vmem:[#allocation2 + $0x60] sm:$0xff] %vm505_vm2, %v1143_v23  ;;  %v1144_v16 = vadd.f32 %v1128_v10, %v1103_v14  ;;  %1342 = vperm.xlu0 (!%p1832_p13), %2069, %v2098_v32   ;;  %v1275_v44 = vld [vmem:[#allocation2 + $0x58] sm:$0xff] (!%p1832_p13) }
 0x29f   : > { %1162 = vst.msk [vmem:[#allocation2 + $0x78] sm:$0xff] %vm505_vm2, %v1146_v13  ;;  %v2102_v1 = vpop.eup (!%p1832_p13), %2101  ;;  %v1273_v34 = vld [vmem:[#allocation2 + $0x48] sm:$0xff] (!%p1832_p13) }
 0x2a0   : > { %1160 = vst.msk [vmem:[#allocation2 + $0x68] sm:$0xff] %vm505_vm2, %v1144_v16  ;;  %v1269_v16 = vld [vmem:[#allocation2 + $0x28] sm:$0xff] (!%p1832_p13) }
 0x2a1   : > { %1357 = vperm.xlu1 %2070, %v2100_v63  }
 0x2a2   : > { %1352 = vperm.xlu0 %2069, %v2102_v1  }
 0x2a5   : > { %v1276_v32 = vld [vmem:[#allocation2 + $0x60] sm:$0xff] }
 0x2a7   : > { %v1277_v60 = vld [vmem:[#allocation2 + $0x68] sm:$0xff] }
 0x304   : > { %v1293_v4 = vpop.permute.xlu1 %1292 }
 0x305   : > { %v1362_v5 = vmul.f32 %v1293_v4, %v1266_v2  ;;  %v1283_v6 = vpop.permute.xlu0 %1282 }
 0x306   : > { %v1360_v7 = vmul.f32 %v1283_v6, %v1264_v3 }
 0x307   : > { %v1396_v8 = vmul.f32 1.442695, %v1362_v5  ;;  %vm1378_vm1 = vcmp.gt.f32.partialorder %v1362_v5, 0.0 }
 0x308   : > { %v1392_v10 = vmul.f32 1.442695, %v1360_v7  ;;  %v1298_v23 = vpop.permute.xlu1 %1297  ;;  %vm1376_vm0 = vcmp.gt.f32.partialorder %v1360_v7, 0.0 }
 0x309   : > { %2103 = vpow2.f32 %v1396_v8  ;;  %v2612_v11 = vmul.f32 %v1298_v23, %v1267_v57  ;;  %v1288_v13 = vpop.permute.xlu0 %1287 }
 0x30a   : > { %2105 = vpow2.f32 %v1392_v10  ;;  %v1361_v14 = vmul.f32 %v1288_v13, %v1265_v9  ;;  %v1279_v10 = vld [vmem:[#allocation2 + $0x78] sm:$0xff] }
 0x30b   : > { %v1398_v17 = vmul.f32 1.442695, %v2612_v11  ;;  %vm1379_vm5 = vcmp.gt.f32.partialorder %v2612_v11, 0.0 }
 0x30c   : > { %v1394_v19 = vmul.f32 1.442695, %v1361_v14  ;;  %v1308_v20 = vpop.permute.xlu1 %1307  ;;  %vm1377_vm12 = vcmp.gt.f32.partialorder %v1361_v14, 0.0 }
 0x30d   : > { %2107 = vpow2.f32 %v1398_v17  ;;  %v2615_v41 = vmul.f32 %v1308_v20, %v1269_v16  ;;  %v1303_v51 = vpop.permute.xlu0 %1302  ;;  %v1278_v16 = vld [vmem:[#allocation2 + $0x70] sm:$0xff] }
 0x30e   : > { %2109 = vpow2.f32 %v1394_v19  ;;  %v2617_v21 = vmul.f32 %v1303_v51, %v1268_v18 }
 0x30f   : > { %v1402_v24 = vmul.f32 1.442695, %v2615_v41  ;;  %vm1381_vm7 = vcmp.gt.f32.partialorder %v2615_v41, 0.0 }
 0x310   : > { %v1400_v26 = vmul.f32 1.442695, %v2617_v21  ;;  %v1318_v27 = vpop.permute.xlu1 %1317  ;;  %vm1380_vm6 = vcmp.gt.f32.partialorder %v2617_v21, 0.0 }
 0x311   : > { %2111 = vpow2.f32 %v1402_v24  ;;  %v2621_v28 = vmul.f32 %v1318_v27, %v1271_v22  ;;  %v1313_v29 = vpop.permute.xlu0 %1312 }
 0x312   : > { %2113 = vpow2.f32 %v1400_v26  ;;  %v2623_v33 = vmul.f32 %v1313_v29, %v1270_v25 }
 0x313   : > { %v2104_v35 = vpop.eup %2103  ;;  %v1406_v36 = vmul.f32 1.442695, %v2621_v28  ;;  %vm1383_vm11 = vcmp.gt.f32.partialorder %v2621_v28, 0.0 }
 0x314   : > { %v2106_v37 = vpop.eup %2105  ;;  %v1404_v38 = vmul.f32 1.442695, %v2623_v33  ;;  %v1328_v31 = vpop.permute.xlu1 %1327  ;;  %v1835_v39 = vadd.f32 -1.0, %v2104_v35  ;;  %vm1382_vm10 = vcmp.gt.f32.partialorder %v2623_v33, 0.0 }
 0x315   : > { %2115 = vpow2.f32 %v1406_v36  ;;  %v2627_v40 = vmul.f32 %v1328_v31, %v1273_v34  ;;  %v1323_v42 = vpop.permute.xlu0 %1322  ;;  %v1833_v43 = vadd.f32 -1.0, %v2106_v37 }
 0x316   : > { %2117 = vpow2.f32 %v1404_v38  ;;  %v2629_v12 = vmul.f32 %v1323_v42, %v1272_v15  ;;  %v2637_v52 = vsel %vm1378_vm1, %v1362_v5, %v1835_v39 }
 0x317   : > { %v2108_v0 = vpop.eup %2107  ;;  %v1410_v45 = vmul.f32 1.442695, %v2627_v40  ;;  %v2632_v46 = vsel %vm1376_vm0, %v1360_v7, %v1833_v43  ;;  %v1462_v3 = vsel %vm505_vm2, %v2637_v52, -inf  ;;  %vm1385_vm4 = vcmp.gt.f32.partialorder %v2627_v40, 0.0 }
 0x318   : > { %v2110_v58 = vpop.eup %2109  ;;  %v1408_v48 = vmul.f32 1.442695, %v2629_v12  ;;  %v1338_v49 = vpop.permute.xlu1 %1337  ;;  %v1456_v50 = vsel %vm505_vm2, %v2632_v46, -inf  ;;  %v1836_v56 = vadd.f32 -1.0, %v2108_v0  ;;  %vm1384_vm3 = vcmp.gt.f32.partialorder %v2629_v12, 0.0 }
 0x319   : > { %2119 = vpow2.f32 %v1410_v45  ;;  %v2639_v53 = vmul.f32 %v1338_v49, %v1275_v44  ;;  %1457 = vmax.xlane.f32.xlu0 %v1456_v50  ;;  %v1333_v54 = vpop.permute.xlu0 %1332  ;;  %v1834_v55 = vadd.f32 -1.0, %v2110_v58 }
 0x31a   : > { %2121 = vpow2.f32 %v1408_v48  ;;  %v2641_v59 = vmul.f32 %v1333_v54, %v1274_v47  ;;  %v2655_v57 = vsel %vm1379_vm5, %v2612_v11, %v1836_v56 }
 0x31b   : > { %v2112_v61 = vpop.eup %2111  ;;  %v1414_v30 = vmul.f32 1.442695, %v2639_v53  ;;  %v2644_v62 = vsel %vm1377_vm12, %v1361_v14, %v1834_v55  ;;  %v1465_v19 = vsel %vm505_vm2, %v2655_v57, -inf  ;;  %vm1387_vm15 = vcmp.gt.f32.partialorder %v2639_v53, 0.0 }
 0x31c   : > { %v2114_v63 = vpop.eup %2113  ;;  %v1412_v1 = vmul.f32 1.442695, %v2641_v59  ;;  %v1348_v2 = vpop.permute.xlu1 %1347  ;;  %v1459_v4 = vsel %vm505_vm2, %v2644_v62, -inf  ;;  %v1838_v5 = vadd.f32 -1.0, %v2112_v61  ;;  %vm1386_vm9 = vcmp.gt.f32.partialorder %v2641_v59, 0.0 }
 0x31d   : > { %2123 = vpow2.f32 %v1414_v30  ;;  %v2652_v6 = vmul.f32 %v1348_v2, %v1277_v60  ;;  %1463 = vmax.xlane.f32.xlu0 %v1462_v3  ;;  %1460 = vmax.xlane.f32.xlu1 %v1459_v4  ;;  %v1343_v7 = vpop.permute.xlu0 %1342  ;;  %v1837_v8 = vadd.f32 -1.0, %v2114_v63 }
 0x31e   : > { %2125 = vpow2.f32 %v1412_v1  ;;  %v2657_v9 = vmul.f32 %v1343_v7, %v1276_v32  ;;  %v2671_v51 = vsel %vm1381_vm7, %v2615_v41, %v1838_v5 }
 0x31f   : > { %v2116_v23 = vpop.eup %2115  ;;  %v1418_v13 = vmul.f32 1.442695, %v2652_v6  ;;  %v2662_v14 = vsel %vm1380_vm6, %v2617_v21, %v1837_v8  ;;  %v1471_v36 = vsel %vm505_vm2, %v2671_v51, -inf  ;;  %vm1389_vm13 = vcmp.gt.f32.partialorder %v2652_v6, 0.0 }
 0x320   : > { %v2118_v17 = vpop.eup %2117  ;;  %v1416_v11 = vmul.f32 1.442695, %v2657_v9  ;;  %v1358_v18 = vpop.permute.xlu1 %1357  ;;  %v1468_v20 = vsel %vm505_vm2, %v2662_v14, -inf  ;;  %v1840_v25 = vadd.f32 -1.0, %v2116_v23  ;;  %vm1388_vm8 = vcmp.gt.f32.partialorder %v2657_v9, 0.0 }
 0x321   : > { %2127 = vpow2.f32 %v1418_v13  ;;  %v2673_v22 = vmul.f32 %v1358_v18, %v1279_v10  ;;  %1466 = vmax.xlane.f32.xlu0 %v1465_v19  ;;  %1469 = vmax.xlane.f32.xlu1 %v1468_v20  ;;  %v1353_v21 = vpop.permute.xlu0 %1352  ;;  %v1839_v24 = vadd.f32 -1.0, %v2118_v17 }
 0x322   : > { %2129 = vpow2.f32 %v1416_v11  ;;  %v1374_v26 = vmul.f32 %v1353_v21, %v1278_v16  ;;  %v2686_v37 = vsel %vm1383_vm11, %v2621_v28, %v1840_v25 }
 0x323   : > { %v2120_v27 = vpop.eup %2119  ;;  %v1422_v29 = vmul.f32 1.442695, %v2673_v22  ;;  %v2678_v34 = vsel %vm1382_vm10, %v2623_v33, %v1839_v24  ;;  %v1477_v43 = vsel %vm505_vm2, %v2686_v37, -inf  ;;  %vm1391_vm0 = vcmp.gt.f32.partialorder %v2673_v22, 0.0 }
 0x324   : > { %v2122_v41 = vpop.eup %2121  ;;  %v1420_v35 = vmul.f32 1.442695, %v1374_v26  ;;  %v1474_v15 = vsel %vm505_vm2, %v2678_v34, -inf  ;;  %v1842_v31 = vadd.f32 -1.0, %v2120_v27  ;;  %vm1390_vm14 = vcmp.gt.f32.partialorder %v1374_v26, 0.0 }
 0x325   : > { %2131 = vpow2.f32 %v1422_v29  ;;  %1472 = vmax.xlane.f32.xlu0 %v1471_v36  ;;  %1475 = vmax.xlane.f32.xlu1 %v1474_v15  ;;  %v1841_v38 = vadd.f32 -1.0, %v2122_v41 }
 0x326   : > { %2133 = vpow2.f32 %v1420_v35  ;;  %v2698_v28 = vsel %vm1385_vm4, %v2627_v40, %v1842_v31 }
 0x327   : > { %v2124_v33 = vpop.eup %2123  ;;  %v2690_v39 = vsel %vm1384_vm3, %v2629_v12, %v1841_v38  ;;  %v1483_v48 = vsel %vm505_vm2, %v2698_v28, -inf }
 0x328   : > { %v2126_v42 = vpop.eup %2125  ;;  %v1480_v44 = vsel %vm505_vm2, %v2690_v39, -inf  ;;  %v1844_v45 = vadd.f32 -1.0, %v2124_v33 }
 0x329   : > { %1478 = vmax.xlane.f32.xlu0 %v1477_v43  ;;  %1481 = vmax.xlane.f32.xlu1 %v1480_v44  ;;  %v1843_v0 = vadd.f32 -1.0, %v2126_v42 }
 0x32a   : > { %v2710_v40 = vsel %vm1387_vm15, %v2639_v53, %v1844_v45 }
 0x32b   : > { %v2128_v12 = vpop.eup %2127  ;;  %v2702_v47 = vsel %vm1386_vm9, %v2641_v59, %v1843_v0  ;;  %v1489_v60 = vsel %vm505_vm2, %v2710_v40, -inf }
 0x32c   : > { %v2130_v58 = vpop.eup %2129  ;;  %v1486_v49 = vsel %vm505_vm2, %v2702_v47, -inf  ;;  %v1846_v54 = vadd.f32 -1.0, %v2128_v12 }
 0x32d   : > { %1484 = vmax.xlane.f32.xlu0 %v1483_v48  ;;  %1487 = vmax.xlane.f32.xlu1 %v1486_v49  ;;  %v1845_v50 = vadd.f32 -1.0, %v2130_v58 }
 0x32e   : > { %v2722_v53 = vsel %vm1389_vm13, %v2652_v6, %v1846_v54 }
 0x32f   : > { %v2132_v55 = vpop.eup %2131  ;;  %v2714_v56 = vsel %vm1388_vm8, %v2657_v9, %v1845_v50  ;;  %v1495_v1 = vsel %vm505_vm2, %v2722_v53, -inf }
 0x330   : > { %v2134_v59 = vpop.eup %2133  ;;  %v1492_v61 = vsel %vm505_vm2, %v2714_v56, -inf  ;;  %v1848_v32 = vadd.f32 -1.0, %v2132_v55 }
 0x331   : > { %1490 = vmax.xlane.f32.xlu0 %v1489_v60  ;;  %1493 = vmax.xlane.f32.xlu1 %v1492_v61  ;;  %v1847_v30 = vadd.f32 -1.0, %v2134_v59 }
 0x332   : > { %v2732_v3 = vsel %vm1391_vm0, %v2673_v22, %v1848_v32 }
 0x333   : > { %v2724_v63 = vsel %vm1390_vm14, %v1374_v26, %v1847_v30  ;;  %v1501_v4 = vsel %vm505_vm2, %v2732_v3, -inf }
 0x334   : > { %v1498_v2 = vsel %vm505_vm2, %v2724_v63, -inf }
 0x335   : > { %1496 = vmax.xlane.f32.xlu0 %v1495_v1  ;;  %1499 = vmax.xlane.f32.xlu1 %v1498_v2 }
 0x339   : > { %1502 = vmax.xlane.f32.xlu0 %v1501_v4 }
 0x3a6   : > { %v1458_v5 = vpop.xlane.xlu0 %1457 }
 0x3a7   : > { %v2737_v6 = vsub.f32 %v2632_v46, %v1458_v5 }
 0x3a9   : > { %v1520_v7 = vmul.f32 1.442695, %v2737_v6 }
 0x3aa   : > { %v1461_v8 = vpop.xlane.xlu1 %1460  ;;  %v1464_v9 = vpop.xlane.xlu0 %1463 }
 0x3ab   : > { %2135 = vpow2.f32 %v1520_v7  ;;  %v2741_v10 = vsub.f32 %v2644_v62, %v1461_v8  ;;  %v2744_v23 = vsub.f32 %v2637_v52, %v1464_v9 }
 0x3ad   : > { %v1522_v13 = vmul.f32 1.442695, %v2741_v10  ;;  %v1524_v16 = vmul.f32 1.442695, %v2744_v23 }
 0x3ae   : > { %v1470_v17 = vpop.xlane.xlu1 %1469  ;;  %v1467_v11 = vpop.xlane.xlu0 %1466 }
 0x3af   : > { %2137 = vpow2.f32 %v1522_v13  ;;  %v2749_v46 = vsub.f32 %v2662_v14, %v1470_v17  ;;  %v2752_v18 = vsub.f32 %v2655_v57, %v1467_v11 }
 0x3b0   : > { %2139 = vpow2.f32 %v1524_v16 }
 0x3b1   : > { %v1528_v62 = vmul.f32 1.442695, %v2749_v46  ;;  %v1526_v19 = vmul.f32 1.442695, %v2752_v18 }
 0x3b2   : > { %v1476_v52 = vpop.xlane.xlu1 %1475  ;;  %v1473_v20 = vpop.xlane.xlu0 %1472 }
 0x3b3   : > { %2141 = vpow2.f32 %v1528_v62  ;;  %v2757_v22 = vsub.f32 %v2678_v34, %v1476_v52  ;;  %v2760_v21 = vsub.f32 %v2671_v51, %v1473_v20 }
 0x3b4   : > { %2143 = vpow2.f32 %v1526_v19 }
 0x3b5   : > { %v2136_v14 = vpop.eup %2135  ;;  %v1532_v24 = vmul.f32 1.442695, %v2757_v22  ;;  %v1530_v57 = vmul.f32 1.442695, %v2760_v21 }
 0x3b6   : > { %v1482_v25 = vpop.xlane.xlu1 %1481  ;;  %v1479_v26 = vpop.xlane.xlu0 %1478  ;;  %v1552_v27 = vsel %vm505_vm2, %v2136_v14, 0.0 }
 0x3b7   : > { %2145 = vpow2.f32 %v1532_v24  ;;  %v2766_v29 = vsub.f32 %v2690_v39, %v1482_v25  ;;  %v2769_v34 = vsub.f32 %v2686_v37, %v1479_v26  ;;  %1553 = vadd.xlane.f32.xlu1 %v1552_v27 }
 0x3b8   : > { %2147 = vpow2.f32 %v1530_v57 }
 0x3b9   : > { %v2138_v51 = vpop.eup %2137  ;;  %v1536_v41 = vmul.f32 1.442695, %v2766_v29  ;;  %v1534_v35 = vmul.f32 1.442695, %v2769_v34 }
 0x3ba   : > { %v2140_v36 = vpop.eup %2139  ;;  %v1488_v15 = vpop.xlane.xlu1 %1487  ;;  %v1555_v31 = vsel %vm505_vm2, %v2138_v51, 0.0 }
 0x3bb   : > { %v1485_v38 = vpop.xlane.xlu0 %1484  ;;  %2149 = vpow2.f32 %v1536_v41  ;;  %v2775_v33 = vsub.f32 %v2702_v47, %v1488_v15  ;;  %1556 = vadd.xlane.f32.xlu0 %v1555_v31  ;;  %v1558_v37 = vsel %vm505_vm2, %v2140_v36, 0.0 }
 0x3bc   : > { %v2778_v39 = vsub.f32 %v2698_v28, %v1485_v38  ;;  %2151 = vpow2.f32 %v1534_v35  ;;  %1559 = vadd.xlane.f32.xlu1 %v1558_v37 }
 0x3bd   : > { %v2142_v42 = vpop.eup %2141  ;;  %v1540_v43 = vmul.f32 1.442695, %v2775_v33 }
 0x3be   : > { %v1538_v44 = vmul.f32 1.442695, %v2778_v39  ;;  %v2144_v0 = vpop.eup %2143  ;;  %v1494_v45 = vpop.xlane.xlu1 %1493  ;;  %v1564_v58 = vsel %vm505_vm2, %v2142_v42, 0.0 }
 0x3bf   : > { %v1491_v12 = vpop.xlane.xlu0 %1490  ;;  %2153 = vpow2.f32 %v1540_v43  ;;  %v2785_v47 = vsub.f32 %v2714_v56, %v1494_v45  ;;  %v1561_v48 = vsel %vm505_vm2, %v2144_v0, 0.0 }
 0x3c0   : > { %v2788_v28 = vsub.f32 %v2710_v40, %v1491_v12  ;;  %2155 = vpow2.f32 %v1538_v44  ;;  %1565 = vadd.xlane.f32.xlu1 %v1564_v58  ;;  %1562 = vadd.xlane.f32.xlu0 %v1561_v48 }
 0x3c1   : > { %v2146_v49 = vpop.eup %2145  ;;  %v1544_v50 = vmul.f32 1.442695, %v2785_v47 }
 0x3c2   : > { %v1542_v54 = vmul.f32 1.442695, %v2788_v28  ;;  %v2148_v55 = vpop.eup %2147  ;;  %v1500_v59 = vpop.xlane.xlu1 %1499  ;;  %v1570_v61 = vsel %vm505_vm2, %v2146_v49, 0.0 }
 0x3c3   : > { %v1497_v60 = vpop.xlane.xlu0 %1496  ;;  %2157 = vpow2.f32 %v1544_v50  ;;  %v2795_v56 = vsub.f32 %v2724_v63, %v1500_v59  ;;  %v1567_v30 = vsel %vm505_vm2, %v2148_v55, 0.0 }
 0x3c4   : > { %v2798_v40 = vsub.f32 %v2722_v53, %v1497_v60  ;;  %2159 = vpow2.f32 %v1542_v54  ;;  %1571 = vadd.xlane.f32.xlu1 %v1570_v61  ;;  %1568 = vadd.xlane.f32.xlu0 %v1567_v30 }
 0x3c5   : > { %v2150_v32 = vpop.eup %2149  ;;  %v1548_v1 = vmul.f32 1.442695, %v2795_v56 }
 0x3c6   : > { %v1546_v2 = vmul.f32 1.442695, %v2798_v40  ;;  %v2152_v4 = vpop.eup %2151  ;;  %v1576_v7 = vsel %vm505_vm2, %v2150_v32, 0.0 }
 0x3c7   : > { %v1503_v5 = vpop.xlane.xlu0 %1502  ;;  %2161 = vpow2.f32 %v1548_v1  ;;  %v1573_v53 = vsel %vm505_vm2, %v2152_v4, 0.0 }
 0x3c8   : > { %v2805_v63 = vsub.f32 %v2732_v3, %v1503_v5  ;;  %2163 = vpow2.f32 %v1546_v2  ;;  %1577 = vadd.xlane.f32.xlu1 %v1576_v7  ;;  %1574 = vadd.xlane.f32.xlu0 %v1573_v53 }
 0x3c9   : > { %v2154_v8 = vpop.eup %2153 }
 0x3ca   : > { %v1550_v9 = vmul.f32 1.442695, %v2805_v63  ;;  %v2156_v13 = vpop.eup %2155  ;;  %v1582_v16 = vsel %vm505_vm2, %v2154_v8, 0.0 }
 0x3cb   : > { %v1579_v17 = vsel %vm505_vm2, %v2156_v13, 0.0 }
 0x3cc   : > { %2165 = vpow2.f32 %v1550_v9  ;;  %1583 = vadd.xlane.f32.xlu1 %v1582_v16  ;;  %1580 = vadd.xlane.f32.xlu0 %v1579_v17 }
 0x3cd   : > { %v2158_v11 = vpop.eup %2157 }
 0x3ce   : > { %v2160_v62 = vpop.eup %2159  ;;  %v1588_v3 = vsel %vm505_vm2, %v2158_v11, 0.0 }
 0x3cf   : > { %v1585_v19 = vsel %vm505_vm2, %v2160_v62, 0.0 }
 0x3d0   : > { %1589 = vadd.xlane.f32.xlu1 %v1588_v3  ;;  %1586 = vadd.xlane.f32.xlu0 %v1585_v19 }
 0x3d1   : > { %v2162_v52 = vpop.eup %2161 }
 0x3d2   : > { %v2164_v20 = vpop.eup %2163  ;;  %v1594_v14 = vsel %vm505_vm2, %v2162_v52, 0.0 }
 0x3d3   : > { %v1591_v24 = vsel %vm505_vm2, %v2164_v20, 0.0 }
 0x3d4   : > { %1595 = vadd.xlane.f32.xlu1 %v1594_v14  ;;  %1592 = vadd.xlane.f32.xlu0 %v1591_v24 }
 0x3d6   : > { %v2166_v57 = vpop.eup %2165 }
 0x3d7   : > { %v1597_v25 = vsel %vm505_vm2, %v2166_v57, 0.0 }
 0x3d8   : > { %1598 = vadd.xlane.f32.xlu0 %v1597_v25 }
 0x444   : > { %v1554_v26 = vpop.xlane.xlu1 %1553 }
 0x445   : > { %2167 = vlog2.f32 %v1554_v26 }
 0x448   : > { %v1557_v27 = vpop.xlane.xlu0 %1556 }
 0x449   : > { %v1560_v51 = vpop.xlane.xlu1 %1559  ;;  %2169 = vlog2.f32 %v1557_v27 }
 0x44a   : > { %2171 = vlog2.f32 %v1560_v51 }
 0x44d   : > { %v1566_v41 = vpop.xlane.xlu1 %1565  ;;  %v1563_v35 = vpop.xlane.xlu0 %1562 }
 0x44e   : > { %2173 = vlog2.f32 %v1566_v41 }
 0x44f   : > { %v2168_v36 = vpop.eup %2167  ;;  %2175 = vlog2.f32 %v1563_v35 }
 0x450   : > { %v1601_v15 = vmul.f32 0.6931472, %v2168_v36 }
 0x451   : > { %v1572_v38 = vpop.xlane.xlu1 %1571  ;;  %v1569_v31 = vpop.xlane.xlu0 %1568 }
 0x452   : > { %v1632_v37 = vsub.f32 %v2737_v6, %v1601_v15  ;;  %2177 = vlog2.f32 %v1572_v38 }
 0x453   : > { %v2170_v42 = vpop.eup %2169  ;;  %2179 = vlog2.f32 %v1569_v31 }
 0x454   : > { %v2172_v43 = vpop.eup %2171  ;;  %1648 = vst.msk [vmem:[%s2363_s12] sm:$0xff] %vm505_vm2, %v1632_v37  ;;  %v1603_v44 = vmul.f32 0.6931472, %v2170_v42 }
 0x455   : > { %v1605_v0 = vmul.f32 0.6931472, %v2172_v43  ;;  %v1578_v45 = vpop.xlane.xlu1 %1577  ;;  %v1575_v12 = vpop.xlane.xlu0 %1574 }
 0x456   : > { %v1633_v58 = vsub.f32 %v2741_v10, %v1603_v44  ;;  %2181 = vlog2.f32 %v1578_v45 }
 0x457   : > { %v1634_v48 = vsub.f32 %v2744_v23, %v1605_v0  ;;  %2183 = vlog2.f32 %v1575_v12 }
 0x458   : > { %v2174_v49 = vpop.eup %2173  ;;  %1649 = vst.msk [vmem:[%s2363_s12 + $0x8] sm:$0xff] %vm505_vm2, %v1633_v58 }
 0x459   : > { %v2176_v6 = vpop.eup %2175  ;;  %1650 = vst.msk [vmem:[%s2363_s12 + $0x10] sm:$0xff] %vm505_vm2, %v1634_v48  ;;  %v1609_v50 = vmul.f32 0.6931472, %v2174_v49  ;;  %v1584_v54 = vpop.xlane.xlu1 %1583 }
 0x45a   : > { %v1581_v55 = vpop.xlane.xlu0 %1580  ;;  %v1607_v59 = vmul.f32 0.6931472, %v2176_v6  ;;  %2185 = vlog2.f32 %v1584_v54 }
 0x45b   : > { %v1636_v60 = vsub.f32 %v2749_v46, %v1609_v50  ;;  %2187 = vlog2.f32 %v1581_v55 }
 0x45c   : > { %v2178_v10 = vpop.eup %2177  ;;  %v1635_v23 = vsub.f32 %v2752_v18, %v1607_v59 }
 0x45d   : > { %v2180_v61 = vpop.eup %2179  ;;  %1652 = vst.msk [vmem:[%s2363_s12 + $0x20] sm:$0xff] %vm505_vm2, %v1636_v60  ;;  %v1613_v30 = vmul.f32 0.6931472, %v2178_v10  ;;  %v1590_v32 = vpop.xlane.xlu1 %1589 }
 0x45e   : > { %v1587_v1 = vpop.xlane.xlu0 %1586  ;;  %1651 = vst.msk [vmem:[%s2363_s12 + $0x18] sm:$0xff] %vm505_vm2, %v1635_v23  ;;  %v1611_v2 = vmul.f32 0.6931472, %v2180_v61  ;;  %2189 = vlog2.f32 %v1590_v32 }
 0x45f   : > { %v1638_v4 = vsub.f32 %v2757_v22, %v1613_v30  ;;  %2191 = vlog2.f32 %v1587_v1 }
 0x460   : > { %v2182_v46 = vpop.eup %2181  ;;  %v1637_v5 = vsub.f32 %v2760_v21, %v1611_v2 }
 0x461   : > { %v2184_v7 = vpop.eup %2183  ;;  %1654 = vst.msk [vmem:[%s2363_s12 + $0x30] sm:$0xff] %vm505_vm2, %v1638_v4  ;;  %v1617_v18 = vmul.f32 0.6931472, %v2182_v46  ;;  %v1596_v53 = vpop.xlane.xlu1 %1595 }
 0x462   : > { %v1593_v8 = vpop.xlane.xlu0 %1592  ;;  %1653 = vst.msk [vmem:[%s2363_s12 + $0x28] sm:$0xff] %vm505_vm2, %v1637_v5  ;;  %v1615_v9 = vmul.f32 0.6931472, %v2184_v7  ;;  %2193 = vlog2.f32 %v1596_v53 }
 0x463   : > { %v1640_v13 = vsub.f32 %v2766_v29, %v1617_v18  ;;  %2195 = vlog2.f32 %v1593_v8 }
 0x464   : > { %v2186_v22 = vpop.eup %2185  ;;  %v1639_v16 = vsub.f32 %v2769_v34, %v1615_v9 }
 0x465   : > { %v2188_v21 = vpop.eup %2187  ;;  %1656 = vst.msk [vmem:[%s2363_s12 + $0x40] sm:$0xff] %vm505_vm2, %v1640_v13  ;;  %v1621_v17 = vmul.f32 0.6931472, %v2186_v22 }
 0x466   : > { %v1599_v11 = vpop.xlane.xlu0 %1598  ;;  %1655 = vst.msk [vmem:[%s2363_s12 + $0x38] sm:$0xff] %vm505_vm2, %v1639_v16  ;;  %v1619_v62 = vmul.f32 0.6931472, %v2188_v21 }
 0x467   : > { %2197 = vlog2.f32 %v1599_v11  ;;  %v1642_v3 = vsub.f32 %v2775_v33, %v1621_v17 }
 0x468   : > { %v2190_v19 = vpop.eup %2189  ;;  %v1641_v29 = vsub.f32 %v2778_v39, %v1619_v62 }
 0x469   : > { %v2192_v52 = vpop.eup %2191  ;;  %1658 = vst.msk [vmem:[%s2363_s12 + $0x50] sm:$0xff] %vm505_vm2, %v1642_v3  ;;  %v1625_v34 = vmul.f32 0.6931472, %v2190_v19 }
 0x46a   : > { %1657 = vst.msk [vmem:[%s2363_s12 + $0x48] sm:$0xff] %vm505_vm2, %v1641_v29  ;;  %v1623_v20 = vmul.f32 0.6931472, %v2192_v52 }
 0x46b   : > { %v1644_v14 = vsub.f32 %v2785_v47, %v1625_v34 }
 0x46c   : > { %v2194_v24 = vpop.eup %2193  ;;  %v1643_v57 = vsub.f32 %v2788_v28, %v1623_v20 }
 0x46d   : > { %v2196_v25 = vpop.eup %2195  ;;  %1660 = vst.msk [vmem:[%s2363_s12 + $0x60] sm:$0xff] %vm505_vm2, %v1644_v14  ;;  %v1629_v33 = vmul.f32 0.6931472, %v2194_v24 }
 0x46e   : > { %1659 = vst.msk [vmem:[%s2363_s12 + $0x58] sm:$0xff] %vm505_vm2, %v1643_v57  ;;  %v1627_v39 = vmul.f32 0.6931472, %v2196_v25 }
 0x46f   : > { %v1646_v26 = vsub.f32 %v2795_v56, %v1629_v33 }
 0x470   : > { %v1645_v51 = vsub.f32 %v2798_v40, %v1627_v39 }
 0x471   : > { %v2198_v27 = vpop.eup %2197  ;;  %1662 = vst.msk [vmem:[%s2363_s12 + $0x70] sm:$0xff] %vm505_vm2, %v1646_v26 }
 0x472   : > { %v1631_v41 = vmul.f32 0.6931472, %v2198_v27  ;;  %1661 = vst.msk [vmem:[%s2363_s12 + $0x68] sm:$0xff] %vm505_vm2, %v1645_v51 }
 0x474   : > { %v1647_v47 = vsub.f32 %v2805_v63, %v1631_v41 }
 0x476   : > { %1663 = vst.msk [vmem:[%s2363_s12 + $0x78] sm:$0xff] %vm505_vm2, %v1647_v47 }
 0x477 PF: > { %s15_s24 = sadd.s32 1, %s2253_s24   ;;  %s2895_s18 = smov %s2233_s19 }
 0x478   : > { %p12_p0 = scmp.ge.s32.totalorder %s15_s24, 6   ;;  %s2896_s19 = smov %s2341_s6 }
 0x479   : > { %s2897_s20 = smov %s2245_s22  ;;  %s2898_s21 = smov %s2249_s23 }
 0x47a   : > { %s2899_s22 = smov %s2902_s25  ;;  %s2900_s23 = smov %s2906_s26 }
 0x47b   :  { %14 = sbr.rel (!%p12_p0) target bundleno = 4 (0x4), region = 127 }

// kernel: spgat_forward.5
= control target key start
LH: loop header
LB: loop body
LE: loop exit
PB: predicated region body
PF: predicated region fallthrough
CT: control target
= control target key end

     0   :  { %s4711_s18 = smov 0   ;;  %s4713_s19 = smov 0   ;;  %s6974_s0 = inlined_call_operand.vmem [shape: bf16[256,128], index: 0, kind: input, shape index: {}, may-alias: {0,1}]   ;;  %s6975_s1 = inlined_call_operand.vmem [shape: bf16[256,128], index: 1, kind: input, shape index: {}, may-alias: {0,1}]   ;;  %s6976_s2 = inlined_call_operand.vmem [shape: s8[256,256], index: 2, kind: input, shape index: {}]   ;;  %s6977_s3 = inlined_call_operand.vmem [shape: bf16[128,4], index: 3, kind: input, shape index: {}]   ;;  %s6978_s4 = inlined_call_operand.vmem [shape: bf16[128,4], index: 4, kind: input, shape index: {}]   ;;  %s6979_s5 = inlined_call_operand.vmem [shape: bf16[256,128], index: 5, kind: output, shape index: {}]  }
   0x1   :  { %s4715_s20 = smov 0   ;;  %s4717_s21 = smov 0  }
   0x2   :  { %s4719_s22 = smov 0   ;;  %s4721_s23 = smov 0  }
   0x3   :  { %s4723_s24 = smov 0  }
   0x4 LB: > { %s24_s25 = sadd.s32 1, %s4657_s22  ;;  %s27_s26 = sadd.s32 1, %s4661_s23  ;;  %s4665_s24 = sphi %s4723_s24, %s15_s24   ;;  %s4661_s23 = sphi %s4721_s23, %s7069_s23   ;;  %s4657_s22 = sphi %s4719_s22, %s7068_s22   ;;  %s4653_s21 = sphi %s4717_s21, %s7067_s21   ;;  %s4649_s20 = sphi %s4715_s20, %s7066_s20   ;;  %s4645_s19 = sphi %s4713_s19, %s7065_s19   ;;  %s4641_s18 = sphi %s4711_s18, %s7064_s18  }
   0x5   : > { %p25_p0 = scmp.ge.s32.totalorder %s24_s25, 2  ;;  %p95_p1 = scmp.ne.s32.totalorder %s4645_s19, %s4641_s18 }
   0x6   : > { %p96_p2 = scmp.eq.s32.totalorder %s4665_s24, 0  ;;  %s88_s30 = sadd.s32 1, %s4645_s19 }
   0x7   : > { %s7071_s25 = smov (%p25_p0, %s24_s25), 0  ;;  %s7073_s26 = smov (!%p25_p0, %s27_s26), %s4661_s23 }
   0x8   : > { %p97_p3 = por %p96_p2, %p95_p1  ;;  %p29_p4 = scmp.ge.s32.totalorder %s7073_s26, 2 }
   0x9   : > { %s84_s27 = ssub.s32 %s4657_s22, %s7071_s25  ;;  %p3599_p6 = scmp.ge.s32.totalorder %s4665_s24, 4 }
   0xa   : > { %s7075_s26 = smov (%p29_p4, %s7073_s26), 0 }
   0xb   : > { %s83_s28 = ssub.s32 %s4661_s23, %s7075_s26  ;;  %195 = sbr.rel (%p3599_p6) target bundleno = 26 (0x1a), region = 24 }
   0xc   : > { %s85_s29 = sor.u32 %s84_s27, %s83_s28 }
   0xd   : > { %p86_p5 = scmp.eq.s32.totalorder %s85_s29, 0 }
   0xf   : > { %s4762_s6 = scalar_select %p86_p5, %s4645_s19, %s88_s30  }
  0x12   : > { %216 = sbr.rel (!%p97_p3) target bundleno = 26 (0x1a), region = 36  ;;  %s218_s7 = sand.u32 (%p97_p3), 1, %s4645_s19  }
  0x13   : > { %s3824_s8 = sshll.u32 (%p97_p3), %s4661_s23, 3  ;;  %s3600_s9 = sshll.u32 (%p97_p3), %s218_s7, 5 }
  0x14   : > { %s223_s10 = sadd.s32 (%p97_p3), %s4657_s22, %s3824_s8  ;;  %s220_s15 = scalar_lea.vmem (%p97_p3), [#allocation4], %s3600_s9 }
  0x15   : > { %s3603_s11 = sshll.u32 (%p97_p3), %s223_s10, 3 }
  0x16   : > { %s225_s14 = scalar_lea.vmem (%p97_p3), %s6976_s2, %s3603_s11 }
  0x17   : > { %v259_v0 = vld [vmem:[%s225_s14] sm:$0xff] (%p97_p3)  ;;  %v261_v1 = vld [vmem:[%s225_s14 + $0x10] sm:$0xff] (%p97_p3) }
  0x18   : > { %v263_v2 = vld [vmem:[%s225_s14 + $0x20] sm:$0xff] (%p97_p3)  ;;  %260 = vst [vmem:[%s220_s15] sm:$0xff] (%p97_p3), %v259_v0  ;;  %262 = vst [vmem:[%s220_s15 + $0x8] sm:$0xff] (%p97_p3), %v261_v1  ;;  %v265_v3 = vld [vmem:[%s225_s14 + $0x30] sm:$0xff] (%p97_p3) }
  0x19   : > { %264 = vst [vmem:[%s220_s15 + $0x10] sm:$0xff] %v263_v2  ;;  %266 = vst [vmem:[%s220_s15 + $0x18] sm:$0xff] %v265_v3 }
  0x1a PF: > { %p3604_p7 = scmp.ge.s32.totalorder %s4665_s24, 1  ;;  %p271_p8 = scmp.lt.s32.totalorder %s4665_s24, 5 }
  0x1c   : > { %p272_p9 = pnand %p3604_p7, %p271_p8 }
  0x1e   : > { %275 = sbr.rel (%p272_p9) target bundleno = 1342 (0x53e), region = 74 }
  0x25   : > { %s278_s16 = sand.u32 1, %s4641_s18   ;;  %s3606_s17 = sshll.u32 %s4653_s21, 4 }
  0x26   : > { %s3605_s27 = sshll.u32 %s278_s16, 5  ;;  %p316_p10 = scmp.lt.s32.totalorder %s3606_s17, 31 }
  0x27   : > { %s3608_s28 = sshll.u32 %s4649_s20, 4  ;;  %s4791_s14 = scalar_lea.vmem [#allocation4], %s3605_s27 }
  0x28   : > { %s7077_s17 = smov (!%p316_p10, %s3606_s17), 31  ;;  %p322_p11 = scmp.lt.s32.totalorder %s3608_s28, 31 }
  0x29   : > { %s3607_s29 = sshll.u32 %s7077_s17, 2  ;;  %p3612_p12 = scmp.ne.s32.totalorder %s4649_s20, 0 }
  0x2a   : > { %s4779_s8 = scalar_lea.vmem %s6974_s0, %s3607_s29  ;;  %s4784_s11 = scalar_lea.vmem %s6979_s5, %s3607_s29  ;;  %vm355_vm0 = vcmask (!%p3612_p12), 31744   ;;  %v4667_v4 = vmov (!%p3612_p12), 0.0  }
  0x2b   : > { %s7079_s28 = smov (!%p322_p11, %s3608_s28), 31  ;;  %338 = sbr.rel (%p3612_p12) target bundleno = 60 (0x3c), region = 82 }
  0x2c   : > { %s3609_s12 = sshll.u32 %s7079_s28, 2  ;;  %339 = vst [vmem:[#allocation2] sm:$0xff] (!%p3612_p12), %v4667_v4  ;;  %340 = vst [vmem:[#allocation2 + $0x8] sm:$0xff] (!%p3612_p12), %v4667_v4 }
  0x2d   : > { %s4789_s13 = scalar_lea.vmem %s6975_s1, %s3609_s12  ;;  %341 = vst [vmem:[#allocation2 + $0x10] sm:$0xff] (!%p3612_p12), %v4667_v4  ;;  %342 = vst [vmem:[#allocation2 + $0x18] sm:$0xff] (!%p3612_p12), %v4667_v4 }
  0x2e   : > { %343 = vst [vmem:[#allocation2 + $0x20] sm:$0xff] (!%p3612_p12), %v4667_v4  ;;  %344 = vst [vmem:[#allocation2 + $0x28] sm:$0xff] (!%p3612_p12), %v4667_v4 }
  0x2f   : > { %345 = vst [vmem:[#allocation2 + $0x30] sm:$0xff] (!%p3612_p12), %v4667_v4  ;;  %346 = vst [vmem:[#allocation2 + $0x38] sm:$0xff] (!%p3612_p12), %v4667_v4 }
  0x30   : > { %347 = vst [vmem:[#allocation2 + $0x40] sm:$0xff] (!%p3612_p12), %v4667_v4  ;;  %348 = vst [vmem:[#allocation2 + $0x48] sm:$0xff] (!%p3612_p12), %v4667_v4 }
  0x31   : > { %349 = vst [vmem:[#allocation2 + $0x50] sm:$0xff] (!%p3612_p12), %v4667_v4  ;;  %350 = vst [vmem:[#allocation2 + $0x58] sm:$0xff] (!%p3612_p12), %v4667_v4 }
  0x32   : > { %351 = vst [vmem:[#allocation2 + $0x60] sm:$0xff] %v4667_v4  ;;  %352 = vst [vmem:[#allocation2 + $0x68] sm:$0xff] %v4667_v4 }
  0x33   : > { %353 = vst [vmem:[#allocation2 + $0x70] sm:$0xff] %v4667_v4  ;;  %354 = vst [vmem:[#allocation2 + $0x78] sm:$0xff] %v4667_v4 }
  0x34   : > { %356 = vst.msk [vmem:[#allocation3] sm:$0xff] %vm355_vm0, %v4667_v4  ;;  %357 = vst.msk [vmem:[#allocation3 + $0x8] sm:$0xff] %vm355_vm0, %v4667_v4 }
  0x35   : > { %358 = vst.msk [vmem:[#allocation3 + $0x10] sm:$0xff] %vm355_vm0, %v4667_v4  ;;  %359 = vst.msk [vmem:[#allocation3 + $0x18] sm:$0xff] %vm355_vm0, %v4667_v4 }
  0x36   : > { %360 = vst.msk [vmem:[#allocation3 + $0x20] sm:$0xff] %vm355_vm0, %v4667_v4  ;;  %361 = vst.msk [vmem:[#allocation3 + $0x28] sm:$0xff] %vm355_vm0, %v4667_v4 }
  0x37   : > { %362 = vst.msk [vmem:[#allocation3 + $0x30] sm:$0xff] %vm355_vm0, %v4667_v4  ;;  %363 = vst.msk [vmem:[#allocation3 + $0x38] sm:$0xff] %vm355_vm0, %v4667_v4 }
  0x38   : > { %364 = vst.msk [vmem:[#allocation3 + $0x40] sm:$0xff] %vm355_vm0, %v4667_v4  ;;  %365 = vst.msk [vmem:[#allocation3 + $0x48] sm:$0xff] %vm355_vm0, %v4667_v4 }
  0x39   : > { %366 = vst.msk [vmem:[#allocation3 + $0x50] sm:$0xff] %vm355_vm0, %v4667_v4  ;;  %367 = vst.msk [vmem:[#allocation3 + $0x58] sm:$0xff] %vm355_vm0, %v4667_v4 }
  0x3a   : > { %368 = vst.msk [vmem:[#allocation3 + $0x60] sm:$0xff] %vm355_vm0, %v4667_v4  ;;  %369 = vst.msk [vmem:[#allocation3 + $0x68] sm:$0xff] %vm355_vm0, %v4667_v4 }
  0x3b   : > { %370 = vst.msk [vmem:[#allocation3 + $0x70] sm:$0xff] %vm355_vm0, %v4667_v4  ;;  %371 = vst.msk [vmem:[#allocation3 + $0x78] sm:$0xff] %vm355_vm0, %v4667_v4 }
  0x3c PF: > { %v4283_v5 = vld [vmem:[%s6977_s3] sm:$0xff]   ;;  %v4284_v6 = vld [vmem:[%s6977_s3 + $0x8] sm:$0xff]   ;;  %v4668_v7 = vmov 0.0   ;;  %vm4669_vm1 = vmmov 0   ;;  %v4285_v8 = vld [vmem:[%s6977_s3 + $0x10] sm:$0xff]   ;;  %v4670_v9 = vmov 0   ;;  %v913_v3 = vlaneseq }
  0x3d   : > { %4009 = vmatprep.subr.bf16.mxu1 %v4668_v7  ;;  %3977 = vmatprep.subr.bf16.mxu0 %v4283_v5  ;;  %v4286_v10 = vld [vmem:[%s6977_s3 + $0x18] sm:$0xff]   ;;  %v4291_v11 = vld [vmem:[%s4779_s8] sm:$0xff]   ;;  %v4288_v14 = vld [vmem:[%s6977_s3 + $0x28] sm:$0xff]   ;;  %s4671_s18 = smov 96   ;;  %s4672_s7 = smov 64   ;;  %v4673_v38 = vmov 2  }
  0x3e   : > { %4025 = vmatprep.mubr.msk.bf16.mxu1 %vm4669_vm1, %v4668_v7  ;;  %3978 = vmatpush3.bf16.msra.mxu0 %v4283_v5  ;;  %v4287_v12 = vld [vmem:[%s6977_s3 + $0x20] sm:$0xff]   ;;  %v4298_v15 = vld [vmem:[%s6978_s4 + $0x8] sm:$0xff]   ;;  %v4289_v16 = vld [vmem:[%s6977_s3 + $0x30] sm:$0xff]   ;;  %v4674_v53 = vmov 1   ;;  %v4675_v2 = vmov 3   ;;  %v914_v4 = vshrl.u32 %v913_v3, 7 }
  0x3f   : > { %3979 = vmatprep.subr.bf16.mxu0 %v4284_v6  ;;  %4243 = vset.pattern.permute.xlu1 %v4670_v9  ;;  %v4297_v13 = vld [vmem:[%s6978_s4] sm:$0xff]   ;;  %v4299_v17 = vld [vmem:[%s6978_s4 + $0x10] sm:$0xff]   ;;  %v4290_v18 = vld [vmem:[%s6977_s3 + $0x38] sm:$0xff]   ;;  %p3741_p13 = scmp.ne.s32.totalorder %s4649_s20, 1 }
  0x40   : > { %3993 = vmatprep.mubr.bf16.mxu0 %v4291_v11  ;;  %729 = vxpose.xlu0.c.b16.start [1/8] (narrow) %v4297_v13, 16  ;;  %v4302_v19 = vld [vmem:[%s6978_s4 + $0x18] sm:$0xff]   ;;  %v4851_v20 = vld [vmem:[%s4789_s13] sm:$0xff]   ;;  %v4861_v22 = vld [vmem:[%s4789_s13 + $0x8] sm:$0xff]   ;;  %v1962_v5 = vsub.s32 3, %v914_v4 }
  0x41   : > { %4010 = vmatpush3.bf16.xpose.msra.mxu1 %v4851_v20  ;;  %1418 = vrot.lane.b32.xlu1 %v4851_v20, %s4671_s18  ;;  %v4303_v21 = vld [vmem:[%s6978_s4 + $0x20] sm:$0xff]   ;;  %v4292_v23 = vld [vmem:[%s4779_s8 + $0x8] sm:$0xff]   ;;  %v4293_v24 = vld [vmem:[%s4779_s8 + $0x10] sm:$0xff]  }
  0x42   : > { %3980 = vmatpush3.bf16.msra.mxu0 %v4284_v6  ;;  %4011 = vmatprep.subr.bf16.mxu1 %v4668_v7  ;;  %v4304_v25 = vld [vmem:[%s6978_s4 + $0x28] sm:$0xff]   ;;  %v4873_v26 = vld [vmem:[%s4789_s13 + $0x10] sm:$0xff]   ;;  %v4294_v28 = vld [vmem:[%s4779_s8 + $0x18] sm:$0xff]  }
  0x43   : > { %3981 = vmatprep.subr.bf16.mxu0 %v4285_v8  ;;  %v4305_v27 = vld [vmem:[%s6978_s4 + $0x30] sm:$0xff]   ;;  %v4884_v29 = vld [vmem:[%s4789_s13 + $0x18] sm:$0xff]   ;;  %v4295_v30 = vld [vmem:[%s4779_s8 + $0x20] sm:$0xff]  }
  0x44   : > { %730 = vxpose.xlu0.c.b16.cont [2/8] (narrow) %v4298_v15, 16  ;;  %v4306_v31 = vld [vmem:[%s6978_s4 + $0x38] sm:$0xff]   ;;  %v4896_v32 = vld [vmem:[%s4789_s13 + $0x20] sm:$0xff]   ;;  %v4296_v33 = vld [vmem:[%s4779_s8 + $0x28] sm:$0xff]  }
  0x45   : > { %1420 = vrot.lane.b32.xlu1 %v4861_v22, %s4671_s18  ;;  %v4904_v34 = vld [vmem:[%s4789_s13 + $0x28] sm:$0xff]   ;;  %v4300_v35 = vld [vmem:[%s4779_s8 + $0x30] sm:$0xff]   ;;  %v4301_v37 = vld [vmem:[%s4779_s8 + $0x38] sm:$0xff]   ;;  %s4676_s8 = smov 32  }
  0x46   : > { %3982 = vmatpush3.bf16.msra.mxu0 %v4285_v8  ;;  %v4913_v36 = vld [vmem:[%s4789_s13 + $0x30] sm:$0xff]   ;;  %v4935_v39 = vld [vmem:[%s4789_s13 + $0x38] sm:$0xff]  }
  0x47   : > { %3983 = vmatprep.subr.bf16.mxu0 %v4286_v10 }
  0x48   : > { %731 = vxpose.xlu0.c.b16.cont [3/8] (narrow) %v4299_v17, 16  ;;  %v915_v17 = vsub.s32 0, %v914_v4 }
  0x49   : > { %4012 = vmatpush3.bf16.xpose.msra.mxu1 %v4861_v22  ;;  %1422 = vrot.lane.b32.xlu1 %v4873_v26, %s4671_s18 }
  0x4a   : > { %3984 = vmatpush3.bf16.msra.mxu0 %v4286_v10  ;;  %4013 = vmatprep.subr.bf16.mxu1 %v4668_v7 }
  0x4b   : > { %3985 = vmatprep.subr.bf16.mxu0 %v4287_v12 }
  0x4c   : > { %732 = vxpose.xlu0.c.b16.cont [4/8] (narrow) %v4302_v19, 16 }
  0x4d   : > { %1424 = vrot.lane.b32.xlu1 %v4884_v29, %s4671_s18 }
  0x4e   : > { %3986 = vmatpush3.bf16.msra.mxu0 %v4287_v12 }
  0x4f   : > { %3987 = vmatprep.subr.bf16.mxu0 %v4288_v14 }
  0x50   : > { %733 = vxpose.xlu0.c.b16.cont [5/8] (narrow) %v4303_v21, 16 }
  0x51   : > { %4014 = vmatpush3.bf16.xpose.msra.mxu1 %v4873_v26  ;;  %1426 = vrot.lane.b32.xlu1 %v4896_v32, %s4671_s18 }
  0x52   : > { %3988 = vmatpush3.bf16.msra.mxu0 %v4288_v14  ;;  %4015 = vmatprep.subr.bf16.mxu1 %v4668_v7 }
  0x53   : > { %3989 = vmatprep.subr.bf16.mxu0 %v4289_v16 }
  0x54   : > { %734 = vxpose.xlu0.c.b16.cont [6/8] (narrow) %v4304_v25, 16 }
  0x55   : > { %1428 = vrot.lane.b32.xlu1 %v4904_v34, %s4671_s18 }
  0x56   : > { %3990 = vmatpush3.bf16.msra.mxu0 %v4289_v16 }
  0x57   : > { %3991 = vmatprep.subr.bf16.mxu0 %v4290_v18 }
  0x58   : > { %735 = vxpose.xlu0.c.b16.cont [7/8] (narrow) %v4305_v27, 16 }
  0x59   : > { %4016 = vmatpush3.bf16.xpose.msra.mxu1 %v4884_v29  ;;  %1430 = vrot.lane.b32.xlu1 %v4913_v36, %s4671_s18 }
  0x5a   : > { %3992 = vmatpush3.bf16.msra.mxu0 %v4290_v18  ;;  %4017 = vmatprep.subr.bf16.mxu1 %v4668_v7  ;;  %v1605_v18 = vsub.s32 2, %v914_v4 }
  0x5b   : > { %4029 = vmatprep.subr.bf16.mxu0 %v4851_v20 }
  0x5c   : > { %736 = vxpose.xlu0.c.b16.end [8/8] (narrow) %v4306_v31, 16 }
  0x5d   : > { %3994 = vmatmul.mubr.bf16.vlgmr.msra.gmra.mrb[0].mxu0 %v4292_v23 }
  0x5e   : > { %3997 = vmatprep.mubr.bf16.mxu0 %v4293_v24  ;;  %4030 = vmatpush3.bf16.msra.mxu0 %v4851_v20  ;;  %v1248_v24 = vsub.s32 1, %v914_v4 }
  0x5f   : > { %4031 = vmatprep.subr.bf16.mxu0 %v4861_v22 }
  0x61   : > { %4018 = vmatpush3.bf16.xpose.msra.mxu1 %v4896_v32 }
  0x62   : > { %4032 = vmatpush3.bf16.msra.mxu0 %v4861_v22  ;;  %4019 = vmatprep.subr.bf16.mxu1 %v4668_v7 }
  0x63   : > { %4033 = vmatprep.subr.bf16.mxu0 %v4873_v26 }
  0x65   : > { %3998 = vmatmul.mubr.bf16.gmra.mrb[4].mxu0 %v4294_v28  ;;  %1775 = vrot.lane.b32.xlu0 %v4851_v20, %s4672_s7 }
  0x66   : > { %4001 = vmatprep.mubr.bf16.mxu0 %v4295_v30  ;;  %4034 = vmatpush3.bf16.msra.mxu0 %v4873_v26 }
  0x67   : > { %4035 = vmatprep.subr.bf16.mxu0 %v4884_v29  ;;  %4245 = vset.pattern.permute.xlu0 %v4673_v38 }
  0x69   : > { %1777 = vrot.lane.b32.xlu0 %v4861_v22, %s4672_s7  ;;  %4020 = vmatpush3.bf16.xpose.msra.mxu1 %v4904_v34 }
  0x6a   : > { %4036 = vmatpush3.bf16.msra.mxu0 %v4884_v29  ;;  %4021 = vmatprep.subr.bf16.mxu1 %v4668_v7 }
  0x6b   : > { %4037 = vmatprep.subr.bf16.mxu0 %v4896_v32 }
  0x6d   : > { %4002 = vmatmul.mubr.bf16.gmra.mrb[8].mxu0 %v4296_v33  ;;  %1779 = vrot.lane.b32.xlu0 %v4873_v26, %s4672_s7 }
  0x6e   : > { %4005 = vmatprep.mubr.bf16.mxu0 %v4300_v35  ;;  %4038 = vmatpush3.bf16.msra.mxu0 %v4896_v32 }
  0x6f   : > { %4039 = vmatprep.subr.bf16.mxu0 %v4904_v34 }
  0x71   : > { %1781 = vrot.lane.b32.xlu0 %v4884_v29, %s4672_s7  ;;  %4022 = vmatpush3.bf16.xpose.msra.mxu1 %v4913_v36 }
  0x72   : > { %4040 = vmatpush3.bf16.msra.mxu0 %v4904_v34  ;;  %4023 = vmatprep.subr.bf16.mxu1 %v4668_v7 }
  0x73   : > { %4041 = vmatprep.subr.bf16.mxu0 %v4913_v36 }
  0x75   : > { %4006 = vmatmul.mubr.bf16.gmra.mrb[12].mxu0 %v4301_v37  ;;  %1783 = vrot.lane.b32.xlu0 %v4896_v32, %s4672_s7 }
  0x76   : > { %4042 = vmatpush3.bf16.msra.mxu0 %v4913_v36 }
  0x77   : > { %4043 = vmatprep.subr.bf16.mxu0 %v4935_v39 }
  0x79   : > { %1785 = vrot.lane.b32.xlu0 %v4904_v34, %s4672_s7  ;;  %4024 = vmatpush3.bf16.xpose.msra.mxu1 %v4935_v39 }
  0x7a   : > { %4044 = vmatpush3.bf16.msra.mxu0 %v4935_v39 }
  0x7d   : > { %1787 = vrot.lane.b32.xlu0 %v4913_v36, %s4672_s7 }
  0xa6   : > { %v737_v40 = vpop.trf.xlu0 }
  0xa7   : > { %4026 = vmatmul.mubr.bf16.vlgmr.msra.gmra.mrb[0].mxu1 %v737_v40 }
  0xb3   : > { %v4953_v41 = vpop.permute.xlu1 %1418 }
  0xb4   : > { %4061 = vmatprep.subr.bf16.mxu0 %v4953_v41 }
  0xb7   : > { %v5050_v12 = vpop.permute.xlu1 %1420 }
  0xbb   : > { %v5056_v13 = vpop.permute.xlu1 %1422 }
  0xbf   : > { %v5063_v14 = vpop.permute.xlu1 %1424 }
  0xc3   : > { %v5070_v15 = vpop.permute.xlu1 %1426 }
  0xc7   : > { %v5076_v16 = vpop.permute.xlu1 %1428 }
  0xcb   : > { %v5082_v19 = vpop.permute.xlu1 %1430 }
  0xd7   : > { %v1776_v42 = vpop.permute.xlu0 %1775 }
  0xd8   : > { %4093 = vmatprep.subr.bf16.mxu1 %v1776_v42 }
  0xd9   : > { %4094 = vmatpush3.bf16.msra.mxu1 %v1776_v42 }
  0xdb   : > { %v1778_v43 = vpop.permute.xlu0 %1777 }
  0xdc   : > { %4095 = vmatprep.subr.bf16.mxu1 %v1778_v43 }
  0xdd   : > { %4096 = vmatpush3.bf16.msra.mxu1 %v1778_v43 }
  0xdf   : > { %v1780_v44 = vpop.permute.xlu0 %1779 }
  0xe0   : > { %4097 = vmatprep.subr.bf16.mxu1 %v1780_v44 }
  0xe1   : > { %4098 = vmatpush3.bf16.msra.mxu1 %v1780_v44  ;;  %v5099_v44 = vld [vmem:[%s4791_s14] sm:$0xff] }
  0xe3   : > { %v1782_v45 = vpop.permute.xlu0 %1781 }
  0xe4   : > { %4099 = vmatprep.subr.bf16.mxu1 %v1782_v45 }
  0xe5   : > { %4100 = vmatpush3.bf16.msra.mxu1 %v1782_v45 }
  0xe7   : > { %v1784_v46 = vpop.permute.xlu0 %1783 }
  0xe8   : > { %4101 = vmatprep.subr.bf16.mxu1 %v1784_v46 }
  0xe9   : > { %4102 = vmatpush3.bf16.msra.mxu1 %v1784_v46 }
  0xeb   : > { %v1786_v47 = vpop.permute.xlu0 %1785 }
  0xec   : > { %4103 = vmatprep.subr.bf16.mxu1 %v1786_v47 }
  0xed   : > { %4104 = vmatpush3.bf16.msra.mxu1 %v1786_v47 }
  0xef   : > { %v1788_v48 = vpop.permute.xlu0 %1787 }
  0xf0   : > { %4105 = vmatprep.subr.bf16.mxu1 %v1788_v48 }
  0xf1   : > { %4106 = vmatpush3.bf16.msra.mxu1 %v1788_v48 }
 0x130   : > { %v4956_v49 = vpop.f32.mrb[0].mxu0 }
 0x131   : > { %1548 = vperm.xlu0 %4245, %v4956_v49   ;;  %845 = vperm.xlu1 %4243, %v4956_v49   ;;  %v4960_v50 = vpop.f32.mrb[1].mxu0 }
 0x132   : > { %v3996_v51 = vpop.f32.mrb[2].mxu0 }
 0x133   : > { %v4962_v52 = vpop.f32.mrb[3].mxu0 }
 0x135   : > { %4244 = vset.pattern.permute.xlu1 %v4674_v53 }
 0x136   : > { %1191 = vperm.xlu1 %4244, %v4956_v49  }
 0x138   : > { %v4966_v54 = vpop.f32.mrb[4].mxu0 }
 0x139   : > { %v4968_v55 = vpop.f32.mrb[5].mxu0 }
 0x13a   : > { %4246 = vset.pattern.permute.xlu1 %v4670_v9  ;;  %v4971_v56 = vpop.f32.mrb[6].mxu0 }
 0x13b   : > { %835 = vperm.xlu1 %4246, %v4960_v50   ;;  %1568 = vperm.xlu0 %4245, %v4971_v56   ;;  %v4975_v57 = vpop.f32.mrb[7].mxu0 }
 0x13f   : > { %4247 = vset.pattern.permute.xlu1 %v4673_v38  ;;  %1560 = vperm.xlu0 %4245, %v4975_v57  }
 0x140   : > { %1540 = vperm.xlu1 %4247, %v4960_v50   ;;  %v4980_v58 = vpop.f32.mrb[8].mxu0 }
 0x141   : > { %v4982_v59 = vpop.f32.mrb[9].mxu0 }
 0x142   : > { %v4984_v60 = vpop.f32.mrb[10].mxu0 }
 0x143   : > { %4267 = vset.pattern.permute.xlu0 %v4670_v9  ;;  %v4987_v61 = vpop.f32.mrb[11].mxu0 }
 0x144   : > { %4248 = vset.pattern.permute.xlu1 %v4670_v9  ;;  %875 = vperm.xlu0 %4267, %v4982_v59  }
 0x145   : > { %850 = vperm.xlu1 %4248, %v3996_v51  }
 0x148   : > { %4271 = vset.pattern.permute.xlu0 %v4673_v38  ;;  %v4992_v62 = vpop.f32.mrb[12].mxu0 }
 0x149   : > { %4249 = vset.pattern.permute.xlu1 %v4674_v53  ;;  %1584 = vperm.xlu0 %4271, %v4984_v60   ;;  %v4996_v63 = vpop.f32.mrb[13].mxu0 }
 0x14a   : > { %1195 = vperm.xlu1 %4249, %v3996_v51   ;;  %v4998_v0 = vpop.f32.mrb[14].mxu0 }
 0x14b   : > { %v5000_v1 = vpop.f32.mrb[15].mxu0 }
 0x14d   : > { %1576 = vperm.xlu0 %4271, %v4987_v61  }
 0x14e   : > { %4250 = vset.pattern.permute.xlu1 %v4673_v38 }
 0x14f   : > { %1552 = vperm.xlu1 %4250, %v3996_v51  }
 0x151   : > { %4272 = vset.pattern.permute.xlu0 %v4670_v9 }
 0x152   : > { %905 = vperm.xlu0 %4272, %v4992_v62  }
 0x153   : > { %4251 = vset.pattern.permute.xlu1 %v4670_v9 }
 0x154   : > { %840 = vperm.xlu1 %4251, %v4962_v52  }
 0x156   : > { %895 = vperm.xlu0 %4272, %v4996_v63  }
 0x158   : > { %4252 = vset.pattern.permute.xlu1 %v4674_v53 }
 0x159   : > { %1187 = vperm.xlu1 %4252, %v4962_v52  }
 0x15a   : > { %4277 = vset.pattern.permute.xlu0 %v4673_v38 }
 0x15b   : > { %1600 = vperm.xlu0 %4277, %v4998_v0  }
 0x15d   : > { %4253 = vset.pattern.permute.xlu1 %v4673_v38 }
 0x15e   : > { %1544 = vperm.xlu1 %4253, %v4962_v52  }
 0x15f   : > { %1789 = vrot.lane.b32.xlu0 %v4935_v39, %s4672_s7 }
 0x160   : > { %4278 = vset.pattern.permute.xlu0 %v4675_v2 }
 0x162   : > { %4254 = vset.pattern.permute.xlu1 %v4670_v9 }
 0x163   : > { %865 = vperm.xlu1 %4254, %v4966_v54   ;;  %1897 = vperm.xlu0 %4278, %v4960_v50  }
 0x167   : > { %4255 = vset.pattern.permute.xlu1 %v4674_v53  ;;  %1933 = vperm.xlu0 %4278, %v4987_v61  }
 0x168   : > { %1207 = vperm.xlu1 %4255, %v4966_v54  }
 0x16b   : > { %1909 = vperm.xlu0 %4278, %v3996_v51  }
 0x16c   : > { %4256 = vset.pattern.permute.xlu1 %v4673_v38 }
 0x16d   : > { %1564 = vperm.xlu1 %4256, %v4966_v54  }
 0x16f   : > { %1941 = vperm.xlu0 %4278, %v4984_v60  }
 0x171   : > { %4257 = vset.pattern.permute.xlu1 %v4670_v9 }
 0x172   : > { %855 = vperm.xlu1 %4257, %v4968_v55  }
 0x173   : > { %2136 = vrot.lane.b32.xlu0 %v4873_v26, %s4676_s8 }
 0x176   : > { %4258 = vset.pattern.permute.xlu1 %v4674_v53 }
 0x177   : > { %1199 = vperm.xlu1 %4258, %v4968_v55   ;;  %1917 = vperm.xlu0 %4278, %v4975_v57  }
 0x17a   : > { %v827_v6 = vpop.f32.mrb[0].mxu1 }
 0x17b   : > { %4259 = vset.pattern.permute.xlu1 %v4673_v38  ;;  %4280 = vset.pattern.permute.xlu0 %v4674_v53  ;;  %v5044_v7 = vrot.slane %v827_v6, %v1962_v5  ;;  %v4027_v8 = vpop.f32.mrb[1].mxu1  ;;  %v5085_v21 = vrot.slane %v827_v6, %v915_v17  ;;  %v5087_v23 = vrot.slane %v827_v6, %v1605_v18 }
 0x17c   : > { %1556 = vperm.xlu1 %4259, %v4968_v55   ;;  %1183 = vperm.xlu0 %4280, %v4960_v50   ;;  %v830_v10 = vpop.f32.mrb[2].mxu1  ;;  %v5092_v30 = vrot.slane %v827_v6, %v1248_v24 }
 0x17d   : > { %v4028_v11 = vpop.f32.mrb[3].mxu1 }
 0x180   : > { %4260 = vset.pattern.permute.xlu1 %v4670_v9  ;;  %1219 = vperm.xlu0 %4280, %v4987_v61  }
 0x181   : > { %870 = vperm.xlu1 %4260, %v4971_v56  }
 0x184   : > { %1227 = vperm.xlu0 %4280, %v4984_v60  }
 0x185   : > { %4261 = vset.pattern.permute.xlu1 %v4674_v53 }
 0x186   : > { %1211 = vperm.xlu1 %4261, %v4971_v56  }
 0x188   : > { %1243 = vperm.xlu0 %4280, %v4998_v0  }
 0x18a   : > { %4262 = vset.pattern.permute.xlu1 %v4670_v9 }
 0x18b   : > { %860 = vperm.xlu1 %4262, %v4975_v57  }
 0x18c   : > { %1235 = vperm.xlu0 %4280, %v5000_v1  }
 0x18f   : > { %4263 = vset.pattern.permute.xlu1 %v4674_v53 }
 0x190   : > { %1203 = vperm.xlu1 %4263, %v4975_v57   ;;  %4281 = vset.pattern.permute.xlu0 %v4673_v38 }
 0x191   : > { %1592 = vperm.xlu0 %4281, %v5000_v1  }
 0x194   : > { %4264 = vset.pattern.permute.xlu1 %v4670_v9 }
 0x195   : > { %885 = vperm.xlu1 %4264, %v4980_v58   ;;  %4282 = vset.pattern.permute.xlu0 %v4675_v2 }
 0x196   : > { %1925 = vperm.xlu0 %4282, %v4971_v56  }
 0x199   : > { %4265 = vset.pattern.permute.xlu1 %v4674_v53 }
 0x19a   : > { %1223 = vperm.xlu1 %4265, %v4980_v58   ;;  %1957 = vperm.xlu0 %4282, %v4998_v0  }
 0x19e   : > { %4266 = vset.pattern.permute.xlu1 %v4673_v38  ;;  %1949 = vperm.xlu0 %4282, %v5000_v1  }
 0x19f   : > { %1580 = vperm.xlu1 %4266, %v4980_v58  }
 0x1a2   : > { %2140 = vrot.lane.b32.xlu0 %v4896_v32, %s4676_s8 }
 0x1a3   : > { %4268 = vset.pattern.permute.xlu1 %v4674_v53 }
 0x1a4   : > { %1215 = vperm.xlu1 %4268, %v4982_v59  }
 0x1a6   : > { %2144 = vrot.lane.b32.xlu0 %v4913_v36, %s4676_s8 }
 0x1a8   : > { %4269 = vset.pattern.permute.xlu1 %v4673_v38 }
 0x1a9   : > { %1572 = vperm.xlu1 %4269, %v4982_v59  }
 0x1ad   : > { %4270 = vset.pattern.permute.xlu1 %v4670_v9 }
 0x1ae   : > { %890 = vperm.xlu1 %4270, %v4984_v60  }
 0x1b0   : > { %v1549_v25 = vpop.permute.xlu0 %1548  ;;  %v846_v26 = vpop.permute.xlu1 %845 }
 0x1b1   : > { %v1609_v27 = vadd.f32 %v5087_v23, %v1549_v25  ;;  %v919_v28 = vadd.f32 %v5085_v21, %v846_v26 }
 0x1b2   : > { %880 = vperm.xlu1 %4270, %v4987_v61  }
 0x1b3   : > { %v1641_v31 = vmul.f32 0.2, %v1609_v27  ;;  %vm935_vm2 = vcmp.gt.f32.partialorder %v919_v28, 0.0  ;;  %v951_v32 = vmul.f32 0.2, %v919_v28  ;;  %vm1625_vm3 = vcmp.gt.f32.partialorder %v1609_v27, 0.0 }
 0x1b5   : > { %v967_v33 = vsel %vm935_vm2, %v919_v28, %v951_v32  ;;  %v1192_v35 = vpop.permute.xlu1 %1191  ;;  %v1657_v40 = vsel %vm1625_vm3, %v1609_v27, %v1641_v31 }
 0x1b6   : > { %v983_v36 = vsub.f32 0.0, %v967_v33  ;;  %v1252_v37 = vadd.f32 %v5092_v30, %v1192_v35  ;;  %4273 = vset.pattern.permute.xlu1 %v4674_v53  ;;  %v1673_v45 = vsub.f32 0.0, %v1657_v40  ;;  %v410_v53 = vunpack.c.2.s8 %v5099_v44 }
 0x1b7   : > { %1239 = vperm.xlu1 %4273, %v4992_v62   ;;  %v408_v33 = vunpack.c.0.s8 %v5099_v44 }
 0x1b8   : > { %v1001_v42 = vmul.f32 1.442695, %v983_v36  ;;  %vm1268_vm4 = vcmp.gt.f32.partialorder %v1252_v37, 0.0  ;;  %v1284_v43 = vmul.f32 0.2, %v1252_v37  ;;  %v5111_v8 = vcvt.s32.f32 %v410_v53 }
 0x1b9   : > { %v1691_v57 = vmul.f32 1.442695, %v1673_v45  ;;  %v411_v53 = vunpack.c.3.s8 %v5099_v44 }
 0x1ba   : > { %v836_v46 = vpop.permute.xlu1 %835  ;;  %v5101_v47 = vpop.permute.xlu0 %1568  ;;  %4315 = vpow2.f32 %v1001_v42  ;;  %v1300_v48 = vsel %vm1268_vm4, %v1252_v37, %v1284_v43  ;;  %7001 = vst [vmem:[#allocation5_spill] sm:$0xff] %v5111_v8  ;;  %vm6992_vm7 = vcmp.gt.f32.partialorder %v5111_v8, 0.0 }
 0x1bb   : > { %v917_v50 = vadd.f32 %v5085_v21, %v836_v46  ;;  %1231 = vperm.xlu1 %4273, %v4996_v63   ;;  %v1316_v51 = vsub.f32 0.0, %v1300_v48 }
 0x1bd   : > { %vm933_vm5 = vcmp.gt.f32.partialorder %v917_v50, 0.0  ;;  %v949_v56 = vmul.f32 0.2, %v917_v50  ;;  %v1334_v60 = vmul.f32 1.442695, %v1316_v51 }
 0x1be   : > { %v5106_v61 = vpop.permute.xlu0 %1560 }
 0x1bf   : > { %v965_v3 = vsel %vm933_vm5, %v917_v50, %v949_v56  ;;  %v1541_v4 = vpop.permute.xlu1 %1540  ;;  %4274 = vset.pattern.permute.xlu1 %v4673_v38  ;;  %4317 = vpow2.f32 %v1334_v60  ;;  %v5138_v50 = vcvt.s32.f32 %v408_v33 }
 0x1c0   : > { %v981_v5 = vsub.f32 0.0, %v965_v3  ;;  %v1607_v6 = vadd.f32 %v5087_v23, %v1541_v4  ;;  %1588 = vperm.xlu1 %4274, %v4996_v63   ;;  %4319 = vpow2.f32 %v1691_v57 }
 0x1c1   : > { %7002 = vst [vmem:[#allocation6_spill] sm:$0xff] %v5138_v50  ;;  %vm6993_vm10 = vcmp.gt.f32.partialorder %v5138_v50, 0.0 }
 0x1c2   : > { %v997_v10 = vmul.f32 1.442695, %v981_v5  ;;  %vm1623_vm6 = vcmp.gt.f32.partialorder %v1607_v6, 0.0  ;;  %v1639_v11 = vmul.f32 0.2, %v1607_v6 }
 0x1c3   : > { %v5113_v17 = vpop.permute.xlu0 %875 }
 0x1c4   : > { %v851_v18 = vpop.permute.xlu1 %850  ;;  %4275 = vset.pattern.permute.xlu1 %v4670_v9  ;;  %v5117_v24 = vpop.eup %4315  ;;  %v1655_v25 = vsel %vm1623_vm6, %v1607_v6, %v1639_v11  ;;  %4321 = vpow2.f32 %v997_v10 }
 0x1c5   : > { %v920_v26 = vadd.f32 %v5085_v21, %v851_v18  ;;  %910 = vperm.xlu1 %4275, %v4998_v0   ;;  %v1671_v27 = vsub.f32 0.0, %v1655_v25  ;;  %v1031_v31 = vsel %vm6992_vm7, %v5117_v24, 0.0 }
 0x1c6   : > { %1049 = vadd.xlane.f32.xlu0 %v1031_v31 }
 0x1c7   : > { %vm936_vm8 = vcmp.gt.f32.partialorder %v920_v26, 0.0  ;;  %v952_v28 = vmul.f32 0.2, %v920_v26  ;;  %v1687_v32 = vmul.f32 1.442695, %v1671_v27 }
 0x1c8   : > { %v5124_v9 = vpop.permute.xlu0 %1584 }
 0x1c9   : > { %v968_v35 = vsel %vm936_vm8, %v920_v26, %v952_v28  ;;  %v1196_v36 = vpop.permute.xlu1 %1195  ;;  %900 = vperm.xlu1 %4275, %v5000_v1   ;;  %v5128_v37 = vpop.eup %4317  ;;  %4323 = vpow2.f32 %v1687_v32 }
 0x1ca   : > { %v984_v0 = vsub.f32 0.0, %v968_v35  ;;  %v1253_v40 = vadd.f32 %v5092_v30, %v1196_v36  ;;  %v1364_v42 = vsel %vm6992_vm7, %v5128_v37, 0.0  ;;  %v5134_v43 = vpop.eup %4319 }
 0x1cb   : > { %1382 = vadd.xlane.f32.xlu0 %v1364_v42  ;;  %v1721_v57 = vsel %vm6992_vm7, %v5134_v43, 0.0 }
 0x1cc   : > { %v1003_v45 = vmul.f32 1.442695, %v984_v0  ;;  %vm1269_vm9 = vcmp.gt.f32.partialorder %v1253_v40, 0.0  ;;  %v1285_v46 = vmul.f32 0.2, %v1253_v40  ;;  %v5136_v48 = vpop.permute.xlu0 %1576 }
 0x1cd   : > { %4276 = vset.pattern.permute.xlu1 %v4673_v38  ;;  %v5153_v38 = vcvt.s32.f32 %v411_v53 }
 0x1ce   : > { %4325 = vpow2.f32 %v1003_v45  ;;  %v1301_v1 = vsel %vm1269_vm9, %v1253_v40, %v1285_v46  ;;  %v1553_v51 = vpop.permute.xlu1 %1552  ;;  %1596 = vperm.xlu1 %4276, %v4992_v62   ;;  %v5146_v60 = vpop.eup %4321 }
 0x1cf   : > { %v1317_v56 = vsub.f32 0.0, %v1301_v1  ;;  %1739 = vadd.xlane.f32.xlu0 %v1721_v57  ;;  %7003 = vst [vmem:[#allocation7_spill] sm:$0xff] %v5153_v38  ;;  %v1029_v6 = vsel %vm6993_vm10, %v5146_v60, 0.0  ;;  %v1610_v11 = vadd.f32 %v5087_v23, %v1553_v51  ;;  %vm6986_vm11 = vcmp.gt.f32.partialorder %v5153_v38, 0.0 }
 0x1d0   : > { %v409_v51 = vunpack.c.1.s8 %v5099_v44  ;;  %vm5214_vm3 = vmpackc.low %vm6986_vm11, %vm6992_vm7 }
 0x1d1   : > { %v1336_v3 = vmul.f32 1.442695, %v1317_v56  ;;  %v5149_v4 = vpop.permute.xlu0 %905  ;;  %v1642_v28 = vmul.f32 0.2, %v1610_v11  ;;  %vm1626_vm13 = vcmp.gt.f32.partialorder %v1610_v11, 0.0 }
 0x1d2   : > { %1432 = vrot.lane.b32.xlu1 %v4935_v39, %s4671_s18 }
 0x1d3   : > { %4327 = vpow2.f32 %v1336_v3  ;;  %v841_v5 = vpop.permute.xlu1 %840  ;;  %4279 = vset.pattern.permute.xlu1 %v4675_v2  ;;  %v5159_v10 = vpop.eup %4323  ;;  %1045 = vadd.xlane.f32.xlu0 %v1029_v6  ;;  %v1658_v40 = vsel %vm1626_vm13, %v1610_v11, %v1642_v28  ;;  %v5187_v11 = vcvt.s32.f32 %v409_v51 }
 0x1d4   : > { %v918_v18 = vadd.f32 %v5085_v21, %v841_v5  ;;  %v1719_v2 = vsel %vm6993_vm10, %v5159_v10, 0.0  ;;  %v1674_v57 = vsub.f32 0.0, %v1658_v40 }
 0x1d5   : > { %v5163_v25 = vpop.permute.xlu0 %895  ;;  %vm6988_vm1 = vcmp.gt.f32.partialorder %v5187_v11, 0.0 }
 0x1d6   : > { %2132 = vrot.lane.b32.xlu1 %v4851_v20, %s4676_s8  ;;  %vm934_vm12 = vcmp.gt.f32.partialorder %v918_v18, 0.0  ;;  %v950_v26 = vmul.f32 0.2, %v918_v18  ;;  %vm5202_vm2 = vmpackc.low %vm6988_vm1, %vm6993_vm10 }
 0x1d7   : > { %1735 = vadd.xlane.f32.xlu0 %v1719_v2 }
 0x1d8   : > { %v5171_v27 = vpop.eup %4325  ;;  %v1188_v31 = vpop.permute.xlu1 %1187  ;;  %v966_v32 = vsel %vm934_vm12, %v918_v18, %v950_v26  ;;  %v1693_v18 = vmul.f32 1.442695, %v1674_v57 }
 0x1d9   : > { %v1251_v33 = vadd.f32 %v5092_v30, %v1188_v31  ;;  %v1032_v20 = vsel %vm6986_vm11, %v5171_v27, 0.0  ;;  %v982_v35 = vsub.f32 0.0, %v966_v32 }
 0x1da   : > { %v5177_v36 = vpop.permute.xlu0 %1600  ;;  %1901 = vperm.xlu1 %4279, %v4962_v52  }
 0x1db   : > { %vm1267_vm14 = vcmp.gt.f32.partialorder %v1251_v33, 0.0  ;;  %v1283_v0 = vmul.f32 0.2, %v1251_v33  ;;  %v999_v42 = vmul.f32 1.442695, %v982_v35  ;;  %1051 = vadd.xlane.f32.xlu0 %v1032_v20 }
 0x1dd   : > { %v5180_v45 = vpop.eup %4327  ;;  %v1299_v46 = vsel %vm1267_vm14, %v1251_v33, %v1283_v0  ;;  %v1545_v1 = vpop.permute.xlu1 %1544  ;;  %4329 = vpow2.f32 %v999_v42 }
 0x1de   : > { %v1315_v53 = vsub.f32 0.0, %v1299_v46  ;;  %v1790_v56 = vpop.permute.xlu0 %1789  ;;  %1929 = vperm.xlu1 %4279, %v4982_v59   ;;  %v1608_v3 = vadd.f32 %v5087_v23, %v1545_v1  ;;  %v1365_v50 = vsel %vm6986_vm11, %v5180_v45, 0.0 }
 0x1df   : > { %4107 = vmatprep.subr.bf16.mxu1 %v1790_v56 }
 0x1e0   : > { %v1332_v52 = vmul.f32 1.442695, %v1315_v53  ;;  %4108 = vmatpush3.bf16.msra.mxu1 %v1790_v56  ;;  %vm1624_vm15 = vcmp.gt.f32.partialorder %v1608_v3, 0.0  ;;  %v1640_v6 = vmul.f32 0.2, %v1608_v3  ;;  %v3649_v53 = vpack.c.bf16 %v5171_v27, %v5117_v24 }
 0x1e2   : > { %4331 = vpow2.f32 %v1332_v52  ;;  %v866_v44 = vpop.permute.xlu1 %865  ;;  %1905 = vperm.xlu1 %4279, %v4956_v49   ;;  %v1656_v26 = vsel %vm1624_vm15, %v1608_v3, %v1640_v6  ;;  %v5191_v2 = vpop.permute.xlu0 %1897  ;;  %v5229_v3 = vld [vmem:[%s4791_s14 + $0x8] sm:$0xff] }
 0x1e3   : > { %v923_v59 = vadd.f32 %v5085_v21, %v866_v44  ;;  %v1672_v28 = vsub.f32 0.0, %v1656_v26  ;;  %4333 = vpow2.f32 %v1693_v18 }
 0x1e5   : > { %vm939_vm0 = vcmp.gt.f32.partialorder %v923_v59, 0.0  ;;  %v955_v31 = vmul.f32 0.2, %v923_v59  ;;  %v1689_v32 = vmul.f32 1.442695, %v1672_v28 }
 0x1e6   : > { %1937 = vperm.xlu1 %4279, %v4980_v58   ;;  %v5206_v42 = vpop.permute.xlu0 %1933 }
 0x1e7   : > { %v971_v33 = vsel %vm939_vm0, %v923_v59, %v955_v31  ;;  %v1208_v20 = vpop.permute.xlu1 %1207  ;;  %v5195_v35 = vpop.eup %4329  ;;  %4335 = vpow2.f32 %v1689_v32  ;;  %v1612_v32 = vadd.f32 %v5087_v23, %v5106_v61 }
 0x1e8   : > { %v987_v49 = vsub.f32 0.0, %v971_v33  ;;  %v1256_v0 = vadd.f32 %v5092_v30, %v1208_v20  ;;  %v3646_v58 = vpack.c.bf16 %v5195_v35, %v5146_v60 }
 0x1e9   : > { %vm1628_vm9 = vcmp.gt.f32.partialorder %v1612_v32, 0.0 }
 0x1ea   : > { %v1009_v1 = vmul.f32 1.442695, %v987_v49  ;;  %vm1272_vm4 = vcmp.gt.f32.partialorder %v1256_v0, 0.0  ;;  %v1288_v51 = vmul.f32 0.2, %v1256_v0  ;;  %2134 = vrot.lane.b32.xlu1 %v4861_v22, %s4676_s8  ;;  %4045 = vmatprep.mubr.msk.bf16.mxu0 %vm5202_vm2, %v3646_v58  ;;  %v414_v22 = vunpack.c.2.s8 %v5229_v3  ;;  %v5239_v44 = vpop.permute.xlu0 %1909 }
 0x1eb   : > { %4046 = vmatmul.mubr.msk.bf16.vlgmr.msra.gmra.mrb[16].mxu0 %vm5214_vm3, %v3649_v53 }
 0x1ec   : > { %v5224_v60 = vpop.eup %4331  ;;  %4337 = vpow2.f32 %v1009_v1  ;;  %v1304_v56 = vsel %vm1272_vm4, %v1256_v0, %v1288_v51  ;;  %v1565_v57 = vpop.permute.xlu1 %1564  ;;  %4062 = vmatpush3.bf16.msra.mxu0 %v4953_v41  ;;  %v5244_v59 = vcvt.s32.f32 %v414_v22 }
 0x1ed   : > { %v1320_v52 = vsub.f32 0.0, %v1304_v56  ;;  %4063 = vmatprep.subr.bf16.mxu0 %v5050_v12  ;;  %v1613_v24 = vadd.f32 %v5087_v23, %v1565_v57  ;;  %v1363_v27 = vsel %vm6988_vm1, %v5224_v60, 0.0  ;;  %v5241_v26 = vpop.eup %4333 }
 0x1ee   : > { %1913 = vperm.xlu1 %4279, %v4968_v55   ;;  %1380 = vadd.xlane.f32.xlu0 %v1363_v27  ;;  %7008 = vst [vmem:[#allocation8_spill] sm:$0xff] %v5244_v59  ;;  %v3697_v0 = vpack.c.bf16 %v5241_v26, %v5134_v43  ;;  %v5259_v1 = vpop.permute.xlu0 %1941  ;;  %vm6981_vm8 = vcmp.gt.f32.partialorder %v5244_v59, 0.0  ;;  %v1644_v43 = vmul.f32 0.2, %v1612_v32 }
 0x1ef   : > { %v1342_v6 = vmul.f32 1.442695, %v1320_v52  ;;  %vm1629_vm5 = vcmp.gt.f32.partialorder %v1613_v24, 0.0  ;;  %v1645_v18 = vmul.f32 0.2, %v1613_v24 }
 0x1f0   : > { %4064 = vmatpush3.bf16.msra.mxu0 %v5050_v12  ;;  %v1614_v12 = vadd.f32 %v5087_v23, %v5101_v47  ;;  %v1660_v22 = vsel %vm1628_vm9, %v1612_v32, %v1644_v43 }
 0x1f1   : > { %4339 = vpow2.f32 %v1342_v6  ;;  %v856_v41 = vpop.permute.xlu1 %855  ;;  %v5246_v28 = vpop.eup %4335  ;;  %v1661_v31 = vsel %vm1629_vm5, %v1613_v24, %v1645_v18  ;;  %4065 = vmatprep.subr.bf16.mxu0 %v5056_v13 }
 0x1f2   : > { %v921_v55 = vadd.f32 %v5085_v21, %v856_v41  ;;  %1945 = vperm.xlu1 %4279, %v4996_v63   ;;  %v1677_v33 = vsub.f32 0.0, %v1661_v31  ;;  %v3694_v20 = vpack.c.bf16 %v5246_v28, %v5159_v10  ;;  %vm1630_vm12 = vcmp.gt.f32.partialorder %v1614_v12, 0.0 }
 0x1f3   : > { %v412_v31 = vunpack.c.0.s8 %v5229_v3 }
 0x1f4   : > { %vm937_vm6 = vcmp.gt.f32.partialorder %v921_v55, 0.0  ;;  %v953_v49 = vmul.f32 0.2, %v921_v55  ;;  %v1699_v58 = vmul.f32 1.442695, %v1677_v33  ;;  %4066 = vmatpush3.bf16.msra.mxu0 %v5056_v13  ;;  %4109 = vmatprep.mubr.msk.bf16.mxu1 %vm5202_vm2, %v3694_v20 }
 0x1f5   : > { %4067 = vmatprep.subr.bf16.mxu0 %v5063_v14  ;;  %4110 = vmatmul.mubr.msk.bf16.vlgmr.msra.gmra.mrb[4].mxu1 %vm5214_vm3, %v3697_v0  ;;  %v1646_v13 = vmul.f32 0.2, %v1614_v12 }
 0x1f6   : > { %v5265_v63 = vpop.eup %4337  ;;  %v969_v61 = vsel %vm937_vm6, %v921_v55, %v953_v49  ;;  %v1200_v47 = vpop.permute.xlu1 %1199  ;;  %4341 = vpow2.f32 %v1699_v58  ;;  %1921 = vperm.xlu1 %4279, %v4966_v54   ;;  %v1676_v55 = vsub.f32 0.0, %v1660_v22  ;;  %v5291_v49 = vcvt.s32.f32 %v412_v31 }
 0x1f7   : > { %v985_v10 = vsub.f32 0.0, %v969_v61  ;;  %v1254_v51 = vadd.f32 %v5092_v30, %v1200_v47  ;;  %v1035_v53 = vsel %vm6981_vm8, %v5265_v63, 0.0  ;;  %v5279_v54 = vpop.permute.xlu0 %2136  ;;  %v1662_v6 = vsel %vm1630_vm12, %v1614_v12, %v1646_v13 }
 0x1f8   : > { %4068 = vmatpush3.bf16.msra.mxu0 %v5063_v14  ;;  %1057 = vadd.xlane.f32.xlu0 %v1035_v53  ;;  %7009 = vst [vmem:[#allocation9_spill] sm:$0xff] %v5291_v49  ;;  %v1697_v47 = vmul.f32 1.442695, %v1676_v55  ;;  %vm6983_vm15 = vcmp.gt.f32.partialorder %v5291_v49, 0.0  ;;  %v415_v22 = vunpack.c.3.s8 %v5229_v3 }
 0x1f9   : > { %v1005_v56 = vmul.f32 1.442695, %v985_v10  ;;  %vm1270_vm13 = vcmp.gt.f32.partialorder %v1254_v51, 0.0  ;;  %v1286_v57 = vmul.f32 0.2, %v1254_v51  ;;  %4069 = vmatprep.subr.bf16.mxu0 %v5070_v15 }
 0x1fa   : > { %1953 = vperm.xlu1 %4279, %v4992_v62   ;;  %v1678_v62 = vsub.f32 0.0, %v1662_v6  ;;  %v5327_v31 = vcvt.s32.f32 %v415_v22 }
 0x1fb   : > { %v5277_v52 = vpop.eup %4339  ;;  %4343 = vpow2.f32 %v1005_v56  ;;  %v1302_v24 = vsel %vm1270_vm13, %v1254_v51, %v1286_v57  ;;  %v1557_v27 = vpop.permute.xlu1 %1556  ;;  %v413_v56 = vunpack.c.1.s8 %v5229_v3 }
 0x1fc   : > { %v1318_v18 = vsub.f32 0.0, %v1302_v24  ;;  %v1611_v41 = vadd.f32 %v5087_v23, %v1557_v27  ;;  %4070 = vmatpush3.bf16.msra.mxu0 %v5070_v15  ;;  %v1368_v14 = vsel %vm6981_vm8, %v5277_v52, 0.0  ;;  %v5295_v0 = vpop.permute.xlu0 %1917  ;;  %v1701_v43 = vmul.f32 1.442695, %v1678_v62  ;;  %7011 = vst [vmem:[#allocation11_spill] sm:$0xff] %v5327_v31 }
 0x1fd   : > { %4071 = vmatprep.subr.bf16.mxu0 %v5076_v16  ;;  %1390 = vadd.xlane.f32.xlu0 %v1368_v14  ;;  %vm6991_vm12 = vcmp.gt.f32.partialorder %v5327_v31, 0.0 }
 0x1fe   : > { %v1338_v32 = vmul.f32 1.442695, %v1318_v18  ;;  %vm1627_vm14 = vcmp.gt.f32.partialorder %v1611_v41, 0.0  ;;  %v1643_v33 = vmul.f32 0.2, %v1611_v41  ;;  %2138 = vrot.lane.b32.xlu1 %v4884_v29, %s4676_s8  ;;  %vm5352_vm13 = vmpackc.low %vm6991_vm12, %vm6981_vm8 }
 0x200   : > { %4345 = vpow2.f32 %v1338_v32  ;;  %v1659_v20 = vsel %vm1627_vm14, %v1611_v41, %v1643_v33  ;;  %v871_v12 = vpop.permute.xlu1 %870  ;;  %v5293_v15 = vpop.eup %4341  ;;  %4072 = vmatpush3.bf16.msra.mxu0 %v5076_v16  ;;  %v5325_v41 = vcvt.s32.f32 %v413_v56 }
 0x201   : > { %v1675_v58 = vsub.f32 0.0, %v1659_v20  ;;  %v924_v61 = vadd.f32 %v5085_v21, %v871_v12  ;;  %4073 = vmatprep.subr.bf16.mxu0 %v5082_v19  ;;  %v1725_v29 = vsel %vm6981_vm8, %v5293_v15, 0.0  ;;  %v1184_v53 = vpop.permute.xlu0 %1183 }
 0x202   : > { %1747 = vadd.xlane.f32.xlu0 %v1725_v29  ;;  %2142 = vrot.lane.b32.xlu1 %v4904_v34, %s4676_s8  ;;  %7010 = vst [vmem:[#allocation10_spill] sm:$0xff] %v5325_v41  ;;  %vm445_vm6 = vcmp.gt.f32.partialorder %v5325_v41, 0.0 }
 0x203   : > { %v1695_v10 = vmul.f32 1.442695, %v1675_v58  ;;  %v956_v51 = vmul.f32 0.2, %v924_v61  ;;  %vm940_vm0 = vcmp.gt.f32.partialorder %v924_v61, 0.0  ;;  %vm5338_vm9 = vmpackc.low %vm445_vm6, %vm6983_vm15 }
 0x204   : > { %4074 = vmatpush3.bf16.msra.mxu0 %v5082_v19  ;;  %v1250_v19 = vadd.f32 %v5092_v30, %v1184_v53 }
 0x205   : > { %v5306_v13 = vpop.eup %4343  ;;  %4347 = vpow2.f32 %v1695_v10  ;;  %v5309_v16 = vpop.permute.xlu1 %1211  ;;  %v972_v57 = vsel %vm940_vm0, %v924_v61, %v956_v51 }
 0x206   : > { %4349 = vpow2.f32 %v1697_v47  ;;  %2146 = vrot.lane.b32.xlu1 %v4935_v39, %s4676_s8  ;;  %v1033_v34 = vsel %vm6983_vm15, %v5306_v13, 0.0  ;;  %v988_v6 = vsub.f32 0.0, %v972_v57  ;;  %v1282_v3 = vmul.f32 0.2, %v1250_v19 }
 0x207   : > { %4351 = vpow2.f32 %v1701_v43  ;;  %1053 = vadd.xlane.f32.xlu0 %v1033_v34  ;;  %vm1266_vm5 = vcmp.gt.f32.partialorder %v1250_v19, 0.0  ;;  %v925_v34 = vadd.f32 %v5085_v21, %v5113_v17 }
 0x208   : > { %v1011_v32 = vmul.f32 1.442695, %v988_v6  ;;  %v1298_v10 = vsel %vm1266_vm5, %v1250_v19, %v1282_v3  ;;  %v1618_v3 = vadd.f32 %v5087_v23, %v5124_v9 }
 0x209   : > { %v1314_v57 = vsub.f32 0.0, %v1298_v10  ;;  %v957_v19 = vmul.f32 0.2, %v925_v34  ;;  %vm941_vm0 = vcmp.gt.f32.partialorder %v925_v34, 0.0 }
 0x20a   : > { %v5318_v24 = vpop.eup %4345  ;;  %v861_v27 = vpop.permute.xlu1 %860  ;;  %4353 = vpow2.f32 %v1011_v32  ;;  %v5372_v32 = vld [vmem:[%s4791_s14 + $0x10] sm:$0xff]  ;;  %v1650_v9 = vmul.f32 0.2, %v1618_v3 }
 0x20b   : > { %v922_v18 = vadd.f32 %v5085_v21, %v861_v27  ;;  %v1366_v39 = vsel %vm6983_vm15, %v5318_v24, 0.0  ;;  %v1330_v6 = vmul.f32 1.442695, %v1314_v57 }
 0x20c   : > { %1386 = vadd.xlane.f32.xlu0 %v1366_v39 }
 0x20d   : > { %vm938_vm4 = vcmp.gt.f32.partialorder %v922_v18, 0.0  ;;  %v954_v14 = vmul.f32 0.2, %v922_v18 }
 0x20f   : > { %v4348_v55 = vpop.eup %4347  ;;  %v970_v33 = vsel %vm938_vm4, %v922_v18, %v954_v14  ;;  %v5329_v62 = vpop.permute.xlu1 %1203  ;;  %v973_v14 = vsel %vm941_vm0, %v925_v34, %v957_v19  ;;  %v416_v34 = vunpack.c.0.s8 %v5372_v32  ;;  %vm1634_vm4 = vcmp.gt.f32.partialorder %v1618_v3, 0.0 }
 0x210   : > { %v5332_v20 = vpop.eup %4349  ;;  %v986_v12 = vsub.f32 0.0, %v970_v33  ;;  %v1723_v47 = vsel %vm6983_vm15, %v4348_v55, 0.0  ;;  %v989_v10 = vsub.f32 0.0, %v973_v14 }
 0x211   : > { %v5343_v61 = vpop.eup %4351  ;;  %v3700_v29 = vpack.c.bf16 %v5332_v20, %v4348_v55  ;;  %1743 = vadd.xlane.f32.xlu0 %v1723_v47  ;;  %v1616_v55 = vadd.f32 %v5087_v23, %v5136_v48  ;;  %v418_v47 = vunpack.c.2.s8 %v5372_v32 }
 0x212   : > { %v1007_v51 = vmul.f32 1.442695, %v986_v12  ;;  %v3703_v53 = vpack.c.bf16 %v5343_v61, %v5293_v15  ;;  %v1220_v15 = vpop.permute.xlu0 %1219 }
 0x213   : > { %4113 = vmatprep.mubr.msk.bf16.mxu1 %vm5338_vm9, %v3700_v29  ;;  %vm1632_vm5 = vcmp.gt.f32.partialorder %v1616_v55, 0.0 }
 0x214   : > { %4355 = vpow2.f32 %v1007_v51  ;;  %4114 = vmatmul.mubr.msk.bf16.gmra.mrb[8].mxu1 %vm5352_vm13, %v3703_v53  ;;  %v886_v56 = vpop.permute.xlu1 %885  ;;  %v5374_v12 = vpop.eup %4353 }
 0x215   : > { %v927_v22 = vadd.f32 %v5085_v21, %v886_v56  ;;  %4357 = vpow2.f32 %v1330_v6  ;;  %v1648_v56 = vmul.f32 0.2, %v1616_v55  ;;  %v3655_v19 = vpack.c.bf16 %v5374_v12, %v5265_v63 }
 0x216   : > { %v1228_v51 = vpop.permute.xlu0 %1227 }
 0x217   : > { %vm943_vm14 = vcmp.gt.f32.partialorder %v927_v22, 0.0  ;;  %v959_v27 = vmul.f32 0.2, %v927_v22  ;;  %v1664_v14 = vsel %vm1632_vm5, %v1616_v55, %v1648_v56 }
 0x219   : > { %v975_v17 = vsel %vm943_vm14, %v927_v22, %v959_v27  ;;  %v5365_v18 = vpop.permute.xlu1 %1223  ;;  %v1261_v22 = vadd.f32 %v5092_v30, %v1228_v51  ;;  %v1257_v27 = vadd.f32 %v5092_v30, %v5309_v16  ;;  %v1259_v16 = vadd.f32 %v5092_v30, %v1220_v15 }
 0x21a   : > { %v991_v39 = vsub.f32 0.0, %v975_v17  ;;  %v5390_v17 = vcvt.s32.f32 %v418_v47  ;;  %v5397_v5 = vpop.permute.xlu0 %1243  ;;  %v1680_v15 = vsub.f32 0.0, %v1664_v14 }
 0x21b   : > { %vm1277_vm0 = vcmp.gt.f32.partialorder %v1261_v22, 0.0  ;;  %vm1273_vm5 = vcmp.gt.f32.partialorder %v1257_v27, 0.0 }
 0x21c   : > { %v1017_v33 = vmul.f32 1.442695, %v991_v39  ;;  %7016 = vst [vmem:[#allocation12_spill] sm:$0xff] %v5390_v17  ;;  %v1013_v39 = vmul.f32 1.442695, %v989_v10  ;;  %vm6999_vm8 = vcmp.gt.f32.partialorder %v5390_v17, 0.0  ;;  %v5401_v10 = vcvt.s32.f32 %v416_v34 }
 0x21e   : > { %v5377_v29 = vpop.eup %4355  ;;  %4359 = vpow2.f32 %v1017_v33  ;;  %v1581_v53 = vpop.permute.xlu1 %1580  ;;  %v931_v33 = vadd.f32 %v5085_v21, %v5149_v4  ;;  %7017 = vst [vmem:[#allocation13_spill] sm:$0xff] %v5401_v10 }
 0x21f   : > { %v1617_v48 = vadd.f32 %v5087_v23, %v1581_v53  ;;  %v3652_v57 = vpack.c.bf16 %v5377_v29, %v5306_v13  ;;  %v1666_v13 = vsel %vm1634_vm4, %v1618_v3, %v1650_v9  ;;  %v1293_v53 = vmul.f32 0.2, %v1261_v22  ;;  %v5403_v9 = vpop.eup %4357  ;;  %v5411_v14 = vpop.permute.xlu0 %1235 }
 0x220   : > { %v1682_v3 = vsub.f32 0.0, %v1666_v13  ;;  %4361 = vpow2.f32 %v1013_v39  ;;  %v963_v56 = vmul.f32 0.2, %v931_v33  ;;  %vm947_vm15 = vcmp.gt.f32.partialorder %v931_v33, 0.0 }
 0x221   : > { %vm1633_vm14 = vcmp.gt.f32.partialorder %v1617_v48, 0.0  ;;  %v1649_v6 = vmul.f32 0.2, %v1617_v48  ;;  %4049 = vmatprep.mubr.msk.bf16.mxu0 %vm5338_vm9, %v3652_v57  ;;  %v1289_v57 = vmul.f32 0.2, %v1257_v27 }
 0x222   : > { %4050 = vmatmul.mubr.msk.bf16.gmra.mrb[20].mxu0 %vm5352_vm13, %v3655_v19  ;;  %v1291_v19 = vmul.f32 0.2, %v1259_v16  ;;  %v1709_v49 = vmul.f32 1.442695, %v1682_v3  ;;  %v419_v3 = vunpack.c.3.s8 %v5372_v32 }
 0x223   : > { %v1665_v63 = vsel %vm1633_vm14, %v1617_v48, %v1649_v6  ;;  %v1216_v51 = vpop.permute.xlu1 %1215  ;;  %v1309_v6 = vsel %vm1277_vm0, %v1261_v22, %v1293_v53  ;;  %vm1275_vm14 = vcmp.gt.f32.partialorder %v1259_v16, 0.0  ;;  %v1305_v39 = vsel %vm1273_vm5, %v1257_v27, %v1289_v57 }
 0x224   : > { %v1681_v59 = vsub.f32 0.0, %v1665_v63  ;;  %v1258_v47 = vadd.f32 %v5092_v30, %v1216_v51  ;;  %v1362_v22 = vsel %vm6993_vm10, %v5403_v9, 0.0  ;;  %v1325_v53 = vsub.f32 0.0, %v1309_v6 }
 0x225   : > { %v979_v27 = vsel %vm947_vm15, %v931_v33, %v963_v56  ;;  %v1321_v57 = vsub.f32 0.0, %v1305_v39  ;;  %v1255_v6 = vadd.f32 %v5092_v30, %v5329_v62  ;;  %vm6987_vm15 = vcmp.gt.f32.partialorder %v5401_v10, 0.0 }
 0x226   : > { %v1707_v55 = vmul.f32 1.442695, %v1681_v59  ;;  %vm1274_vm4 = vcmp.gt.f32.partialorder %v1258_v47, 0.0  ;;  %v1290_v4 = vmul.f32 0.2, %v1258_v47  ;;  %v995_v39 = vsub.f32 0.0, %v979_v27 }
 0x227   : > { %vm1271_vm5 = vcmp.gt.f32.partialorder %v1255_v6, 0.0 }
 0x228   : > { %v5405_v48 = vpop.eup %4359  ;;  %4363 = vpow2.f32 %v1707_v55  ;;  %v1306_v63 = vsel %vm1274_vm4, %v1258_v47, %v1290_v4  ;;  %v1573_v51 = vpop.permute.xlu1 %1572  ;;  %v1705_v4 = vmul.f32 1.442695, %v1680_v15 }
 0x229   : > { %v1322_v34 = vsub.f32 0.0, %v1306_v63  ;;  %v1615_v13 = vadd.f32 %v5087_v23, %v1573_v51  ;;  %v1039_v59 = vsel %vm6999_vm8, %v5405_v48, 0.0  ;;  %v1307_v63 = vsel %vm1275_vm14, %v1259_v16, %v1291_v19 }
 0x22a   : > { %1065 = vadd.xlane.f32.xlu0 %v1039_v59  ;;  %1378 = vadd.xlane.f32.xlu1 %v1362_v22  ;;  %v417_v51 = vunpack.c.1.s8 %v5372_v32  ;;  %v1323_v16 = vsub.f32 0.0, %v1307_v63  ;;  %v1352_v19 = vmul.f32 1.442695, %v1325_v53  ;;  %v1593_v32 = vpop.permute.xlu0 %1592  ;;  %v1344_v22 = vmul.f32 1.442695, %v1321_v57 }
 0x22b   : > { %v1346_v47 = vmul.f32 1.442695, %v1322_v34  ;;  %vm1631_vm0 = vcmp.gt.f32.partialorder %v1615_v13, 0.0  ;;  %v1647_v55 = vmul.f32 0.2, %v1615_v13  ;;  %v1620_v62 = vadd.f32 %v5087_v23, %v1593_v32 }
 0x22c   : > { %v1260_v57 = vadd.f32 %v5092_v30, %v5365_v18 }
 0x22d   : > { %v1663_v8 = vsel %vm1631_vm0, %v1615_v13, %v1647_v55  ;;  %v891_v59 = vpop.permute.xlu1 %890  ;;  %4365 = vpow2.f32 %v1346_v47  ;;  %v5426_v13 = vpop.eup %4361  ;;  %vm1636_vm0 = vcmp.gt.f32.partialorder %v1620_v62, 0.0 }
 0x22e   : > { %v1679_v34 = vsub.f32 0.0, %v1663_v8  ;;  %v928_v15 = vadd.f32 %v5085_v21, %v891_v59  ;;  %4367 = vpow2.f32 %v1709_v49  ;;  %1384 = vadd.xlane.f32.xlu1 %v1365_v50  ;;  %v1722_v49 = vsel %vm6986_vm11, %v5241_v26, 0.0  ;;  %v5528_v38 = vpop.permute.xlu0 %1925 }
 0x22f   : > { %4369 = vpow2.f32 %v1705_v4  ;;  %v1287_v50 = vmul.f32 0.2, %v1255_v6  ;;  %v1348_v4 = vmul.f32 1.442695, %v1323_v16  ;;  %v1030_v59 = vsel %vm6988_vm1, %v5195_v35, 0.0 }
 0x230   : > { %v1703_v33 = vmul.f32 1.442695, %v1679_v34  ;;  %vm944_vm4 = vcmp.gt.f32.partialorder %v928_v15, 0.0  ;;  %v960_v56 = vmul.f32 0.2, %v928_v15  ;;  %v5443_v34 = vcvt.s32.f32 %v417_v51 }
 0x231   : > { %v881_v8 = vpop.permute.xlu1 %880  ;;  %v1652_v16 = vmul.f32 0.2, %v1620_v62  ;;  %v1037_v18 = vsel %vm6987_vm15, %v5426_v13, 0.0  ;;  %v1292_v35 = vmul.f32 0.2, %v1260_v57  ;;  %v5451_v51 = vcvt.s32.f32 %v419_v3 }
 0x232   : > { %v5432_v53 = vpop.eup %4363  ;;  %4371 = vpow2.f32 %v1703_v33  ;;  %v976_v47 = vsel %vm944_vm4, %v928_v15, %v960_v56  ;;  %v926_v55 = vadd.f32 %v5085_v21, %v881_v8  ;;  %1741 = vadd.xlane.f32.xlu1 %v1722_v49  ;;  %v1303_v15 = vsel %vm1271_vm5, %v1255_v6, %v1287_v50 }
 0x233   : > { %v992_v63 = vsub.f32 0.0, %v976_v47  ;;  %v1729_v27 = vsel %vm6999_vm8, %v5432_v53, 0.0  ;;  %4373 = vpow2.f32 %v1352_v19  ;;  %v1025_v49 = vmul.f32 1.442695, %v995_v39 }
 0x234   : > { %vm942_vm14 = vcmp.gt.f32.partialorder %v926_v55, 0.0  ;;  %v958_v26 = vmul.f32 0.2, %v926_v55  ;;  %1755 = vadd.xlane.f32.xlu0 %v1729_v27  ;;  %4375 = vpow2.f32 %v1344_v22  ;;  %v1319_v50 = vsub.f32 0.0, %v1303_v15 }
 0x235   : > { %v1019_v32 = vmul.f32 1.442695, %v992_v63  ;;  %4377 = vpow2.f32 %v1348_v4  ;;  %v1668_v27 = vsel %vm1636_vm0, %v1620_v62, %v1652_v16  ;;  %vm1276_vm5 = vcmp.gt.f32.partialorder %v1260_v57, 0.0  ;;  %v5479_v16 = vld [vmem:[%s4791_s14 + $0x18] sm:$0xff] }
 0x236   : > { %v974_v33 = vsel %vm942_vm14, %v926_v55, %v958_v26  ;;  %v1240_v56 = vpop.permute.xlu1 %1239  ;;  %1047 = vadd.xlane.f32.xlu1 %v1030_v59  ;;  %v1720_v3 = vsel %vm6988_vm1, %v5246_v28, 0.0  ;;  %vm6994_vm14 = vcmp.gt.f32.partialorder %v5443_v34, 0.0  ;;  %v929_v62 = vadd.f32 %v5085_v21, %v5163_v25  ;;  %v7031_v28 = vld [vmem:[#allocation5_spill] sm:$0xff] }
 0x237   : > { %v990_v19 = vsub.f32 0.0, %v974_v33  ;;  %v1264_v8 = vadd.f32 %v5092_v30, %v1240_v56  ;;  %v5449_v22 = vpop.eup %4365  ;;  %4379 = vpow2.f32 %v1019_v32  ;;  %vm5473_vm0 = vmpackc.low %vm6994_vm14, %vm6987_vm15  ;;  %v1340_v32 = vmul.f32 1.442695, %v1319_v50 }
 0x238   : > { %1061 = vadd.xlane.f32.xlu0 %v1037_v18  ;;  %v5453_v6 = vpop.eup %4367  ;;  %v1370_v4 = vsel %vm6987_vm15, %v5449_v22, 0.0  ;;  %v1684_v33 = vsub.f32 0.0, %v1668_v27  ;;  %v1308_v56 = vsel %vm1276_vm5, %v1260_v57, %v1292_v35  ;;  %v1036_v50 = vsel %vm6991_vm12, %v5374_v12, 0.0 }
 0x239   : > { %v1015_v47 = vmul.f32 1.442695, %v990_v19  ;;  %vm1280_vm4 = vcmp.gt.f32.partialorder %v1264_v8, 0.0  ;;  %v1296_v55 = vmul.f32 0.2, %v1264_v8  ;;  %v5455_v63 = vpop.eup %4369  ;;  %v3709_v57 = vpack.c.bf16 %v5453_v6, %v5432_v53 }
 0x23a   : > { %v5458_v26 = vpop.permute.xlu1 %1231  ;;  %1737 = vadd.xlane.f32.xlu1 %v1720_v3  ;;  %v1622_v27 = vadd.f32 %v5087_v23, %v5177_v36  ;;  %v1324_v3 = vsub.f32 0.0, %v1308_v56  ;;  %vm945_vm5 = vcmp.gt.f32.partialorder %v929_v62, 0.0  ;;  %v961_v53 = vmul.f32 0.2, %v929_v62 }
 0x23b   : > { %4381 = vpow2.f32 %v1015_v47  ;;  %v1312_v39 = vsel %vm1280_vm4, %v1264_v8, %v1296_v55  ;;  %vm6998_vm4 = vcmp.gt.f32.partialorder %v5451_v51, 0.0 }
 0x23c   : > { %v4372_v59 = vpop.eup %4371  ;;  %v1328_v15 = vsub.f32 0.0, %v1312_v39  ;;  %1394 = vadd.xlane.f32.xlu0 %v1370_v4  ;;  %vm5487_vm11 = vmpackc.low %vm6998_vm4, %vm6999_vm8  ;;  %4383 = vpow2.f32 %v1025_v49  ;;  %v422_v49 = vunpack.c.2.s8 %v5479_v16  ;;  %v1713_v39 = vmul.f32 1.442695, %v1684_v33 }
 0x23d   : > { %v3706_v25 = vpack.c.bf16 %v5455_v63, %v4372_v59  ;;  %v5491_v8 = vpop.eup %4373  ;;  %v1727_v55 = vsel %vm6987_vm15, %v4372_v59, 0.0  ;;  %4385 = vpow2.f32 %v1340_v32  ;;  %v1654_v33 = vmul.f32 0.2, %v1622_v27 }
 0x23e   : > { %v1358_v18 = vmul.f32 1.442695, %v1328_v15  ;;  %v5498_v35 = vpop.eup %4375  ;;  %1059 = vadd.xlane.f32.xlu1 %v1036_v50  ;;  %v1373_v15 = vsel %vm6998_vm4, %v5491_v8, 0.0  ;;  %v5518_v56 = vcvt.s32.f32 %v422_v49  ;;  %v1350_v50 = vmul.f32 1.442695, %v1324_v3 }
 0x23f   : > { %v1589_v47 = vpop.permute.xlu1 %1588  ;;  %4117 = vmatprep.mubr.msk.bf16.mxu1 %vm5473_vm0, %v3706_v25  ;;  %v5510_v4 = vpop.eup %4377  ;;  %v1369_v36 = vsel %vm6991_vm12, %v5498_v35, 0.0  ;;  %v420_v25 = vunpack.c.0.s8 %v5479_v16  ;;  %vm1638_vm1 = vcmp.gt.f32.partialorder %v1622_v27, 0.0  ;;  %v1726_v3 = vsel %vm6991_vm12, %v5343_v61, 0.0 }
 0x240   : > { %v1619_v12 = vadd.f32 %v5087_v23, %v1589_v47  ;;  %4118 = vmatmul.mubr.msk.bf16.gmra.mrb[12].mxu1 %vm5487_vm11, %v3709_v57  ;;  %1751 = vadd.xlane.f32.xlu0 %v1727_v55  ;;  %4387 = vpow2.f32 %v1358_v18  ;;  %v421_v47 = vunpack.c.1.s8 %v5479_v16 }
 0x241   : > { %v5521_v32 = vpop.eup %4379  ;;  %4389 = vpow2.f32 %v1713_v39 }
 0x242   : > { %vm1635_vm15 = vcmp.gt.f32.partialorder %v1619_v12, 0.0  ;;  %v1651_v59 = vmul.f32 0.2, %v1619_v12  ;;  %1392 = vadd.xlane.f32.xlu1 %v1369_v36  ;;  %v977_v36 = vsel %vm945_vm5, %v929_v62, %v961_v53  ;;  %v3661_v53 = vpack.c.bf16 %v5521_v32, %v5405_v48 }
 0x243   : > { %4391 = vpow2.f32 %v1350_v50  ;;  %vm7000_vm5 = vcmp.gt.f32.partialorder %v5518_v56, 0.0  ;;  %v5548_v48 = vcvt.s32.f32 %v420_v25  ;;  %v1034_v50 = vsel %vm445_vm6, %v5377_v29, 0.0 }
 0x244   : > { %v1667_v18 = vsel %vm1635_vm15, %v1619_v12, %v1651_v59  ;;  %v911_v57 = vpop.permute.xlu1 %910  ;;  %1400 = vadd.xlane.f32.xlu0 %v1373_v15  ;;  %v1371_v59 = vsel %vm6994_vm14, %v5510_v4, 0.0 }
 0x245   : > { %v5524_v55 = vpop.eup %4381  ;;  %v1683_v10 = vsub.f32 0.0, %v1667_v18  ;;  %v932_v49 = vadd.f32 %v5085_v21, %v911_v57  ;;  %v993_v18 = vsub.f32 0.0, %v977_v36  ;;  %v1670_v57 = vsel %vm1638_vm1, %v1622_v27, %v1654_v33 }
 0x246   : > { %v3658_v12 = vpack.c.bf16 %v5524_v55, %v5426_v13  ;;  %1749 = vadd.xlane.f32.xlu1 %v1726_v3  ;;  %v5540_v39 = vpop.eup %4383  ;;  %v5550_v3 = vpop.permute.xlu0 %1957  ;;  %v1262_v27 = vadd.f32 %v5092_v30, %v5458_v26  ;;  %v5557_v36 = vcvt.s32.f32 %v421_v47 }
 0x247   : > { %v1711_v15 = vmul.f32 1.442695, %v1683_v10  ;;  %vm948_vm15 = vcmp.gt.f32.partialorder %v932_v49, 0.0  ;;  %v964_v62 = vmul.f32 0.2, %v932_v49  ;;  %v1043_v25 = vsel %vm7000_vm5, %v5540_v39, 0.0 }
 0x248   : > { %4053 = vmatprep.mubr.msk.bf16.mxu0 %vm5473_vm0, %v3658_v12  ;;  %1396 = vadd.xlane.f32.xlu0 %v1371_v59  ;;  %v901_v61 = vpop.permute.xlu1 %900  ;;  %v1021_v26 = vmul.f32 1.442695, %v993_v18  ;;  %vm1278_vm12 = vcmp.gt.f32.partialorder %v1262_v27, 0.0 }
 0x249   : > { %4393 = vpow2.f32 %v1711_v15  ;;  %v980_v10 = vsel %vm948_vm15, %v932_v49, %v964_v62  ;;  %v930_v13 = vadd.f32 %v5085_v21, %v901_v61  ;;  %4054 = vmatmul.mubr.msk.bf16.gmra.mrb[24].mxu0 %vm5487_vm11, %v3661_v53  ;;  %v5559_v49 = vpop.eup %4385  ;;  %v1686_v21 = vsub.f32 0.0, %v1670_v57 }
 0x24a   : > { %v996_v33 = vsub.f32 0.0, %v980_v10  ;;  %1055 = vadd.xlane.f32.xlu1 %v1034_v50  ;;  %v5564_v59 = vpop.eup %4387  ;;  %v1265_v15 = vadd.f32 %v5092_v30, %v5397_v5  ;;  %vm452_vm15 = vcmp.gt.f32.partialorder %v5548_v48, 0.0  ;;  %v1294_v53 = vmul.f32 0.2, %v1262_v27 }
 0x24b   : > { %vm946_vm1 = vcmp.gt.f32.partialorder %v930_v13, 0.0  ;;  %v962_v12 = vmul.f32 0.2, %v930_v13  ;;  %v1367_v10 = vsel %vm445_vm6, %v5559_v49, 0.0  ;;  %v1717_v50 = vmul.f32 1.442695, %v1686_v21  ;;  %v5577_v18 = vpop.eup %4389 }
 0x24c   : > { %1073 = vadd.xlane.f32.xlu0 %v1043_v25  ;;  %v1027_v29 = vmul.f32 1.442695, %v996_v33  ;;  %v1376_v5 = vsel %vm7000_vm5, %v5564_v59, 0.0  ;;  %4395 = vpow2.f32 %v1021_v26  ;;  %v1964_v21 = vadd.f32 %v5044_v7, %v5191_v2 }
 0x24d   : > { %v978_v47 = vsel %vm946_vm1, %v930_v13, %v962_v12  ;;  %v1597_v62 = vpop.permute.xlu1 %1596  ;;  %vm453_vm1 = vcmp.gt.f32.partialorder %v5557_v36, 0.0  ;;  %v5579_v13 = vpop.permute.xlu0 %1949  ;;  %v1973_v12 = vadd.f32 %v5044_v7, %v5206_v42  ;;  %v1297_v26 = vmul.f32 0.2, %v1265_v15 }
 0x24e   : > { %v994_v57 = vsub.f32 0.0, %v978_v47  ;;  %v1621_v61 = vadd.f32 %v5087_v23, %v1597_v62  ;;  %1388 = vadd.xlane.f32.xlu1 %v1367_v10  ;;  %4397 = vpow2.f32 %v1027_v29  ;;  %v1724_v47 = vsel %vm445_vm6, %v5332_v20, 0.0  ;;  %v5588_v62 = vpop.eup %4391  ;;  %vm5597_vm14 = vmpackc.low %vm453_vm1, %vm452_vm15 }
 0x24f   : > { %vm1281_vm10 = vcmp.gt.f32.partialorder %v1265_v15, 0.0  ;;  %v423_v29 = vunpack.c.3.s8 %v5479_v16 }
 0x250   : > { %v1023_v33 = vmul.f32 1.442695, %v994_v57  ;;  %vm1637_vm7 = vcmp.gt.f32.partialorder %v1621_v61, 0.0  ;;  %v1653_v23 = vmul.f32 0.2, %v1621_v61  ;;  %1406 = vadd.xlane.f32.xlu0 %v1376_v5  ;;  %v1310_v57 = vsel %vm1278_vm12, %v1262_v27, %v1294_v53 }
 0x251   : > { %v1433_v25 = vpop.permute.xlu1 %1432  ;;  %v5601_v20 = vpop.permute.xlu0 %2140  ;;  %v1996_v53 = vmul.f32 0.2, %v1964_v21  ;;  %vm1989_vm12 = vcmp.gt.f32.partialorder %v1973_v12, 0.0  ;;  %v5618_v16 = vcvt.s32.f32 %v423_v29 }
 0x252   : > { %4399 = vpow2.f32 %v1023_v33  ;;  %v1669_v10 = vsel %vm1637_vm7, %v1621_v61, %v1653_v23  ;;  %4075 = vmatprep.subr.bf16.mxu0 %v1433_v25  ;;  %1745 = vadd.xlane.f32.xlu1 %v1724_v47  ;;  %vm1980_vm7 = vcmp.gt.f32.partialorder %v1964_v21, 0.0  ;;  %v1326_v61 = vsub.f32 0.0, %v1310_v57 }
 0x253   : > { %v5591_v5 = vpop.eup %4393  ;;  %v1685_v2 = vsub.f32 0.0, %v1669_v10  ;;  %4076 = vmatpush3.bf16.msra.mxu0 %v1433_v25  ;;  %4401 = vpow2.f32 %v1717_v50  ;;  %v2005_v25 = vmul.f32 0.2, %v1973_v12  ;;  %v1313_v47 = vsel %vm1281_vm10, %v1265_v15, %v1297_v26 }
 0x254   : > { %v3712_v27 = vpack.c.bf16 %v5577_v18, %v5591_v5  ;;  %v1263_v10 = vadd.f32 %v5092_v30, %v5411_v14  ;;  %v1372_v50 = vsel %vm6999_vm8, %v5588_v62, 0.0  ;;  %v2012_v30 = vsel %vm1980_vm7, %v1964_v21, %v1996_v53 }
 0x255   : > { %v1715_v33 = vmul.f32 1.442695, %v1685_v2  ;;  %v5606_v23 = vpop.permute.xlu1 %2132  ;;  %v1329_v14 = vsub.f32 0.0, %v1313_v47  ;;  %v1354_v15 = vmul.f32 1.442695, %v1326_v61  ;;  %v2021_v2 = vsel %vm1989_vm12, %v1973_v12, %v2005_v25  ;;  %v5621_v17 = vpop.permute.xlu0 %2144 }
 0x256   : > { %4121 = vmatprep.mubr.msk.bf16.mxu1 %vm5597_vm14, %v3712_v27  ;;  %4125 = vmatprep.subr.bf16.mxu0 %v5606_v23  ;;  %v4396_v57 = vpop.eup %4395  ;;  %v1295_v27 = vmul.f32 0.2, %v1263_v10  ;;  %vm1279_vm10 = vcmp.gt.f32.partialorder %v1263_v10, 0.0  ;;  %v2028_v31 = vsub.f32 0.0, %v2012_v30  ;;  %vm455_vm7 = vcmp.gt.f32.partialorder %v5618_v16, 0.0 }
 0x257   : > { %4403 = vpow2.f32 %v1715_v33  ;;  %1398 = vadd.xlane.f32.xlu1 %v1372_v50  ;;  %4157 = vmatprep.subr.bf16.mxu1 %v5606_v23  ;;  %v1040_v33 = vsel %vm6998_vm4, %v5521_v32, 0.0  ;;  %v2037_v21 = vsub.f32 0.0, %v2021_v2  ;;  %v1360_v53 = vmul.f32 1.442695, %v1329_v14  ;;  %vm5636_vm12 = vmpackc.low %vm455_vm7, %vm7000_vm5 }
 0x258   : > { %4165 = vmatpush3.bf16.msra.mxu1 %v5606_v23  ;;  %v5626_v50 = vpop.eup %4397  ;;  %4405 = vpow2.f32 %v1354_v15  ;;  %v1311_v47 = vsel %vm1279_vm10, %v1263_v10, %v1295_v27  ;;  %v1730_v14 = vsel %vm6998_vm4, %v5453_v6, 0.0  ;;  %v3670_v2 = vpack.c.bf16 %v5224_v60, %v5403_v9 }
 0x259   : > { %v1902_v26 = vpop.permute.xlu1 %1901  ;;  %v3667_v15 = vpack.c.bf16 %v5626_v50, %v5540_v39  ;;  %v5652_v41 = vpop.xlane.xlu0 %1049  ;;  %4407 = vpow2.f32 %v1360_v53  ;;  %v1327_v39 = vsub.f32 0.0, %v1311_v47  ;;  %vm7026_vm4 = vcmp.gt.f32.partialorder %v5443_v34, 0.0 }
 0x25a   : > { %v1965_v10 = vadd.f32 %v5044_v7, %v1902_v26  ;;  %v1038_v60 = vsel %vm7026_vm4, %v5524_v55, 0.0  ;;  %v1967_v55 = vadd.f32 %v5044_v7, %v5239_v44 }
 0x25b   : > { %1067 = vadd.xlane.f32.xlu1 %v1040_v33  ;;  %v2044_v33 = vmul.f32 1.442695, %v2028_v31 }
 0x25c   : > { %v5628_v29 = vpop.eup %4399  ;;  %vm1981_vm4 = vcmp.gt.f32.partialorder %v1965_v10, 0.0 }
 0x25d   : > { %v1930_v12 = vpop.permute.xlu1 %1929  ;;  %v3664_v61 = vpack.c.bf16 %v5628_v29, %v4396_v57  ;;  %v5640_v25 = vpop.eup %4401  ;;  %4409 = vpow2.f32 %v2044_v33 }
 0x25e   : > { %v1972_v30 = vadd.f32 %v5044_v7, %v1930_v12  ;;  %v2062_v12 = vmul.f32 1.442695, %v2037_v21  ;;  %v1997_v21 = vmul.f32 0.2, %v1965_v10  ;;  %v5675_v33 = vpop.xlane.xlu0 %1382 }
 0x25f   : > { %1757 = vadd.xlane.f32.xlu1 %v1730_v14  ;;  %4057 = vmatprep.mubr.msk.bf16.mxu0 %vm5597_vm14, %v3664_v61 }
 0x260   : > { %vm1988_vm10 = vcmp.gt.f32.partialorder %v1972_v30, 0.0  ;;  %v2004_v27 = vmul.f32 0.2, %v1972_v30  ;;  %4058 = vmatmul.mubr.msk.bf16.gmra.mrb[28].mxu0 %vm5636_vm12, %v3667_v15  ;;  %4411 = vpow2.f32 %v2062_v12  ;;  %v1999_v12 = vmul.f32 0.2, %v1967_v55 }
 0x261   : > { %v4404_v6 = vpop.eup %4403  ;;  %4077 = vmatprep.mubr.msk.bf16.mxu0 %vm5202_vm2, %v3670_v2  ;;  %v1906_v61 = vpop.permute.xlu1 %1905 }
 0x262   : > { %v2020_v31 = vsel %vm1988_vm10, %v1972_v30, %v2004_v27  ;;  %v1966_v9 = vadd.f32 %v5044_v7, %v1906_v61  ;;  %v1733_v26 = vsel %vm7000_vm5, %v4404_v6, 0.0  ;;  %v3715_v14 = vpack.c.bf16 %v5640_v25, %v4404_v6 }
 0x263   : > { %v2036_v15 = vsub.f32 0.0, %v2020_v31  ;;  %1063 = vadd.xlane.f32.xlu1 %v1038_v60  ;;  %1763 = vadd.xlane.f32.xlu0 %v1733_v26  ;;  %vm7027_vm10 = vcmp.gt.f32.partialorder %v5443_v34, 0.0  ;;  %v1356_v27 = vmul.f32 1.442695, %v1327_v39  ;;  %v1041_v61 = vsel %vm452_vm15, %v4396_v57, 0.0  ;;  %v5679_v60 = vpop.eup %4405 }
 0x264   : > { %vm1982_vm8 = vcmp.gt.f32.partialorder %v1966_v9, 0.0  ;;  %v1998_v53 = vmul.f32 0.2, %v1966_v9  ;;  %4122 = vmatmul.mubr.msk.bf16.gmra.mrb[16].mxu1 %vm5636_vm12, %v3715_v14  ;;  %v1728_v2 = vsel %vm7027_vm10, %v5455_v63, 0.0  ;;  %v3676_v31 = vpack.c.bf16 %v5559_v49, %v5318_v24  ;;  %v5701_v49 = vpop.xlane.xlu0 %1739 }
 0x265   : > { %v2060_v47 = vmul.f32 1.442695, %v2036_v15  ;;  %v5670_v30 = vpop.permute.xlu1 %1937  ;;  %v2013_v26 = vsel %vm1981_vm4, %v1965_v10, %v1997_v21  ;;  %v7028_v63 = vpack.c.bf16 %v5180_v45, %v5128_v37  ;;  %v1969_v57 = vadd.f32 %v5044_v7, %v5295_v0  ;;  %v5699_v0 = vpop.eup %4407 }
 0x266   : > { %v2014_v6 = vsel %vm1982_vm8, %v1966_v9, %v1998_v53  ;;  %vm1983_vm8 = vcmp.gt.f32.partialorder %v1967_v55, 0.0  ;;  %v1044_v37 = vsel %vm455_vm7, %v5626_v50, 0.0  ;;  %v1374_v45 = vsel %vm452_vm15, %v5679_v60, 0.0 }
 0x267   : > { %4413 = vpow2.f32 %v2060_v47  ;;  %v2030_v44 = vsub.f32 0.0, %v2014_v6  ;;  %1753 = vadd.xlane.f32.xlu1 %v1728_v2  ;;  %1069 = vadd.xlane.f32.xlu0 %v1041_v61  ;;  %v2029_v24 = vsub.f32 0.0, %v2013_v26  ;;  %vm1985_vm4 = vcmp.gt.f32.partialorder %v1969_v57, 0.0  ;;  %v5706_v15 = vpop.eup %4409 }
 0x268   : > { %4078 = vmatmul.mubr.msk.bf16.vlgmr.msra.gmra.mrb[32].mxu0 %vm5214_vm3, %v7028_v63  ;;  %4415 = vpow2.f32 %v1356_v27  ;;  %v2001_v10 = vmul.f32 0.2, %v1969_v57  ;;  %v1971_v50 = vadd.f32 %v5044_v7, %v5528_v38  ;;  %v1377_v53 = vsel %vm455_vm7, %v5699_v0, 0.0  ;;  %v5741_v26 = vpop.xlane.xlu0 %1045 }
 0x269   : > { %v2048_v39 = vmul.f32 1.442695, %v2030_v44  ;;  %4126 = vmatpush3.bf16.msra.mxu0 %v5606_v23  ;;  %4081 = vmatprep.mubr.msk.bf16.mxu0 %vm5338_vm9, %v3676_v31  ;;  %v2135_v9 = vpop.permute.xlu1 %2134  ;;  %v2015_v23 = vsel %vm1983_vm8, %v1967_v55, %v1999_v12  ;;  %v1731_v55 = vsel %vm452_vm15, %v5591_v5, 0.0  ;;  %v3679_v38 = vpack.c.bf16 %v5498_v35, %v5277_v52 }
 0x26a   : > { %4127 = vmatprep.subr.bf16.mxu0 %v2135_v9  ;;  %4158 = vmatprep.subr.bf16.mxu1 %v2135_v9  ;;  %v2046_v47 = vmul.f32 1.442695, %v2029_v24  ;;  %v3682_v2 = vpack.c.bf16 %v5510_v4, %v5449_v22  ;;  %v5720_v27 = vpop.eup %4411  ;;  %v2031_v6 = vsub.f32 0.0, %v2015_v23  ;;  %v5724_v61 = vadd.f32 %v5044_v7, %v5259_v1  ;;  %v7029_v4 = vld [vmem:[#allocation6_spill] sm:$0xff] }
 0x26b   : > { %4417 = vpow2.f32 %v2048_v39  ;;  %1075 = vadd.xlane.f32.xlu1 %v1044_v37  ;;  %1402 = vadd.xlane.f32.xlu0 %v1374_v45  ;;  %v2017_v35 = vsel %vm1985_vm4, %v1969_v57, %v2001_v10  ;;  %v2003_v5 = vmul.f32 0.2, %v1971_v50  ;;  %v1734_v1 = vsel %vm455_vm7, %v5640_v25, 0.0 }
 0x26c   : > { %4166 = vmatpush3.bf16.msra.mxu1 %v2135_v9  ;;  %vm7030_vm8 = vcmp.gt.f32.partialorder %v7029_v4, 0.0  ;;  %vm1987_vm5 = vcmp.gt.f32.partialorder %v1971_v50, 0.0  ;;  %v1974_v63 = vadd.f32 %v5044_v7, %v5670_v30  ;;  %4419 = vpow2.f32 %v2046_v47  ;;  %v5767_v47 = vpop.xlane.xlu0 %1735 }
 0x26d   : > { %4128 = vmatpush3.bf16.msra.mxu0 %v2135_v9  ;;  %4159 = vmatprep.subr.bf16.mxu1 %v5279_v54  ;;  %v1914_v14 = vpop.permute.xlu1 %1913  ;;  %v2076_v31 = vsel %vm7030_vm8, %v5706_v15, 0.0  ;;  %v2050_v9 = vmul.f32 1.442695, %v2031_v6  ;;  %vm1991_vm4 = vcmp.gt.f32.partialorder %v5724_v61, 0.0  ;;  %v2033_v37 = vsub.f32 0.0, %v2017_v35 }
 0x26e   : > { %4129 = vmatprep.subr.bf16.mxu0 %v5279_v54  ;;  %v1968_v21 = vadd.f32 %v5044_v7, %v1914_v14  ;;  %v2019_v30 = vsel %vm1987_vm5, %v1971_v50, %v2003_v5  ;;  %v1977_v24 = vadd.f32 %v5044_v7, %v5579_v13  ;;  %v3685_v10 = vpack.c.bf16 %v5491_v8, %v5588_v62 }
 0x26f   : > { %1408 = vadd.xlane.f32.xlu1 %v1377_v53  ;;  %1759 = vadd.xlane.f32.xlu0 %v1731_v55  ;;  %v2006_v14 = vmul.f32 0.2, %v1974_v63  ;;  %v1042_v53 = vsel %vm453_vm1, %v5628_v29, 0.0  ;;  %vm1990_vm5 = vcmp.gt.f32.partialorder %v1974_v63, 0.0  ;;  %v2007_v8 = vmul.f32 0.2, %v5724_v61 }
 0x270   : > { %vm1984_vm10 = vcmp.gt.f32.partialorder %v1968_v21, 0.0  ;;  %v2000_v44 = vmul.f32 0.2, %v1968_v21  ;;  %4167 = vmatpush3.bf16.msra.mxu1 %v5279_v54  ;;  %4082 = vmatmul.mubr.msk.bf16.gmra.mrb[36].mxu0 %vm5352_vm13, %v3679_v38  ;;  %v2054_v62 = vmul.f32 1.442695, %v2033_v37  ;;  %v2035_v29 = vsub.f32 0.0, %v2019_v30  ;;  %v5782_v37 = vpop.xlane.xlu0 %1051 }
 0x271   : > { %v5729_v52 = vpop.eup %4413  ;;  %4130 = vmatpush3.bf16.msra.mxu0 %v5279_v54  ;;  %4085 = vmatprep.mubr.msk.bf16.mxu0 %vm5473_vm0, %v3682_v2  ;;  %v1946_v22 = vpop.permute.xlu1 %1945  ;;  %v2009_v2 = vmul.f32 0.2, %v1977_v24  ;;  %v2022_v6 = vsel %vm1990_vm5, %v1974_v63, %v2006_v14  ;;  %v2023_v4 = vsel %vm1991_vm4, %v5724_v61, %v2007_v8 }
 0x272   : > { %v2016_v12 = vsel %vm1984_vm10, %v1968_v21, %v2000_v44  ;;  %v3730_v54 = vpack.c.bf16 %v5720_v27, %v5729_v52  ;;  %v1976_v39 = vadd.f32 %v5044_v7, %v1946_v22  ;;  %v4416_v25 = vpop.eup %4415  ;;  %v2058_v63 = vmul.f32 1.442695, %v2035_v29  ;;  %v7036_v29 = vld [vmem:[#allocation7_spill] sm:$0xff] }
 0x273   : > { %v2032_v57 = vsub.f32 0.0, %v2016_v12  ;;  %1765 = vadd.xlane.f32.xlu1 %v1734_v1  ;;  %2092 = vadd.xlane.f32.xlu0 %v2076_v31  ;;  %v3688_v38 = vpack.c.bf16 %v4416_v25, %v5679_v60  ;;  %v1375_v35 = vsel %vm453_vm1, %v4416_v25, 0.0  ;;  %v1979_v31 = vadd.f32 %v5044_v7, %v5550_v3 }
 0x274   : > { %4149 = vmatprep.mubr.msk.bf16.mxu1 %vm5473_vm0, %v3730_v54  ;;  %vm7032_vm0 = vcmp.gt.f32.partialorder %v7031_v28, 0.0  ;;  %v2008_v50 = vmul.f32 0.2, %v1976_v39  ;;  %vm1992_vm10 = vcmp.gt.f32.partialorder %v1976_v39, 0.0  ;;  %v2039_v61 = vsub.f32 0.0, %v2023_v4 }
 0x275   : > { %v5751_v45 = vpop.eup %4417  ;;  %v2052_v23 = vmul.f32 1.442695, %v2032_v57  ;;  %v1922_v21 = vpop.permute.xlu1 %1921  ;;  %v2011_v3 = vmul.f32 0.2, %v1979_v31  ;;  %vm1995_vm5 = vcmp.gt.f32.partialorder %v1979_v31, 0.0 }
 0x276   : > { %v2078_v55 = vsel %vm7032_vm0, %v5751_v45, 0.0  ;;  %v1970_v13 = vadd.f32 %v5044_v7, %v1922_v21  ;;  %vm1993_vm0 = vcmp.gt.f32.partialorder %v1977_v24, 0.0  ;;  %v2024_v5 = vsel %vm1992_vm10, %v1976_v39, %v2008_v50  ;;  %v4420_v54 = vpop.eup %4419 }
 0x277   : > { %4421 = vpow2.f32 %v2052_v23  ;;  %1071 = vadd.xlane.f32.xlu1 %v1042_v53  ;;  %2096 = vadd.xlane.f32.xlu0 %v2078_v55  ;;  %v2025_v57 = vsel %vm1993_vm0, %v1977_v24, %v2009_v2  ;;  %v2040_v39 = vsub.f32 0.0, %v2024_v5  ;;  %v3718_v14 = vpack.c.bf16 %v4420_v54, %v5706_v15  ;;  %v7034_v55 = vld [vmem:[#allocation9_spill] sm:$0xff] }
 0x278   : > { %4423 = vpow2.f32 %v2050_v9  ;;  %4086 = vmatmul.mubr.msk.bf16.gmra.mrb[40].mxu0 %vm5487_vm11, %v3685_v10  ;;  %vm1986_vm8 = vcmp.gt.f32.partialorder %v1970_v13, 0.0  ;;  %v2002_v60 = vmul.f32 0.2, %v1970_v13  ;;  %v2038_v9 = vsub.f32 0.0, %v2022_v6 }
 0x279   : > { %4089 = vmatprep.mubr.msk.bf16.mxu0 %vm5597_vm14, %v3688_v38  ;;  %v1954_v44 = vpop.permute.xlu1 %1953  ;;  %4425 = vpow2.f32 %v2054_v62  ;;  %v1732_v10 = vsel %vm453_vm1, %v5577_v18, 0.0  ;;  %v2041_v24 = vsub.f32 0.0, %v2025_v57  ;;  %v2068_v28 = vmul.f32 1.442695, %v2040_v39  ;;  %v7043_v39 = vld [vmem:[#allocation13_spill] sm:$0xff] }
 0x27a   : > { %v2018_v22 = vsel %vm1986_vm8, %v1970_v13, %v2002_v60  ;;  %v1978_v1 = vadd.f32 %v5044_v7, %v1954_v44  ;;  %v3691_v7 = vpack.c.bf16 %v5699_v0, %v5564_v59  ;;  %v2064_v53 = vmul.f32 1.442695, %v2038_v9 }
 0x27b   : > { %1404 = vadd.xlane.f32.xlu1 %v1375_v35  ;;  %v2034_v12 = vsub.f32 0.0, %v2018_v22  ;;  %v5797_v0 = vpop.xlane.xlu0 %1380  ;;  %vm7033_vm10 = vcmp.gt.f32.partialorder %v5187_v11, 0.0  ;;  %vm7035_vm8 = vcmp.gt.f32.partialorder %v7034_v55, 0.0  ;;  %v2066_v13 = vmul.f32 1.442695, %v2039_v61 }
 0x27c   : > { %v2010_v30 = vmul.f32 0.2, %v1978_v1  ;;  %vm1994_vm4 = vcmp.gt.f32.partialorder %v1978_v1, 0.0  ;;  %v2077_v15 = vsel %vm7033_vm10, %v4420_v54, 0.0  ;;  %v2027_v8 = vsel %vm1995_vm5, %v1979_v31, %v2011_v3 }
 0x27d   : > { %v2056_v25 = vmul.f32 1.442695, %v2034_v12  ;;  %v2139_v23 = vpop.permute.xlu1 %2138  ;;  %v2070_v62 = vmul.f32 1.442695, %v2041_v24  ;;  %v2043_v6 = vsub.f32 0.0, %v2027_v8  ;;  %v7039_v12 = vld [vmem:[#allocation8_spill] sm:$0xff] }
 0x27e   : > { %4131 = vmatprep.subr.bf16.mxu0 %v2139_v23  ;;  %4160 = vmatprep.subr.bf16.mxu1 %v2139_v23  ;;  %v2026_v59 = vsel %vm1994_vm4, %v1978_v1, %v2010_v30  ;;  %vm7040_vm0 = vcmp.gt.f32.partialorder %v7039_v12, 0.0  ;;  %vm7044_vm4 = vcmp.gt.f32.partialorder %v7043_v39, 0.0  ;;  %vm7045_vm5 = vcmp.gt.f32.partialorder %v5443_v34, 0.0 }
 0x27f   : > { %1761 = vadd.xlane.f32.xlu1 %v1732_v10  ;;  %4427 = vpow2.f32 %v2056_v25  ;;  %4132 = vmatpush3.bf16.msra.mxu0 %v2139_v23  ;;  %v2042_v11 = vsub.f32 0.0, %v2026_v59  ;;  %v2074_v4 = vmul.f32 1.442695, %v2043_v6  ;;  %v2084_v25 = vsel %vm7044_vm4, %v5729_v52, 0.0  ;;  %v7046_v52 = vld [vmem:[#allocation12_spill] sm:$0xff] }
 0x280   : > { %4429 = vpow2.f32 %v2058_v63  ;;  %4168 = vmatpush3.bf16.msra.mxu1 %v2139_v23  ;;  %4090 = vmatmul.mubr.msk.bf16.gmra.mrb[44].mxu0 %vm5636_vm12, %v3691_v7  ;;  %v7041_v63 = vld [vmem:[#allocation11_spill] sm:$0xff]  ;;  %v2085_v7 = vsel %vm7045_vm5, %v5720_v27, 0.0  ;;  %vm7047_vm10 = vcmp.gt.f32.partialorder %v7046_v52, 0.0 }
 0x281   : > { %v5790_v21 = vpop.eup %4421  ;;  %4141 = vmatprep.mubr.msk.bf16.mxu0 %vm5202_vm2, %v3718_v14  ;;  %4133 = vmatprep.subr.bf16.mxu0 %v5601_v20  ;;  %v2143_v50 = vpop.permute.xlu1 %2142  ;;  %4431 = vpow2.f32 %v2064_v53  ;;  %vm7037_vm2 = vcmp.gt.f32.partialorder %v7036_v29, 0.0  ;;  %v2072_v44 = vmul.f32 1.442695, %v2042_v11 }
 0x282   : > { %v5794_v18 = vpop.eup %4423  ;;  %v2080_v38 = vsel %vm7035_vm8, %v5790_v21, 0.0  ;;  %4161 = vmatprep.subr.bf16.mxu1 %v5601_v20  ;;  %4433 = vpow2.f32 %v2068_v28  ;;  %vm7048_vm8 = vcmp.gt.f32.partialorder %v5451_v51, 0.0 }
 0x283   : > { %2094 = vadd.xlane.f32.xlu1 %v2077_v15  ;;  %2100 = vadd.xlane.f32.xlu0 %v2080_v38  ;;  %v2079_v2 = vsel %vm7037_vm2, %v5794_v18, 0.0  ;;  %v4426_v60 = vpop.eup %4425  ;;  %4435 = vpow2.f32 %v2066_v13 }
 0x284   : > { %4134 = vmatpush3.bf16.msra.mxu0 %v5601_v20  ;;  %4169 = vmatpush3.bf16.msra.mxu1 %v5601_v20  ;;  %4437 = vpow2.f32 %v2070_v62  ;;  %v2081_v5 = vsel %vm445_vm6, %v4426_v60, 0.0  ;;  %vm7042_vm6 = vcmp.gt.f32.partialorder %v7041_v63, 0.0  ;;  %v3724_v14 = vpack.c.bf16 %v4426_v60, %v5790_v21 }
 0x285   : > { %4135 = vmatprep.subr.bf16.mxu0 %v2143_v50  ;;  %v5811_v40 = vpop.xlane.xlu0 %1057  ;;  %4162 = vmatprep.subr.bf16.mxu1 %v2143_v50  ;;  %v2147_v22 = vpop.permute.xlu1 %2146  ;;  %4439 = vpow2.f32 %v2072_v44 }
 0x286   : > { %4441 = vpow2.f32 %v2074_v4 }
 0x287   : > { %2098 = vadd.xlane.f32.xlu1 %v2079_v2 }
 0x288   : > { %4136 = vmatpush3.bf16.msra.mxu0 %v2143_v50  ;;  %4170 = vmatpush3.bf16.msra.mxu1 %v2143_v50 }
 0x289   : > { %4137 = vmatprep.subr.bf16.mxu0 %v5621_v17  ;;  %v4428_v20 = vpop.eup %4427  ;;  %4163 = vmatprep.subr.bf16.mxu1 %v5621_v17 }
 0x28a   : > { %v4430_v1 = vpop.eup %4429  ;;  %v5820_v31 = vpop.xlane.xlu0 %1390  ;;  %v2082_v54 = vsel %vm7040_vm0, %v4428_v20, 0.0 }
 0x28b   : > { %2102 = vadd.xlane.f32.xlu1 %v2081_v5  ;;  %2104 = vadd.xlane.f32.xlu0 %v2082_v54  ;;  %v2083_v57 = vsel %vm7042_vm6, %v4430_v1, 0.0  ;;  %v4432_v9 = vpop.eup %4431 }
 0x28c   : > { %4138 = vmatpush3.bf16.msra.mxu0 %v5621_v17  ;;  %4171 = vmatpush3.bf16.msra.mxu1 %v5621_v17  ;;  %v4434_v30 = vpop.eup %4433  ;;  %v3721_v17 = vpack.c.bf16 %v5794_v18, %v5751_v45  ;;  %v2086_v24 = vsel %vm7047_vm10, %v4432_v9, 0.0  ;;  %v3727_v18 = vpack.c.bf16 %v4430_v1, %v4428_v20 }
 0x28d   : > { %4139 = vmatprep.subr.bf16.mxu0 %v2147_v22  ;;  %4164 = vmatprep.subr.bf16.mxu1 %v2147_v22  ;;  %v4436_v10 = vpop.eup %4435  ;;  %v2088_v45 = vsel %vm452_vm15, %v4434_v30, 0.0  ;;  %vm2461_vm15 = vcmask 261120  }
 0x28e   : > { %v4438_v61 = vpop.eup %4437  ;;  %v3733_v3 = vpack.c.bf16 %v4436_v10, %v4432_v9  ;;  %v2087_v46 = vsel %vm7048_vm8, %v4436_v10, 0.0 }
 0x28f   : > { %2106 = vadd.xlane.f32.xlu1 %v2083_v57  ;;  %v5831_v23 = vpop.xlane.xlu0 %1747  ;;  %2108 = vadd.xlane.f32.xlu0 %v2084_v25  ;;  %v3736_v53 = vpack.c.bf16 %v4438_v61, %v4434_v30  ;;  %v4440_v27 = vpop.eup %4439  ;;  %v2089_v42 = vsel %vm453_vm1, %v4438_v61, 0.0  ;;  %vm2495_vm1 = vcmask 785408  }
 0x290   : > { %4140 = vmatpush3.bf16.msra.mxu0 %v2147_v22  ;;  %4172 = vmatpush3.bf16.msra.mxu1 %v2147_v22  ;;  %v4442_v21 = vpop.eup %4441 }
 0x291   : > { %v3739_v28 = vpack.c.bf16 %v4442_v21, %v4440_v27  ;;  %v2091_v48 = vsel %vm455_vm7, %v4442_v21, 0.0  ;;  %vm2478_vm7 = vcmask 523264  }
 0x293   : > { %2110 = vadd.xlane.f32.xlu1 %v2085_v7  ;;  %4142 = vmatmul.mubr.msk.bf16.vlgmr.msra.gmra.mrb[48].mxu0 %vm5214_vm3, %v3721_v17  ;;  %vm2560_vm3 = vcmask 7168  }
 0x294   : > { %4150 = vmatmul.mubr.msk.bf16.vlgmr.msra.gmra.mrb[20].mxu1 %vm5487_vm11, %v3733_v3  ;;  %2112 = vadd.xlane.f32.xlu0 %v2086_v24  ;;  %v1054_v34 = vpop.xlane.xlu0 %1053  ;;  %vm7049_vm11 = vcmp.gt.f32.partialorder %v5518_v56, 0.0 }
 0x295   : > { %4145 = vmatprep.mubr.msk.bf16.mxu0 %vm5338_vm9, %v3724_v14  ;;  %4153 = vmatprep.mubr.msk.bf16.mxu1 %vm5597_vm14, %v3736_v53  ;;  %v2090_v51 = vsel %vm7049_vm11, %v4440_v27, 0.0  ;;  %vm2577_vm9 = vcmask 15360   ;;  %vm2627_vm14 = vcmask 31744  }
 0x297   : > { %2114 = vadd.xlane.f32.xlu1 %v2087_v46 }
 0x298   : > { %2116 = vadd.xlane.f32.xlu0 %v2088_v45 }
 0x299   : > { %v1387_v19 = vpop.xlane.xlu0 %1386 }
 0x29a   : > { %v2565_v58 = vsel %vm2560_vm3, %v1054_v34, %v1387_v19 }
 0x29b   : > { %2118 = vadd.xlane.f32.xlu1 %v2089_v42  ;;  %4146 = vmatmul.mubr.msk.bf16.gmra.mrb[52].mxu0 %vm5352_vm13, %v3727_v18  ;;  %vm2594_vm13 = vcmask 23552  }
 0x29c   : > { %4154 = vmatmul.mubr.msk.bf16.gmra.mrb[24].mxu1 %vm5636_vm12, %v3739_v28  ;;  %2120 = vadd.xlane.f32.xlu0 %v2090_v51 }
 0x29e   : > { %v1744_v59 = vpop.xlane.xlu0 %1743 }
 0x29f   : > { %2122 = vadd.xlane.f32.xlu1 %v2091_v48  ;;  %v5865_v36 = vsel %vm2577_vm9, %v2565_v58, %v1744_v59 }
 0x2b7   : > { %v1379_v15 = vpop.xlane.xlu1 %1378  ;;  %v1066_v43 = vpop.xlane.xlu0 %1065 }
 0x2bb   : > { %v5867_v55 = vpop.xlane.xlu1 %1384 }
 0x2be   : > { %v5869_v38 = vpop.f32.mrb[16].mxu0 }
 0x2bf   : > { %v5871_v56 = vpop.xlane.xlu1 %1741  ;;  %v5873_v32 = vpop.f32.mrb[17].mxu0 }
 0x2c0   : > { %v5875_v50 = vpop.f32.mrb[18].mxu0 }
 0x2c1   : > { %v1756_v16 = vpop.xlane.xlu0 %1755  ;;  %v5877_v13 = vpop.f32.mrb[19].mxu0 }
 0x2c3   : > { %v5879_v8 = vpop.xlane.xlu1 %1047 }
 0x2c5   : > { %v1062_v62 = vpop.xlane.xlu0 %1061 }
 0x2c7   : > { %v5881_v11 = vpop.xlane.xlu1 %1737 }
 0x2c8   : > { %v4111_v29 = vpop.f32.mrb[4].mxu1 }
 0x2c9   : > { %v1395_v2 = vpop.xlane.xlu0 %1394  ;;  %v1833_v60 = vpop.f32.mrb[5].mxu1  ;;  %2353 = vrot.lane.b32.xlu1 %v4111_v29, %s4672_s7 }
 0x2ca   : > { %v2569_v6 = vsel %vm2560_vm3, %v1062_v62, %v1395_v2  ;;  %v4112_v44 = vpop.f32.mrb[6].mxu1 }
 0x2cb   : > { %v1836_v20 = vpop.f32.mrb[7].mxu1  ;;  %2355 = vrot.lane.b32.xlu0 %v4112_v44, %s4672_s7  ;;  %v1060_v35 = vpop.xlane.xlu1 %1059  ;;  %v2563_v44 = vsel %vm2560_vm3, %v5652_v41, %v5675_v33  ;;  %v2562_v41 = vsel %vm2560_vm3, %v5879_v8, %v5797_v0  ;;  %v2545_v33 = vld [vmem:[#allocation3 + $0x8] sm:$0xff]  ;;  %v2547_v0 = vld [vmem:[#allocation3 + $0x18] sm:$0xff] }
 0x2cd   : > { %v1752_v5 = vpop.xlane.xlu0 %1751  ;;  %2349 = vrot.lane.b32.xlu1 %v1833_v60, %s4672_s7 }
 0x2ce   : > { %v5887_v22 = vsel %vm2577_vm9, %v2569_v6, %v1752_v5 }
 0x2cf   : > { %2351 = vrot.lane.b32.xlu0 %v1836_v20, %s4672_s7  ;;  %v1393_v1 = vpop.xlane.xlu1 %1392  ;;  %v2546_v20 = vld [vmem:[#allocation3 + $0x10] sm:$0xff] }
 0x2d0   : > { %v2568_v4 = vsel %vm2560_vm3, %v1060_v35, %v1393_v1 }
 0x2d1   : > { %v5897_v57 = vpop.xlane.xlu0 %1400 }
 0x2d3   : > { %v1750_v12 = vpop.xlane.xlu1 %1749 }
 0x2d4   : > { %v5893_v54 = vsel %vm2577_vm9, %v2568_v4, %v1750_v12 }
 0x2d5   : > { %v5901_v39 = vpop.xlane.xlu0 %1396 }
 0x2d7   : > { %v5895_v63 = vpop.xlane.xlu1 %1055 }
 0x2d9   : > { %v5906_v17 = vpop.xlane.xlu0 %1073 }
 0x2db   : > { %v5899_v9 = vpop.xlane.xlu1 %1388 }
 0x2dd   : > { %v5915_v53 = vpop.xlane.xlu0 %1406 }
 0x2df   : > { %v5903_v25 = vpop.xlane.xlu1 %1745 }
 0x2e4   : > { %v1399_v30 = vpop.xlane.xlu1 %1398 }
 0x2e5   : > { %v2571_v10 = vsel %vm2560_vm3, %v1066_v43, %v1399_v30  ;;  %v2561_v43 = vsel %vm2560_vm3, %v5741_v26, %v1379_v15  ;;  %v2580_v26 = vsel %vm2577_vm9, %v2563_v44, %v5701_v49  ;;  %v2579_v49 = vsel %vm2577_vm9, %v2562_v41, %v5881_v11  ;;  %v2548_v30 = vld [vmem:[#allocation3 + $0x20] sm:$0xff] }
 0x2e6   : > { %v5909_v61 = vsel %vm2577_vm9, %v2571_v10, %v1756_v16  ;;  %v2544_v16 = vld [vmem:[#allocation3] sm:$0xff]  ;;  %v2578_v2 = vsel %vm2577_vm9, %v2561_v43, %v5767_v47 }
 0x2e7   : > { %v4115_v7 = vpop.f32.mrb[8].mxu1  ;;  %v2552_v41 = vld [vmem:[#allocation3 + $0x40] sm:$0xff] }
 0x2e8   : > { %v1849_v3 = vpop.f32.mrb[9].mxu1  ;;  %2361 = vrot.lane.b32.xlu1 %v4115_v7, %s4672_s7  ;;  %v5912_v52 = vpop.xlane.xlu1 %1067 }
 0x2e9   : > { %v4116_v24 = vpop.f32.mrb[10].mxu1 }
 0x2ea   : > { %v1852_v14 = vpop.f32.mrb[11].mxu1  ;;  %2363 = vrot.lane.b32.xlu0 %v4116_v24, %s4672_s7 }
 0x2ec   : > { %2357 = vrot.lane.b32.xlu1 %v1849_v3, %s4672_s7  ;;  %v5918_v34 = vpop.xlane.xlu1 %1757 }
 0x2ee   : > { %2359 = vrot.lane.b32.xlu0 %v1852_v14, %s4672_s7  ;;  %v2564_v14 = vsel %vm2560_vm3, %v5782_v37, %v5867_v55  ;;  %v2566_v37 = vsel %vm2560_vm3, %v5895_v63, %v5899_v9  ;;  %v2549_v55 = vld [vmem:[#allocation3 + $0x28] sm:$0xff] }
 0x2ef   : > { %v2581_v8 = vsel %vm2577_vm9, %v2564_v14, %v5871_v56  ;;  %v2567_v56 = vsel %vm2560_vm3, %v5811_v40, %v5820_v31  ;;  %v2583_v44 = vsel %vm2577_vm9, %v2566_v37, %v5903_v25  ;;  %v2551_v31 = vld [vmem:[#allocation3 + $0x38] sm:$0xff]  ;;  %v2553_v14 = vld [vmem:[#allocation3 + $0x48] sm:$0xff] }
 0x2f0   : > { %v5921_v46 = vpop.xlane.xlu1 %1063  ;;  %v5923_v27 = vpop.xlane.xlu0 %1763 }
 0x2f4   : > { %v5925_v45 = vpop.xlane.xlu1 %1753  ;;  %v5927_v21 = vpop.xlane.xlu0 %1069 }
 0x2f5   : > { %v5929_v19 = vpop.f32.mrb[20].mxu0 }
 0x2f6   : > { %v5931_v18 = vpop.f32.mrb[21].mxu0 }
 0x2f7   : > { %v5933_v58 = vpop.f32.mrb[22].mxu0 }
 0x2f8   : > { %v5935_v42 = vpop.xlane.xlu1 %1075  ;;  %v5937_v28 = vpop.xlane.xlu0 %1402 }
 0x2f9   : > { %v5939_v51 = vpop.f32.mrb[23].mxu0 }
 0x2fc   : > { %v5941_v48 = vpop.xlane.xlu1 %1408  ;;  %v5943_v59 = vpop.xlane.xlu0 %1759 }
 0x300   : > { %v5947_v62 = vpop.xlane.xlu1 %1765  ;;  %v2093_v29 = vpop.xlane.xlu0 %2092 }
 0x301   : > { %v2595_v60 = vsel %vm2594_vm13, %v2578_v2, %v2093_v29 }
 0x302   : > { %v2611_v6 = vadd.f32 %v2595_v60, %v2544_v16 }
 0x304   : > { %2628 = vst.msk [vmem:[#allocation3] sm:$0xff] %vm2627_vm14, %v2611_v6  ;;  %v5958_v15 = vpop.xlane.xlu1 %1071  ;;  %v2097_v35 = vpop.xlane.xlu0 %2096 }
 0x305   : > { %v2597_v5 = vsel %vm2594_vm13, %v2580_v26, %v2097_v35  ;;  %v2550_v26 = vld [vmem:[#allocation3 + $0x30] sm:$0xff]  ;;  %v2584_v35 = vsel %vm2577_vm9, %v2567_v56, %v5831_v23  ;;  %v2575_v56 = vsel %vm2560_vm3, %v5906_v17, %v5915_v53  ;;  %v2576_v17 = vsel %vm2560_vm3, %v5935_v42, %v5941_v48 }
 0x306   : > { %v2613_v47 = vadd.f32 %v2597_v5, %v2546_v20 }
 0x308   : > { %2630 = vst.msk [vmem:[#allocation3 + $0x10] sm:$0xff] %vm2627_vm14, %v2613_v47  ;;  %v5962_v1 = vpop.xlane.xlu1 %1404 }
 0x30c   : > { %v5964_v4 = vpop.xlane.xlu1 %1761 }
 0x310   : > { %v2095_v12 = vpop.xlane.xlu1 %2094  ;;  %v2101_v7 = vpop.xlane.xlu0 %2100 }
 0x311   : > { %v2596_v10 = vsel %vm2594_vm13, %v2579_v49, %v2095_v12  ;;  %v2599_v24 = vsel %vm2594_vm13, %v5865_v36, %v2101_v7 }
 0x312   : > { %v2612_v3 = vadd.f32 %v2596_v10, %v2545_v33  ;;  %v2615_v43 = vadd.f32 %v2599_v24, %v2548_v30 }
 0x313   : > { %v4119_v16 = vpop.f32.mrb[12].mxu1 }
 0x314   : > { %2629 = vst.msk [vmem:[#allocation3 + $0x8] sm:$0xff] %vm2627_vm14, %v2612_v3  ;;  %v2099_v11 = vpop.xlane.xlu1 %2098  ;;  %v1865_v29 = vpop.f32.mrb[13].mxu1  ;;  %2369 = vrot.lane.b32.xlu1 %v4119_v16, %s4672_s7  ;;  %2632 = vst.msk [vmem:[#allocation3 + $0x20] sm:$0xff] %vm2627_vm14, %v2615_v43  ;;  %v2570_v3 = vsel %vm2560_vm3, %v5921_v46, %v5901_v39  ;;  %v2572_v46 = vsel %vm2560_vm3, %v5912_v52, %v5897_v57 }
 0x315   : > { %v2598_v36 = vsel %vm2594_vm13, %v2581_v8, %v2099_v11  ;;  %v4120_v2 = vpop.f32.mrb[14].mxu1 }
 0x316   : > { %v2614_v60 = vadd.f32 %v2598_v36, %v2547_v0  ;;  %v1868_v6 = vpop.f32.mrb[15].mxu1  ;;  %2371 = vrot.lane.b32.xlu0 %v4120_v2, %s4672_s7  ;;  %v2554_v0 = vld [vmem:[#allocation3 + $0x50] sm:$0xff]  ;;  %v2555_v36 = vld [vmem:[#allocation3 + $0x58] sm:$0xff]  ;;  %v2573_v2 = vsel %vm2560_vm3, %v5927_v21, %v5937_v28  ;;  %v2557_v28 = vld [vmem:[#allocation3 + $0x68] sm:$0xff] }
 0x318   : > { %2631 = vst.msk [vmem:[#allocation3 + $0x18] sm:$0xff] %vm2627_vm14, %v2614_v60  ;;  %v2103_v20 = vpop.xlane.xlu1 %2102  ;;  %2365 = vrot.lane.b32.xlu1 %v1865_v29, %s4672_s7  ;;  %v2105_v63 = vpop.xlane.xlu0 %2104 }
 0x319   : > { %v2600_v5 = vsel %vm2594_vm13, %v2583_v44, %v2103_v20  ;;  %v2601_v47 = vsel %vm2594_vm13, %v2584_v35, %v2105_v63  ;;  %v2558_v20 = vld [vmem:[#allocation3 + $0x70] sm:$0xff]  ;;  %v2593_v63 = vsel %vm2577_vm9, %v2576_v17, %v5947_v62 }
 0x31a   : > { %v2616_v9 = vadd.f32 %v2600_v5, %v2549_v55  ;;  %2367 = vrot.lane.b32.xlu0 %v1868_v6, %s4672_s7  ;;  %v2617_v40 = vadd.f32 %v2601_v47, %v2550_v26  ;;  %v2556_v6 = vld [vmem:[#allocation3 + $0x60] sm:$0xff]  ;;  %v2592_v26 = vsel %vm2577_vm9, %v2575_v56, %v5923_v27 }
 0x31c   : > { %2633 = vst.msk [vmem:[#allocation3 + $0x28] sm:$0xff] %vm2627_vm14, %v2616_v9  ;;  %v2107_v25 = vpop.xlane.xlu1 %2106  ;;  %v6000_v33 = vpop.f32.mrb[24].mxu0  ;;  %2634 = vst.msk [vmem:[#allocation3 + $0x30] sm:$0xff] %vm2627_vm14, %v2617_v40 }
 0x31d   : > { %v2602_v23 = vsel %vm2594_vm13, %v5893_v54, %v2107_v25  ;;  %v2109_v49 = vpop.xlane.xlu0 %2108  ;;  %v6005_v12 = vpop.f32.mrb[25].mxu0  ;;  %v2587_v54 = vsel %vm2577_vm9, %v2570_v3, %v5925_v45  ;;  %v2589_v45 = vsel %vm2577_vm9, %v2572_v46, %v5918_v34  ;;  %v2574_v34 = vsel %vm2560_vm3, %v5958_v15, %v5962_v1 }
 0x31e   : > { %v2618_v30 = vadd.f32 %v2602_v23, %v2551_v31  ;;  %v2603_v10 = vsel %vm2594_vm13, %v5887_v22, %v2109_v49  ;;  %v6009_v7 = vpop.f32.mrb[26].mxu0 }
 0x31f   : > { %v2619_v24 = vadd.f32 %v2603_v10, %v2552_v41  ;;  %v6014_v43 = vpop.f32.mrb[27].mxu0 }
 0x320   : > { %2635 = vst.msk [vmem:[#allocation3 + $0x38] sm:$0xff] %vm2627_vm14, %v2618_v30  ;;  %v2111_v16 = vpop.xlane.xlu1 %2110 }
 0x321   : > { %2636 = vst.msk [vmem:[#allocation3 + $0x40] sm:$0xff] %vm2627_vm14, %v2619_v24  ;;  %v2604_v22 = vsel %vm2594_vm13, %v2587_v54, %v2111_v16  ;;  %v2113_v8 = vpop.xlane.xlu0 %2112 }
 0x322   : > { %v2620_v11 = vadd.f32 %v2604_v22, %v2553_v14  ;;  %v2605_v39 = vsel %vm2594_vm13, %v5909_v61, %v2113_v8  ;;  %v2590_v61 = vsel %vm2577_vm9, %v2573_v2, %v5943_v59  ;;  %v2591_v59 = vsel %vm2577_vm9, %v2574_v34, %v5964_v4  ;;  %v2559_v4 = vld [vmem:[#allocation3 + $0x78] sm:$0xff] }
 0x323   : > { %v2621_v29 = vadd.f32 %v2605_v39, %v2554_v0 }
 0x324   : > { %2637 = vst.msk [vmem:[#allocation3 + $0x48] sm:$0xff] %vm2627_vm14, %v2620_v11  ;;  %v2115_v60 = vpop.xlane.xlu1 %2114 }
 0x325   : > { %2638 = vst.msk [vmem:[#allocation3 + $0x50] sm:$0xff] %vm2627_vm14, %v2621_v29  ;;  %v2606_v57 = vsel %vm2594_vm13, %v2589_v45, %v2115_v60  ;;  %v2117_v52 = vpop.xlane.xlu0 %2116 }
 0x326   : > { %v2622_v37 = vadd.f32 %v2606_v57, %v2555_v36  ;;  %v2607_v55 = vsel %vm2594_vm13, %v2590_v61, %v2117_v52 }
 0x327   : > { %v2623_v21 = vadd.f32 %v2607_v55, %v2556_v6 }
 0x328   : > { %2639 = vst.msk [vmem:[#allocation3 + $0x58] sm:$0xff] %vm2627_vm14, %v2622_v37  ;;  %v2119_v44 = vpop.xlane.xlu1 %2118 }
 0x329   : > { %2640 = vst.msk [vmem:[#allocation3 + $0x60] sm:$0xff] %vm2627_vm14, %v2623_v21  ;;  %v2608_v15 = vsel %vm2594_vm13, %v2591_v59, %v2119_v44  ;;  %v2121_v1 = vpop.xlane.xlu0 %2120 }
 0x32a   : > { %v2624_v35 = vadd.f32 %v2608_v15, %v2557_v28  ;;  %v2609_v5 = vsel %vm2594_vm13, %v2592_v26, %v2121_v1 }
 0x32b   : > { %v2625_v53 = vadd.f32 %v2609_v5, %v2558_v20 }
 0x32c   : > { %2641 = vst.msk [vmem:[#allocation3 + $0x68] sm:$0xff] %vm2627_vm14, %v2624_v35  ;;  %v2123_v27 = vpop.xlane.xlu1 %2122 }
 0x32d   : > { %2642 = vst.msk [vmem:[#allocation3 + $0x70] sm:$0xff] %vm2627_vm14, %v2625_v53  ;;  %v2610_v9 = vsel %vm2594_vm13, %v2593_v63, %v2123_v27 }
 0x32e   : > { %v2626_v47 = vadd.f32 %v2610_v9, %v2559_v4 }
 0x330   : > { %2643 = vst.msk [vmem:[#allocation3 + $0x78] sm:$0xff] %vm2627_vm14, %v2626_v47 }
 0x333   : > { %v6060_v40 = vpop.f32.mrb[28].mxu0 }
 0x334   : > { %v6062_v31 = vpop.f32.mrb[29].mxu0 }
 0x335   : > { %v6064_v42 = vpop.f32.mrb[30].mxu0 }
 0x336   : > { %v6066_v48 = vpop.f32.mrb[31].mxu0 }
 0x337   : > { %v4123_v25 = vpop.f32.mrb[16].mxu1 }
 0x338   : > { %v1881_v62 = vpop.f32.mrb[17].mxu1  ;;  %2377 = vrot.lane.b32.xlu1 %v4123_v25, %s4672_s7 }
 0x339   : > { %v4124_v41 = vpop.f32.mrb[18].mxu1 }
 0x33a   : > { %v1884_v23 = vpop.f32.mrb[19].mxu1  ;;  %2379 = vrot.lane.b32.xlu0 %v4124_v41, %s4672_s7 }
 0x33b   : > { %v4079_v49 = vpop.f32.mrb[32].mxu0  ;;  %v6106_v15 = vpop.permute.xlu1 %2353 }
 0x33c   : > { %2373 = vrot.lane.b32.xlu1 %v1881_v62, %s4672_s7  ;;  %v1476_v30 = vpop.f32.mrb[33].mxu0 }
 0x33d   : > { %v4080_v10 = vpop.f32.mrb[34].mxu0  ;;  %v6104_v26 = vpop.permute.xlu0 %2355 }
 0x33e   : > { %2375 = vrot.lane.b32.xlu0 %v1884_v23, %s4672_s7  ;;  %v1479_v3 = vpop.f32.mrb[35].mxu0 }
 0x33f   : > { %v6110_v35 = vpop.permute.xlu1 %2349 }
 0x340   : > { %2289 = vrot.lane.b32.xlu1 %v4079_v49, %s4676_s8 }
 0x341   : > { %v6108_v1 = vpop.permute.xlu0 %2351 }
 0x342   : > { %2285 = vrot.lane.b32.xlu0 %v1476_v30, %s4676_s8 }
 0x343   : > { %v4083_v24 = vpop.f32.mrb[36].mxu0 }
 0x344   : > { %v1492_v14 = vpop.f32.mrb[37].mxu0 }
 0x345   : > { %v4084_v54 = vpop.f32.mrb[38].mxu0 }
 0x346   : > { %2291 = vrot.lane.b32.xlu0 %v4080_v10, %s4676_s8  ;;  %v1495_v16 = vpop.f32.mrb[39].mxu0 }
 0x34b   : > { %v4087_v0 = vpop.f32.mrb[40].mxu0 }
 0x34c   : > { %v1508_v22 = vpop.f32.mrb[41].mxu0 }
 0x34d   : > { %v4088_v8 = vpop.f32.mrb[42].mxu0 }
 0x34e   : > { %v1511_v11 = vpop.f32.mrb[43].mxu0 }
 0x353   : > { %v4091_v39 = vpop.f32.mrb[44].mxu0 }
 0x354   : > { %v1524_v46 = vpop.f32.mrb[45].mxu0 }
 0x355   : > { %v4092_v29 = vpop.f32.mrb[46].mxu0 }
 0x356   : > { %v1527_v36 = vpop.f32.mrb[47].mxu0 }
 0x35a   : > { %v6114_v17 = vpop.permute.xlu1 %2361 }
 0x35c   : > { %v6112_v5 = vpop.permute.xlu0 %2363 }
 0x35e   : > { %v6118_v4 = vpop.permute.xlu1 %2357 }
 0x360   : > { %v6116_v53 = vpop.permute.xlu0 %2359 }
 0x366   : > { %v4143_v45 = vpop.f32.mrb[48].mxu0 }
 0x367   : > { %v4151_v2 = vpop.f32.mrb[20].mxu1  ;;  %v2190_v60 = vpop.f32.mrb[49].mxu0 }
 0x368   : > { %v2222_v6 = vpop.f32.mrb[21].mxu1  ;;  %2433 = vrot.lane.b32.xlu1 %v4151_v2, %s4671_s18  ;;  %v4144_v61 = vpop.f32.mrb[50].mxu0 }
 0x369   : > { %v4152_v57 = vpop.f32.mrb[22].mxu1  ;;  %v2193_v52 = vpop.f32.mrb[51].mxu0 }
 0x36a   : > { %v2225_v37 = vpop.f32.mrb[23].mxu1  ;;  %2435 = vrot.lane.b32.xlu0 %v4152_v57, %s4671_s18 }
 0x36c   : > { %2429 = vrot.lane.b32.xlu1 %v2222_v6, %s4671_s18 }
 0x36e   : > { %2431 = vrot.lane.b32.xlu0 %v2225_v37, %s4671_s18  ;;  %v4147_v55 = vpop.f32.mrb[52].mxu0 }
 0x36f   : > { %v4155_v34 = vpop.f32.mrb[24].mxu1  ;;  %v2206_v21 = vpop.f32.mrb[53].mxu0 }
 0x370   : > { %v2238_v28 = vpop.f32.mrb[25].mxu1  ;;  %2287 = vrot.lane.b32.xlu1 %v1479_v3, %s4676_s8  ;;  %v4148_v56 = vpop.f32.mrb[54].mxu0 }
 0x371   : > { %v4156_v59 = vpop.f32.mrb[26].mxu1  ;;  %v2209_v44 = vpop.f32.mrb[55].mxu0 }
 0x372   : > { %v2241_v20 = vpop.f32.mrb[27].mxu1  ;;  %2299 = vrot.lane.b32.xlu0 %v4084_v54, %s4676_s8 }
 0x374   : > { %2297 = vrot.lane.b32.xlu1 %v4083_v24, %s4676_s8 }
 0x376   : > { %2295 = vrot.lane.b32.xlu0 %v1495_v16, %s4676_s8 }
 0x378   : > { %2293 = vrot.lane.b32.xlu1 %v1492_v14, %s4676_s8 }
 0x37a   : > { %2439 = vrot.lane.b32.xlu0 %v2241_v20, %s4671_s18  ;;  %v2261_v20 = vld [vmem:[#allocation2 + $0x40] sm:$0xff] }
 0x37c   : > { %2437 = vrot.lane.b32.xlu1 %v2238_v28, %s4671_s18 }
 0x37e   : > { %2307 = vrot.lane.b32.xlu0 %v4088_v8, %s4676_s8 }
 0x380   : > { %2305 = vrot.lane.b32.xlu1 %v4087_v0, %s4676_s8 }
 0x382   : > { %2303 = vrot.lane.b32.xlu0 %v1511_v11, %s4676_s8 }
 0x384   : > { %2301 = vrot.lane.b32.xlu1 %v1508_v22, %s4676_s8 }
 0x386   : > { %2315 = vrot.lane.b32.xlu0 %v4092_v29, %s4676_s8  ;;  %v2370_v27 = vpop.permute.xlu1 %2369 }
 0x388   : > { %2313 = vrot.lane.b32.xlu1 %v4091_v39, %s4676_s8  ;;  %v2372_v63 = vpop.permute.xlu0 %2371 }
 0x38a   : > { %2311 = vrot.lane.b32.xlu0 %v1527_v36, %s4676_s8  ;;  %v2366_v47 = vpop.permute.xlu1 %2365  ;;  %v2264_v36 = vld [vmem:[#allocation2 + $0x58] sm:$0xff] }
 0x38c   : > { %2309 = vrot.lane.b32.xlu1 %v1524_v46, %s4676_s8  ;;  %v2368_v9 = vpop.permute.xlu0 %2367 }
 0x38e   : > { %2419 = vrot.lane.b32.xlu0 %v4144_v61, %s4671_s18  ;;  %v2263_v61 = vld [vmem:[#allocation2 + $0x50] sm:$0xff] }
 0x390   : > { %2417 = vrot.lane.b32.xlu1 %v4143_v45, %s4671_s18 }
 0x392   : > { %2415 = vrot.lane.b32.xlu0 %v2193_v52, %s4671_s18 }
 0x394   : > { %2413 = vrot.lane.b32.xlu1 %v2190_v60, %s4671_s18 }
 0x396   : > { %2427 = vrot.lane.b32.xlu0 %v4148_v56, %s4671_s18 }
 0x398   : > { %2425 = vrot.lane.b32.xlu1 %v4147_v55, %s4671_s18 }
 0x39a   : > { %2423 = vrot.lane.b32.xlu0 %v2209_v44, %s4671_s18 }
 0x39c   : > { %2421 = vrot.lane.b32.xlu1 %v2206_v21, %s4671_s18  ;;  %v2262_v21 = vld [vmem:[#allocation2 + $0x48] sm:$0xff] }
 0x39e   : > { %2443 = vrot.lane.b32.xlu0 %v4156_v59, %s4671_s18 }
 0x3a0   : > { %2441 = vrot.lane.b32.xlu1 %v4155_v34, %s4671_s18 }
 0x3aa   : > { %v2378_v62 = vpop.permute.xlu1 %2377 }
 0x3ac   : > { %v2380_v25 = vpop.permute.xlu0 %2379 }
 0x3ae   : > { %v6120_v23 = vpop.permute.xlu1 %2373 }
 0x3b0   : > { %v2376_v41 = vpop.permute.xlu0 %2375 }
 0x3b2   : > { %v2290_v30 = vpop.permute.xlu1 %2289 }
 0x3b4   : > { %v6122_v49 = vpop.permute.xlu0 %2285 }
 0x3b8   : > { %v2292_v10 = vpop.permute.xlu0 %2291 }
 0x3da   : > { %v2434_v3 = vpop.permute.xlu1 %2433 }
 0x3dc   : > { %v2436_v24 = vpop.permute.xlu0 %2435 }
 0x3de   : > { %v2430_v14 = vpop.permute.xlu1 %2429 }
 0x3e0   : > { %v2432_v54 = vpop.permute.xlu0 %2431 }
 0x3e2   : > { %v2288_v16 = vpop.permute.xlu1 %2287 }
 0x3e4   : > { %v6124_v0 = vpop.permute.xlu0 %2299 }
 0x3e6   : > { %v6126_v22 = vpop.permute.xlu1 %2297 }
 0x3e8   : > { %v6128_v8 = vpop.permute.xlu0 %2295 }
 0x3ea   : > { %v6130_v11 = vpop.permute.xlu1 %2293 }
 0x3ec   : > { %v2440_v39 = vpop.permute.xlu0 %2439 }
 0x3ee   : > { %v2438_v46 = vpop.permute.xlu1 %2437 }
 0x3f0   : > { %v2308_v29 = vpop.permute.xlu0 %2307 }
 0x3f1   : > { %v2473_v45 = vsel %vm2461_vm15, %v6009_v7, %v2308_v29 }
 0x3f2   : > { %v2490_v2 = vsel %vm2478_vm7, %v2473_v45, %v2372_v63  ;;  %v2306_v60 = vpop.permute.xlu1 %2305 }
 0x3f3   : > { %v2507_v6 = vsel %vm2495_vm1, %v2490_v2, %v2436_v24  ;;  %v2472_v57 = vsel %vm2461_vm15, %v6000_v33, %v2306_v60 }
 0x3f4   : > { %v2523_v52 = vadd.f32 %v2507_v6, %v2264_v36  ;;  %v2489_v37 = vsel %vm2478_vm7, %v2472_v57, %v2370_v27  ;;  %v2304_v55 = vpop.permute.xlu0 %2303  ;;  %v2265_v6 = vld [vmem:[#allocation2 + $0x60] sm:$0xff] }
 0x3f5   : > { %v2506_v34 = vsel %vm2495_vm1, %v2489_v37, %v2434_v3  ;;  %v2471_v28 = vsel %vm2461_vm15, %v6014_v43, %v2304_v55 }
 0x3f6   : > { %2539 = vst [vmem:[#allocation2 + $0x58] sm:$0xff] %v2523_v52  ;;  %v2522_v7 = vadd.f32 %v2506_v34, %v2263_v61  ;;  %v2488_v56 = vsel %vm2478_vm7, %v2471_v28, %v2368_v9  ;;  %v2302_v59 = vpop.permute.xlu1 %2301  ;;  %v2256_v61 = vld [vmem:[#allocation2 + $0x18] sm:$0xff]  ;;  %v2254_v34 = vld [vmem:[#allocation2 + $0x8] sm:$0xff]  ;;  %v2253_v28 = vld [vmem:[#allocation2] sm:$0xff] }
 0x3f7   : > { %v2505_v44 = vsel %vm2495_vm1, %v2488_v56, %v2432_v54  ;;  %v2470_v33 = vsel %vm2461_vm15, %v6005_v12, %v2302_v59  ;;  %v2468_v56 = vsel %vm2461_vm15, %v5929_v19, %v6126_v22  ;;  %v2260_v59 = vld [vmem:[#allocation2 + $0x38] sm:$0xff] }
 0x3f8   : > { %2538 = vst [vmem:[#allocation2 + $0x50] sm:$0xff] %v2522_v7  ;;  %v2521_v63 = vadd.f32 %v2505_v44, %v2262_v21  ;;  %v2487_v27 = vsel %vm2478_vm7, %v2470_v33, %v2366_v47  ;;  %v2316_v3 = vpop.permute.xlu0 %2315  ;;  %v2465_v47 = vsel %vm2461_vm15, %v5875_v50, %v2292_v10  ;;  %v2469_v21 = vsel %vm2461_vm15, %v5933_v58, %v6124_v0  ;;  %v2259_v33 = vld [vmem:[#allocation2 + $0x30] sm:$0xff] }
 0x3f9   : > { %v2504_v24 = vsel %vm2495_vm1, %v2487_v27, %v2430_v14  ;;  %v2477_v43 = vsel %vm2461_vm15, %v6064_v42, %v2316_v3  ;;  %v2266_v14 = vld [vmem:[#allocation2 + $0x68] sm:$0xff]  ;;  %v2486_v58 = vsel %vm2478_vm7, %v2469_v21, %v6112_v5  ;;  %v2485_v19 = vsel %vm2478_vm7, %v2468_v56, %v6114_v17 }
 0x3fa   : > { %2537 = vst [vmem:[#allocation2 + $0x48] sm:$0xff] %v2521_v63  ;;  %v2520_v29 = vadd.f32 %v2504_v24, %v2261_v20  ;;  %v2314_v9 = vpop.permute.xlu1 %2313  ;;  %v6151_v36 = vsel %vm2478_vm7, %v2477_v43, %v2380_v25  ;;  %v2464_v25 = vsel %vm2461_vm15, %v5869_v38, %v2290_v30  ;;  %v2467_v20 = vsel %vm2461_vm15, %v5939_v51, %v6128_v8  ;;  %v2258_v3 = vld [vmem:[#allocation2 + $0x28] sm:$0xff] }
 0x3fb   : > { %v2476_v54 = vsel %vm2461_vm15, %v6060_v40, %v2314_v9  ;;  %v2481_v37 = vsel %vm2478_vm7, %v2464_v25, %v6106_v15  ;;  %v2466_v27 = vsel %vm2461_vm15, %v5931_v18, %v6130_v11  ;;  %v2484_v51 = vsel %vm2478_vm7, %v2467_v20, %v6116_v53  ;;  %v2268_v11 = vld [vmem:[#allocation2 + $0x78] sm:$0xff]  ;;  %v2267_v53 = vld [vmem:[#allocation2 + $0x70] sm:$0xff] }
 0x3fc   : > { %2536 = vst [vmem:[#allocation2 + $0x40] sm:$0xff] %v2520_v29  ;;  %v2312_v12 = vpop.permute.xlu0 %2311  ;;  %v6156_v45 = vsel %vm2478_vm7, %v2476_v54, %v2378_v62  ;;  %v2257_v29 = vld [vmem:[#allocation2 + $0x20] sm:$0xff]  ;;  %v2483_v17 = vsel %vm2478_vm7, %v2466_v27, %v6118_v4 }
 0x3fd   : > { %v2475_v42 = vsel %vm2461_vm15, %v6066_v48, %v2312_v12  ;;  %v2482_v48 = vsel %vm2478_vm7, %v2465_v47, %v6104_v26  ;;  %v2462_v26 = vsel %vm2461_vm15, %v5873_v32, %v6122_v49 }
 0x3fe   : > { %v2492_v2 = vsel %vm2478_vm7, %v2475_v42, %v2376_v41  ;;  %v2310_v60 = vpop.permute.xlu1 %2309  ;;  %v2463_v41 = vsel %vm2461_vm15, %v5877_v13, %v2288_v16  ;;  %v2479_v32 = vsel %vm2478_vm7, %v2462_v26, %v6110_v35 }
 0x3ff   : > { %v2509_v40 = vsel %vm2495_vm1, %v2492_v2, %v2440_v39  ;;  %v2474_v62 = vsel %vm2461_vm15, %v6062_v31, %v2310_v60  ;;  %v2255_v39 = vld [vmem:[#allocation2 + $0x10] sm:$0xff]  ;;  %v2480_v16 = vsel %vm2478_vm7, %v2463_v41, %v6108_v1 }
 0x400   : > { %v2525_v57 = vadd.f32 %v2509_v40, %v2266_v14  ;;  %v2491_v50 = vsel %vm2478_vm7, %v2474_v62, %v6120_v23  ;;  %v2420_v10 = vpop.permute.xlu0 %2419 }
 0x401   : > { %v2508_v38 = vsel %vm2495_vm1, %v2491_v50, %v2438_v46  ;;  %v2499_v30 = vsel %vm2495_vm1, %v2482_v48, %v2420_v10 }
 0x402   : > { %2541 = vst [vmem:[#allocation2 + $0x68] sm:$0xff] %v2525_v57  ;;  %v2524_v52 = vadd.f32 %v2508_v38, %v2265_v6  ;;  %v2515_v31 = vadd.f32 %v2499_v30, %v2256_v61  ;;  %v2418_v55 = vpop.permute.xlu1 %2417 }
 0x403   : > { %v2498_v23 = vsel %vm2495_vm1, %v2481_v37, %v2418_v55 }
 0x404   : > { %2540 = vst [vmem:[#allocation2 + $0x60] sm:$0xff] %v2524_v52  ;;  %2531 = vst [vmem:[#allocation2 + $0x18] sm:$0xff] %v2515_v31  ;;  %v2514_v13 = vadd.f32 %v2498_v23, %v2255_v39  ;;  %v2416_v46 = vpop.permute.xlu0 %2415 }
 0x405   : > { %v2497_v15 = vsel %vm2495_vm1, %v2480_v16, %v2416_v46 }
 0x406   : > { %2530 = vst [vmem:[#allocation2 + $0x10] sm:$0xff] %v2514_v13  ;;  %v2513_v7 = vadd.f32 %v2497_v15, %v2254_v34  ;;  %v2414_v49 = vpop.permute.xlu1 %2413 }
 0x407   : > { %v2496_v1 = vsel %vm2495_vm1, %v2479_v32, %v2414_v49 }
 0x408   : > { %2529 = vst [vmem:[#allocation2 + $0x8] sm:$0xff] %v2513_v7  ;;  %v2512_v44 = vadd.f32 %v2496_v1, %v2253_v28  ;;  %v2428_v0 = vpop.permute.xlu0 %2427 }
 0x409   : > { %v2503_v35 = vsel %vm2495_vm1, %v2486_v58, %v2428_v0 }
 0x40a   : > { %2528 = vst [vmem:[#allocation2] sm:$0xff] %v2512_v44  ;;  %v2519_v63 = vadd.f32 %v2503_v35, %v2260_v59  ;;  %v2426_v22 = vpop.permute.xlu1 %2425 }
 0x40b   : > { %v2502_v5 = vsel %vm2495_vm1, %v2485_v19, %v2426_v22 }
 0x40c   : > { %2535 = vst [vmem:[#allocation2 + $0x38] sm:$0xff] %v2519_v63  ;;  %v2518_v24 = vadd.f32 %v2502_v5, %v2259_v33  ;;  %v2424_v8 = vpop.permute.xlu0 %2423 }
 0x40d   : > { %v2501_v43 = vsel %vm2495_vm1, %v2484_v51, %v2424_v8 }
 0x40e   : > { %2534 = vst [vmem:[#allocation2 + $0x30] sm:$0xff] %v2518_v24  ;;  %v2517_v9 = vadd.f32 %v2501_v43, %v2258_v3  ;;  %v2422_v54 = vpop.permute.xlu1 %2421 }
 0x40f   : > { %v2500_v18 = vsel %vm2495_vm1, %v2483_v17, %v2422_v54 }
 0x410   : > { %2533 = vst [vmem:[#allocation2 + $0x28] sm:$0xff] %v2517_v9  ;;  %v2516_v12 = vadd.f32 %v2500_v18, %v2257_v29  ;;  %v2444_v47 = vpop.permute.xlu0 %2443  ;;  %2647 = sbr.rel (%p3741_p13) target bundleno = 1342 (0x53e), region = 86 }
 0x411   : > { %v2511_v14 = vsel %vm2495_vm1, %v6151_v36, %v2444_v47 }
 0x412   : > { %2532 = vst [vmem:[#allocation2 + $0x20] sm:$0xff] %v2516_v12  ;;  %v2527_v42 = vadd.f32 %v2511_v14, %v2268_v11  ;;  %v2442_v2 = vpop.permute.xlu1 %2441 }
 0x413   : > { %v2510_v60 = vsel %vm2495_vm1, %v6156_v45, %v2442_v2 }
 0x414   : > { %2543 = vst [vmem:[#allocation2 + $0x78] sm:$0xff] %v2527_v42  ;;  %v2526_v25 = vadd.f32 %v2510_v60, %v2267_v53 }
 0x416   : > { %2542 = vst [vmem:[#allocation2 + $0x70] sm:$0xff] %v2526_v25 }
 0x417   : > { %v2650_v4 = vld [vmem:[#allocation3 + $0x10] sm:$0xff]  ;;  %v2648_v40 = vld [vmem:[#allocation3] sm:$0xff]  ;;  %v2651_v6 = vld [vmem:[#allocation3 + $0x18] sm:$0xff]  ;;  %v4677_v62 = vmov 0   ;;  %v4678_v43 = vmov 1   ;;  %v4679_v29 = vmov 2  }
 0x418   : > { %4444 = vset.pattern.permute.xlu1 %v4677_v62  ;;  %4443 = vset.pattern.permute.xlu0 %v4677_v62  ;;  %v2666_v36 = vmax.f32 %v2650_v4, 1e-30  ;;  %v2664_v61 = vmax.f32 %v2648_v40, 1e-30  ;;  %v2667_v57 = vmax.f32 %v2651_v6, 1e-30 }
 0x419   : > { %v2649_v50 = vld [vmem:[#allocation3 + $0x8] sm:$0xff]  ;;  %v2652_v45 = vld [vmem:[#allocation3 + $0x20] sm:$0xff]  ;;  %v2655_v30 = vld [vmem:[#allocation3 + $0x38] sm:$0xff]  ;;  %v4680_v9 = vmov 3  }
 0x41a   : > { %v2653_v48 = vld [vmem:[#allocation3 + $0x28] sm:$0xff]  ;;  %4451 = vrcp.f32 %v2666_v36  ;;  %v2665_v10 = vmax.f32 %v2649_v50, 1e-30  ;;  %v2668_v38 = vmax.f32 %v2652_v45, 1e-30  ;;  %v2654_v39 = vld [vmem:[#allocation3 + $0x30] sm:$0xff] }
 0x41b   : > { %4453 = vrcp.f32 %v2664_v61  ;;  %v2669_v41 = vmax.f32 %v2653_v48, 1e-30  ;;  %v2671_v52 = vmax.f32 %v2655_v30, 1e-30  ;;  %v2670_v31 = vmax.f32 %v2654_v39, 1e-30 }
 0x41c   : > { %4455 = vrcp.f32 %v2667_v57  ;;  %v2657_v37 = vld [vmem:[#allocation3 + $0x48] sm:$0xff]  ;;  %v2656_v55 = vld [vmem:[#allocation3 + $0x40] sm:$0xff]  ;;  %v2659_v16 = vld [vmem:[#allocation3 + $0x58] sm:$0xff] }
 0x41d   : > { %4457 = vrcp.f32 %v2665_v10  ;;  %v2673_v23 = vmax.f32 %v2657_v37, 1e-30  ;;  %v2672_v13 = vmax.f32 %v2656_v55, 1e-30  ;;  %v2658_v21 = vld [vmem:[#allocation3 + $0x50] sm:$0xff]  ;;  %v2661_v32 = vld [vmem:[#allocation3 + $0x68] sm:$0xff] }
 0x41e   : > { %4459 = vrcp.f32 %v2669_v41  ;;  %v2675_v28 = vmax.f32 %v2659_v16, 1e-30  ;;  %v2674_v7 = vmax.f32 %v2658_v21, 1e-30  ;;  %v2660_v56 = vld [vmem:[#allocation3 + $0x60] sm:$0xff]  ;;  %v2663_v58 = vld [vmem:[#allocation3 + $0x78] sm:$0xff] }
 0x41f   : > { %4461 = vrcp.f32 %v2668_v38  ;;  %v2677_v59 = vmax.f32 %v2661_v32, 1e-30  ;;  %v2676_v44 = vmax.f32 %v2660_v56, 1e-30  ;;  %v2662_v20 = vld [vmem:[#allocation3 + $0x70] sm:$0xff]  ;;  %v6293_v4 = vld [vmem:[#allocation2 + $0x8] sm:$0xff] }
 0x420   : > { %4463 = vrcp.f32 %v2671_v52  ;;  %v2679_v33 = vmax.f32 %v2663_v58, 1e-30  ;;  %v2678_v63 = vmax.f32 %v2662_v20, 1e-30  ;;  %v6297_v62 = vld [vmem:[#allocation2 + $0x10] sm:$0xff]  ;;  %v6307_v10 = vld [vmem:[#allocation2 + $0x20] sm:$0xff] }
 0x421   : > { %4465 = vrcp.f32 %v2670_v31  ;;  %v6313_v30 = vld [vmem:[#allocation2 + $0x30] sm:$0xff] }
 0x422   : > { %4467 = vrcp.f32 %v2673_v23  ;;  %v6322_v23 = vld [vmem:[#allocation2 + $0x40] sm:$0xff] }
 0x423   : > { %4469 = vrcp.f32 %v2672_v13 }
 0x424   : > { %v6217_v26 = vpop.eup %4451  ;;  %4471 = vrcp.f32 %v2675_v28  ;;  %v6334_v28 = vld [vmem:[#allocation2 + $0x50] sm:$0xff] }
 0x425   : > { %v6219_v34 = vpop.eup %4453  ;;  %2724 = vperm.xlu1 %4444, %v6217_v26   ;;  %4473 = vrcp.f32 %v2674_v7 }
 0x426   : > { %v6222_v46 = vpop.eup %4455  ;;  %2714 = vperm.xlu0 %4443, %v6219_v34   ;;  %4475 = vrcp.f32 %v2677_v59 }
 0x427   : > { %v6225_v15 = vpop.eup %4457  ;;  %4477 = vrcp.f32 %v2676_v44 }
 0x428   : > { %v6228_v49 = vpop.eup %4459  ;;  %4479 = vrcp.f32 %v2679_v33 }
 0x429   : > { %2729 = vperm.xlu1 %4444, %v6222_v46   ;;  %v6231_v1 = vpop.eup %4461  ;;  %4481 = vrcp.f32 %v2678_v63 }
 0x42a   : > { %2719 = vperm.xlu0 %4443, %v6225_v15   ;;  %v6234_v0 = vpop.eup %4463 }
 0x42b   : > { %v6237_v35 = vpop.eup %4465 }
 0x42c   : > { %v6240_v19 = vpop.eup %4467 }
 0x42d   : > { %2739 = vperm.xlu1 %4444, %v6228_v49   ;;  %v6243_v22 = vpop.eup %4469 }
 0x42e   : > { %2734 = vperm.xlu0 %4443, %v6231_v1   ;;  %v4472_v27 = vpop.eup %4471 }
 0x42f   : > { %v6247_v5 = vpop.eup %4473 }
 0x430   : > { %v4476_v3 = vpop.eup %4475 }
 0x431   : > { %2749 = vperm.xlu1 %4444, %v6234_v0   ;;  %v4478_v24 = vpop.eup %4477 }
 0x432   : > { %2744 = vperm.xlu0 %4443, %v6237_v35   ;;  %v4480_v51 = vpop.eup %4479 }
 0x433   : > { %v4482_v8 = vpop.eup %4481 }
 0x435   : > { %2759 = vperm.xlu1 %4444, %v6240_v19  }
 0x436   : > { %2754 = vperm.xlu0 %4443, %v6243_v22  }
 0x439   : > { %2769 = vperm.xlu1 %4444, %v4472_v27  }
 0x43a   : > { %2764 = vperm.xlu0 %4443, %v6247_v5  }
 0x43d   : > { %2779 = vperm.xlu1 %4444, %v4476_v3  }
 0x43e   : > { %2774 = vperm.xlu0 %4443, %v4478_v24  }
 0x441   : > { %2789 = vperm.xlu1 %4444, %v4480_v51  }
 0x442   : > { %2784 = vperm.xlu0 %4443, %v4482_v8  }
 0x445   : > { %4446 = vset.pattern.permute.xlu1 %v4678_v43 }
 0x446   : > { %4445 = vset.pattern.permute.xlu0 %v4678_v43  ;;  %2893 = vperm.xlu1 %4446, %v6225_v15   ;;  %v6365_v43 = vld [vmem:[#allocation2 + $0x70] sm:$0xff] }
 0x447   : > { %2889 = vperm.xlu0 %4445, %v6219_v34  }
 0x44a   : > { %2897 = vperm.xlu1 %4446, %v6217_v26  }
 0x44b   : > { %2901 = vperm.xlu0 %4445, %v6222_v46  }
 0x44e   : > { %2905 = vperm.xlu1 %4446, %v6231_v1  }
 0x44f   : > { %2909 = vperm.xlu0 %4445, %v6228_v49  }
 0x452   : > { %2913 = vperm.xlu1 %4446, %v6237_v35  }
 0x453   : > { %2917 = vperm.xlu0 %4445, %v6234_v0  }
 0x456   : > { %2921 = vperm.xlu1 %4446, %v6243_v22  }
 0x457   : > { %2925 = vperm.xlu0 %4445, %v6240_v19  }
 0x45a   : > { %2929 = vperm.xlu1 %4446, %v6247_v5  }
 0x45b   : > { %2933 = vperm.xlu0 %4445, %v4472_v27  }
 0x45e   : > { %2937 = vperm.xlu1 %4446, %v4478_v24  }
 0x45f   : > { %2941 = vperm.xlu0 %4445, %v4476_v3  }
 0x462   : > { %2945 = vperm.xlu1 %4446, %v4482_v8  }
 0x463   : > { %2949 = vperm.xlu0 %4445, %v4480_v51  }
 0x466   : > { %4447 = vset.pattern.permute.xlu1 %v4679_v29 }
 0x467   : > { %4448 = vset.pattern.permute.xlu0 %v4679_v29  ;;  %3049 = vperm.xlu1 %4447, %v6219_v34  }
 0x468   : > { %3053 = vperm.xlu0 %4448, %v6225_v15  }
 0x46b   : > { %3057 = vperm.xlu1 %4447, %v6217_v26  }
 0x46c   : > { %3065 = vperm.xlu0 %4448, %v6231_v1  }
 0x46f   : > { %3061 = vperm.xlu1 %4447, %v6222_v46  }
 0x470   : > { %3073 = vperm.xlu0 %4448, %v6237_v35  }
 0x473   : > { %3069 = vperm.xlu1 %4447, %v6228_v49  }
 0x474   : > { %3081 = vperm.xlu0 %4448, %v6243_v22  }
 0x477   : > { %3077 = vperm.xlu1 %4447, %v6234_v0  }
 0x478   : > { %3089 = vperm.xlu0 %4448, %v6247_v5  }
 0x47b   : > { %3085 = vperm.xlu1 %4447, %v6240_v19  }
 0x47c   : > { %3097 = vperm.xlu0 %4448, %v4478_v24  }
 0x47f   : > { %3093 = vperm.xlu1 %4447, %v4472_v27  }
 0x480   : > { %3105 = vperm.xlu0 %4448, %v4482_v8  }
 0x483   : > { %3101 = vperm.xlu1 %4447, %v4476_v3  }
 0x484   : > { %4449 = vset.pattern.permute.xlu0 %v4680_v9 }
 0x485   : > { %3209 = vperm.xlu0 %4449, %v6219_v34  }
 0x487   : > { %3109 = vperm.xlu1 %4447, %v4480_v51  }
 0x489   : > { %3221 = vperm.xlu0 %4449, %v6222_v46  }
 0x48b   : > { %4450 = vset.pattern.permute.xlu1 %v4680_v9 }
 0x48c   : > { %3213 = vperm.xlu1 %4450, %v6225_v15  }
 0x48d   : > { %3229 = vperm.xlu0 %4449, %v6228_v49  }
 0x490   : > { %3217 = vperm.xlu1 %4450, %v6217_v26  }
 0x491   : > { %3237 = vperm.xlu0 %4449, %v6234_v0   ;;  %v6348_v0 = vld [vmem:[#allocation2 + $0x60] sm:$0xff] }
 0x494   : > { %3225 = vperm.xlu1 %4450, %v6231_v1   ;;  %v6342_v1 = vld [vmem:[#allocation2] sm:$0xff] }
 0x495   : > { %3245 = vperm.xlu0 %4449, %v6240_v19  }
 0x498   : > { %3233 = vperm.xlu1 %4450, %v6237_v35  }
 0x499   : > { %3253 = vperm.xlu0 %4449, %v4472_v27  }
 0x49c   : > { %3241 = vperm.xlu1 %4450, %v6243_v22  }
 0x49d   : > { %3261 = vperm.xlu0 %4449, %v4476_v3  }
 0x4a0   : > { %3249 = vperm.xlu1 %4450, %v6247_v5   ;;  %v6359_v5 = vld [vmem:[#allocation2 + $0x18] sm:$0xff] }
 0x4a1   : > { %3269 = vperm.xlu0 %4449, %v4480_v51  }
 0x4a4   : > { %v2725_v17 = vpop.permute.xlu1 %2724  ;;  %3257 = vperm.xlu1 %4450, %v4478_v24  }
 0x4a5   : > { %v2715_v54 = vpop.permute.xlu0 %2714  ;;  %v6303_v57 = vmul.f32 %v2725_v17, %v6297_v62 }
 0x4a6   : > { %v6356_v22 = vmul.f32 %v2715_v54, %v6342_v1 }
 0x4a7   : > { %v2828_v45 = vmul.f32 1.442695, %v6303_v57  ;;  %vm2810_vm0 = vcmp.gt.f32.partialorder %v6303_v57, 0.0 }
 0x4a8   : > { %v6283_v18 = vpop.permute.xlu1 %2729  ;;  %3265 = vperm.xlu1 %4450, %v4482_v8  }
 0x4a9   : > { %v2720_v11 = vpop.permute.xlu0 %2719 }
 0x4aa   : > { %v2793_v36 = vmul.f32 %v2720_v11, %v6293_v4 }
 0x4ac   : > { %v6285_v12 = vpop.permute.xlu1 %2739  ;;  %v2826_v48 = vmul.f32 1.442695, %v2793_v36  ;;  %vm2809_vm12 = vcmp.gt.f32.partialorder %v2793_v36, 0.0 }
 0x4ad   : > { %v2735_v47 = vpop.permute.xlu0 %2734 }
 0x4ae   : > { %v6311_v41 = vmul.f32 %v2735_v47, %v6307_v10  ;;  %4483 = vpow2.f32 %v2826_v48 }
 0x4af   : > { %4485 = vpow2.f32 %v2828_v45 }
 0x4b0   : > { %v6287_v14 = vpop.permute.xlu1 %2749  ;;  %v2832_v37 = vmul.f32 1.442695, %v6311_v41  ;;  %vm2812_vm4 = vcmp.gt.f32.partialorder %v6311_v41, 0.0 }
 0x4b1   : > { %v2745_v53 = vpop.permute.xlu0 %2744 }
 0x4b2   : > { %v6320_v55 = vmul.f32 %v2745_v53, %v6313_v30 }
 0x4b4   : > { %v6289_v42 = vpop.permute.xlu1 %2759  ;;  %v2836_v46 = vmul.f32 1.442695, %v6320_v55  ;;  %vm2814_vm10 = vcmp.gt.f32.partialorder %v6320_v55, 0.0 }
 0x4b5   : > { %v2755_v2 = vpop.permute.xlu0 %2754 }
 0x4b6   : > { %v6332_v21 = vmul.f32 %v2755_v2, %v6322_v23  ;;  %v2824_v2 = vmul.f32 1.442695, %v6356_v22 }
 0x4b8   : > { %v6291_v60 = vpop.permute.xlu1 %2769  ;;  %v4484_v49 = vpop.eup %4483  ;;  %v2840_v59 = vmul.f32 1.442695, %v6332_v21  ;;  %vm2816_vm3 = vcmp.gt.f32.partialorder %v6332_v21, 0.0 }
 0x4b9   : > { %v2765_v25 = vpop.permute.xlu0 %2764  ;;  %v4486_v33 = vpop.eup %4485  ;;  %v3743_v63 = vadd.f32 -1.0, %v4484_v49 }
 0x4ba   : > { %v6346_v44 = vmul.f32 %v2765_v25, %v6334_v28  ;;  %v3744_v54 = vadd.f32 -1.0, %v4486_v33  ;;  %v6375_v25 = vmul.f32 %v6283_v18, %v6359_v5  ;;  %v6389_v18 = vld [vmem:[#allocation2 + $0x38] sm:$0xff] }
 0x4bb   : > { %v2873_v11 = vsel %vm2809_vm12, %v2793_v36, %v3743_v63  ;;  %v6410_v63 = vmul.f32 %v6287_v14, %v6389_v18 }
 0x4bc   : > { %v6295_v40 = vpop.permute.xlu1 %2779  ;;  %v2844_v3 = vmul.f32 1.442695, %v6346_v44  ;;  %vm2818_vm9 = vcmp.gt.f32.partialorder %v6346_v44, 0.0 }
 0x4bd   : > { %v2775_v6 = vpop.permute.xlu0 %2774 }
 0x4be   : > { %v6363_v24 = vmul.f32 %v2775_v6, %v6348_v0  ;;  %v6377_v6 = vld [vmem:[#allocation2 + $0x28] sm:$0xff] }
 0x4c0   : > { %v6300_v61 = vpop.permute.xlu1 %2789  ;;  %vm2820_vm14 = vcmp.gt.f32.partialorder %v6363_v24, 0.0 }
 0x4c1   : > { %v6305_v50 = vpop.permute.xlu0 %2784 }
 0x4c2   : > { %v6386_v36 = vmul.f32 %v6305_v50, %v6365_v43  ;;  %v6400_v50 = vmul.f32 %v6285_v12, %v6377_v6 }
 0x4c4   : > { %v2852_v12 = vmul.f32 1.442695, %v6386_v36  ;;  %v2834_v14 = vmul.f32 1.442695, %v6400_v50 }
 0x4c5   : > { %v2894_v38 = vpop.permute.xlu1 %2893 }
 0x4c6   : > { %v2953_v39 = vmul.f32 %v2894_v38, %v6293_v4  ;;  %v6316_v52 = vpop.permute.xlu0 %2889  ;;  %v2848_v38 = vmul.f32 1.442695, %v6363_v24 }
 0x4c8   : > { %v2986_v31 = vmul.f32 1.442695, %v2953_v39  ;;  %vm2969_vm2 = vcmp.gt.f32.partialorder %v2953_v39, 0.0 }
 0x4c9   : > { %v2898_v26 = vpop.permute.xlu1 %2897 }
 0x4ca   : > { %4487 = vpow2.f32 %v2986_v31  ;;  %v6325_v34 = vmul.f32 %v2898_v26, %v6297_v62  ;;  %v6327_v13 = vpop.permute.xlu0 %2901 }
 0x4cb   : > { %4489 = vpow2.f32 %v2832_v37 }
 0x4cc   : > { %v2988_v16 = vmul.f32 1.442695, %v6325_v34  ;;  %vm2970_vm6 = vcmp.gt.f32.partialorder %v6325_v34, 0.0 }
 0x4cd   : > { %v2906_v15 = vpop.permute.xlu1 %2905 }
 0x4ce   : > { %4491 = vpow2.f32 %v2988_v16  ;;  %v6337_v7 = vmul.f32 %v2906_v15, %v6307_v10  ;;  %v6339_v32 = vpop.permute.xlu0 %2909 }
 0x4cf   : > { %4493 = vpow2.f32 %v2836_v46  ;;  %v2874_v46 = vsel %vm2810_vm0, %v6303_v57, %v3744_v54  ;;  %v6412_v57 = vld [vmem:[#allocation2 + $0x48] sm:$0xff]  ;;  %v6424_v54 = vld [vmem:[#allocation2 + $0x58] sm:$0xff]  ;;  %vm2822_vm0 = vcmp.gt.f32.partialorder %v6386_v36, 0.0 }
 0x4d0   : > { %v2992_v56 = vmul.f32 1.442695, %v6337_v7  ;;  %vm2972_vm5 = vcmp.gt.f32.partialorder %v6337_v7, 0.0 }
 0x4d1   : > { %v2914_v58 = vpop.permute.xlu1 %2913 }
 0x4d2   : > { %4495 = vpow2.f32 %v2992_v56  ;;  %v6351_v20 = vmul.f32 %v2914_v58, %v6313_v30  ;;  %v6353_v35 = vpop.permute.xlu0 %2917 }
 0x4d3   : > { %4497 = vpow2.f32 %v2840_v59  ;;  %v2830_v59 = vmul.f32 1.442695, %v6375_v25 }
 0x4d4   : > { %v4488_v19 = vpop.eup %4487  ;;  %v2996_v27 = vmul.f32 1.442695, %v6351_v20  ;;  %vm2974_vm8 = vcmp.gt.f32.partialorder %v6351_v20, 0.0 }
 0x4d5   : > { %v3759_v51 = vadd.f32 -1.0, %v4488_v19  ;;  %v2922_v8 = vpop.permute.xlu1 %2921  ;;  %v4490_v17 = vpop.eup %4489 }
 0x4d6   : > { %4499 = vpow2.f32 %v2996_v27  ;;  %v6368_v29 = vmul.f32 %v2922_v8, %v6322_v23  ;;  %v6370_v9 = vpop.permute.xlu0 %2925  ;;  %v3746_v15 = vadd.f32 -1.0, %v4490_v17 }
 0x4d7   : > { %v3033_v47 = vsel %vm2969_vm2, %v2953_v39, %v3759_v51  ;;  %4501 = vpow2.f32 %v2844_v3  ;;  %vm2808_vm2 = vcmp.gt.f32.partialorder %v6356_v22, 0.0 }
 0x4d8   : > { %v4492_v53 = vpop.eup %4491  ;;  %v6380_v48 = vsel %vm2461_vm15, %v2873_v11, %v3033_v47  ;;  %v3000_v45 = vmul.f32 1.442695, %v6368_v29  ;;  %v2876_v8 = vsel %vm2812_vm4, %v6311_v41, %v3746_v15  ;;  %v6437_v41 = vld [vmem:[#allocation2 + $0x68] sm:$0xff]  ;;  %vm2976_vm11 = vcmp.gt.f32.partialorder %v6368_v29, 0.0 }
 0x4d9   : > { %v3760_v39 = vadd.f32 -1.0, %v4492_v53  ;;  %v2930_v31 = vpop.permute.xlu1 %2929  ;;  %v4494_v16 = vpop.eup %4493  ;;  %v6429_v53 = vmul.f32 %v6289_v42, %v6412_v57  ;;  %v6443_v42 = vld [vmem:[#allocation2 + $0x78] sm:$0xff]  ;;  %vm2811_vm4 = vcmp.gt.f32.partialorder %v6375_v25, 0.0 }
 0x4da   : > { %4503 = vpow2.f32 %v3000_v45  ;;  %v6393_v37 = vmul.f32 %v2930_v31, %v6334_v28  ;;  %v6395_v26 = vpop.permute.xlu0 %2933  ;;  %v3748_v17 = vadd.f32 -1.0, %v4494_v16  ;;  %v6441_v31 = vmul.f32 %v6291_v60, %v6424_v54 }
 0x4db   : > { %v3034_v49 = vsel %vm2970_vm6, %v6325_v34, %v3760_v39  ;;  %4505 = vpow2.f32 %v2824_v2  ;;  %v2842_v60 = vmul.f32 1.442695, %v6429_v53 }
 0x4dc   : > { %v4496_v56 = vpop.eup %4495  ;;  %v6405_v58 = vsel %vm2461_vm15, %v2874_v46, %v3034_v49  ;;  %v3004_v33 = vmul.f32 1.442695, %v6393_v37  ;;  %4507 = vpow2.f32 %v2848_v38  ;;  %v2838_v38 = vmul.f32 1.442695, %v6410_v63 }
 0x4dd   : > { %v3762_v19 = vadd.f32 -1.0, %v4496_v56  ;;  %v2938_v34 = vpop.permute.xlu1 %2937  ;;  %v4498_v51 = vpop.eup %4497  ;;  %v2878_v49 = vsel %vm2814_vm10, %v6320_v55, %v3748_v17  ;;  %v6465_v55 = vmul.f32 %v6300_v61, %v6443_v42  ;;  %v6478_v61 = vmul.f32 %v6327_v13, %v6359_v5 }
 0x4de   : > { %4509 = vpow2.f32 %v3004_v33  ;;  %v6418_v27 = vmul.f32 %v2938_v34, %v6348_v0  ;;  %v6420_v3 = vpop.permute.xlu0 %2941  ;;  %v3750_v56 = vadd.f32 -1.0, %v4498_v51  ;;  %vm2978_vm13 = vcmp.gt.f32.partialorder %v6393_v37, 0.0 }
 0x4df   : > { %v3036_v11 = vsel %vm2972_vm5, %v6337_v7, %v3762_v19  ;;  %4511 = vpow2.f32 %v2830_v59  ;;  %v2854_v13 = vmul.f32 1.442695, %v6465_v55  ;;  %vm2813_vm5 = vcmp.gt.f32.partialorder %v6400_v50, 0.0 }
 0x4e0   : > { %v4500_v47 = vpop.eup %4499  ;;  %v6432_v2 = vsel %vm2461_vm15, %v2876_v8, %v3036_v11  ;;  %v3008_v45 = vmul.f32 1.442695, %v6418_v27  ;;  %4513 = vpow2.f32 %v2852_v12  ;;  %v6456_v12 = vmul.f32 %v6295_v40, %v6437_v41 }
 0x4e1   : > { %7050 = vst [vmem:[#allocation14_spill] sm:$0xff] %v6432_v2  ;;  %v3764_v39 = vadd.f32 -1.0, %v4500_v47  ;;  %v2946_v7 = vpop.permute.xlu1 %2945  ;;  %v4502_v15 = vpop.eup %4501  ;;  %v6472_v40 = vmul.f32 %v6316_v52, %v6342_v1  ;;  %v2880_v11 = vsel %vm2816_vm3, %v6332_v21, %v3750_v56  ;;  %v6495_v21 = vmul.f32 %v6353_v35, %v6389_v18 }
 0x4e2   : > { %4515 = vpow2.f32 %v3008_v45  ;;  %v6447_v16 = vmul.f32 %v2946_v7, %v6365_v43  ;;  %v6449_v46 = vpop.permute.xlu0 %2949  ;;  %v3752_v47 = vadd.f32 -1.0, %v4502_v15  ;;  %v2850_v52 = vmul.f32 1.442695, %v6456_v12 }
 0x4e3   : > { %4517 = vpow2.f32 %v2834_v14  ;;  %v3038_v59 = vsel %vm2974_vm8, %v6351_v20, %v3764_v39  ;;  %v2846_v14 = vmul.f32 1.442695, %v6441_v31  ;;  %v6486_v7 = vmul.f32 %v6339_v32, %v6377_v6 }
 0x4e4   : > { %v4504_v33 = vpop.eup %4503  ;;  %v6459_v19 = vsel %vm2461_vm15, %v2878_v49, %v3038_v59  ;;  %v3012_v34 = vmul.f32 1.442695, %v6447_v16  ;;  %4519 = vpow2.f32 %v2838_v38  ;;  %v2984_v56 = vmul.f32 1.442695, %v6472_v40 }
 0x4e5   : > { %7051 = vst [vmem:[#allocation15_spill] sm:$0xff] %v6459_v19  ;;  %v3766_v20 = vadd.f32 -1.0, %v4504_v33  ;;  %v6467_v51 = vpop.eup %4505  ;;  %v6500_v32 = vmul.f32 %v6370_v9, %v6412_v57  ;;  %vm2980_vm12 = vcmp.gt.f32.partialorder %v6418_v27, 0.0  ;;  %vm2982_vm6 = vcmp.gt.f32.partialorder %v6447_v16, 0.0 }
 0x4e6   : > { %4521 = vpow2.f32 %v3012_v34  ;;  %v3050_v8 = vpop.permute.xlu1 %3049  ;;  %v4508_v17 = vpop.eup %4507  ;;  %vm2815_vm10 = vcmp.gt.f32.partialorder %v6410_v63, 0.0  ;;  %vm2817_vm8 = vcmp.gt.f32.partialorder %v6429_v53, 0.0  ;;  %vm2819_vm3 = vcmp.gt.f32.partialorder %v6441_v31, 0.0 }
 0x4e7   : > { %v3040_v45 = vsel %vm2976_vm11, %v6368_v29, %v3766_v20  ;;  %v6481_v38 = vpop.permute.xlu0 %3053  ;;  %4523 = vpow2.f32 %v2842_v60  ;;  %v2882_v60 = vsel %vm2818_vm9, %v6346_v44, %v3752_v47  ;;  %v3754_v34 = vadd.f32 -1.0, %v4508_v17 }
 0x4e8   : > { %v4510_v39 = vpop.eup %4509  ;;  %v6489_v49 = vsel %vm2461_vm15, %v2880_v11, %v3040_v45  ;;  %4525 = vpow2.f32 %v2846_v14  ;;  %v2990_v20 = vmul.f32 1.442695, %v6478_v61  ;;  %v2994_v45 = vmul.f32 1.442695, %v6486_v7 }
 0x4e9   : > { %7052 = vst [vmem:[#allocation16_spill] sm:$0xff] %v6489_v49  ;;  %v3768_v29 = vadd.f32 -1.0, %v4510_v39  ;;  %v4512_v15 = vpop.eup %4511  ;;  %4527 = vpow2.f32 %v2850_v52  ;;  %v6514_v39 = vmul.f32 %v6395_v26, %v6424_v54  ;;  %v2998_v44 = vmul.f32 1.442695, %v6495_v21 }
 0x4ea   : > { %v3058_v59 = vpop.permute.xlu1 %3057  ;;  %v4514_v33 = vpop.eup %4513  ;;  %4529 = vpow2.f32 %v2854_v13  ;;  %v3002_v47 = vmul.f32 1.442695, %v6500_v32  ;;  %v2884_v26 = vsel %vm2820_vm14, %v6363_v24, %v3754_v34  ;;  %v6534_v2 = vmul.f32 %v3050_v8, %v6342_v1 }
 0x4eb   : > { %v3042_v35 = vsel %vm2978_vm13, %v6393_v37, %v3768_v29  ;;  %v6506_v11 = vpop.permute.xlu0 %3065  ;;  %v6519_v37 = vmul.f32 %v6420_v3, %v6437_v41  ;;  %4531 = vpow2.f32 %v2984_v56  ;;  %v3006_v3 = vmul.f32 1.442695, %v6514_v39 }
 0x4ec   : > { %v4516_v14 = vpop.eup %4515  ;;  %v6510_v9 = vsel %vm2461_vm15, %v2882_v60, %v3042_v35  ;;  %v3756_v60 = vadd.f32 -1.0, %v4514_v33  ;;  %4533 = vpow2.f32 %v2990_v20  ;;  %v3742_v33 = vadd.f32 -1.0, %v6467_v51 }
 0x4ed   : > { %7053 = vst [vmem:[#allocation17_spill] sm:$0xff] %v6510_v9  ;;  %v4518_v49 = vpop.eup %4517  ;;  %v3770_v17 = vadd.f32 -1.0, %v4516_v14  ;;  %4535 = vpow2.f32 %v2994_v45  ;;  %v3010_v9 = vmul.f32 1.442695, %v6519_v37  ;;  %v3745_v34 = vadd.f32 -1.0, %v4512_v15 }
 0x4ee   : > { %v3062_v52 = vpop.permute.xlu1 %3061  ;;  %v4520_v29 = vpop.eup %4519  ;;  %4537 = vpow2.f32 %v2998_v44  ;;  %v2886_v20 = vsel %vm2822_vm0, %v6386_v36, %v3756_v60  ;;  %v6553_v51 = vmul.f32 %v6481_v38, %v6293_v4  ;;  %vm2821_vm11 = vcmp.gt.f32.partialorder %v6456_v12, 0.0 }
 0x4ef   : > { %v3044_v13 = vsel %vm2980_vm12, %v6418_v27, %v3770_v17  ;;  %v6526_v35 = vpop.permute.xlu0 %3073  ;;  %4539 = vpow2.f32 %v3002_v47  ;;  %v3747_v17 = vadd.f32 -1.0, %v4518_v49  ;;  %v2875_v38 = vsel %vm2811_vm4, %v6375_v25, %v3745_v34 }
 0x4f0   : > { %v4522_v14 = vpop.eup %4521  ;;  %v6530_v56 = vsel %vm2461_vm15, %v2884_v26, %v3044_v13  ;;  %4541 = vpow2.f32 %v3006_v3  ;;  %v3749_v26 = vadd.f32 -1.0, %v4520_v29  ;;  %v3144_v13 = vmul.f32 1.442695, %v6534_v2 }
 0x4f1   : > { %7054 = vst [vmem:[#allocation18_spill] sm:$0xff] %v6530_v56  ;;  %v3772_v19 = vadd.f32 -1.0, %v4522_v14  ;;  %v4524_v24 = vpop.eup %4523  ;;  %4543 = vpow2.f32 %v3010_v9  ;;  %v2872_v9 = vsel %vm2808_vm2, %v6356_v22, %v3742_v33  ;;  %v6576_v3 = vmul.f32 %v6506_v11, %v6307_v10 }
 0x4f2   : > { %v6539_v27 = vpop.permute.xlu1 %3069  ;;  %v4526_v8 = vpop.eup %4525  ;;  %v2879_v25 = vsel %vm2815_vm10, %v6410_v63, %v3749_v26  ;;  %4545 = vpow2.f32 %v3144_v13  ;;  %v6583_v33 = vmul.f32 %v3062_v52, %v6359_v5  ;;  %vm2823_vm9 = vcmp.gt.f32.partialorder %v6465_v55, 0.0 }
 0x4f3   : > { %v3046_v45 = vsel %vm2982_vm6, %v6447_v16, %v3772_v19  ;;  %v6544_v44 = vpop.permute.xlu0 %3081  ;;  %v4528_v36 = vpop.eup %4527  ;;  %v3751_v16 = vadd.f32 -1.0, %v4524_v24  ;;  %v6558_v19 = vmul.f32 %v3058_v59, %v6297_v62  ;;  %v3753_v29 = vadd.f32 -1.0, %v4526_v8 }
 0x4f4   : > { %v6548_v47 = vsel %vm2461_vm15, %v2886_v20, %v3046_v45  ;;  %v4530_v15 = vpop.eup %4529  ;;  %v2877_v59 = vsel %vm2813_vm5, %v6400_v50, %v3747_v17  ;;  %v3146_v24 = vmul.f32 1.442695, %v6553_v51  ;;  %v3755_v20 = vadd.f32 -1.0, %v4528_v36 }
 0x4f5   : > { %7055 = vst [vmem:[#allocation19_spill] sm:$0xff] %v6548_v47  ;;  %v4532_v14 = vpop.eup %4531  ;;  %v2881_v34 = vsel %vm2817_vm8, %v6429_v53, %v3751_v16  ;;  %v3148_v11 = vmul.f32 1.442695, %v6558_v19  ;;  %v6591_v17 = vsel %vm2819_vm3, %v6441_v31, %v3753_v29  ;;  %v3757_v63 = vadd.f32 -1.0, %v4530_v15 }
 0x4f6   : > { %v6560_v49 = vpop.permute.xlu1 %3077  ;;  %v4534_v22 = vpop.eup %4533  ;;  %vm2968_vm13 = vcmp.gt.f32.partialorder %v6472_v40, 0.0  ;;  %v3758_v26 = vadd.f32 -1.0, %v4532_v14  ;;  %vm2971_vm14 = vcmp.gt.f32.partialorder %v6478_v61, 0.0  ;;  %v3152_v36 = vmul.f32 1.442695, %v6576_v3 }
 0x4f7   : > { %v6569_v60 = vpop.permute.xlu0 %3089  ;;  %v4536_v50 = vpop.eup %4535  ;;  %v3761_v53 = vadd.f32 -1.0, %v4534_v22  ;;  %v6600_v16 = vmul.f32 %v6526_v35, %v6313_v30  ;;  %v6604_v31 = vmul.f32 %v6449_v46, %v6443_v42  ;;  %4547 = vpow2.f32 %v3146_v24 }
 0x4f8   : > { %v4538_v8 = vpop.eup %4537  ;;  %v3763_v47 = vadd.f32 -1.0, %v4536_v50  ;;  %v3150_v15 = vmul.f32 1.442695, %v6583_v33  ;;  %v2885_v14 = vsel %vm2821_vm11, %v6456_v12, %v3755_v20  ;;  %vm2973_vm12 = vcmp.gt.f32.partialorder %v6486_v7, 0.0 }
 0x4f9   : > { %v4540_v13 = vpop.eup %4539  ;;  %v3765_v22 = vadd.f32 -1.0, %v4538_v8  ;;  %4549 = vpow2.f32 %v3148_v11  ;;  %v6616_v46 = vsel %vm2823_vm9, %v6465_v55, %v3757_v63  ;;  %v3032_v24 = vsel %vm2968_vm13, %v6472_v40, %v3758_v26 }
 0x4fa   : > { %v6588_v45 = vpop.permute.xlu1 %3085  ;;  %v4542_v29 = vpop.eup %4541  ;;  %7056 = vst [vmem:[#allocation20_spill] sm:$0xff] %v6616_v46  ;;  %v3767_v50 = vadd.f32 -1.0, %v4540_v13  ;;  %v6623_v12 = vmul.f32 %v6539_v27, %v6377_v6  ;;  %v3035_v11 = vsel %vm2971_vm14, %v6478_v61, %v3761_v53  ;;  %vm2975_vm2 = vcmp.gt.f32.partialorder %v6495_v21, 0.0 }
 0x4fb   : > { %v6594_v52 = vpop.permute.xlu0 %3097  ;;  %v4544_v35 = vpop.eup %4543  ;;  %4551 = vpow2.f32 %v3152_v36  ;;  %v3156_v55 = vmul.f32 1.442695, %v6600_v16  ;;  %v3037_v8 = vsel %vm2973_vm12, %v6486_v7, %v3763_v47  ;;  %v3769_v63 = vadd.f32 -1.0, %v4542_v29 }
 0x4fc   : > { %v3014_v40 = vmul.f32 1.442695, %v6604_v31  ;;  %4553 = vpow2.f32 %v3150_v15  ;;  %v3368_v27 = vsel %vm2461_vm15, %v2872_v9, %v3032_v24  ;;  %v3039_v26 = vsel %vm2975_vm2, %v6495_v21, %v3765_v22  ;;  %v4546_v61 = vpop.eup %4545 }
 0x4fd   : > { %vm2977_vm0 = vcmp.gt.f32.partialorder %v6500_v32, 0.0  ;;  %v3771_v13 = vadd.f32 -1.0, %v4544_v35  ;;  %v6640_v53 = vsel %vm2461_vm15, %v2875_v38, %v3035_v11  ;;  %v3154_v7 = vmul.f32 1.442695, %v6623_v12 }
 0x4fe   : > { %v6611_v56 = vpop.permute.xlu1 %3093  ;;  %v3041_v36 = vsel %vm2977_vm0, %v6500_v32, %v3767_v50  ;;  %v6646_v47 = vmul.f32 %v6560_v49, %v6389_v18  ;;  %v6649_v9 = vsel %vm2461_vm15, %v2877_v59, %v3037_v8  ;;  %vm2979_vm6 = vcmp.gt.f32.partialorder %v6514_v39, 0.0 }
 0x4ff   : > { %v6625_v20 = vpop.permute.xlu0 %3105  ;;  %vm2981_vm4 = vcmp.gt.f32.partialorder %v6519_v37, 0.0  ;;  %4555 = vpow2.f32 %v3156_v55  ;;  %v6654_v38 = vsel %vm2461_vm15, %v2879_v25, %v3039_v26  ;;  %v3043_v32 = vsel %vm2979_vm6, %v6514_v39, %v3769_v63 }
 0x500   : > { %4557 = vpow2.f32 %v3014_v40  ;;  %v6659_v15 = vmul.f32 %v6544_v44, %v6322_v23  ;;  %v6662_v49 = vsel %vm2461_vm15, %v2881_v34, %v3041_v36  ;;  %v3045_v59 = vsel %vm2981_vm4, %v6519_v37, %v3771_v13 }
 0x501   : > { %v3774_v29 = vadd.f32 -1.0, %v4546_v61  ;;  %v4548_v25 = vpop.eup %4547  ;;  %vm3128_vm5 = vcmp.gt.f32.partialorder %v6534_v2, 0.0  ;;  %4559 = vpow2.f32 %v3154_v7  ;;  %v3158_v39 = vmul.f32 1.442695, %v6646_v47 }
 0x502   : > { %v6637_v46 = vpop.permute.xlu1 %3101  ;;  %v6674_v44 = vmul.f32 %v6569_v60, %v6334_v28  ;;  %v6678_v37 = vsel %vm2461_vm15, %v6591_v17, %v3043_v32  ;;  %vm3129_vm10 = vcmp.gt.f32.partialorder %v6553_v51, 0.0  ;;  %v6687_v11 = vsel %vm2461_vm15, %v2885_v14, %v3045_v59 }
 0x503   : > { %v4550_v34 = vpop.eup %4549  ;;  %vm3130_vm8 = vcmp.gt.f32.partialorder %v6558_v19, 0.0  ;;  %vm3132_vm3 = vcmp.gt.f32.partialorder %v6576_v3, 0.0  ;;  %v3160_v60 = vmul.f32 1.442695, %v6659_v15  ;;  %v3192_v55 = vsel %vm3128_vm5, %v6534_v2, %v3774_v29 }
 0x504   : > { %v3210_v21 = vpop.permute.xlu0 %3209  ;;  %v3775_v8 = vadd.f32 -1.0, %v4548_v25  ;;  %v3776_v40 = vadd.f32 -1.0, %v4550_v34  ;;  %vm3131_vm11 = vcmp.gt.f32.partialorder %v6583_v33, 0.0  ;;  %v3164_v14 = vmul.f32 1.442695, %v6674_v44 }
 0x505   : > { %v6666_v22 = vmul.f32 %v3210_v21, %v6342_v1  ;;  %v6683_v1 = vmul.f32 %v6588_v45, %v6412_v57  ;;  %v4552_v17 = vpop.eup %4551  ;;  %v6701_v61 = vmul.f32 %v6594_v52, %v6348_v0  ;;  %v6708_v7 = vsel %vm2478_vm7, %v3368_v27, %v3192_v55 }
 0x506   : > { %v6668_v35 = vpop.permute.xlu1 %3109  ;;  %v4554_v63 = vpop.eup %4553  ;;  %vm3134_vm9 = vcmp.gt.f32.partialorder %v6600_v16, 0.0  ;;  %v3193_v52 = vsel %vm3129_vm10, %v6553_v51, %v3775_v8  ;;  %v3778_v59 = vadd.f32 -1.0, %v4552_v17  ;;  %vm3133_vm13 = vcmp.gt.f32.partialorder %v6623_v12, 0.0 }
 0x507   : > { %v3304_v24 = vmul.f32 1.442695, %v6666_v22  ;;  %v3162_v13 = vmul.f32 1.442695, %v6683_v1  ;;  %v3777_v29 = vadd.f32 -1.0, %v4554_v63  ;;  %v6722_v27 = vmul.f32 %v6611_v56, %v6424_v54 }
 0x508   : > { %v3222_v50 = vpop.permute.xlu0 %3221  ;;  %v3194_v51 = vsel %vm3130_vm8, %v6558_v19, %v3776_v40  ;;  %v3168_v34 = vmul.f32 1.442695, %v6701_v61  ;;  %v6735_v56 = vmul.f32 %v6625_v20, %v6365_v43  ;;  %v6742_v19 = vsel %vm2478_vm7, %v6380_v48, %v3193_v52 }
 0x509   : > { %4561 = vpow2.f32 %v3304_v24  ;;  %v6694_v45 = vmul.f32 %v3222_v50, %v6359_v5  ;;  %v4556_v32 = vpop.eup %4555  ;;  %v3195_v8 = vsel %vm3131_vm11, %v6583_v33, %v3777_v29  ;;  %v3166_v20 = vmul.f32 1.442695, %v6722_v27 }
 0x50a   : > { %4563 = vpow2.f32 %v3158_v39  ;;  %v3780_v17 = vadd.f32 -1.0, %v4556_v32  ;;  %v6753_v63 = vmul.f32 %v6637_v46, %v6437_v41  ;;  %vm3135_vm14 = vcmp.gt.f32.partialorder %v6646_v47, 0.0 }
 0x50b   : > { %v3214_v26 = vpop.permute.xlu1 %3213  ;;  %v3310_v2 = vmul.f32 1.442695, %v6694_v45  ;;  %4565 = vpow2.f32 %v3160_v60  ;;  %vm3288_vm12 = vcmp.gt.f32.partialorder %v6666_v22, 0.0  ;;  %vm3291_vm0 = vcmp.gt.f32.partialorder %v6694_v45, 0.0 }
 0x50c   : > { %v6705_v36 = vmul.f32 %v3214_v26, %v6293_v4  ;;  %v3230_v5 = vpop.permute.xlu0 %3229  ;;  %v6717_v4 = vpop.eup %4557  ;;  %vm3136_vm6 = vcmp.gt.f32.partialorder %v6659_v15, 0.0  ;;  %vm3137_vm4 = vcmp.gt.f32.partialorder %v6683_v1, 0.0  ;;  %vm2983_vm11 = vcmp.gt.f32.partialorder %v6604_v31, 0.0 }
 0x50d   : > { %v6712_v21 = vmul.f32 %v3230_v5, %v6377_v6  ;;  %4567 = vpow2.f32 %v3310_v2  ;;  %v4560_v60 = vpop.eup %4559  ;;  %v3198_v2 = vsel %vm3134_vm9, %v6600_v16, %v3780_v17  ;;  %v3172_v5 = vmul.f32 1.442695, %v6735_v56 }
 0x50e   : > { %4569 = vpow2.f32 %v3164_v14  ;;  %v3306_v6 = vmul.f32 1.442695, %v6705_v36  ;;  %v3779_v26 = vadd.f32 -1.0, %v4560_v60  ;;  %v3170_v16 = vmul.f32 1.442695, %v6753_v63 }
 0x50f   : > { %v3314_v25 = vmul.f32 1.442695, %v6712_v21  ;;  %v3218_v39 = vpop.permute.xlu1 %3217  ;;  %4571 = vpow2.f32 %v3162_v13  ;;  %vm3289_vm2 = vcmp.gt.f32.partialorder %v6705_v36, 0.0  ;;  %vm3293_vm10 = vcmp.gt.f32.partialorder %v6712_v21, 0.0 }
 0x510   : > { %v6731_v24 = vmul.f32 %v3218_v39, %v6297_v62  ;;  %v3238_v50 = vpop.permute.xlu0 %3237  ;;  %4573 = vpow2.f32 %v3306_v6  ;;  %v3196_v62 = vsel %vm3132_vm3, %v6576_v3, %v3778_v59  ;;  %v6759_v3 = vsel %vm2478_vm7, %v6405_v58, %v3194_v51  ;;  %v7057_v58 = vld [vmem:[#allocation14_spill] sm:$0xff]  ;;  %v7058_v51 = vld [vmem:[#allocation15_spill] sm:$0xff] }
 0x511   : > { %v6738_v55 = vmul.f32 %v3238_v50, %v6389_v18  ;;  %4575 = vpow2.f32 %v3314_v25  ;;  %v6774_v52 = vsel %vm2478_vm7, %v7057_v58, %v3196_v62 }
 0x512   : > { %v3308_v18 = vmul.f32 1.442695, %v6731_v24  ;;  %4577 = vpow2.f32 %v3168_v34  ;;  %v6785_v34 = vsel %vm2478_vm7, %v7058_v51, %v3198_v2  ;;  %vm3290_vm5 = vcmp.gt.f32.partialorder %v6731_v24, 0.0 }
 0x513   : > { %v3318_v48 = vmul.f32 1.442695, %v6738_v55  ;;  %v3226_v40 = vpop.permute.xlu1 %3225  ;;  %v4562_v14 = vpop.eup %4561  ;;  %vm3295_vm3 = vcmp.gt.f32.partialorder %v6738_v55, 0.0 }
 0x514   : > { %v6763_v33 = vmul.f32 %v3226_v40, %v6307_v10  ;;  %v3246_v13 = vpop.permute.xlu0 %3245  ;;  %v4564_v46 = vpop.eup %4563  ;;  %4579 = vpow2.f32 %v3308_v18  ;;  %v6778_v10 = vsel %vm2478_vm7, %v6640_v53, %v3195_v8  ;;  %v3790_v6 = vadd.f32 -1.0, %v4562_v14 }
 0x515   : > { %v6770_v32 = vmul.f32 %v3246_v13, %v6412_v57  ;;  %4581 = vpow2.f32 %v3318_v48  ;;  %v4566_v29 = vpop.eup %4565  ;;  %v3197_v53 = vsel %vm3133_vm13, %v6623_v12, %v3779_v26  ;;  %v3781_v62 = vadd.f32 -1.0, %v4564_v46 }
 0x516   : > { %v3312_v59 = vmul.f32 1.442695, %v6763_v33  ;;  %4583 = vpow2.f32 %v3166_v20  ;;  %v6797_v8 = vmul.f32 %v6668_v35, %v6443_v42  ;;  %v6802_v48 = vadd.f32 -1.0, %v4566_v29 }
 0x517   : > { %v3322_v25 = vmul.f32 1.442695, %v6770_v32  ;;  %v3234_v57 = vpop.permute.xlu1 %3233  ;;  %v4568_v39 = vpop.eup %4567  ;;  %v3352_v40 = vsel %vm3288_vm12, %v6666_v22, %v3790_v6  ;;  %v6816_v58 = vsel %vm3135_vm14, %v6646_v47, %v3781_v62  ;;  %vm3292_vm8 = vcmp.gt.f32.partialorder %v6763_v33, 0.0 }
 0x518   : > { %4585 = vpow2.f32 %v3312_v59  ;;  %v6791_v50 = vmul.f32 %v3234_v57, %v6313_v30  ;;  %v3254_v60 = vpop.permute.xlu0 %3253  ;;  %v6793_v17 = vpop.eup %4569  ;;  %v3793_v14 = vadd.f32 -1.0, %v4568_v39  ;;  %v3174_v22 = vmul.f32 1.442695, %v6797_v8 }
 0x519   : > { %4587 = vpow2.f32 %v3172_v5  ;;  %v6800_v20 = vmul.f32 %v3254_v60, %v6424_v54  ;;  %v4572_v18 = vpop.eup %4571  ;;  %v3389_v54 = vsel %vm2478_vm7, %v6649_v9, %v3197_v53  ;;  %v3400_v9 = vsel %vm2495_vm1, %v6708_v7, %v3352_v40 }
 0x51a   : > { %4589 = vpow2.f32 %v3322_v25  ;;  %v3316_v30 = vmul.f32 1.442695, %v6791_v50  ;;  %v4574_v12 = vpop.eup %4573  ;;  %v3355_v6 = vsel %vm3291_vm0, %v6694_v45, %v3793_v14  ;;  %v3783_v62 = vadd.f32 -1.0, %v4572_v18 }
 0x51b   : > { %4591 = vpow2.f32 %v3170_v16  ;;  %v3326_v26 = vmul.f32 1.442695, %v6800_v20  ;;  %v3242_v35 = vpop.permute.xlu1 %3241  ;;  %v4576_v13 = vpop.eup %4575  ;;  %v3791_v46 = vadd.f32 -1.0, %v4574_v12  ;;  %v3403_v18 = vsel %vm2495_vm1, %v6778_v10, %v3355_v6 }
 0x51c   : > { %4593 = vpow2.f32 %v3316_v30  ;;  %v6811_v2 = vmul.f32 %v3242_v35, %v6322_v23  ;;  %v3262_v5 = vpop.permute.xlu0 %3261  ;;  %v6823_v29 = vpop.eup %4577  ;;  %v3795_v25 = vadd.f32 -1.0, %v4576_v13  ;;  %vm3294_vm9 = vcmp.gt.f32.partialorder %v6791_v50, 0.0 }
 0x51d   : > { %v6821_v59 = vmul.f32 %v3262_v5, %v6437_v41  ;;  %v3353_v23 = vsel %vm3289_vm2, %v6705_v36, %v3791_v46  ;;  %4595 = vpow2.f32 %v3326_v26  ;;  %vm3297_vm13 = vcmp.gt.f32.partialorder %v6770_v32, 0.0 }
 0x51e   : > { %v3320_v16 = vmul.f32 1.442695, %v6811_v2  ;;  %v4580_v47 = vpop.eup %4579  ;;  %v3401_v41 = vsel %vm2495_vm1, %v6742_v19, %v3353_v23  ;;  %v3357_v26 = vsel %vm3293_vm10, %v6712_v21, %v3795_v25  ;;  %v3391_v25 = vsel %vm2478_vm7, %v6654_v38, %v6816_v58 }
 0x51f   : > { %v3250_v57 = vpop.permute.xlu1 %3249  ;;  %v4582_v39 = vpop.eup %4581  ;;  %v3844_v7 = vpack.c.bf16 %v3401_v41, %v3400_v9  ;;  %v3792_v51 = vadd.f32 -1.0, %v4580_v47  ;;  %v3330_v36 = vmul.f32 1.442695, %v6821_v59  ;;  %v3405_v9 = vsel %vm2495_vm1, %v3389_v54, %v3357_v26 }
 0x520   : > { %4597 = vpow2.f32 %v3320_v16  ;;  %v3270_v53 = vpop.permute.xlu0 %3269  ;;  %v4584_v60 = vpop.eup %4583  ;;  %v6838_v45 = vmul.f32 %v3250_v57, %v6334_v28  ;;  %v3797_v40 = vadd.f32 -1.0, %v4582_v39  ;;  %v3784_v57 = vadd.f32 -1.0, %v6793_v17 }
 0x521   : > { %v6841_v19 = vmul.f32 %v3270_v53, %v6443_v42  ;;  %4599 = vpow2.f32 %v3174_v22  ;;  %3845 = vst [vmem:[%s4784_s11] sm:$0xff] %v3844_v7   ;;  %v3354_v12 = vsel %vm3290_vm5, %v6731_v24, %v3792_v51  ;;  %v3201_v39 = vsel %vm3137_vm4, %v6683_v1, %v3783_v62 }
 0x522   : > { %v4586_v30 = vpop.eup %4585  ;;  %v3402_v28 = vsel %vm2495_vm1, %v6759_v3, %v3354_v12  ;;  %4601 = vpow2.f32 %v3330_v36  ;;  %v3324_v24 = vmul.f32 1.442695, %v6838_v45  ;;  %v3359_v23 = vsel %vm3295_vm3, %v6738_v55, %v3797_v40 }
 0x523   : > { %v6846_v14 = vpop.eup %4587  ;;  %v3794_v42 = vadd.f32 -1.0, %v4586_v30  ;;  %v3258_v35 = vpop.permute.xlu1 %3257  ;;  %v3849_v46 = vpack.c.bf16 %v3403_v18, %v3402_v28  ;;  %v3334_v21 = vmul.f32 1.442695, %v6841_v19  ;;  %v3407_v7 = vsel %vm2495_vm1, %v3391_v25, %v3359_v23  ;;  %v7062_v25 = vld [vmem:[#allocation20_spill] sm:$0xff] }
 0x524   : > { %v4590_v13 = vpop.eup %4589  ;;  %v6859_v22 = vmul.f32 %v3258_v35, %v6348_v0  ;;  %4603 = vpow2.f32 %v3324_v24  ;;  %v3200_v0 = vsel %vm3136_vm6, %v6659_v15, %v6802_v48  ;;  %v3773_v36 = vadd.f32 -1.0, %v6717_v4 }
 0x525   : > { %v4592_v5 = vpop.eup %4591  ;;  %v3356_v10 = vsel %vm3292_vm8, %v6763_v33, %v3794_v42  ;;  %3881 = vst [vmem:[%s4784_s11 + $0x8] sm:$0xff] %v3849_v46   ;;  %v3799_v33 = vadd.f32 -1.0, %v4590_v13  ;;  %4605 = vpow2.f32 %v3334_v21  ;;  %v3785_v62 = vadd.f32 -1.0, %v4584_v60  ;;  %v7060_v46 = vld [vmem:[#allocation17_spill] sm:$0xff] }
 0x526   : > { %v4594_v3 = vpop.eup %4593  ;;  %v3404_v16 = vsel %vm2495_vm1, %v6774_v52, %v3356_v10  ;;  %v3328_v55 = vmul.f32 1.442695, %v6859_v22  ;;  %vm3296_vm14 = vcmp.gt.f32.partialorder %v6811_v2, 0.0  ;;  %v3393_v30 = vsel %vm2478_vm7, %v6662_v49, %v3201_v39 }
 0x527   : > { %v3854_v47 = vpack.c.bf16 %v3405_v9, %v3404_v16  ;;  %v3796_v6 = vadd.f32 -1.0, %v4594_v3  ;;  %v3266_v41 = vpop.permute.xlu1 %3265  ;;  %v4596_v54 = vpop.eup %4595  ;;  %v3361_v38 = vsel %vm3297_vm13, %v6770_v32, %v3799_v33  ;;  %vm3138_vm12 = vcmp.gt.f32.partialorder %v6674_v44, 0.0 }
 0x528   : > { %v6874_v52 = vmul.f32 %v3266_v41, %v6365_v43  ;;  %4607 = vpow2.f32 %v3328_v55  ;;  %v3786_v4 = vadd.f32 -1.0, %v6823_v29  ;;  %v3409_v40 = vsel %vm2495_vm1, %v3393_v30, %v3361_v38 }
 0x529   : > { %3882 = vst [vmem:[%s4784_s11 + $0x10] sm:$0xff] %v3854_v47   ;;  %v3358_v15 = vsel %vm3294_vm9, %v6791_v50, %v3796_v6  ;;  %v7059_v50 = vld [vmem:[#allocation16_spill] sm:$0xff]  ;;  %v3202_v18 = vsel %vm3138_vm12, %v6674_v44, %v3784_v57  ;;  %vm3139_vm2 = vcmp.gt.f32.partialorder %v6722_v27, 0.0  ;;  %v3787_v49 = vadd.f32 -1.0, %v4592_v5  ;;  %v7061_v47 = vld [vmem:[#allocation18_spill] sm:$0xff] }
 0x52a   : > { %v4598_v48 = vpop.eup %4597  ;;  %v3406_v43 = vsel %vm2495_vm1, %v6785_v34, %v3358_v15  ;;  %v3332_v51 = vmul.f32 1.442695, %v6874_v52  ;;  %v3392_v53 = vsel %vm2478_vm7, %v7059_v50, %v3200_v0  ;;  %v3801_v34 = vadd.f32 -1.0, %v4596_v54 }
 0x52b   : > { %v3859_v17 = vpack.c.bf16 %v3407_v7, %v3406_v43  ;;  %v3798_v58 = vadd.f32 -1.0, %v4598_v48  ;;  %v4600_v1 = vpop.eup %4599  ;;  %vm3140_vm0 = vcmp.gt.f32.partialorder %v6701_v61, 0.0  ;;  %v3203_v42 = vsel %vm3139_vm2, %v6722_v27, %v3785_v62 }
 0x52c   : > { %4609 = vpow2.f32 %v3332_v51  ;;  %v4602_v12 = vpop.eup %4601  ;;  %vm3299_vm6 = vcmp.gt.f32.partialorder %v6800_v20, 0.0  ;;  %vm3141_vm4 = vcmp.gt.f32.partialorder %v6753_v63, 0.0  ;;  %v3394_v24 = vsel %vm2478_vm7, %v7060_v46, %v3202_v18 }
 0x52d   : > { %3883 = vst [vmem:[%s4784_s11 + $0x18] sm:$0xff] %v3859_v17   ;;  %v3360_v32 = vsel %vm3296_vm14, %v6811_v2, %v3798_v58  ;;  %v3047_v2 = vsel %vm2983_vm11, %v6604_v31, %v3773_v36  ;;  %v3363_v44 = vsel %vm3299_vm6, %v6800_v20, %v3801_v34  ;;  %v3803_v35 = vadd.f32 -1.0, %v4602_v12 }
 0x52e   : > { %v3408_v60 = vsel %vm2495_vm1, %v3392_v53, %v3360_v32  ;;  %v4604_v28 = vpop.eup %4603  ;;  %v3204_v5 = vsel %vm3140_vm0, %v6701_v61, %v3786_v4  ;;  %v3788_v31 = vadd.f32 -1.0, %v6846_v14  ;;  %vm3298_vm5 = vcmp.gt.f32.partialorder %v6838_v45, 0.0 }
 0x52f   : > { %v3864_v26 = vpack.c.bf16 %v3409_v40, %v3408_v60  ;;  %v4606_v29 = vpop.eup %4605  ;;  %v3800_v13 = vadd.f32 -1.0, %v4604_v28  ;;  %v3395_v27 = vsel %vm2478_vm7, %v6678_v37, %v3203_v42  ;;  %v3205_v10 = vsel %vm3141_vm4, %v6753_v63, %v3787_v49 }
 0x530   : > { %v3789_v21 = vadd.f32 -1.0, %v4600_v1  ;;  %v3411_v9 = vsel %vm2495_vm1, %v3395_v27, %v3363_v44  ;;  %vm3301_vm10 = vcmp.gt.f32.partialorder %v6821_v59, 0.0  ;;  %v3805_v23 = vadd.f32 -1.0, %v4606_v29 }
 0x531   : > { %3884 = vst [vmem:[%s4784_s11 + $0x20] sm:$0xff] %v3864_v26   ;;  %v3362_v20 = vsel %vm3298_vm5, %v6838_v45, %v3800_v13  ;;  %vm3142_vm8 = vcmp.gt.f32.partialorder %v6735_v56, 0.0  ;;  %v3365_v14 = vsel %vm3301_vm10, %v6821_v59, %v3803_v35  ;;  %v3396_v63 = vsel %vm2478_vm7, %v7061_v47, %v3204_v5 }
 0x532   : > { %v4608_v3 = vpop.eup %4607  ;;  %v3410_v61 = vsel %vm2495_vm1, %v3394_v24, %v3362_v20  ;;  %v3206_v45 = vsel %vm3142_vm8, %v6735_v56, %v3788_v31  ;;  %vm3143_vm3 = vcmp.gt.f32.partialorder %v6797_v8, 0.0  ;;  %vm3300_vm11 = vcmp.gt.f32.partialorder %v6859_v22, 0.0 }
 0x533   : > { %v3869_v16 = vpack.c.bf16 %v3411_v9, %v3410_v61  ;;  %v3802_v37 = vadd.f32 -1.0, %v4608_v3  ;;  %v3397_v6 = vsel %vm2478_vm7, %v6687_v11, %v3205_v10  ;;  %v3207_v41 = vsel %vm3143_vm3, %v6797_v8, %v3789_v21  ;;  %v7063_v8 = vld [vmem:[#allocation19_spill] sm:$0xff] }
 0x534   : > { %vm3303_vm9 = vcmp.gt.f32.partialorder %v6841_v19, 0.0  ;;  %v3413_v0 = vsel %vm2495_vm1, %v3397_v6, %v3365_v14  ;;  %v3383_v57 = vsel %vm2461_vm15, %v7062_v25, %v3047_v2  ;;  %vm3302_vm13 = vcmp.gt.f32.partialorder %v6874_v52, 0.0 }
 0x535   : > { %3885 = vst [vmem:[%s4784_s11 + $0x28] sm:$0xff] %v3869_v16   ;;  %v3364_v59 = vsel %vm3300_vm11, %v6859_v22, %v3802_v37  ;;  %v3367_v56 = vsel %vm3303_vm9, %v6841_v19, %v3805_v23  ;;  %v3398_v39 = vsel %vm2478_vm7, %v7063_v8, %v3206_v45  ;;  %v3399_v15 = vsel %vm2478_vm7, %v3383_v57, %v3207_v41 }
 0x536   : > { %v4610_v33 = vpop.eup %4609  ;;  %v3412_v55 = vsel %vm2495_vm1, %v3396_v63, %v3364_v59  ;;  %v3415_v48 = vsel %vm2495_vm1, %v3399_v15, %v3367_v56 }
 0x537   : > { %v3804_v54 = vadd.f32 -1.0, %v4610_v33  ;;  %v3874_v11 = vpack.c.bf16 %v3413_v0, %v3412_v55 }
 0x539   : > { %v3366_v22 = vsel %vm3302_vm13, %v6874_v52, %v3804_v54  ;;  %3886 = vst [vmem:[%s4784_s11 + $0x30] sm:$0xff] %v3874_v11  }
 0x53a   : > { %v3414_v19 = vsel %vm2495_vm1, %v3398_v39, %v3366_v22 }
 0x53b   : > { %v3879_v7 = vpack.c.bf16 %v3415_v48, %v3414_v19 }
 0x53d   : > { %3887 = vst [vmem:[%s4784_s11 + $0x38] sm:$0xff] %v3879_v7  }
 0x53e PF: > { %s15_s24 = sadd.s32 1, %s4665_s24   ;;  %s7064_s18 = smov %s4645_s19 }
 0x53f   : > { %p12_p0 = scmp.ge.s32.totalorder %s15_s24, 6   ;;  %s7065_s19 = smov %s4762_s6 }
 0x540   : > { %s7066_s20 = smov %s4657_s22  ;;  %s7067_s21 = smov %s4661_s23 }
 0x541   : > { %s7068_s22 = smov %s7071_s25  ;;  %s7069_s23 = smov %s7075_s26 }
 0x542   :  { %14 = sbr.rel (!%p12_p0) target bundleno = 4 (0x4), region = 127 }

</bundles_post_ra>
